<compile_context>
chip_gen: v6e
topology: v6e:2x2x1
jax: 0.10.0
libtpu: 0.0.40
codegen_flags: <defaults>
</compile_context>

<pallas_src>
import math
import jax
import jax.numpy as jnp
from jax.experimental import pallas as pl
from jax.experimental.pallas import tpu as pltpu


def _round_up(n, m):
    return (n + m - 1) // m * m


# --------------------------------------------------------------------------
# kernel: encode -> reparameterize -> decode for one batch tile
# --------------------------------------------------------------------------
def _vae_kernel(x_ref, eps_ref,
                w1_ref, b1_ref, w2_ref, b2_ref,
                wmv_ref, bmv_ref,
                w3_ref, b3_ref, w4_ref, b4_ref, w5_ref, b5_ref,
                xrec_ref, mv_ref):
    bf16 = jnp.bfloat16
    latent = eps_ref.shape[-1]

    x = x_ref[...]                                                  # bf16 (bt, Dp)

    # ----- encode -----
    h = jnp.dot(x, w1_ref[...], preferred_element_type=jnp.float32) + b1_ref[...]
    h = jnp.maximum(h, 0.0)
    h = jnp.dot(h.astype(bf16), w2_ref[...],
                preferred_element_type=jnp.float32) + b2_ref[...]
    h = jnp.maximum(h, 0.0)

    # fused [mean | log_var] matmul (lane-dense, width 2*latent = 128)
    ml = jnp.dot(h.astype(bf16), wmv_ref[...],
                 preferred_element_type=jnp.float32) + bmv_ref[...]
    mv_ref[...] = ml                                                # (bt, 2*latent) f32

    mean = ml[:, :latent]
    log_var = ml[:, latent:]

    # ----- reparameterize -----
    std = jnp.exp(0.5 * log_var)
    z = mean + eps_ref[...] * std

    # ----- decode -----
    d = jnp.dot(z.astype(bf16), w3_ref[...],
                preferred_element_type=jnp.float32) + b3_ref[...]
    d = jnp.maximum(d, 0.0)
    d = jnp.dot(d.astype(bf16), w4_ref[...],
                preferred_element_type=jnp.float32) + b4_ref[...]
    d = jnp.maximum(d, 0.0)
    logits = jnp.dot(d.astype(bf16), w5_ref[...],
                     preferred_element_type=jnp.float32) + b5_ref[...]
    # sigmoid as a single EUP op: sigmoid(x) = 0.5*tanh(0.5*x) + 0.5
    xrec_ref[...] = (0.5 * jnp.tanh(0.5 * logits) + 0.5).astype(xrec_ref.dtype)


# --------------------------------------------------------------------------
# one-time weight packing (hoisted out of the per-call path)
# --------------------------------------------------------------------------
def prepack_params(params, input_dim, latent_dim):
    (w1, b1, w2, b2, wm, bm, wv, bv, w3, b3, w4, b4, w5, b5) = params
    f32, bf16 = jnp.float32, jnp.bfloat16
    D_pad = _round_up(input_dim, 128)            # 784 -> 896 (lane-dense)

    w1p = jnp.zeros((D_pad, 512), bf16).at[:input_dim].set(w1.astype(bf16))
    w5p = jnp.zeros((512, D_pad), bf16).at[:, :input_dim].set(w5.astype(bf16))
    b5p = jnp.zeros((1, D_pad), f32).at[:, :input_dim].set(b5.astype(f32))
    wmv = jnp.concatenate([wm, wv], axis=1).astype(bf16)            # (256, 2L)
    bmv = jnp.concatenate([bm, bv], axis=1).astype(f32)             # (1, 2L)

    return (w1p, b1.astype(f32), w2.astype(bf16), b2.astype(f32),
            wmv, bmv,
            w3.astype(bf16), b3.astype(f32), w4.astype(bf16), b4.astype(f32),
            w5p, b5p)


def _auto_batch_tile(B):
    """Single grid step on 1-TC chips (v5e/v6e); 128-row tiles on 2-TC v7x."""
    B8 = _round_up(max(B, 8), 8)
    try:
        kind = jax.devices()[0].device_kind.lower()
    except Exception:
        kind = ""
    two_tc = ("v7" in kind) or ("7x" in kind)
    if two_tc and B8 > 128:
        return 128
    return min(B8, 512)


# --------------------------------------------------------------------------
# wrapper: pre-pack weights once, return jitted forward
# --------------------------------------------------------------------------
def make_vae_forward(params, *, input_dim=784, latent_dim=64, batch_tile=None):
    weight_args = prepack_params(params, input_dim, latent_dim)
    D_pad = weight_args[0].shape[0]
    L2 = 2 * latent_dim
    f32, bf16 = jnp.float32, jnp.bfloat16

    @jax.jit
    def fwd(x, eps):
        B = x.shape[0]
        bt = batch_tile if batch_tile is not None else _auto_batch_tile(B)
        B_pad = _round_up(max(B, bt), bt)

        x_p = jnp.zeros((B_pad, D_pad), bf16).at[:B, :input_dim].set(x.astype(bf16))
        eps_p = jnp.zeros((B_pad, latent_dim), f32).at[:B].set(eps.astype(f32))

        def batch_spec(n):
            return pl.BlockSpec((bt, n), lambda i: (i, 0))

        def full_spec(arr):
            # same full block at every grid step (weights stay resident in VMEM)
            return pl.BlockSpec(arr.shape, lambda i: (0, 0))

        in_specs = ([batch_spec(D_pad), batch_spec(latent_dim)]
                    + [full_spec(a) for a in weight_args])
        out_specs = [batch_spec(D_pad), batch_spec(L2)]
        out_shape = [jax.ShapeDtypeStruct((B_pad, D_pad), bf16),   # bf16 writeback
                     jax.ShapeDtypeStruct((B_pad, L2), f32)]

        flops = 2 * B_pad * (D_pad * 512 + 512 * 256 + 256 * L2
                             + latent_dim * 256 + 256 * 512 + 512 * D_pad)
        bytes_accessed = (x_p.size * 2 + eps_p.size * 4
                          + sum(int(a.size) * a.dtype.itemsize for a in weight_args)
                          + B_pad * D_pad * 2 + B_pad * L2 * 4)
        cost = pl.CostEstimate(flops=flops,
                               transcendentals=B_pad * (latent_dim + D_pad),
                               bytes_accessed=bytes_accessed)

        xrec_p, mv = pl.pallas_call(
            _vae_kernel,
            out_shape=out_shape,
            grid_spec=pltpu.PrefetchScalarGridSpec(
                num_scalar_prefetch=0,
                grid=(B_pad // bt,),
                in_specs=in_specs,
                out_specs=out_specs,
            ),
            compiler_params=pltpu.CompilerParams(
                dimension_semantics=("parallel",),
                vmem_limit_bytes=32 << 20,
            ),
            cost_estimate=cost,
        )(x_p, eps_p, *weight_args)

        # these slices/casts fuse under the surrounding jit
        x_rec = xrec_p[:B, :input_dim].astype(f32)
        mean = mv[:B, :latent_dim]
        log_var = mv[:B, latent_dim:]
        return x_rec, mean, log_var

    return fwd


def vae_forward(x, eps, params, *, batch_tile=None):
    """Convenience one-shot API: x [B, input_dim], eps [B, latent_dim]."""
    fwd = make_vae_forward(params, input_dim=x.shape[1], latent_dim=eps.shape[1],
                           batch_tile=batch_tile)
    return fwd(x, eps)


# --------------------------------------------------------------------------
# init + pure-JAX reference
# --------------------------------------------------------------------------
def init_params(key, input_dim=784, latent_dim=64):
    """Deterministic init mimicking PyTorch nn.Linear default U(-1/sqrt(fan_in), +)."""
    dims = [
        (input_dim, 512),    # fc1
        (512, 256),          # fc2
        (256, latent_dim),   # fc_mean
        (256, latent_dim),   # fc_log_var
        (latent_dim, 256),   # fc3
        (256, 512),          # fc4
        (512, input_dim),    # fc5
    ]
    params = []
    keys = jax.random.split(key, 2 * len(dims))
    for i, (fan_in, fan_out) in enumerate(dims):
        bound = 1.0 / math.sqrt(fan_in)
        w = jax.random.uniform(keys[2 * i], (fan_in, fan_out),
                               minval=-bound, maxval=bound, dtype=jnp.float32)
        b = jax.random.uniform(keys[2 * i + 1], (1, fan_out),
                               minval=-bound, maxval=bound, dtype=jnp.float32)
        params.append(w)
        params.append(b)
    return tuple(params)


def reference_forward(x, eps, params):
    """Pure-JAX reference mirroring the kernel's bf16-operand / f32-accumulate math."""
    (w1, b1, w2, b2, wm, bm, wv, bv, w3, b3, w4, b4, w5, b5) = params
    bf16 = jnp.bfloat16

    def lin(a, w, b):
        return jnp.dot(a.astype(bf16), w.astype(bf16),
                       preferred_element_type=jnp.float32) + b

    h = jax.nn.relu(lin(x, w1, b1))
    h = jax.nn.relu(lin(h, w2, b2))
    mean = lin(h, wm, bm)
    log_var = lin(h, wv, bv)
    z = mean + eps * jnp.exp(0.5 * log_var)
    d = jax.nn.relu(lin(z, w3, b3))
    d = jax.nn.relu(lin(d, w4, b4))
    x_rec = jax.nn.sigmoid(lin(d, w5, b5))
    return x_rec, mean, log_var


if __name__ == "__main__":
    key = jax.random.PRNGKey(0)
    k_param, k_x, k_eps = jax.random.split(key, 3)

    input_dim = 784
    latent_dim = 64
    batch = 200          # exercises batch padding; 2 grid steps on v7x,
                         # single grid step on v5e/v6e (auto batch tile)

    params = init_params(k_param, input_dim=input_dim, latent_dim=latent_dim)
    x = jax.random.uniform(k_x, (batch, input_dim), dtype=jnp.float32)
    eps = jax.random.normal(k_eps, (batch, latent_dim), dtype=jnp.float32)

    fwd = make_vae_forward(params, input_dim=input_dim, latent_dim=latent_dim)
    x_rec, mean, log_var = fwd(x, eps)
    jax.block_until_ready((x_rec, mean, log_var))

    # sanity check against pure-JAX reference (bf16 matmul operands in both paths;
    # kernel stores x_rec in bf16 -> slightly looser tolerance there)
    x_rec_ref, mean_ref, log_var_ref = reference_forward(x, eps, params)
    assert x_rec.shape == (batch, input_dim)
    assert mean.shape == (batch, latent_dim)
    assert log_var.shape == (batch, latent_dim)
    assert jnp.allclose(x_rec, x_rec_ref, atol=2e-2, rtol=2e-2)
    assert jnp.allclose(mean, mean_ref, atol=1e-2, rtol=1e-2)
    assert jnp.allclose(log_var, log_var_ref, atol=1e-2, rtol=1e-2)

    print("KERNEL_OK")
</pallas_src>

<mosaic_0001>
module attributes {stable_mosaic.version = 11 : i64} {
  func.func @_vae_kernel(%arg0: i32, %arg1: memref<200x896xbf16, #tpu.memory_space<vmem>>, %arg2: memref<200x64xf32, #tpu.memory_space<vmem>>, %arg3: memref<896x512xbf16, #tpu.memory_space<vmem>>, %arg4: memref<1x512xf32, #tpu.memory_space<vmem>>, %arg5: memref<512x256xbf16, #tpu.memory_space<vmem>>, %arg6: memref<1x256xf32, #tpu.memory_space<vmem>>, %arg7: memref<256x128xbf16, #tpu.memory_space<vmem>>, %arg8: memref<1x128xf32, #tpu.memory_space<vmem>>, %arg9: memref<64x256xbf16, #tpu.memory_space<vmem>>, %arg10: memref<1x256xf32, #tpu.memory_space<vmem>>, %arg11: memref<256x512xbf16, #tpu.memory_space<vmem>>, %arg12: memref<1x512xf32, #tpu.memory_space<vmem>>, %arg13: memref<512x896xbf16, #tpu.memory_space<vmem>>, %arg14: memref<1x896xf32, #tpu.memory_space<vmem>>, %arg15: memref<200x896xbf16, #tpu.memory_space<vmem>>, %arg16: memref<200x128xf32, #tpu.memory_space<vmem>>) attributes {dimension_semantics = [#tpu.dimension_semantics<parallel>], iteration_bounds = array<i64: 1>, scalar_prefetch = 0 : i64, scratch_operands = 0 : i64, tpu.core_type = #tpu.core_type<tc>, window_params = [{transform_indices = @transform_0, window_bounds = array<i64: 200, 896>}, {transform_indices = @transform_1, window_bounds = array<i64: 200, 64>}, {pipeline_mode = #tpu.pipeline_mode<synchronous>, transform_indices = @transform_2, window_bounds = array<i64: 896, 512>}, {pipeline_mode = #tpu.pipeline_mode<synchronous>, transform_indices = @transform_3, window_bounds = array<i64: 1, 512>}, {pipeline_mode = #tpu.pipeline_mode<synchronous>, transform_indices = @transform_4, window_bounds = array<i64: 512, 256>}, {pipeline_mode = #tpu.pipeline_mode<synchronous>, transform_indices = @transform_5, window_bounds = array<i64: 1, 256>}, {pipeline_mode = #tpu.pipeline_mode<synchronous>, transform_indices = @transform_6, window_bounds = array<i64: 256, 128>}, {pipeline_mode = #tpu.pipeline_mode<synchronous>, transform_indices = @transform_7, window_bounds = array<i64: 1, 128>}, {pipeline_mode = #tpu.pipeline_mode<synchronous>, transform_indices = @transform_8, window_bounds = array<i64: 64, 256>}, {pipeline_mode = #tpu.pipeline_mode<synchronous>, transform_indices = @transform_9, window_bounds = array<i64: 1, 256>}, {pipeline_mode = #tpu.pipeline_mode<synchronous>, transform_indices = @transform_10, window_bounds = array<i64: 256, 512>}, {pipeline_mode = #tpu.pipeline_mode<synchronous>, transform_indices = @transform_11, window_bounds = array<i64: 1, 512>}, {pipeline_mode = #tpu.pipeline_mode<synchronous>, transform_indices = @transform_12, window_bounds = array<i64: 512, 896>}, {pipeline_mode = #tpu.pipeline_mode<synchronous>, transform_indices = @transform_13, window_bounds = array<i64: 1, 896>}, {transform_indices = @transform_14, window_bounds = array<i64: 200, 896>}, {transform_indices = @transform_15, window_bounds = array<i64: 200, 128>}]} {
    %c0 = arith.constant 0 : index
    %c0_0 = arith.constant 0 : index
    %0 = vector.load %arg1[%c0, %c0_0] : memref<200x896xbf16, #tpu.memory_space<vmem>>, vector<200x896xbf16>
    %c0_1 = arith.constant 0 : index
    %c0_2 = arith.constant 0 : index
    %1 = vector.load %arg3[%c0_1, %c0_2] : memref<896x512xbf16, #tpu.memory_space<vmem>>, vector<896x512xbf16>
    %cst = arith.constant dense<0.000000e+00> : vector<200x512xf32>
    %2 = tpu.matmul %0, %1, %cst {dimension_numbers = #tpu.dot_dimension_numbers<[1], [0], [0], [1], [0, 0, 1, 1], [], []>} : vector<200x896xbf16>, vector<896x512xbf16>, vector<200x512xf32> -> vector<200x512xf32>
    %c0_3 = arith.constant 0 : index
    %c0_4 = arith.constant 0 : index
    %3 = vector.load %arg4[%c0_3, %c0_4] : memref<1x512xf32, #tpu.memory_space<vmem>>, vector<1x512xf32>
    %4 = vector.broadcast %3 : vector<1x512xf32> to vector<200x512xf32>
    %5 = arith.addf %2, %4 : vector<200x512xf32>
    %cst_5 = arith.constant 0.000000e+00 : f32
    %6 = vector.broadcast %cst_5 : f32 to vector<200x512xf32>
    %7 = arith.maximumf %5, %6 : vector<200x512xf32>
    %8 = arith.truncf %7 : vector<200x512xf32> to vector<200x512xbf16>
    %c0_6 = arith.constant 0 : index
    %c0_7 = arith.constant 0 : index
    %9 = vector.load %arg5[%c0_6, %c0_7] : memref<512x256xbf16, #tpu.memory_space<vmem>>, vector<512x256xbf16>
    %cst_8 = arith.constant dense<0.000000e+00> : vector<200x256xf32>
    %10 = tpu.matmul %8, %9, %cst_8 {dimension_numbers = #tpu.dot_dimension_numbers<[1], [0], [0], [1], [0, 0, 1, 1], [], []>} : vector<200x512xbf16>, vector<512x256xbf16>, vector<200x256xf32> -> vector<200x256xf32>
    %c0_9 = arith.constant 0 : index
    %c0_10 = arith.constant 0 : index
    %11 = vector.load %arg6[%c0_9, %c0_10] : memref<1x256xf32, #tpu.memory_space<vmem>>, vector<1x256xf32>
    %12 = vector.broadcast %11 : vector<1x256xf32> to vector<200x256xf32>
    %13 = arith.addf %10, %12 : vector<200x256xf32>
    %cst_11 = arith.constant 0.000000e+00 : f32
    %14 = vector.broadcast %cst_11 : f32 to vector<200x256xf32>
    %15 = arith.maximumf %13, %14 : vector<200x256xf32>
    %16 = arith.truncf %15 : vector<200x256xf32> to vector<200x256xbf16>
    %c0_12 = arith.constant 0 : index
    %c0_13 = arith.constant 0 : index
    %17 = vector.load %arg7[%c0_12, %c0_13] : memref<256x128xbf16, #tpu.memory_space<vmem>>, vector<256x128xbf16>
    %cst_14 = arith.constant dense<0.000000e+00> : vector<200x128xf32>
    %18 = tpu.matmul %16, %17, %cst_14 {dimension_numbers = #tpu.dot_dimension_numbers<[1], [0], [0], [1], [0, 0, 1, 1], [], []>} : vector<200x256xbf16>, vector<256x128xbf16>, vector<200x128xf32> -> vector<200x128xf32>
    %c0_15 = arith.constant 0 : index
    %c0_16 = arith.constant 0 : index
    %19 = vector.load %arg8[%c0_15, %c0_16] : memref<1x128xf32, #tpu.memory_space<vmem>>, vector<1x128xf32>
    %20 = vector.broadcast %19 : vector<1x128xf32> to vector<200x128xf32>
    %21 = arith.addf %18, %20 : vector<200x128xf32>
    %c0_17 = arith.constant 0 : index
    %c0_18 = arith.constant 0 : index
    %22 = vector.load %arg16[%c0_17, %c0_18] : memref<200x128xf32, #tpu.memory_space<vmem>>, vector<200x128xf32>
    tpu.vector_store %arg16[%c0_17, %c0_18], %21 {strides = array<i32>} : memref<200x128xf32, #tpu.memory_space<vmem>>, vector<200x128xf32>,
    %23 = vector.extract_strided_slice %21 {offsets = [0, 0], sizes = [200, 64], strides = [1, 1]} : vector<200x128xf32> to vector<200x64xf32>
    %24 = vector.extract_strided_slice %21 {offsets = [0, 64], sizes = [200, 64], strides = [1, 1]} : vector<200x128xf32> to vector<200x64xf32>
    %cst_19 = arith.constant 5.000000e-01 : f32
    %25 = vector.broadcast %cst_19 : f32 to vector<200x64xf32>
    %26 = arith.mulf %25, %24 : vector<200x64xf32>
    %27 = math.exp %26 : vector<200x64xf32>
    %c0_20 = arith.constant 0 : index
    %c0_21 = arith.constant 0 : index
    %28 = vector.load %arg2[%c0_20, %c0_21] : memref<200x64xf32, #tpu.memory_space<vmem>>, vector<200x64xf32>
    %29 = arith.mulf %28, %27 : vector<200x64xf32>
    %30 = arith.addf %23, %29 : vector<200x64xf32>
    %31 = arith.truncf %30 : vector<200x64xf32> to vector<200x64xbf16>
    %c0_22 = arith.constant 0 : index
    %c0_23 = arith.constant 0 : index
    %32 = vector.load %arg9[%c0_22, %c0_23] : memref<64x256xbf16, #tpu.memory_space<vmem>>, vector<64x256xbf16>
    %cst_24 = arith.constant dense<0.000000e+00> : vector<200x256xf32>
    %33 = tpu.matmul %31, %32, %cst_24 {dimension_numbers = #tpu.dot_dimension_numbers<[1], [0], [0], [1], [0, 0, 1, 1], [], []>} : vector<200x64xbf16>, vector<64x256xbf16>, vector<200x256xf32> -> vector<200x256xf32>
    %c0_25 = arith.constant 0 : index
    %c0_26 = arith.constant 0 : index
    %34 = vector.load %arg10[%c0_25, %c0_26] : memref<1x256xf32, #tpu.memory_space<vmem>>, vector<1x256xf32>
    %35 = vector.broadcast %34 : vector<1x256xf32> to vector<200x256xf32>
    %36 = arith.addf %33, %35 : vector<200x256xf32>
    %cst_27 = arith.constant 0.000000e+00 : f32
    %37 = vector.broadcast %cst_27 : f32 to vector<200x256xf32>
    %38 = arith.maximumf %36, %37 : vector<200x256xf32>
    %39 = arith.truncf %38 : vector<200x256xf32> to vector<200x256xbf16>
    %c0_28 = arith.constant 0 : index
    %c0_29 = arith.constant 0 : index
    %40 = vector.load %arg11[%c0_28, %c0_29] : memref<256x512xbf16, #tpu.memory_space<vmem>>, vector<256x512xbf16>
    %cst_30 = arith.constant dense<0.000000e+00> : vector<200x512xf32>
    %41 = tpu.matmul %39, %40, %cst_30 {dimension_numbers = #tpu.dot_dimension_numbers<[1], [0], [0], [1], [0, 0, 1, 1], [], []>} : vector<200x256xbf16>, vector<256x512xbf16>, vector<200x512xf32> -> vector<200x512xf32>
    %c0_31 = arith.constant 0 : index
    %c0_32 = arith.constant 0 : index
    %42 = vector.load %arg12[%c0_31, %c0_32] : memref<1x512xf32, #tpu.memory_space<vmem>>, vector<1x512xf32>
    %43 = vector.broadcast %42 : vector<1x512xf32> to vector<200x512xf32>
    %44 = arith.addf %41, %43 : vector<200x512xf32>
    %cst_33 = arith.constant 0.000000e+00 : f32
    %45 = vector.broadcast %cst_33 : f32 to vector<200x512xf32>
    %46 = arith.maximumf %44, %45 : vector<200x512xf32>
    %47 = arith.truncf %46 : vector<200x512xf32> to vector<200x512xbf16>
    %c0_34 = arith.constant 0 : index
    %c0_35 = arith.constant 0 : index
    %48 = vector.load %arg13[%c0_34, %c0_35] : memref<512x896xbf16, #tpu.memory_space<vmem>>, vector<512x896xbf16>
    %cst_36 = arith.constant dense<0.000000e+00> : vector<200x896xf32>
    %49 = tpu.matmul %47, %48, %cst_36 {dimension_numbers = #tpu.dot_dimension_numbers<[1], [0], [0], [1], [0, 0, 1, 1], [], []>} : vector<200x512xbf16>, vector<512x896xbf16>, vector<200x896xf32> -> vector<200x896xf32>
    %c0_37 = arith.constant 0 : index
    %c0_38 = arith.constant 0 : index
    %50 = vector.load %arg14[%c0_37, %c0_38] : memref<1x896xf32, #tpu.memory_space<vmem>>, vector<1x896xf32>
    %51 = vector.broadcast %50 : vector<1x896xf32> to vector<200x896xf32>
    %52 = arith.addf %49, %51 : vector<200x896xf32>
    %cst_39 = arith.constant 5.000000e-01 : f32
    %53 = vector.broadcast %cst_39 : f32 to vector<200x896xf32>
    %54 = arith.mulf %53, %52 : vector<200x896xf32>
    %55 = math.tanh %54 : vector<200x896xf32>
    %cst_40 = arith.constant 5.000000e-01 : f32
    %56 = vector.broadcast %cst_40 : f32 to vector<200x896xf32>
    %57 = arith.mulf %56, %55 : vector<200x896xf32>
    %cst_41 = arith.constant 5.000000e-01 : f32
    %58 = vector.broadcast %cst_41 : f32 to vector<200x896xf32>
    %59 = arith.addf %57, %58 : vector<200x896xf32>
    %60 = arith.truncf %59 : vector<200x896xf32> to vector<200x896xbf16>
    %c0_42 = arith.constant 0 : index
    %c0_43 = arith.constant 0 : index
    %61 = vector.load %arg15[%c0_42, %c0_43] : memref<200x896xbf16, #tpu.memory_space<vmem>>, vector<200x896xbf16>
    tpu.vector_store %arg15[%c0_42, %c0_43], %60 {strides = array<i32>} : memref<200x896xbf16, #tpu.memory_space<vmem>>, vector<200x896xbf16>,
    return
  }
  func.func @transform_0(%arg0: i32) -> (i32, i32) {
    %c0_i32 = arith.constant 0 : i32
    %c0_i32_0 = arith.constant 0 : i32
    return %arg0, %c0_i32 : i32, i32
  }
  func.func @transform_1(%arg0: i32) -> (i32, i32) {
    %c0_i32 = arith.constant 0 : i32
    %c0_i32_0 = arith.constant 0 : i32
    return %arg0, %c0_i32 : i32, i32
  }
  func.func @transform_2(%arg0: i32) -> (i32, i32) {
    %c0_i32 = arith.constant 0 : i32
    %c0_i32_0 = arith.constant 0 : i32
    %c0_i32_1 = arith.constant 0 : i32
    return %c0_i32, %c0_i32_0 : i32, i32
  }
  func.func @transform_3(%arg0: i32) -> (i32, i32) {
    %c0_i32 = arith.constant 0 : i32
    %c0_i32_0 = arith.constant 0 : i32
    %c0_i32_1 = arith.constant 0 : i32
    return %c0_i32, %c0_i32_0 : i32, i32
  }
  func.func @transform_4(%arg0: i32) -> (i32, i32) {
    %c0_i32 = arith.constant 0 : i32
    %c0_i32_0 = arith.constant 0 : i32
    %c0_i32_1 = arith.constant 0 : i32
    return %c0_i32, %c0_i32_0 : i32, i32
  }
  func.func @transform_5(%arg0: i32) -> (i32, i32) {
    %c0_i32 = arith.constant 0 : i32
    %c0_i32_0 = arith.constant 0 : i32
    %c0_i32_1 = arith.constant 0 : i32
    return %c0_i32, %c0_i32_0 : i32, i32
  }
  func.func @transform_6(%arg0: i32) -> (i32, i32) {
    %c0_i32 = arith.constant 0 : i32
    %c0_i32_0 = arith.constant 0 : i32
    %c0_i32_1 = arith.constant 0 : i32
    return %c0_i32, %c0_i32_0 : i32, i32
  }
  func.func @transform_7(%arg0: i32) -> (i32, i32) {
    %c0_i32 = arith.constant 0 : i32
    %c0_i32_0 = arith.constant 0 : i32
    %c0_i32_1 = arith.constant 0 : i32
    return %c0_i32, %c0_i32_0 : i32, i32
  }
  func.func @transform_8(%arg0: i32) -> (i32, i32) {
    %c0_i32 = arith.constant 0 : i32
    %c0_i32_0 = arith.constant 0 : i32
    %c0_i32_1 = arith.constant 0 : i32
    return %c0_i32, %c0_i32_0 : i32, i32
  }
  func.func @transform_9(%arg0: i32) -> (i32, i32) {
    %c0_i32 = arith.constant 0 : i32
    %c0_i32_0 = arith.constant 0 : i32
    %c0_i32_1 = arith.constant 0 : i32
    return %c0_i32, %c0_i32_0 : i32, i32
  }
  func.func @transform_10(%arg0: i32) -> (i32, i32) {
    %c0_i32 = arith.constant 0 : i32
    %c0_i32_0 = arith.constant 0 : i32
    %c0_i32_1 = arith.constant 0 : i32
    return %c0_i32, %c0_i32_0 : i32, i32
  }
  func.func @transform_11(%arg0: i32) -> (i32, i32) {
    %c0_i32 = arith.constant 0 : i32
    %c0_i32_0 = arith.constant 0 : i32
    %c0_i32_1 = arith.constant 0 : i32
    return %c0_i32, %c0_i32_0 : i32, i32
  }
  func.func @transform_12(%arg0: i32) -> (i32, i32) {
    %c0_i32 = arith.constant 0 : i32
    %c0_i32_0 = arith.constant 0 : i32
    %c0_i32_1 = arith.constant 0 : i32
    return %c0_i32, %c0_i32_0 : i32, i32
  }
  func.func @transform_13(%arg0: i32) -> (i32, i32) {
    %c0_i32 = arith.constant 0 : i32
    %c0_i32_0 = arith.constant 0 : i32
    %c0_i32_1 = arith.constant 0 : i32
    return %c0_i32, %c0_i32_0 : i32, i32
  }
  func.func @transform_14(%arg0: i32) -> (i32, i32) {
    %c0_i32 = arith.constant 0 : i32
    %c0_i32_0 = arith.constant 0 : i32
    return %arg0, %c0_i32 : i32, i32
  }
  func.func @transform_15(%arg0: i32) -> (i32, i32) {
    %c0_i32 = arith.constant 0 : i32
    %c0_i32_0 = arith.constant 0 : i32
    return %arg0, %c0_i32 : i32, i32
  }
}

</mosaic_0001>

<bundles_post_ra>
// kernel: fwd.1
= control target key start
LH: loop header
LB: loop body
LE: loop exit
PB: predicated region body
PF: predicated region fallthrough
CT: control target
= control target key end

     0   :  { %21 = vsyncpa [#allocation3], 0  ;;  %s16967_s0 = inlined_call_operand.vmem [shape: bf16[200,896], index: 0, kind: input, shape index: {}]   ;;  %s16968_s1 = inlined_call_operand.vmem [shape: f32[200,64], index: 1, kind: input, shape index: {}]   ;;  %s16969_s2 = inlined_call_operand.vmem [shape: bf16[896,512], index: 2, kind: input, shape index: {}]   ;;  %s16970_s3 = inlined_call_operand.vmem [shape: f32[1,512], index: 3, kind: input, shape index: {}]   ;;  %s16971_s4 = inlined_call_operand.hbm [shape: bf16[512,256], index: 4, kind: input, shape index: {}]   ;;  %s16972_s5 = inlined_call_operand.vmem [shape: f32[1,256], index: 5, kind: input, shape index: {}]   ;;  %s16973_s6 = inlined_call_operand.vmem [shape: bf16[256,128], index: 6, kind: input, shape index: {}]   ;;  %s16974_s7 = inlined_call_operand.vmem [shape: f32[1,128], index: 7, kind: input, shape index: {}]   ;;  %s16975_s8 = inlined_call_operand.vmem [shape: bf16[64,256], index: 8, kind: input, shape index: {}]   ;;  %s16976_s9 = inlined_call_operand.vmem [shape: f32[1,256], index: 9, kind: input, shape index: {}]   ;;  %s16977_s10 = inlined_call_operand.hbm [shape: bf16[256,512], index: 10, kind: input, shape index: {}]   ;;  %s16978_s11 = inlined_call_operand.vmem [shape: f32[1,512], index: 11, kind: input, shape index: {}]   ;;  %s16979_s12 = inlined_call_operand.vmem [shape: bf16[512,896], index: 12, kind: input, shape index: {}]   ;;  %s16980_s13 = inlined_call_operand.vmem [shape: f32[1,896], index: 13, kind: input, shape index: {}]   ;;  %s16981_s14 = inlined_call_operand.vmem [shape: bf16[200,896], index: 14, kind: output, shape index: {0}]   ;;  %s16982_s15 = inlined_call_operand.vmem [shape: f32[200,128], index: 15, kind: output, shape index: {1}]  }
   0x1   :  { %22 = vsyncpa [#allocation5], 0  ;;  %s12792_s18 = smov [#allocation2]  }
   0x2   :  { %s36_s19 = sshll.u32 %s12792_s18, 4  ;;  %s37_s19 = int_to_ptr.vmem [resolvable:$true] %s36_s19 }
   0x3   :  { %s12756_s20 = scalar_lea.vmem %s37_s19, 8192  ;;  %p12761_p1 = scmp.lt.s32.totalorder %s37_s19, %s37_s19 }
   0x4   :  { %p12757_p0 = scmp.ne.s32.totalorder %s37_s19, %s12756_s20  ;;  %p12762_p2 = scmp.lt.s32.totalorder %s12756_s20, %s12756_s20 }
   0x6   :  { %p12763_p3 = por %p12762_p2, %p12761_p1 }
   0x8   :  { %p12764_p4 = pnand %p12763_p3, %p12757_p0 }
   0xa   :  { %12767 = shalt.err (!%p12764_p4)
}
   0xb   :  { %s12793_s21 = smov 128   ;;  %s12794_s22 = smov 8  }
   0xc   :  { %42 = dma.hbm_to_vmem [thread:$0]  %s16971_s4, 8192, %s37_s19, [#allocation3], %s12793_s21, %s12793_s21, %s12794_s22  }
   0xd   :  { %s12795_s25 = smov [#allocation4]  }
   0xe   :  { %s58_s26 = sshll.u32 %s12795_s25, 4  ;;  %s59_s26 = int_to_ptr.vmem [resolvable:$true] %s58_s26 }
   0xf   :  { %s12776_s27 = scalar_lea.vmem %s59_s26, 8192  ;;  %p12781_p6 = scmp.lt.s32.totalorder %s59_s26, %s59_s26 }
  0x10   :  { %p12777_p5 = scmp.ne.s32.totalorder %s59_s26, %s12776_s27  ;;  %p12782_p7 = scmp.lt.s32.totalorder %s12776_s27, %s12776_s27 }
  0x12   :  { %p12783_p8 = por %p12782_p7, %p12781_p6 }
  0x14   :  { %p12784_p9 = pnand %p12783_p8, %p12777_p5 }
  0x16   :  { %12787 = shalt.err (!%p12784_p9)
}
  0x17   :  { %s12796_s28 = smov 256   ;;  %s12797_s29 = smov 16  }
  0x18   :  { %64 = dma.hbm_to_vmem [thread:$0]  %s16977_s10, 8192, %s59_s26, [#allocation5], %s12796_s28, %s12796_s28, %s12797_s29  }
  0x19   :  { %12788 = dma.done.wait [#allocation3], 8192  }
  0x1a   :  { %12789 = vsyncadd [#allocation3], 4294959104 }
  0x1b   :  { %12790 = dma.done.wait [#allocation5], 8192  }
  0x1c   :  { %12791 = vsyncadd [#allocation5], 4294959104  ;;  %v11256_v0 = vld [vmem:[%s16969_s2 + $0xe4] ss:$16 sps:$4 sm:$0xff]   ;;  %v11260_v2 = vld [vmem:[%s16969_s2 + $0xe0] ss:$16 sps:$4 sm:$0xff]  }
  0x1d   :  { %v11258_v1 = vld [vmem:[%s16969_s2 + $0x2e4] ss:$16 sps:$4 sm:$0xff]   ;;  %2001 = vmatprep.subr.bf16.mxu0 %v11256_v0  ;;  %v11261_v3 = vld [vmem:[%s16969_s2 + $0x2e0] ss:$16 sps:$4 sm:$0xff]   ;;  %v11357_v51 = vld [vmem:[%s16967_s0 + $0xc] ss:$28 sps:$4 sm:$0xff]  }
  0x1e   :  { %2162 = vmatprep.subr.bf16.mxu1 %v11258_v1  ;;  %v11262_v4 = vld [vmem:[%s16969_s2 + $0xc4] ss:$16 sps:$4 sm:$0xff]   ;;  %2002 = vmatpush1.bf16.msra.mxu0 %v11260_v2  ;;  %v11266_v6 = vld [vmem:[%s16969_s2 + $0xc0] ss:$16 sps:$4 sm:$0xff]   ;;  %s12799_s22 = smov 64   ;;  %vm4854_vm0 = vcmask 523264  }
  0x1f   :  { %2163 = vmatpush1.bf16.msra.mxu1 %v11261_v3  ;;  %v11264_v5 = vld [vmem:[%s16969_s2 + $0x2c4] ss:$16 sps:$4 sm:$0xff]   ;;  %2003 = vmatprep.subr.bf16.mxu0 %v11262_v4  ;;  %v11267_v7 = vld [vmem:[%s16969_s2 + $0x2c0] ss:$16 sps:$4 sm:$0xff]  }
  0x20   :  { %2164 = vmatprep.subr.bf16.mxu1 %v11264_v5  ;;  %v11268_v8 = vld [vmem:[%s16969_s2 + $0xa4] ss:$16 sps:$4 sm:$0xff]   ;;  %v11272_v10 = vld [vmem:[%s16969_s2 + $0xa0] ss:$16 sps:$4 sm:$0xff]   ;;  %2194 = vmatprep.mubr.bf16.mxu1 %v11357_v51 }
  0x21   :  { %v11270_v9 = vld [vmem:[%s16969_s2 + $0x2a4] ss:$16 sps:$4 sm:$0xff]   ;;  %v11273_v11 = vld [vmem:[%s16969_s2 + $0x2a0] ss:$16 sps:$4 sm:$0xff]  }
  0x22   :  { %2004 = vmatpush1.bf16.msra.mxu0 %v11266_v6  ;;  %v11274_v12 = vld [vmem:[%s16969_s2 + $0x84] ss:$16 sps:$4 sm:$0xff]   ;;  %v11278_v14 = vld [vmem:[%s16969_s2 + $0x80] ss:$16 sps:$4 sm:$0xff]  }
  0x23   :  { %2165 = vmatpush1.bf16.msra.mxu1 %v11267_v7  ;;  %2005 = vmatprep.subr.bf16.mxu0 %v11268_v8  ;;  %v11276_v13 = vld [vmem:[%s16969_s2 + $0x284] ss:$16 sps:$4 sm:$0xff]   ;;  %v11279_v15 = vld [vmem:[%s16969_s2 + $0x280] ss:$16 sps:$4 sm:$0xff]   ;;  %v11364_v8 = vld [vmem:[%s16967_s0 + $0x3c] ss:$28 sps:$4 sm:$0xff]  }
  0x24   :  { %2166 = vmatprep.subr.bf16.mxu1 %v11270_v9  ;;  %v11280_v16 = vld [vmem:[%s16969_s2 + $0x64] ss:$16 sps:$4 sm:$0xff]   ;;  %v11284_v18 = vld [vmem:[%s16969_s2 + $0x60] ss:$16 sps:$4 sm:$0xff]  }
  0x25   :  { %v11282_v17 = vld [vmem:[%s16969_s2 + $0x264] ss:$16 sps:$4 sm:$0xff]   ;;  %v11285_v19 = vld [vmem:[%s16969_s2 + $0x260] ss:$16 sps:$4 sm:$0xff]  }
  0x26   :  { %2006 = vmatpush1.bf16.msra.mxu0 %v11272_v10  ;;  %v11286_v20 = vld [vmem:[%s16969_s2 + $0x44] ss:$16 sps:$4 sm:$0xff]   ;;  %v11290_v22 = vld [vmem:[%s16969_s2 + $0x40] ss:$16 sps:$4 sm:$0xff]  }
  0x27   :  { %2167 = vmatpush1.bf16.msra.mxu1 %v11273_v11  ;;  %2007 = vmatprep.subr.bf16.mxu0 %v11274_v12  ;;  %v11288_v21 = vld [vmem:[%s16969_s2 + $0x244] ss:$16 sps:$4 sm:$0xff]   ;;  %v11291_v23 = vld [vmem:[%s16969_s2 + $0x240] ss:$16 sps:$4 sm:$0xff]  }
  0x28   :  { %2168 = vmatprep.subr.bf16.mxu1 %v11276_v13  ;;  %v11292_v24 = vld [vmem:[%s16969_s2 + $0x24] ss:$16 sps:$4 sm:$0xff]   ;;  %v11296_v26 = vld [vmem:[%s16969_s2 + $0x20] ss:$16 sps:$4 sm:$0xff]  }
  0x29   :  { %v11294_v25 = vld [vmem:[%s16969_s2 + $0x224] ss:$16 sps:$4 sm:$0xff]   ;;  %v11297_v27 = vld [vmem:[%s16969_s2 + $0x220] ss:$16 sps:$4 sm:$0xff]  }
  0x2a   :  { %2008 = vmatpush1.bf16.msra.mxu0 %v11278_v14  ;;  %v11298_v28 = vld [vmem:[%s16969_s2 + $0x4] ss:$16 sps:$4 sm:$0xff]   ;;  %v11302_v30 = vld [vmem:[%s16969_s2] ss:$16 sps:$4 sm:$0xff]  }
  0x2b   :  { %2169 = vmatpush1.bf16.msra.mxu1 %v11279_v15  ;;  %2009 = vmatprep.subr.bf16.mxu0 %v11280_v16  ;;  %v11300_v29 = vld [vmem:[%s16969_s2 + $0x204] ss:$16 sps:$4 sm:$0xff]   ;;  %v11303_v31 = vld [vmem:[%s16969_s2 + $0x200] ss:$16 sps:$4 sm:$0xff]  }
  0x2c   :  { %2170 = vmatprep.subr.bf16.mxu1 %v11282_v17  ;;  %v11304_v32 = vld [vmem:[%s16969_s2 + $0x1e4] ss:$16 sps:$4 sm:$0xff]   ;;  %v11308_v34 = vld [vmem:[%s16969_s2 + $0x1e0] ss:$16 sps:$4 sm:$0xff]  }
  0x2d   :  { %v11306_v33 = vld [vmem:[%s16969_s2 + $0x3e4] ss:$16 sps:$4 sm:$0xff]   ;;  %v11309_v35 = vld [vmem:[%s16969_s2 + $0x3e0] ss:$16 sps:$4 sm:$0xff]  }
  0x2e   :  { %2010 = vmatpush1.bf16.msra.mxu0 %v11284_v18  ;;  %v11310_v36 = vld [vmem:[%s16969_s2 + $0x1c4] ss:$16 sps:$4 sm:$0xff]   ;;  %v11314_v38 = vld [vmem:[%s16969_s2 + $0x1c0] ss:$16 sps:$4 sm:$0xff]  }
  0x2f   :  { %2171 = vmatpush1.bf16.msra.mxu1 %v11285_v19  ;;  %2011 = vmatprep.subr.bf16.mxu0 %v11286_v20  ;;  %v11312_v37 = vld [vmem:[%s16969_s2 + $0x3c4] ss:$16 sps:$4 sm:$0xff]   ;;  %v11315_v39 = vld [vmem:[%s16969_s2 + $0x3c0] ss:$16 sps:$4 sm:$0xff]   ;;  %v11378_v20 = vld [vmem:[%s16967_s0 + $0x7c] ss:$28 sps:$4 sm:$0xff]  }
  0x30   :  { %2172 = vmatprep.subr.bf16.mxu1 %v11288_v21  ;;  %v11316_v40 = vld [vmem:[%s16969_s2 + $0x1a4] ss:$16 sps:$4 sm:$0xff]   ;;  %v11320_v42 = vld [vmem:[%s16969_s2 + $0x1a0] ss:$16 sps:$4 sm:$0xff]  }
  0x31   :  { %v11318_v41 = vld [vmem:[%s16969_s2 + $0x3a4] ss:$16 sps:$4 sm:$0xff]   ;;  %v11321_v43 = vld [vmem:[%s16969_s2 + $0x3a0] ss:$16 sps:$4 sm:$0xff]  }
  0x32   :  { %2012 = vmatpush1.bf16.msra.mxu0 %v11290_v22  ;;  %v11322_v44 = vld [vmem:[%s16969_s2 + $0x184] ss:$16 sps:$4 sm:$0xff]   ;;  %v11326_v46 = vld [vmem:[%s16969_s2 + $0x180] ss:$16 sps:$4 sm:$0xff]  }
  0x33   :  { %2173 = vmatpush1.bf16.msra.mxu1 %v11291_v23  ;;  %2013 = vmatprep.subr.bf16.mxu0 %v11292_v24  ;;  %v11324_v45 = vld [vmem:[%s16969_s2 + $0x384] ss:$16 sps:$4 sm:$0xff]   ;;  %v11327_v47 = vld [vmem:[%s16969_s2 + $0x380] ss:$16 sps:$4 sm:$0xff]  }
  0x34   :  { %2174 = vmatprep.subr.bf16.mxu1 %v11294_v25  ;;  %v11328_v48 = vld [vmem:[%s16969_s2 + $0x164] ss:$16 sps:$4 sm:$0xff]   ;;  %v11332_v52 = vld [vmem:[%s16969_s2 + $0x160] ss:$16 sps:$4 sm:$0xff]  }
  0x35   :  { %v11354_v49 = vld [vmem:[%s16967_s0 + $0x4] ss:$28 sps:$4 sm:$0xff]   ;;  %v11371_v16 = vld [vmem:[%s16967_s0 + $0x38] ss:$28 sps:$4 sm:$0xff]   ;;  %v11383_v25 = vld [vmem:[%s16967_s0 + $0x70] ss:$28 sps:$4 sm:$0xff]  }
  0x36   :  { %2014 = vmatpush1.bf16.msra.mxu0 %v11296_v26  ;;  %v11330_v50 = vld [vmem:[%s16969_s2 + $0x364] ss:$16 sps:$4 sm:$0xff]   ;;  %2033 = vmatprep.mubr.bf16.mxu0 %v11354_v49  ;;  %v11333_v53 = vld [vmem:[%s16969_s2 + $0x360] ss:$16 sps:$4 sm:$0xff]   ;;  %v11409_v49 = vld [vmem:[%s16967_s0 + $0x11c] ss:$28 sps:$4 sm:$0xff]  }
  0x37   :  { %2175 = vmatpush1.bf16.msra.mxu1 %v11297_v27  ;;  %2015 = vmatprep.subr.bf16.mxu0 %v11298_v28  ;;  %v11334_v54 = vld [vmem:[%s16969_s2 + $0x144] ss:$16 sps:$4 sm:$0xff]   ;;  %v11338_v56 = vld [vmem:[%s16969_s2 + $0x140] ss:$16 sps:$4 sm:$0xff]  }
  0x38   :  { %2176 = vmatprep.subr.bf16.mxu1 %v11300_v29  ;;  %v11336_v55 = vld [vmem:[%s16969_s2 + $0x344] ss:$16 sps:$4 sm:$0xff]   ;;  %v11339_v57 = vld [vmem:[%s16969_s2 + $0x340] ss:$16 sps:$4 sm:$0xff]   ;;  %v11388_v29 = vld [vmem:[%s16967_s0 + $0xac] ss:$28 sps:$4 sm:$0xff]  }
  0x39   :  { %v11340_v58 = vld [vmem:[%s16969_s2 + $0x124] ss:$16 sps:$4 sm:$0xff]   ;;  %v11344_v60 = vld [vmem:[%s16969_s2 + $0x120] ss:$16 sps:$4 sm:$0xff]  }
  0x3a   :  { %2016 = vmatpush1.bf16.msra.mxu0 %v11302_v30  ;;  %v11342_v59 = vld [vmem:[%s16969_s2 + $0x324] ss:$16 sps:$4 sm:$0xff]   ;;  %v11345_v61 = vld [vmem:[%s16969_s2 + $0x320] ss:$16 sps:$4 sm:$0xff]  }
  0x3b   :  { %2177 = vmatpush1.bf16.msra.mxu1 %v11303_v31  ;;  %2017 = vmatprep.subr.bf16.mxu0 %v11304_v32  ;;  %v11346_v62 = vld [vmem:[%s16969_s2 + $0x104] ss:$16 sps:$4 sm:$0xff]   ;;  %v11350_v0 = vld [vmem:[%s16969_s2 + $0x100] ss:$16 sps:$4 sm:$0xff]  }
  0x3c   :  { %2178 = vmatprep.subr.bf16.mxu1 %v11306_v33  ;;  %v11348_v63 = vld [vmem:[%s16969_s2 + $0x304] ss:$16 sps:$4 sm:$0xff]   ;;  %v11351_v1 = vld [vmem:[%s16969_s2 + $0x300] ss:$16 sps:$4 sm:$0xff]  }
  0x3d   :  { %v11360_v2 = vld [vmem:[%s16969_s2 + $0x4e4] ss:$16 sps:$4 sm:$0xff]   ;;  %v11352_v4 = vld [vmem:[%s16967_s0] ss:$28 sps:$4 sm:$0xff]  }
  0x3e   :  { %2018 = vmatpush2.bf16.msra.mxu0 %v11308_v34  ;;  %v11363_v3 = vld [vmem:[%s16969_s2 + $0x6e4] ss:$16 sps:$4 sm:$0xff]   ;;  %v11358_v6 = vld [vmem:[%s16969_s2 + $0x4e0] ss:$16 sps:$4 sm:$0xff]  }
  0x3f   :  { %2179 = vmatpush2.bf16.msra.mxu1 %v11309_v35  ;;  %2019 = vmatprep.subr.bf16.mxu0 %v11310_v36  ;;  %v11355_v5 = vld [vmem:[%s16967_s0 + $0x8] ss:$28 sps:$4 sm:$0xff]   ;;  %v11361_v7 = vld [vmem:[%s16969_s2 + $0x6e0] ss:$16 sps:$4 sm:$0xff]   ;;  %v11384_v27 = vld [vmem:[%s16967_s0 + $0x78] ss:$28 sps:$4 sm:$0xff]  }
  0x40   :  { %2180 = vmatprep.subr.bf16.mxu1 %v11312_v37  ;;  %v11366_v9 = vld [vmem:[%s16967_s0 + $0x44] ss:$28 sps:$4 sm:$0xff]   ;;  %v11376_v19 = vld [vmem:[%s16967_s0 + $0x74] ss:$28 sps:$4 sm:$0xff]  }
  0x41   :  { %v11370_v10 = vld [vmem:[%s16969_s2 + $0x4c4] ss:$16 sps:$4 sm:$0xff]   ;;  %v11368_v12 = vld [vmem:[%s16969_s2 + $0x4c0] ss:$16 sps:$4 sm:$0xff]  }
  0x42   :  { %2020 = vmatpush2.bf16.msra.mxu0 %v11314_v38  ;;  %v11382_v11 = vld [vmem:[%s16969_s2 + $0x6c4] ss:$16 sps:$4 sm:$0xff]   ;;  %v11380_v14 = vld [vmem:[%s16969_s2 + $0x6c0] ss:$16 sps:$4 sm:$0xff]  }
  0x43   :  { %2181 = vmatpush2.bf16.msra.mxu1 %v11315_v39  ;;  %2021 = vmatprep.subr.bf16.mxu0 %v11316_v40  ;;  %v11375_v13 = vld [vmem:[%s16969_s2 + $0x4a4] ss:$16 sps:$4 sm:$0xff]   ;;  %v11372_v17 = vld [vmem:[%s16967_s0 + $0x40] ss:$28 sps:$4 sm:$0xff]   ;;  %v11393_v36 = vld [vmem:[%s16967_s0 + $0xb0] ss:$28 sps:$4 sm:$0xff]  }
  0x44   :  { %2182 = vmatprep.subr.bf16.mxu1 %v11318_v41  ;;  %v11399_v15 = vld [vmem:[%s16969_s2 + $0x6a4] ss:$16 sps:$4 sm:$0xff]   ;;  %v11373_v18 = vld [vmem:[%s16969_s2 + $0x4a0] ss:$16 sps:$4 sm:$0xff]   ;;  %v11402_v40 = vld [vmem:[%s16967_s0 + $0xec] ss:$28 sps:$4 sm:$0xff]  }
  0x45   :  { %v11387_v21 = vld [vmem:[%s16969_s2 + $0x484] ss:$16 sps:$4 sm:$0xff]   ;;  %v11397_v22 = vld [vmem:[%s16969_s2 + $0x6a0] ss:$16 sps:$4 sm:$0xff]  }
  0x46   :  { %2022 = vmatpush2.bf16.msra.mxu0 %v11320_v42  ;;  %v11420_v23 = vld [vmem:[%s16969_s2 + $0x684] ss:$16 sps:$4 sm:$0xff]   ;;  %v11385_v24 = vld [vmem:[%s16969_s2 + $0x480] ss:$16 sps:$4 sm:$0xff]  }
  0x47   :  { %2183 = vmatpush2.bf16.msra.mxu1 %v11321_v43  ;;  %2023 = vmatprep.subr.bf16.mxu0 %v11322_v44  ;;  %v11396_v26 = vld [vmem:[%s16969_s2 + $0x464] ss:$16 sps:$4 sm:$0xff]   ;;  %v11418_v28 = vld [vmem:[%s16969_s2 + $0x680] ss:$16 sps:$4 sm:$0xff]  }
  0x48   :  { %2184 = vmatprep.subr.bf16.mxu1 %v11324_v45  ;;  %v11390_v30 = vld [vmem:[%s16967_s0 + $0xb4] ss:$28 sps:$4 sm:$0xff]   ;;  %v11392_v35 = vld [vmem:[%s16967_s0 + $0xa8] ss:$28 sps:$4 sm:$0xff]   ;;  %v11404_v45 = vld [vmem:[%s16967_s0 + $0xe0] ss:$28 sps:$4 sm:$0xff]  }
  0x49   :  { %v11394_v31 = vld [vmem:[%s16969_s2 + $0x460] ss:$16 sps:$4 sm:$0xff]   ;;  %v11435_v32 = vld [vmem:[%s16969_s2 + $0x664] ss:$16 sps:$4 sm:$0xff]  }
  0x4a   :  { %2024 = vmatpush2.bf16.msra.mxu0 %v11326_v46  ;;  %v11408_v33 = vld [vmem:[%s16969_s2 + $0x444] ss:$16 sps:$4 sm:$0xff]   ;;  %v11433_v34 = vld [vmem:[%s16969_s2 + $0x660] ss:$16 sps:$4 sm:$0xff]  }
  0x4b   :  { %2185 = vmatpush2.bf16.msra.mxu1 %v11327_v47  ;;  %2025 = vmatprep.subr.bf16.mxu0 %v11328_v48  ;;  %v11406_v37 = vld [vmem:[%s16969_s2 + $0x440] ss:$16 sps:$4 sm:$0xff]   ;;  %v11415_v39 = vld [vmem:[%s16969_s2 + $0x424] ss:$16 sps:$4 sm:$0xff]  }
  0x4c   :  { %2186 = vmatprep.subr.bf16.mxu1 %v11330_v50  ;;  %v11400_v38 = vld [vmem:[%s16967_s0 + $0xe4] ss:$28 sps:$4 sm:$0xff]  }
  0x4d   :  { %v11413_v41 = vld [vmem:[%s16969_s2 + $0x420] ss:$16 sps:$4 sm:$0xff]   ;;  %v11423_v42 = vld [vmem:[%s16969_s2 + $0x404] ss:$16 sps:$4 sm:$0xff]  }
  0x4e   :  { %2026 = vmatpush2.bf16.msra.mxu0 %v11332_v52  ;;  %v11456_v43 = vld [vmem:[%s16969_s2 + $0x644] ss:$16 sps:$4 sm:$0xff]   ;;  %v11454_v44 = vld [vmem:[%s16969_s2 + $0x640] ss:$16 sps:$4 sm:$0xff]  }
  0x4f   :  { %2187 = vmatpush2.bf16.msra.mxu1 %v11333_v53  ;;  %2027 = vmatprep.subr.bf16.mxu0 %v11334_v54  ;;  %v11421_v46 = vld [vmem:[%s16969_s2 + $0x400] ss:$16 sps:$4 sm:$0xff]   ;;  %v11405_v47 = vld [vmem:[%s16967_s0 + $0xe8] ss:$28 sps:$4 sm:$0xff]  }
  0x50   :  { %2188 = vmatprep.subr.bf16.mxu1 %v11336_v55  ;;  %v11432_v48 = vld [vmem:[%s16969_s2 + $0x5e4] ss:$16 sps:$4 sm:$0xff]   ;;  %v11430_v51 = vld [vmem:[%s16969_s2 + $0x5e0] ss:$16 sps:$4 sm:$0xff]  }
  0x51   :  { %v11411_v50 = vld [vmem:[%s16967_s0 + $0x124] ss:$28 sps:$4 sm:$0xff]  }
  0x52   :  { %2028 = vmatpush2.bf16.msra.mxu0 %v11338_v56  ;;  %v11444_v52 = vld [vmem:[%s16969_s2 + $0x5c4] ss:$16 sps:$4 sm:$0xff]   ;;  %v11475_v53 = vld [vmem:[%s16969_s2 + $0x620] ss:$16 sps:$4 sm:$0xff]  }
  0x53   :  { %2189 = vmatpush2.bf16.msra.mxu1 %v11339_v57  ;;  %2029 = vmatprep.subr.bf16.mxu0 %v11340_v58  ;;  %v11477_v54 = vld [vmem:[%s16969_s2 + $0x624] ss:$16 sps:$4 sm:$0xff]   ;;  %v11442_v55 = vld [vmem:[%s16969_s2 + $0x5c0] ss:$16 sps:$4 sm:$0xff]  }
  0x54   :  { %2190 = vmatprep.subr.bf16.mxu1 %v11342_v59  ;;  %v11416_v56 = vld [vmem:[%s16967_s0 + $0x118] ss:$28 sps:$4 sm:$0xff]   ;;  %v11417_v58 = vld [vmem:[%s16967_s0 + $0x120] ss:$28 sps:$4 sm:$0xff]  }
  0x55   :  { %v11453_v57 = vld [vmem:[%s16969_s2 + $0x5a4] ss:$16 sps:$4 sm:$0xff]  }
  0x56   :  { %2030 = vmatpush2.bf16.msra.mxu0 %v11344_v60  ;;  %v11424_v59 = vld [vmem:[%s16967_s0 + $0x154] ss:$28 sps:$4 sm:$0xff]   ;;  %v11426_v60 = vld [vmem:[%s16967_s0 + $0x15c] ss:$28 sps:$4 sm:$0xff]  }
  0x57   :  { %2191 = vmatpush2.bf16.msra.mxu1 %v11345_v61  ;;  %2031 = vmatprep.subr.bf16.mxu0 %v11346_v62  ;;  %v11451_v61 = vld [vmem:[%s16969_s2 + $0x5a0] ss:$16 sps:$4 sm:$0xff]   ;;  %v11465_v62 = vld [vmem:[%s16969_s2 + $0x584] ss:$16 sps:$4 sm:$0xff]  }
  0x58   :  { %2192 = vmatprep.subr.bf16.mxu1 %v11348_v63  ;;  %v11492_v63 = vld [vmem:[%s16969_s2 + $0x604] ss:$16 sps:$4 sm:$0xff]  }
  0x5a   :  { %2032 = vmatpush2.bf16.msra.mxu0 %v11350_v0  ;;  %v11490_v0 = vld [vmem:[%s16969_s2 + $0x600] ss:$16 sps:$4 sm:$0xff]  }
  0x5b   :  { %2193 = vmatpush2.bf16.msra.mxu1 %v11351_v1  ;;  %2323 = vmatprep.subr.bf16.mxu0 %v11360_v2  ;;  %v11428_v1 = vld [vmem:[%s16967_s0 + $0x150] ss:$28 sps:$4 sm:$0xff]   ;;  %v11429_v2 = vld [vmem:[%s16967_s0 + $0x158] ss:$28 sps:$4 sm:$0xff]  }
  0x5c   :  { %2484 = vmatprep.subr.bf16.mxu1 %v11363_v3  ;;  %v11463_v3 = vld [vmem:[%s16969_s2 + $0x580] ss:$16 sps:$4 sm:$0xff]  }
  0x5d   :  { %2034 = vmatmul.mubr.bf16.vlgmr.msra.gmra.mxu0 %v11352_v4  ;;  %v11436_v4 = vld [vmem:[%s16967_s0 + $0x18c] ss:$28 sps:$4 sm:$0xff]  }
  0x5e   :  { %2195 = vmatmul.mubr.bf16.vlgmr.msra.gmra.mxu1 %v11355_v5  ;;  %2324 = vmatpush1.bf16.msra.mxu0 %v11358_v6  ;;  %v11468_v5 = vld [vmem:[%s16969_s2 + $0x564] ss:$16 sps:$4 sm:$0xff]  }
  0x5f   :  { %2485 = vmatpush1.bf16.msra.mxu1 %v11361_v7  ;;  %2043 = vmatprep.mubr.bf16.mxu0 %v11364_v8  ;;  %v11438_v6 = vld [vmem:[%s16967_s0 + $0x194] ss:$28 sps:$4 sm:$0xff]   ;;  %v11509_v7 = vld [vmem:[%s16969_s2 + $0x2ec] ss:$16 sps:$4 sm:$0xff]  }
  0x60   :  { %2204 = vmatprep.mubr.bf16.mxu1 %v11366_v9  ;;  %2325 = vmatprep.subr.bf16.mxu0 %v11370_v10  ;;  %v11466_v8 = vld [vmem:[%s16969_s2 + $0x560] ss:$16 sps:$4 sm:$0xff]   ;;  %v11480_v9 = vld [vmem:[%s16969_s2 + $0x544] ss:$16 sps:$4 sm:$0xff]  }
  0x61   :  { %2486 = vmatprep.subr.bf16.mxu1 %v11382_v11  ;;  %v11478_v10 = vld [vmem:[%s16969_s2 + $0x540] ss:$16 sps:$4 sm:$0xff]   ;;  %v11440_v11 = vld [vmem:[%s16967_s0 + $0x188] ss:$28 sps:$4 sm:$0xff]  }
  0x62   :  { %2326 = vmatpush1.bf16.msra.mxu0 %v11368_v12  ;;  %v11489_v12 = vld [vmem:[%s16969_s2 + $0x524] ss:$16 sps:$4 sm:$0xff]  }
  0x63   :  { %2487 = vmatpush1.bf16.msra.mxu1 %v11380_v14  ;;  %2327 = vmatprep.subr.bf16.mxu0 %v11375_v13  ;;  %v11441_v13 = vld [vmem:[%s16967_s0 + $0x190] ss:$28 sps:$4 sm:$0xff]   ;;  %v11445_v14 = vld [vmem:[%s16967_s0 + $0x1c4] ss:$28 sps:$4 sm:$0xff]  }
  0x64   :  { %2488 = vmatprep.subr.bf16.mxu1 %v11399_v15  ;;  %v11447_v15 = vld [vmem:[%s16967_s0 + $0x1cc] ss:$28 sps:$4 sm:$0xff]  }
  0x65   :  { %2044 = vmatmul.mubr.bf16.gmra.mxu0 %v11371_v16  ;;  %v11487_v16 = vld [vmem:[%s16969_s2 + $0x520] ss:$16 sps:$4 sm:$0xff]  }
  0x66   :  { %2205 = vmatmul.mubr.bf16.gmra.mxu1 %v11372_v17  ;;  %2328 = vmatpush1.bf16.msra.mxu0 %v11373_v18  ;;  %v11499_v17 = vld [vmem:[%s16969_s2 + $0x504] ss:$16 sps:$4 sm:$0xff]   ;;  %v11449_v18 = vld [vmem:[%s16967_s0 + $0x1c0] ss:$28 sps:$4 sm:$0xff]  }
  0x67   :  { %2053 = vmatprep.mubr.bf16.mxu0 %v11376_v19  ;;  %2214 = vmatprep.mubr.bf16.mxu1 %v11378_v20  ;;  %v11497_v19 = vld [vmem:[%s16969_s2 + $0x500] ss:$16 sps:$4 sm:$0xff]   ;;  %v11506_v20 = vld [vmem:[%s16969_s2 + $0xec] ss:$16 sps:$4 sm:$0xff]  }
  0x68   :  { %2329 = vmatprep.subr.bf16.mxu0 %v11387_v21  ;;  %2489 = vmatpush1.bf16.msra.mxu1 %v11397_v22  ;;  %v11450_v21 = vld [vmem:[%s16967_s0 + $0x1c8] ss:$28 sps:$4 sm:$0xff]   ;;  %v11457_v22 = vld [vmem:[%s16967_s0 + $0x1fc] ss:$28 sps:$4 sm:$0xff]  }
  0x69   :  { %2490 = vmatprep.subr.bf16.mxu1 %v11420_v23  ;;  %v11459_v23 = vld [vmem:[%s16967_s0 + $0x204] ss:$28 sps:$4 sm:$0xff]  }
  0x6a   :  { %2330 = vmatpush1.bf16.msra.mxu0 %v11385_v24  ;;  %v11461_v24 = vld [vmem:[%s16967_s0 + $0x1f8] ss:$28 sps:$4 sm:$0xff]  }
  0x6b   :  { %2331 = vmatprep.subr.bf16.mxu0 %v11396_v26  ;;  %v11469_v26 = vld [vmem:[%s16967_s0 + $0x234] ss:$28 sps:$4 sm:$0xff]  }
  0x6c   :  { %2491 = vmatpush1.bf16.msra.mxu1 %v11418_v28  ;;  %v11473_v28 = vld [vmem:[%s16967_s0 + $0x230] ss:$28 sps:$4 sm:$0xff]  }
  0x6d   :  { %2054 = vmatmul.mubr.bf16.gmra.mxu0 %v11383_v25  ;;  %2492 = vmatprep.subr.bf16.mxu1 %v11435_v32  ;;  %v11462_v25 = vld [vmem:[%s16967_s0 + $0x200] ss:$28 sps:$4 sm:$0xff]  }
  0x6e   :  { %2215 = vmatmul.mubr.bf16.gmra.mxu1 %v11384_v27  ;;  %2063 = vmatprep.mubr.bf16.mxu0 %v11388_v29  ;;  %v11471_v27 = vld [vmem:[%s16967_s0 + $0x23c] ss:$28 sps:$4 sm:$0xff]   ;;  %v174_v32 = vld [vmem:[%s16967_s0 + $0x2a0] sm:$0xff] }
  0x6f   :  { %2224 = vmatprep.mubr.bf16.mxu1 %v11390_v30  ;;  %2332 = vmatpush1.bf16.msra.mxu0 %v11394_v31  ;;  %v11474_v29 = vld [vmem:[%s16967_s0 + $0x238] ss:$28 sps:$4 sm:$0xff]   ;;  %v11481_v30 = vld [vmem:[%s16967_s0 + $0x26c] ss:$28 sps:$4 sm:$0xff]  }
  0x70   :  { %2333 = vmatprep.subr.bf16.mxu0 %v11408_v33  ;;  %2493 = vmatpush1.bf16.msra.mxu1 %v11433_v34  ;;  %v11483_v31 = vld [vmem:[%s16967_s0 + $0x274] ss:$28 sps:$4 sm:$0xff]   ;;  %v175_v33 = vld [vmem:[%s16967_s0 + $0x2a8] sm:$0xff] }
  0x71   :  { %2494 = vmatprep.subr.bf16.mxu1 %v11456_v43  ;;  %v11485_v34 = vld [vmem:[%s16967_s0 + $0x268] ss:$28 sps:$4 sm:$0xff]   ;;  %v11503_v43 = vld [vmem:[%s16967_s0 + $0x18] ss:$28 sps:$4 sm:$0xff]  }
  0x73   :  { %2334 = vmatpush1.bf16.msra.mxu0 %v11406_v37  ;;  %v13380_v37 = vcombine.high %v175_v33, %v175_v33 }
  0x74   :  { %2335 = vmatprep.subr.bf16.mxu0 %v11415_v39  ;;  %2495 = vmatpush1.bf16.msra.mxu1 %v11454_v44  ;;  %v13386_v39 = vcombine.low %v175_v33, %v175_v33  ;;  %v11504_v44 = vld [vmem:[%s16969_s2 + $0xe8] ss:$16 sps:$4 sm:$0xff]  }
  0x75   :  { %2064 = vmatmul.mubr.bf16.gmra.mxu0 %v11392_v35  ;;  %2496 = vmatprep.subr.bf16.mxu1 %v11477_v54  ;;  %v11486_v35 = vld [vmem:[%s16967_s0 + $0x270] ss:$28 sps:$4 sm:$0xff]   ;;  %v11561_v33 = vld [vmem:[%s16967_s0 + $0x128] ss:$28 sps:$4 sm:$0xff]  }
  0x76   :  { %2225 = vmatmul.mubr.bf16.gmra.mxu1 %v11393_v36  ;;  %2073 = vmatprep.mubr.bf16.mxu0 %v11400_v38  ;;  %v13378_v36 = vcombine.high %v174_v32, %v174_v32  ;;  %v13384_v38 = vcombine.low %v174_v32, %v174_v32  ;;  %v11516_v54 = vld [vmem:[%s16967_s0 + $0x50] ss:$28 sps:$4 sm:$0xff]  }
  0x77   :  { %2234 = vmatprep.mubr.bf16.mxu1 %v11402_v40  ;;  %2336 = vmatpush1.bf16.msra.mxu0 %v11413_v41  ;;  %v11502_v40 = vld [vmem:[%s16967_s0 + $0x14] ss:$28 sps:$4 sm:$0xff]   ;;  %v16983_v41 = vmov 0   ;;  %v11601_v32 = vld [vmem:[%s16969_s2 + $0x3ac] ss:$16 sps:$4 sm:$0xff]  }
  0x78   :  { %2337 = vmatprep.subr.bf16.mxu0 %v11423_v42  ;;  %2497 = vmatpush1.bf16.msra.mxu1 %v11475_v53  ;;  %v11500_v42 = vld [vmem:[%s16967_s0 + $0x10] ss:$28 sps:$4 sm:$0xff]   ;;  %v11515_v53 = vld [vmem:[%s16967_s0 + $0x48] ss:$28 sps:$4 sm:$0xff]  }
  0x79   :  { %2498 = vmatprep.subr.bf16.mxu1 %v11492_v63  ;;  %v11542_v63 = vld [vmem:[%s16969_s2 + $0x6c] ss:$16 sps:$4 sm:$0xff]  }
  0x7b   :  { %2338 = vmatpush1.bf16.msra.mxu0 %v11421_v46  ;;  %v11510_v46 = vld [vmem:[%s16967_s0 + $0x4c] ss:$28 sps:$4 sm:$0xff]  }
  0x7c   :  { %2339 = vmatprep.subr.bf16.mxu0 %v11432_v48  ;;  %2499 = vmatpush1.bf16.msra.mxu1 %v11490_v0  ;;  %v11519_v48 = vld [vmem:[%s16969_s2 + $0x2cc] ss:$16 sps:$4 sm:$0xff]  }
  0x7d   :  { %2074 = vmatmul.mubr.bf16.gmra.mxu0 %v11404_v45  ;;  %2806 = vmatprep.subr.bf16.mxu1 %v11509_v7  ;;  %v11507_v45 = vld [vmem:[%s16969_s2 + $0x2e8] ss:$16 sps:$4 sm:$0xff]   ;;  %v11545_v0 = vld [vmem:[%s16969_s2 + $0x26c] ss:$16 sps:$4 sm:$0xff]  }
  0x7e   :  { %2235 = vmatmul.mubr.bf16.gmra.mxu1 %v11405_v47  ;;  %2083 = vmatprep.mubr.bf16.mxu0 %v11409_v49  ;;  %v11514_v47 = vld [vmem:[%s16969_s2 + $0xcc] ss:$16 sps:$4 sm:$0xff]   ;;  %v11512_v49 = vld [vmem:[%s16969_s2 + $0xc8] ss:$16 sps:$4 sm:$0xff]  }
  0x7f   :  { %2244 = vmatprep.mubr.bf16.mxu1 %v11411_v50  ;;  %2340 = vmatpush2.bf16.msra.mxu0 %v11430_v51  ;;  %v11517_v50 = vld [vmem:[%s16969_s2 + $0x2c8] ss:$16 sps:$4 sm:$0xff]   ;;  %v11522_v51 = vld [vmem:[%s16969_s2 + $0xac] ss:$16 sps:$4 sm:$0xff]  }
  0x80   :  { %2341 = vmatprep.subr.bf16.mxu0 %v11444_v52  ;;  %v11527_v52 = vld [vmem:[%s16969_s2 + $0x2ac] ss:$16 sps:$4 sm:$0xff]   ;;  %v11550_v7 = vld [vmem:[%s16969_s2 + $0x48] ss:$16 sps:$4 sm:$0xff]  }
  0x83   :  { %2342 = vmatpush2.bf16.msra.mxu0 %v11442_v55  ;;  %v11520_v55 = vld [vmem:[%s16969_s2 + $0xa8] ss:$16 sps:$4 sm:$0xff]  }
  0x84   :  { %2343 = vmatprep.subr.bf16.mxu0 %v11453_v57  ;;  %v11525_v57 = vld [vmem:[%s16969_s2 + $0x2a8] ss:$16 sps:$4 sm:$0xff]  }
  0x85   :  { %2084 = vmatmul.mubr.bf16.gmra.mxu0 %v11416_v56  ;;  %v11523_v56 = vld [vmem:[%s16967_s0 + $0x84] ss:$28 sps:$4 sm:$0xff]  }
  0x86   :  { %2245 = vmatmul.mubr.bf16.gmra.mxu1 %v11417_v58  ;;  %2093 = vmatprep.mubr.bf16.mxu0 %v11424_v59  ;;  %v11532_v58 = vld [vmem:[%s16969_s2 + $0x8c] ss:$16 sps:$4 sm:$0xff]  }
  0x87   :  { %2254 = vmatprep.mubr.bf16.mxu1 %v11426_v60  ;;  %2344 = vmatpush2.bf16.msra.mxu0 %v11451_v61  ;;  %v11535_v59 = vld [vmem:[%s16969_s2 + $0x28c] ss:$16 sps:$4 sm:$0xff]   ;;  %v11530_v60 = vld [vmem:[%s16969_s2 + $0x88] ss:$16 sps:$4 sm:$0xff]  }
  0x88   :  { %2345 = vmatprep.subr.bf16.mxu0 %v11465_v62  ;;  %v11528_v61 = vld [vmem:[%s16967_s0 + $0x80] ss:$28 sps:$4 sm:$0xff]   ;;  %v11533_v62 = vld [vmem:[%s16969_s2 + $0x288] ss:$16 sps:$4 sm:$0xff]  }
  0x8b   :  { %2346 = vmatpush2.bf16.msra.mxu0 %v11463_v3  ;;  %v11540_v3 = vld [vmem:[%s16969_s2 + $0x68] ss:$16 sps:$4 sm:$0xff]  }
  0x8c   :  { %2347 = vmatprep.subr.bf16.mxu0 %v11468_v5  ;;  %v11552_v5 = vld [vmem:[%s16969_s2 + $0x4c] ss:$16 sps:$4 sm:$0xff]  }
  0x8d   :  { %2094 = vmatmul.mubr.bf16.gmra.mxu0 %v11428_v1  ;;  %v11529_v1 = vld [vmem:[%s16967_s0 + $0x88] ss:$28 sps:$4 sm:$0xff]  }
  0x8e   :  { %2255 = vmatmul.mubr.bf16.gmra.mxu1 %v11429_v2  ;;  %2103 = vmatprep.mubr.bf16.mxu0 %v11436_v4  ;;  %v11536_v2 = vld [vmem:[%s16967_s0 + $0xbc] ss:$28 sps:$4 sm:$0xff]  }
  0x8f   :  { %2264 = vmatprep.mubr.bf16.mxu1 %v11438_v6  ;;  %2348 = vmatpush2.bf16.msra.mxu0 %v11466_v8  ;;  %v11543_v4 = vld [vmem:[%s16969_s2 + $0x268] ss:$16 sps:$4 sm:$0xff]   ;;  %v11555_v6 = vld [vmem:[%s16969_s2 + $0x24c] ss:$16 sps:$4 sm:$0xff]  }
  0x90   :  { %2349 = vmatprep.subr.bf16.mxu0 %v11480_v9  ;;  %v11538_v8 = vld [vmem:[%s16967_s0 + $0xb8] ss:$28 sps:$4 sm:$0xff]   ;;  %v11539_v9 = vld [vmem:[%s16967_s0 + $0xc0] ss:$28 sps:$4 sm:$0xff]  }
  0x93   :  { %2350 = vmatpush2.bf16.msra.mxu0 %v11478_v10  ;;  %v11553_v10 = vld [vmem:[%s16969_s2 + $0x248] ss:$16 sps:$4 sm:$0xff]  }
  0x94   :  { %2351 = vmatprep.subr.bf16.mxu0 %v11489_v12  ;;  %v11565_v12 = vld [vmem:[%s16969_s2 + $0x22c] ss:$16 sps:$4 sm:$0xff]  }
  0x95   :  { %2104 = vmatmul.mubr.bf16.gmra.mxu0 %v11440_v11  ;;  %v11560_v11 = vld [vmem:[%s16969_s2 + $0x2c] ss:$16 sps:$4 sm:$0xff]  }
  0x96   :  { %2265 = vmatmul.mubr.bf16.gmra.mxu1 %v11441_v13  ;;  %2113 = vmatprep.mubr.bf16.mxu0 %v11445_v14  ;;  %v11546_v13 = vld [vmem:[%s16967_s0 + $0xf4] ss:$28 sps:$4 sm:$0xff]   ;;  %v11558_v14 = vld [vmem:[%s16969_s2 + $0x28] ss:$16 sps:$4 sm:$0xff]  }
  0x97   :  { %2274 = vmatprep.mubr.bf16.mxu1 %v11447_v15  ;;  %2352 = vmatpush2.bf16.msra.mxu0 %v11487_v16  ;;  %v11563_v15 = vld [vmem:[%s16969_s2 + $0x228] ss:$16 sps:$4 sm:$0xff]   ;;  %v11568_v16 = vld [vmem:[%s16969_s2 + $0xc] ss:$16 sps:$4 sm:$0xff]  }
  0x98   :  { %2353 = vmatprep.subr.bf16.mxu0 %v11499_v17  ;;  %v11575_v17 = vld [vmem:[%s16969_s2 + $0x20c] ss:$16 sps:$4 sm:$0xff]  }
  0x9b   :  { %2354 = vmatpush2.bf16.msra.mxu0 %v11497_v19  ;;  %v11573_v19 = vld [vmem:[%s16969_s2 + $0x208] ss:$16 sps:$4 sm:$0xff]  }
  0x9c   :  { %2645 = vmatprep.subr.bf16.mxu0 %v11506_v20  ;;  %v11578_v20 = vld [vmem:[%s16969_s2 + $0x1ec] ss:$16 sps:$4 sm:$0xff]  }
  0x9d   :  { %2114 = vmatmul.mubr.bf16.gmra.mxu0 %v11449_v18  ;;  %v11566_v18 = vld [vmem:[%s16969_s2 + $0x8] ss:$16 sps:$4 sm:$0xff]  }
  0x9e   :  { %2275 = vmatmul.mubr.bf16.gmra.mxu1 %v11450_v21  ;;  %2123 = vmatprep.mubr.bf16.mxu0 %v11457_v22  ;;  %v11581_v21 = vld [vmem:[%s16969_s2 + $0x3ec] ss:$16 sps:$4 sm:$0xff]  }
  0x9f   :  { %2284 = vmatprep.mubr.bf16.mxu1 %v11459_v23  ;;  %v11548_v22 = vld [vmem:[%s16967_s0 + $0xf0] ss:$28 sps:$4 sm:$0xff]   ;;  %v11549_v23 = vld [vmem:[%s16967_s0 + $0xf8] ss:$28 sps:$4 sm:$0xff]  }
  0xa5   :  { %2124 = vmatmul.mubr.bf16.gmra.mxu0 %v11461_v24  ;;  %v11556_v24 = vld [vmem:[%s16967_s0 + $0x12c] ss:$28 sps:$4 sm:$0xff]  }
  0xa6   :  { %2285 = vmatmul.mubr.bf16.gmra.mxu1 %v11462_v25  ;;  %2133 = vmatprep.mubr.bf16.mxu0 %v11469_v26  ;;  %v11576_v25 = vld [vmem:[%s16969_s2 + $0x1e8] ss:$16 sps:$4 sm:$0xff]  }
  0xa7   :  { %2294 = vmatprep.mubr.bf16.mxu1 %v11471_v27  ;;  %v11579_v26 = vld [vmem:[%s16969_s2 + $0x3e8] ss:$16 sps:$4 sm:$0xff]   ;;  %v11588_v27 = vld [vmem:[%s16969_s2 + $0x1cc] ss:$16 sps:$4 sm:$0xff]  }
  0xad   :  { %2134 = vmatmul.mubr.bf16.gmra.mxu0 %v11473_v28  ;;  %v11591_v28 = vld [vmem:[%s16969_s2 + $0x3cc] ss:$16 sps:$4 sm:$0xff]  }
  0xae   :  { %2295 = vmatmul.mubr.bf16.gmra.mxu1 %v11474_v29  ;;  %2143 = vmatprep.mubr.bf16.mxu0 %v11481_v30  ;;  %v11586_v29 = vld [vmem:[%s16969_s2 + $0x1c8] ss:$16 sps:$4 sm:$0xff]  }
  0xaf   :  { %2304 = vmatprep.mubr.bf16.mxu1 %v11483_v31  ;;  %v11589_v30 = vld [vmem:[%s16969_s2 + $0x3c8] ss:$16 sps:$4 sm:$0xff]   ;;  %v11598_v31 = vld [vmem:[%s16969_s2 + $0x1ac] ss:$16 sps:$4 sm:$0xff]  }
  0xb5   :  { %2144 = vmatmul.mubr.bf16.gmra.mxu0 %v11485_v34  ;;  %v11562_v34 = vld [vmem:[%s16967_s0 + $0x130] ss:$28 sps:$4 sm:$0xff]  }
  0xb6   :  { %2305 = vmatmul.mubr.bf16.gmra.mxu1 %v11486_v35  ;;  %2153 = vmatprep.mubr.bf16.mxu0 %v13378_v36  ;;  %v11569_v35 = vld [vmem:[%s16967_s0 + $0x164] ss:$28 sps:$4 sm:$0xff]  }
  0xb7   :  { %2314 = vmatprep.mubr.bf16.mxu1 %v13380_v37 }
  0xbd   :  { %2154 = vmatmul.mubr.bf16.gmra.mxu0 %v13384_v38 }
  0xbe   :  { %2315 = vmatmul.mubr.bf16.gmra.mxu1 %v13386_v39  ;;  %2355 = vmatprep.mubr.bf16.mxu0 %v11502_v40  ;;  %v11596_v40 = vld [vmem:[%s16969_s2 + $0x1a8] ss:$16 sps:$4 sm:$0xff]  }
  0xbf   :  { %2516 = vmatprep.mubr.bf16.mxu1 %v16983_v41 }
  0xc5   :  { %2356 = vmatmul.mubr.bf16.vlgmr.msra.gmra.mxu0 %v11500_v42  ;;  %v11599_v42 = vld [vmem:[%s16969_s2 + $0x3a8] ss:$16 sps:$4 sm:$0xff]  }
  0xc6   :  { %2517 = vmatmul.mubr.bf16.vlgmr.msra.gmra.mxu1 %v11503_v43  ;;  %2646 = vmatpush1.bf16.msra.mxu0 %v11504_v44  ;;  %v11608_v43 = vld [vmem:[%s16969_s2 + $0x18c] ss:$16 sps:$4 sm:$0xff]  }
  0xc7   :  { %2807 = vmatpush1.bf16.msra.mxu1 %v11507_v45  ;;  %2365 = vmatprep.mubr.bf16.mxu0 %v11510_v46  ;;  %v11611_v44 = vld [vmem:[%s16969_s2 + $0x38c] ss:$16 sps:$4 sm:$0xff]   ;;  %v11606_v45 = vld [vmem:[%s16969_s2 + $0x188] ss:$16 sps:$4 sm:$0xff]  }
  0xc8   :  { %2526 = vmatprep.mubr.bf16.mxu1 %v16983_v41  ;;  %2647 = vmatprep.subr.bf16.mxu0 %v11514_v47  ;;  %v11609_v46 = vld [vmem:[%s16969_s2 + $0x388] ss:$16 sps:$4 sm:$0xff]   ;;  %v11571_v47 = vld [vmem:[%s16967_s0 + $0x160] ss:$28 sps:$4 sm:$0xff]  }
  0xc9   :  { %2808 = vmatprep.subr.bf16.mxu1 %v11519_v48  ;;  %v11572_v48 = vld [vmem:[%s16967_s0 + $0x168] ss:$28 sps:$4 sm:$0xff]  }
  0xca   :  { %2648 = vmatpush1.bf16.msra.mxu0 %v11512_v49  ;;  %v11582_v49 = vld [vmem:[%s16967_s0 + $0x19c] ss:$28 sps:$4 sm:$0xff]  }
  0xcb   :  { %2809 = vmatpush1.bf16.msra.mxu1 %v11517_v50  ;;  %2649 = vmatprep.subr.bf16.mxu0 %v11522_v51  ;;  %v11614_v50 = vld [vmem:[%s16969_s2 + $0x16c] ss:$16 sps:$4 sm:$0xff]  }
  0xcc   :  { %2810 = vmatprep.subr.bf16.mxu1 %v11527_v52  ;;  %v11621_v51 = vld [vmem:[%s16969_s2 + $0x36c] ss:$16 sps:$4 sm:$0xff]   ;;  %v11612_v52 = vld [vmem:[%s16969_s2 + $0x168] ss:$16 sps:$4 sm:$0xff]  }
  0xcd   :  { %2366 = vmatmul.mubr.bf16.gmra.mxu0 %v11515_v53  ;;  %v11619_v53 = vld [vmem:[%s16969_s2 + $0x368] ss:$16 sps:$4 sm:$0xff]  }
  0xce   :  { %2527 = vmatmul.mubr.bf16.gmra.mxu1 %v11516_v54  ;;  %2650 = vmatpush1.bf16.msra.mxu0 %v11520_v55  ;;  %v11624_v54 = vld [vmem:[%s16969_s2 + $0x14c] ss:$16 sps:$4 sm:$0xff]  }
  0xcf   :  { %2375 = vmatprep.mubr.bf16.mxu0 %v11523_v56  ;;  %2536 = vmatprep.mubr.bf16.mxu1 %v16983_v41  ;;  %v11629_v55 = vld [vmem:[%s16969_s2 + $0x34c] ss:$16 sps:$4 sm:$0xff]   ;;  %v11622_v56 = vld [vmem:[%s16969_s2 + $0x148] ss:$16 sps:$4 sm:$0xff]  }
  0xd0   :  { %2811 = vmatpush1.bf16.msra.mxu1 %v11525_v57  ;;  %2651 = vmatprep.subr.bf16.mxu0 %v11532_v58  ;;  %v11627_v57 = vld [vmem:[%s16969_s2 + $0x348] ss:$16 sps:$4 sm:$0xff]  }
  0xd1   :  { %2812 = vmatprep.subr.bf16.mxu1 %v11535_v59  ;;  %v11584_v58 = vld [vmem:[%s16967_s0 + $0x198] ss:$28 sps:$4 sm:$0xff]   ;;  %v11585_v59 = vld [vmem:[%s16967_s0 + $0x1a0] ss:$28 sps:$4 sm:$0xff]  }
  0xd2   :  { %2652 = vmatpush1.bf16.msra.mxu0 %v11530_v60  ;;  %v11592_v60 = vld [vmem:[%s16967_s0 + $0x1d4] ss:$28 sps:$4 sm:$0xff]  }
  0xd3   :  { %2653 = vmatprep.subr.bf16.mxu0 %v11542_v63  ;;  %v11632_v63 = vld [vmem:[%s16969_s2 + $0x128] ss:$16 sps:$4 sm:$0xff]  }
  0xd4   :  { %2813 = vmatpush1.bf16.msra.mxu1 %v11533_v62  ;;  %v11637_v62 = vld [vmem:[%s16969_s2 + $0x32c] ss:$16 sps:$4 sm:$0xff]  }
  0xd5   :  { %2814 = vmatprep.subr.bf16.mxu1 %v11545_v0  ;;  %2376 = vmatmul.mubr.bf16.gmra.mxu0 %v11528_v61  ;;  %v11634_v61 = vld [vmem:[%s16969_s2 + $0x12c] ss:$16 sps:$4 sm:$0xff]   ;;  %v11635_v0 = vld [vmem:[%s16969_s2 + $0x328] ss:$16 sps:$4 sm:$0xff]  }
  0xd6   :  { %2537 = vmatmul.mubr.bf16.gmra.mxu1 %v11529_v1  ;;  %2385 = vmatprep.mubr.bf16.mxu0 %v11536_v2  ;;  %v11643_v1 = vld [vmem:[%s16969_s2 + $0x10c] ss:$16 sps:$4 sm:$0xff]  }
  0xd7   :  { %2546 = vmatprep.mubr.bf16.mxu1 %v16983_v41  ;;  %2654 = vmatpush1.bf16.msra.mxu0 %v11540_v3  ;;  %v11646_v2 = vld [vmem:[%s16969_s2 + $0x30c] ss:$16 sps:$4 sm:$0xff]   ;;  %v11641_v3 = vld [vmem:[%s16969_s2 + $0x108] ss:$16 sps:$4 sm:$0xff]  }
  0xd8   :  { %2815 = vmatpush1.bf16.msra.mxu1 %v11543_v4  ;;  %2655 = vmatprep.subr.bf16.mxu0 %v11552_v5  ;;  %v11644_v4 = vld [vmem:[%s16969_s2 + $0x308] ss:$16 sps:$4 sm:$0xff]   ;;  %v11594_v5 = vld [vmem:[%s16967_s0 + $0x1d0] ss:$28 sps:$4 sm:$0xff]  }
  0xd9   :  { %2816 = vmatprep.subr.bf16.mxu1 %v11555_v6  ;;  %v11595_v6 = vld [vmem:[%s16967_s0 + $0x1d8] ss:$28 sps:$4 sm:$0xff]  }
  0xdb   :  { %2656 = vmatpush1.bf16.msra.mxu0 %v11550_v7  ;;  %v11649_v7 = vld [vmem:[%s16969_s2 + $0x4ec] ss:$16 sps:$4 sm:$0xff]  }
  0xdc   :  { %2817 = vmatpush1.bf16.msra.mxu1 %v11553_v10  ;;  %2657 = vmatprep.subr.bf16.mxu0 %v11560_v11  ;;  %v11604_v10 = vld [vmem:[%s16967_s0 + $0x208] ss:$28 sps:$4 sm:$0xff]   ;;  %v11605_v11 = vld [vmem:[%s16967_s0 + $0x210] ss:$28 sps:$4 sm:$0xff]  }
  0xdd   :  { %2818 = vmatprep.subr.bf16.mxu1 %v11565_v12  ;;  %2386 = vmatmul.mubr.bf16.gmra.mxu0 %v11538_v8  ;;  %v11652_v8 = vld [vmem:[%s16969_s2 + $0x6ec] ss:$16 sps:$4 sm:$0xff]   ;;  %v11615_v12 = vld [vmem:[%s16967_s0 + $0x244] ss:$28 sps:$4 sm:$0xff]  }
  0xde   :  { %2547 = vmatmul.mubr.bf16.gmra.mxu1 %v11539_v9  ;;  %2395 = vmatprep.mubr.bf16.mxu0 %v11546_v13  ;;  %v11602_v9 = vld [vmem:[%s16967_s0 + $0x20c] ss:$28 sps:$4 sm:$0xff]   ;;  %v404_v13 = vlaneseq }
  0xdf   :  { %2556 = vmatprep.mubr.bf16.mxu1 %v16983_v41  ;;  %2658 = vmatpush1.bf16.msra.mxu0 %v11558_v14  ;;  %v11617_v14 = vld [vmem:[%s16967_s0 + $0x240] ss:$28 sps:$4 sm:$0xff]  }
  0xe0   :  { %2819 = vmatpush1.bf16.msra.mxu1 %v11563_v15  ;;  %2659 = vmatprep.subr.bf16.mxu0 %v11568_v16  ;;  %v11618_v15 = vld [vmem:[%s16967_s0 + $0x248] ss:$28 sps:$4 sm:$0xff]   ;;  %v11625_v16 = vld [vmem:[%s16967_s0 + $0x27c] ss:$28 sps:$4 sm:$0xff]  }
  0xe1   :  { %2820 = vmatprep.subr.bf16.mxu1 %v11575_v17  ;;  %v13695_v17 = vshrl.u32 %v404_v13, 7  ;;  %v11658_v13 = vld [vmem:[%s16969_s2 + $0x4ac] ss:$16 sps:$4 sm:$0xff]  }
  0xe3   :  { %2660 = vmatpush1.bf16.msra.mxu0 %v11566_v18  ;;  %17039 = vst [vmem:[#allocation8_spill] sm:$0xff] %v13695_v17  ;;  %v402_v18 = vld [vmem:[%s16970_s3] sm:$0xf] }
  0xe4   :  { %2821 = vmatpush1.bf16.msra.mxu1 %v11573_v19  ;;  %2661 = vmatprep.subr.bf16.mxu0 %v11578_v20  ;;  %v176_v19 = vld [vmem:[%s16967_s0 + $0x2b0] sm:$0xff]  ;;  %v13705_v20 = vsub.s32 0, %v13695_v17 }
  0xe5   :  { %2822 = vmatprep.subr.bf16.mxu1 %v11581_v21  ;;  %2396 = vmatmul.mubr.bf16.gmra.mxu0 %v11548_v22  ;;  %v11630_v21 = vld [vmem:[%s16967_s0 + $0x278] ss:$28 sps:$4 sm:$0xff]   ;;  %v11631_v22 = vld [vmem:[%s16967_s0 + $0x280] ss:$28 sps:$4 sm:$0xff]  }
  0xe6   :  { %2557 = vmatmul.mubr.bf16.gmra.mxu1 %v11549_v23  ;;  %2405 = vmatprep.mubr.bf16.mxu0 %v11556_v24  ;;  %17040 = vst [vmem:[#allocation9_spill] sm:$0xff] %v13705_v20  ;;  %v13714_v23 = vsub.s32 1, %v13695_v17  ;;  %v13717_v24 = vrot.slane %v402_v18, %v13705_v20 }
  0xe7   :  { %2566 = vmatprep.mubr.bf16.mxu1 %v16983_v41  ;;  %2662 = vmatpush2.bf16.msra.mxu0 %v11576_v25  ;;  %v13719_v25 = vcombine.high %v176_v19, %v176_v19 }
  0xe8   :  { %2823 = vmatpush2.bf16.msra.mxu1 %v11579_v26  ;;  %2663 = vmatprep.subr.bf16.mxu0 %v11588_v27  ;;  %17041 = vst [vmem:[#allocation10_spill] sm:$0xff] %v13714_v23  ;;  %v13722_v26 = vrot.slane %v402_v18, %v13714_v23 }
  0xe9   :  { %2824 = vmatprep.subr.bf16.mxu1 %v11591_v28  ;;  %17042 = vst [vmem:[#allocation11_spill] sm:$0xff] %v13719_v25 }
  0xeb   :  { %2664 = vmatpush2.bf16.msra.mxu0 %v11586_v29 }
  0xec   :  { %2825 = vmatpush2.bf16.msra.mxu1 %v11589_v30  ;;  %2665 = vmatprep.subr.bf16.mxu0 %v11598_v31 }
  0xed   :  { %2826 = vmatprep.subr.bf16.mxu1 %v11601_v32  ;;  %2406 = vmatmul.mubr.bf16.gmra.mxu0 %v11561_v33  ;;  %v11640_v32 = vld [vmem:[%s16967_s0 + $0x2b8] ss:$0 sps:$4 sm:$0xff]  }
  0xee   :  { %2567 = vmatmul.mubr.bf16.gmra.mxu1 %v11562_v34  ;;  %2415 = vmatprep.mubr.bf16.mxu0 %v11569_v35 }
  0xef   :  { %2576 = vmatprep.mubr.bf16.mxu1 %v16983_v41  ;;  %2666 = vmatpush2.bf16.msra.mxu0 %v11596_v40 }
  0xf0   :  { %2827 = vmatpush2.bf16.msra.mxu1 %v11599_v42  ;;  %2667 = vmatprep.subr.bf16.mxu0 %v11608_v43  ;;  %v13733_v42 = vcombine.low %v176_v19, %v176_v19 }
  0xf1   :  { %2828 = vmatprep.subr.bf16.mxu1 %v11611_v44 }
  0xf2   :  { %17043 = vst [vmem:[#allocation12_spill] sm:$0xff] %v13733_v42 }
  0xf3   :  { %2668 = vmatpush2.bf16.msra.mxu0 %v11606_v45 }
  0xf4   :  { %2829 = vmatpush2.bf16.msra.mxu1 %v11609_v46  ;;  %2669 = vmatprep.subr.bf16.mxu0 %v11614_v50 }
  0xf5   :  { %2830 = vmatprep.subr.bf16.mxu1 %v11621_v51  ;;  %2416 = vmatmul.mubr.bf16.gmra.mxu0 %v11571_v47 }
  0xf6   :  { %2577 = vmatmul.mubr.bf16.gmra.mxu1 %v11572_v48  ;;  %2425 = vmatprep.mubr.bf16.mxu0 %v11582_v49 }
  0xf7   :  { %2586 = vmatprep.mubr.bf16.mxu1 %v16983_v41  ;;  %2670 = vmatpush2.bf16.msra.mxu0 %v11612_v52 }
  0xf8   :  { %2831 = vmatpush2.bf16.msra.mxu1 %v11619_v53  ;;  %2671 = vmatprep.subr.bf16.mxu0 %v11624_v54  ;;  %v12659_v53 = vld [vmem:[%s16967_s0 + $0x4] ss:$28 sps:$4 sm:$0xff]   ;;  %v12660_v54 = vld [vmem:[%s16967_s0 + $0xc] ss:$28 sps:$4 sm:$0xff]  }
  0xf9   :  { %2832 = vmatprep.subr.bf16.mxu1 %v11629_v55 }
  0xfb   :  { %2672 = vmatpush2.bf16.msra.mxu0 %v11622_v56 }
  0xfc   :  { %2833 = vmatpush2.bf16.msra.mxu1 %v11627_v57  ;;  %2673 = vmatprep.subr.bf16.mxu0 %v11634_v61 }
  0xfd   :  { %2834 = vmatprep.subr.bf16.mxu1 %v11637_v62  ;;  %2426 = vmatmul.mubr.bf16.gmra.mxu0 %v11584_v58 }
  0xfe   :  { %2587 = vmatmul.mubr.bf16.gmra.mxu1 %v11585_v59  ;;  %2435 = vmatprep.mubr.bf16.mxu0 %v11592_v60  ;;  %v11647_v59 = vld [vmem:[%s16969_s2 + $0x4e8] ss:$16 sps:$4 sm:$0xff]  }
  0xff   :  { %2596 = vmatprep.mubr.bf16.mxu1 %v16983_v41  ;;  %2674 = vmatpush2.bf16.msra.mxu0 %v11632_v63  ;;  %v11650_v60 = vld [vmem:[%s16969_s2 + $0x6e8] ss:$16 sps:$4 sm:$0xff]  }
 0x100   :  { %2835 = vmatpush2.bf16.msra.mxu1 %v11635_v0  ;;  %2675 = vmatprep.subr.bf16.mxu0 %v11643_v1  ;;  %v11655_v1 = vld [vmem:[%s16969_s2 + $0x4cc] ss:$16 sps:$4 sm:$0xff]  }
 0x101   :  { %2836 = vmatprep.subr.bf16.mxu1 %v11646_v2  ;;  %v11661_v2 = vld [vmem:[%s16969_s2 + $0x6cc] ss:$16 sps:$4 sm:$0xff]  }
 0x103   :  { %2676 = vmatpush2.bf16.msra.mxu0 %v11641_v3 }
 0x104   :  { %2837 = vmatpush2.bf16.msra.mxu1 %v11644_v4  ;;  %2967 = vmatprep.subr.bf16.mxu0 %v11649_v7  ;;  %v11653_v7 = vld [vmem:[%s16969_s2 + $0x4c8] ss:$16 sps:$4 sm:$0xff]  }
 0x105   :  { %3128 = vmatprep.subr.bf16.mxu1 %v11652_v8  ;;  %2436 = vmatmul.mubr.bf16.gmra.mxu0 %v11594_v5  ;;  %v11659_v8 = vld [vmem:[%s16969_s2 + $0x6c8] ss:$16 sps:$4 sm:$0xff]  }
 0x106   :  { %2597 = vmatmul.mubr.bf16.gmra.mxu1 %v11595_v6  ;;  %2445 = vmatprep.mubr.bf16.mxu0 %v11602_v9 }
 0x107   :  { %2606 = vmatprep.mubr.bf16.mxu1 %v16983_v41 }
 0x10d   :  { %2446 = vmatmul.mubr.bf16.gmra.mxu0 %v11604_v10 }
 0x10e   :  { %2607 = vmatmul.mubr.bf16.gmra.mxu1 %v11605_v11  ;;  %2455 = vmatprep.mubr.bf16.mxu0 %v11615_v12  ;;  %v12661_v11 = vld [vmem:[%s16967_s0] ss:$28 sps:$4 sm:$0xff]   ;;  %v12662_v12 = vld [vmem:[%s16967_s0 + $0x8] ss:$28 sps:$4 sm:$0xff]  }
 0x10f   :  { %2616 = vmatprep.mubr.bf16.mxu1 %v16983_v41 }
 0x115   :  { %2456 = vmatmul.mubr.bf16.gmra.mxu0 %v11617_v14  ;;  %v11670_v14 = vld [vmem:[%s16969_s2 + $0x6ac] ss:$16 sps:$4 sm:$0xff]  }
 0x116   :  { %2617 = vmatmul.mubr.bf16.gmra.mxu1 %v11618_v15  ;;  %2465 = vmatprep.mubr.bf16.mxu0 %v11625_v16 }
 0x117   :  { %2626 = vmatprep.mubr.bf16.mxu1 %v16983_v41 }
 0x11d   :  { %v2035_v27 = vpop.f32.mrf.mxu0  ;;  %2466 = vmatmul.mubr.bf16.gmra.mxu0 %v11630_v21  ;;  %v12663_v21 = vld [vmem:[%s16967_s0 + $0x3c] ss:$28 sps:$4 sm:$0xff]  }
 0x11e   :  { %v2196_v28 = vpop.f32.mrf.mxu1  ;;  %2627 = vmatmul.mubr.bf16.gmra.mxu1 %v11631_v22  ;;  %v2036_v29 = vadd.f32 %v2035_v27, %v13717_v24  ;;  %2475 = vmatprep.mubr.bf16.mxu0 %v13719_v25  ;;  %v12664_v22 = vld [vmem:[%s16967_s0 + $0x44] ss:$28 sps:$4 sm:$0xff]  }
 0x11f   :  { %2636 = vmatprep.mubr.bf16.mxu1 %v16983_v41  ;;  %v2037_v30 = vpop.f32.mrf.mxu0 }
 0x120   :  { %v2198_v31 = vpop.f32.mrf.mxu1  ;;  %v13730_v33 = vadd.f32 %v2196_v28, %v2036_v29  ;;  %v2038_v34 = vadd.f32 %v2037_v30, %v13722_v26  ;;  %v11656_v29 = vld [vmem:[%s16969_s2 + $0x4a8] ss:$16 sps:$4 sm:$0xff]  }
 0x121   :  { %v2039_v35 = vpop.f32.mrf.mxu0 }
 0x122   :  { %v2200_v40 = vpop.f32.mrf.mxu1  ;;  %v13735_v43 = vadd.f32 %v2198_v31, %v2038_v34  ;;  %v2040_v44 = vadd.f32 %v2039_v35, %v13717_v24 }
 0x123   :  { %v2041_v45 = vpop.f32.mrf.mxu0 }
 0x124   :  { %v2202_v46 = vpop.f32.mrf.mxu1  ;;  %v13738_v47 = vadd.f32 %v2200_v40, %v2040_v44  ;;  %v2042_v48 = vadd.f32 %v2041_v45, %v13722_v26  ;;  %v11668_v40 = vld [vmem:[%s16969_s2 + $0x6a8] ss:$16 sps:$4 sm:$0xff]  }
 0x125   :  { %v2045_v49 = vpop.f32.mrf.mxu0  ;;  %2476 = vmatmul.mubr.bf16.gmra.mxu0 %v13733_v42 }
 0x126   :  { %v2206_v50 = vpop.f32.mrf.mxu1  ;;  %2637 = vmatmul.mubr.bf16.gmra.mxu1 %v11640_v32  ;;  %v13742_v51 = vadd.f32 %v2202_v46, %v2042_v48  ;;  %v2046_v52 = vadd.f32 %v2045_v49, %v13717_v24  ;;  %2677 = vmatprep.mubr.bf16.mxu0 %v12659_v53  ;;  %v11664_v32 = vld [vmem:[%s16969_s2 + $0x48c] ss:$16 sps:$4 sm:$0xff]  }
 0x127   :  { %2838 = vmatprep.mubr.bf16.mxu1 %v12660_v54  ;;  %v2047_v55 = vpop.f32.mrf.mxu0  ;;  %v11679_v46 = vld [vmem:[%s16969_s2 + $0x68c] ss:$16 sps:$4 sm:$0xff]   ;;  %v12665_v54 = vld [vmem:[%s16967_s0 + $0x38] ss:$28 sps:$4 sm:$0xff]  }
 0x128   :  { %v2208_v56 = vpop.f32.mrf.mxu1  ;;  %v13751_v57 = vadd.f32 %v2206_v50, %v2046_v52  ;;  %v2048_v58 = vadd.f32 %v2047_v55, %v13722_v26  ;;  %v11662_v50 = vld [vmem:[%s16969_s2 + $0x488] ss:$16 sps:$4 sm:$0xff]   ;;  %v12666_v55 = vld [vmem:[%s16967_s0 + $0x40] ss:$28 sps:$4 sm:$0xff]  }
 0x129   :  { %v2049_v61 = vpop.f32.mrf.mxu0 }
 0x12a   :  { %v2210_v62 = vpop.f32.mrf.mxu1  ;;  %v13760_v63 = vadd.f32 %v2208_v56, %v2048_v58  ;;  %v2050_v0 = vadd.f32 %v2049_v61, %v13717_v24  ;;  %v11667_v56 = vld [vmem:[%s16969_s2 + $0x46c] ss:$16 sps:$4 sm:$0xff]   ;;  %v11677_v61 = vld [vmem:[%s16969_s2 + $0x688] ss:$16 sps:$4 sm:$0xff]  }
 0x12b   :  { %v2051_v3 = vpop.f32.mrf.mxu0 }
 0x12c   :  { %v2212_v4 = vpop.f32.mrf.mxu1  ;;  %v13769_v5 = vadd.f32 %v2210_v62, %v2050_v0  ;;  %v2052_v6 = vadd.f32 %v2051_v3, %v13722_v26 }
 0x12d   :  { %v2055_v9 = vpop.f32.mrf.mxu0  ;;  %2678 = vmatmul.mubr.bf16.vlgmr.msra.gmra.mxu0 %v12661_v11  ;;  %v11686_v11 = vld [vmem:[%s16969_s2 + $0x668] ss:$16 sps:$4 sm:$0xff]  }
 0x12e   :  { %v2216_v10 = vpop.f32.mrf.mxu1  ;;  %2839 = vmatmul.mubr.bf16.vlgmr.msra.gmra.mxu1 %v12662_v12  ;;  %v13790_v15 = vadd.f32 %v2212_v4, %v2052_v6  ;;  %v2056_v16 = vadd.f32 %v2055_v9, %v13717_v24  ;;  %2968 = vmatpush1.bf16.msra.mxu0 %v11647_v59 }
 0x12f   :  { %3129 = vmatpush1.bf16.msra.mxu1 %v11650_v60  ;;  %v2057_v18 = vpop.f32.mrf.mxu0  ;;  %2687 = vmatprep.mubr.bf16.mxu0 %v12663_v21  ;;  %v12667_v60 = vld [vmem:[%s16967_s0 + $0x74] ss:$28 sps:$4 sm:$0xff]  }
 0x130   :  { %v2218_v19 = vpop.f32.mrf.mxu1  ;;  %2848 = vmatprep.mubr.bf16.mxu1 %v12664_v22  ;;  %v13799_v27 = vadd.f32 %v2216_v10, %v2056_v16  ;;  %v2058_v28 = vadd.f32 %v2057_v18, %v13722_v26  ;;  %2969 = vmatprep.subr.bf16.mxu0 %v11655_v1  ;;  %v12668_v1 = vld [vmem:[%s16967_s0 + $0x7c] ss:$28 sps:$4 sm:$0xff]  }
 0x131   :  { %3130 = vmatprep.subr.bf16.mxu1 %v11661_v2  ;;  %v2059_v30 = vpop.f32.mrf.mxu0  ;;  %v11673_v10 = vld [vmem:[%s16969_s2 + $0x44c] ss:$16 sps:$4 sm:$0xff]  }
 0x132   :  { %v2220_v31 = vpop.f32.mrf.mxu1  ;;  %v13808_v34 = vadd.f32 %v2218_v19, %v2058_v28  ;;  %v2060_v35 = vadd.f32 %v2059_v30, %v13717_v24  ;;  %2970 = vmatpush1.bf16.msra.mxu0 %v11653_v7  ;;  %v11665_v7 = vld [vmem:[%s16969_s2 + $0x468] ss:$16 sps:$4 sm:$0xff]   ;;  %v11697_v19 = vld [vmem:[%s16969_s2 + $0x64c] ss:$16 sps:$4 sm:$0xff]  }
 0x133   :  { %3131 = vmatpush1.bf16.msra.mxu1 %v11659_v8  ;;  %v2061_v44 = vpop.f32.mrf.mxu0  ;;  %2971 = vmatprep.subr.bf16.mxu0 %v11658_v13  ;;  %v12669_v28 = vld [vmem:[%s16967_s0 + $0x70] ss:$28 sps:$4 sm:$0xff]   ;;  %v11671_v30 = vld [vmem:[%s16969_s2 + $0x448] ss:$16 sps:$4 sm:$0xff]  }
 0x134   :  { %v2222_v45 = vpop.f32.mrf.mxu1  ;;  %3132 = vmatprep.subr.bf16.mxu1 %v11670_v14  ;;  %v13817_v48 = vadd.f32 %v2220_v31, %v2060_v35  ;;  %v2062_v49 = vadd.f32 %v2061_v44, %v13722_v26  ;;  %v11688_v14 = vld [vmem:[%s16969_s2 + $0x66c] ss:$16 sps:$4 sm:$0xff]  }
 0x135   :  { %v2065_v52 = vpop.f32.mrf.mxu0  ;;  %2688 = vmatmul.mubr.bf16.gmra.mxu0 %v12665_v54  ;;  %v12671_v35 = vld [vmem:[%s16967_s0 + $0xac] ss:$28 sps:$4 sm:$0xff]  }
 0x136   :  { %v2226_v53 = vpop.f32.mrf.mxu1  ;;  %2849 = vmatmul.mubr.bf16.gmra.mxu1 %v12666_v55  ;;  %v13832_v58 = vadd.f32 %v2222_v45, %v2062_v49  ;;  %v2066_v59 = vadd.f32 %v2065_v52, %v13717_v24  ;;  %2972 = vmatpush1.bf16.msra.mxu0 %v11656_v29  ;;  %v12670_v29 = vld [vmem:[%s16967_s0 + $0x78] ss:$28 sps:$4 sm:$0xff]  }
 0x137   :  { %2697 = vmatprep.mubr.bf16.mxu0 %v12667_v60  ;;  %v2067_v62 = vpop.f32.mrf.mxu0  ;;  %2858 = vmatprep.mubr.bf16.mxu1 %v12668_v1  ;;  %v11695_v52 = vld [vmem:[%s16969_s2 + $0x648] ss:$16 sps:$4 sm:$0xff]   ;;  %v11682_v60 = vld [vmem:[%s16969_s2 + $0x40c] ss:$16 sps:$4 sm:$0xff]  }
 0x138   :  { %v2228_v0 = vpop.f32.mrf.mxu1  ;;  %2973 = vmatprep.subr.bf16.mxu0 %v11664_v32  ;;  %v13844_v2 = vadd.f32 %v2226_v53, %v2066_v59  ;;  %v2068_v3 = vadd.f32 %v2067_v62, %v13722_v26  ;;  %3133 = vmatpush1.bf16.msra.mxu1 %v11668_v40  ;;  %v12672_v40 = vld [vmem:[%s16967_s0 + $0xb4] ss:$28 sps:$4 sm:$0xff]   ;;  %v11674_v55 = vld [vmem:[%s16969_s2 + $0x428] ss:$16 sps:$4 sm:$0xff]   ;;  %v11706_v1 = vld [vmem:[%s16969_s2 + $0x62c] ss:$16 sps:$4 sm:$0xff]  }
 0x139   :  { %v2069_v4 = vpop.f32.mrf.mxu0  ;;  %3134 = vmatprep.subr.bf16.mxu1 %v11679_v46  ;;  %v11676_v46 = vld [vmem:[%s16969_s2 + $0x42c] ss:$16 sps:$4 sm:$0xff]  }
 0x13a   :  { %v2230_v6 = vpop.f32.mrf.mxu1  ;;  %v13850_v8 = vadd.f32 %v2228_v0, %v2068_v3  ;;  %v2070_v9 = vadd.f32 %v2069_v4, %v13717_v24  ;;  %2974 = vmatpush1.bf16.msra.mxu0 %v11662_v50 }
 0x13b   :  { %v2071_v12 = vpop.f32.mrf.mxu0  ;;  %2975 = vmatprep.subr.bf16.mxu0 %v11667_v56 }
 0x13c   :  { %v2232_v13 = vpop.f32.mrf.mxu1  ;;  %v13862_v16 = vadd.f32 %v2230_v6, %v2070_v9  ;;  %v2072_v18 = vadd.f32 %v2071_v12, %v13722_v26  ;;  %3135 = vmatpush1.bf16.msra.mxu1 %v11677_v61  ;;  %v11704_v61 = vld [vmem:[%s16969_s2 + $0x628] ss:$16 sps:$4 sm:$0xff]   ;;  %v11715_v6 = vld [vmem:[%s16969_s2 + $0x60c] ss:$16 sps:$4 sm:$0xff]  }
 0x13d   :  { %v2075_v21 = vpop.f32.mrf.mxu0  ;;  %2698 = vmatmul.mubr.bf16.gmra.mxu0 %v12669_v28  ;;  %3136 = vmatprep.subr.bf16.mxu1 %v11688_v14  ;;  %v11680_v12 = vld [vmem:[%s16969_s2 + $0x408] ss:$16 sps:$4 sm:$0xff]   ;;  %v11685_v28 = vld [vmem:[%s16969_s2 + $0x5ec] ss:$16 sps:$4 sm:$0xff]  }
 0x13e   :  { %v2236_v22 = vpop.f32.mrf.mxu1  ;;  %2859 = vmatmul.mubr.bf16.gmra.mxu1 %v12670_v29  ;;  %v13877_v31 = vadd.f32 %v2232_v13, %v2072_v18  ;;  %v2076_v32 = vadd.f32 %v2075_v21, %v13717_v24  ;;  %2707 = vmatprep.mubr.bf16.mxu0 %v12671_v35  ;;  %v12675_v18 = vld [vmem:[%s16967_s0 + $0xe4] ss:$28 sps:$4 sm:$0xff]  }
 0x13f   :  { %2868 = vmatprep.mubr.bf16.mxu1 %v12672_v40  ;;  %v2077_v44 = vpop.f32.mrf.mxu0  ;;  %2976 = vmatpush1.bf16.msra.mxu0 %v11665_v7 }
 0x140   :  { %v2238_v45 = vpop.f32.mrf.mxu1  ;;  %v13889_v49 = vadd.f32 %v2236_v22, %v2076_v32  ;;  %v2078_v50 = vadd.f32 %v2077_v44, %v13722_v26  ;;  %2977 = vmatprep.subr.bf16.mxu0 %v11673_v10  ;;  %3137 = vmatpush1.bf16.msra.mxu1 %v11686_v11  ;;  %v12673_v10 = vld [vmem:[%s16967_s0 + $0xa8] ss:$28 sps:$4 sm:$0xff]   ;;  %v12674_v11 = vld [vmem:[%s16967_s0 + $0xb0] ss:$28 sps:$4 sm:$0xff]  }
 0x141   :  { %v2079_v53 = vpop.f32.mrf.mxu0  ;;  %3138 = vmatprep.subr.bf16.mxu1 %v11697_v19  ;;  %v12676_v19 = vld [vmem:[%s16967_s0 + $0xec] ss:$28 sps:$4 sm:$0xff]  }
 0x142   :  { %v2240_v54 = vpop.f32.mrf.mxu1  ;;  %v13898_v56 = vadd.f32 %v2238_v45, %v2078_v50  ;;  %v2080_v59 = vadd.f32 %v2079_v53, %v13717_v24  ;;  %v11713_v32 = vld [vmem:[%s16969_s2 + $0x608] ss:$16 sps:$4 sm:$0xff]  }
 0x143   :  { %v2081_v62 = vpop.f32.mrf.mxu0  ;;  %2978 = vmatpush1.bf16.msra.mxu0 %v11671_v30 }
 0x144   :  { %v2242_v0 = vpop.f32.mrf.mxu1  ;;  %v13910_v3 = vadd.f32 %v2240_v54, %v2080_v59  ;;  %v2082_v4 = vadd.f32 %v2081_v62, %v13722_v26  ;;  %2979 = vmatprep.subr.bf16.mxu0 %v11676_v46  ;;  %3139 = vmatpush1.bf16.msra.mxu1 %v11695_v52  ;;  %v11683_v52 = vld [vmem:[%s16969_s2 + $0x5e8] ss:$16 sps:$4 sm:$0xff]  }
 0x145   :  { %v2085_v7 = vpop.f32.mrf.mxu0  ;;  %2708 = vmatmul.mubr.bf16.gmra.mxu0 %v12673_v10  ;;  %3140 = vmatprep.subr.bf16.mxu1 %v11706_v1  ;;  %v12678_v62 = vld [vmem:[%s16967_s0 + $0xe8] ss:$28 sps:$4 sm:$0xff]  }
 0x146   :  { %v2246_v9 = vpop.f32.mrf.mxu1  ;;  %2869 = vmatmul.mubr.bf16.gmra.mxu1 %v12674_v11  ;;  %v13925_v13 = vadd.f32 %v2242_v0, %v2082_v4  ;;  %v2086_v14 = vadd.f32 %v2085_v7, %v13717_v24  ;;  %2717 = vmatprep.mubr.bf16.mxu0 %v12675_v18  ;;  %v12679_v4 = vld [vmem:[%s16967_s0 + $0x11c] ss:$28 sps:$4 sm:$0xff]  }
 0x147   :  { %2878 = vmatprep.mubr.bf16.mxu1 %v12676_v19  ;;  %v2087_v21 = vpop.f32.mrf.mxu0  ;;  %2980 = vmatpush1.bf16.msra.mxu0 %v11674_v55  ;;  %v11691_v55 = vld [vmem:[%s16969_s2 + $0x5cc] ss:$16 sps:$4 sm:$0xff]   ;;  %v11689_v10 = vld [vmem:[%s16969_s2 + $0x5c8] ss:$16 sps:$4 sm:$0xff]  }
 0x148   :  { %v2248_v22 = vpop.f32.mrf.mxu1  ;;  %v13937_v29 = vadd.f32 %v2246_v9, %v2086_v14  ;;  %v2088_v30 = vadd.f32 %v2087_v21, %v13722_v26  ;;  %2981 = vmatprep.subr.bf16.mxu0 %v11682_v60  ;;  %3141 = vmatpush1.bf16.msra.mxu1 %v11704_v61  ;;  %v12677_v61 = vld [vmem:[%s16967_s0 + $0xe0] ss:$28 sps:$4 sm:$0xff]  }
 0x149   :  { %v2089_v35 = vpop.f32.mrf.mxu0  ;;  %3142 = vmatprep.subr.bf16.mxu1 %v11715_v6  ;;  %v12680_v6 = vld [vmem:[%s16967_s0 + $0x124] ss:$28 sps:$4 sm:$0xff]   ;;  %v11694_v14 = vld [vmem:[%s16969_s2 + $0x5ac] ss:$16 sps:$4 sm:$0xff]  }
 0x14a   :  { %v2250_v40 = vpop.f32.mrf.mxu1  ;;  %v13943_v44 = vadd.f32 %v2248_v22, %v2088_v30  ;;  %v2090_v45 = vadd.f32 %v2089_v35, %v13717_v24 }
 0x14b   :  { %v2091_v46 = vpop.f32.mrf.mxu0  ;;  %2982 = vmatpush1.bf16.msra.mxu0 %v11680_v12 }
 0x14c   :  { %v2252_v50 = vpop.f32.mrf.mxu1  ;;  %v13949_v53 = vadd.f32 %v2250_v40, %v2090_v45  ;;  %v2092_v54 = vadd.f32 %v2091_v46, %v13722_v26  ;;  %2983 = vmatprep.subr.bf16.mxu0 %v11685_v28  ;;  %3143 = vmatpush1.bf16.msra.mxu1 %v11713_v32  ;;  %v11692_v32 = vld [vmem:[%s16969_s2 + $0x5a8] ss:$16 sps:$4 sm:$0xff]   ;;  %v11700_v45 = vld [vmem:[%s16969_s2 + $0x58c] ss:$16 sps:$4 sm:$0xff]  }
 0x14d   :  { %v2095_v59 = vpop.f32.mrf.mxu0  ;;  %2718 = vmatmul.mubr.bf16.gmra.mxu0 %v12677_v61  ;;  %v12684_v61 = vld [vmem:[%s16967_s0 + $0x15c] ss:$28 sps:$4 sm:$0xff]  }
 0x14e   :  { %v2256_v60 = vpop.f32.mrf.mxu1  ;;  %2879 = vmatmul.mubr.bf16.gmra.mxu1 %v12678_v62  ;;  %v13961_v0 = vadd.f32 %v2252_v50, %v2092_v54  ;;  %v2096_v1 = vadd.f32 %v2095_v59, %v13717_v24  ;;  %2727 = vmatprep.mubr.bf16.mxu0 %v12679_v4  ;;  %v12682_v54 = vld [vmem:[%s16967_s0 + $0x120] ss:$28 sps:$4 sm:$0xff]   ;;  %v11698_v4 = vld [vmem:[%s16969_s2 + $0x588] ss:$16 sps:$4 sm:$0xff]  }
 0x14f   :  { %2888 = vmatprep.mubr.bf16.mxu1 %v12680_v6  ;;  %v2097_v7 = vpop.f32.mrf.mxu0  ;;  %2984 = vmatpush2.bf16.msra.mxu0 %v11683_v52  ;;  %v12681_v52 = vld [vmem:[%s16967_s0 + $0x118] ss:$28 sps:$4 sm:$0xff]  }
 0x150   :  { %v2258_v9 = vpop.f32.mrf.mxu1  ;;  %v13973_v11 = vadd.f32 %v2256_v60, %v2096_v1  ;;  %v2098_v12 = vadd.f32 %v2097_v7, %v13722_v26  ;;  %2985 = vmatprep.subr.bf16.mxu0 %v11691_v55  ;;  %v12683_v60 = vld [vmem:[%s16967_s0 + $0x154] ss:$28 sps:$4 sm:$0xff]  }
 0x151   :  { %v2099_v18 = vpop.f32.mrf.mxu0 }
 0x152   :  { %v2260_v19 = vpop.f32.mrf.mxu1  ;;  %v13979_v21 = vadd.f32 %v2258_v9, %v2098_v12  ;;  %v2100_v22 = vadd.f32 %v2099_v18, %v13717_v24  ;;  %v11703_v9 = vld [vmem:[%s16969_s2 + $0x56c] ss:$16 sps:$4 sm:$0xff]  }
 0x153   :  { %v2101_v28 = vpop.f32.mrf.mxu0  ;;  %2986 = vmatpush2.bf16.msra.mxu0 %v11689_v10 }
 0x154   :  { %v2262_v30 = vpop.f32.mrf.mxu1  ;;  %v13985_v35 = vadd.f32 %v2260_v19, %v2100_v22  ;;  %v2102_v40 = vadd.f32 %v2101_v28, %v13722_v26  ;;  %2987 = vmatprep.subr.bf16.mxu0 %v11694_v14  ;;  %v11701_v28 = vld [vmem:[%s16969_s2 + $0x568] ss:$16 sps:$4 sm:$0xff]  }
 0x155   :  { %v2105_v46 = vpop.f32.mrf.mxu0  ;;  %2728 = vmatmul.mubr.bf16.gmra.mxu0 %v12681_v52  ;;  %v12686_v52 = vld [vmem:[%s16967_s0 + $0x158] ss:$28 sps:$4 sm:$0xff]  }
 0x156   :  { %v2266_v50 = vpop.f32.mrf.mxu1  ;;  %2889 = vmatmul.mubr.bf16.gmra.mxu1 %v12682_v54  ;;  %v13997_v55 = vadd.f32 %v2262_v30, %v2102_v40  ;;  %v2106_v59 = vadd.f32 %v2105_v46, %v13717_v24  ;;  %2737 = vmatprep.mubr.bf16.mxu0 %v12683_v60  ;;  %v11709_v40 = vld [vmem:[%s16969_s2 + $0x54c] ss:$16 sps:$4 sm:$0xff]  }
 0x157   :  { %2898 = vmatprep.mubr.bf16.mxu1 %v12684_v61  ;;  %v2107_v62 = vpop.f32.mrf.mxu0  ;;  %2988 = vmatpush2.bf16.msra.mxu0 %v11692_v32  ;;  %v12687_v60 = vld [vmem:[%s16967_s0 + $0x18c] ss:$28 sps:$4 sm:$0xff]   ;;  %v12688_v61 = vld [vmem:[%s16967_s0 + $0x194] ss:$28 sps:$4 sm:$0xff]  }
 0x158   :  { %v2268_v1 = vpop.f32.mrf.mxu1  ;;  %v14009_v6 = vadd.f32 %v2266_v50, %v2106_v59  ;;  %v2108_v7 = vadd.f32 %v2107_v62, %v13722_v26  ;;  %2989 = vmatprep.subr.bf16.mxu0 %v11700_v45  ;;  %v12685_v50 = vld [vmem:[%s16967_s0 + $0x150] ss:$28 sps:$4 sm:$0xff]  }
 0x159   :  { %v2109_v10 = vpop.f32.mrf.mxu0 }
 0x15a   :  { %v2270_v12 = vpop.f32.mrf.mxu1  ;;  %v14015_v14 = vadd.f32 %v2268_v1, %v2108_v7  ;;  %v2110_v18 = vadd.f32 %v2109_v10, %v13717_v24  ;;  %v11712_v10 = vld [vmem:[%s16969_s2 + $0x52c] ss:$16 sps:$4 sm:$0xff]  }
 0x15b   :  { %v2111_v19 = vpop.f32.mrf.mxu0  ;;  %2990 = vmatpush2.bf16.msra.mxu0 %v11698_v4  ;;  %v11707_v4 = vld [vmem:[%s16969_s2 + $0x548] ss:$16 sps:$4 sm:$0xff]  }
 0x15c   :  { %v2272_v22 = vpop.f32.mrf.mxu1  ;;  %v14021_v30 = vadd.f32 %v2270_v12, %v2110_v18  ;;  %v2112_v32 = vadd.f32 %v2111_v19, %v13722_v26  ;;  %2991 = vmatprep.subr.bf16.mxu0 %v11703_v9 }
 0x15d   :  { %v2115_v45 = vpop.f32.mrf.mxu0  ;;  %2738 = vmatmul.mubr.bf16.gmra.mxu0 %v12685_v50  ;;  %v11718_v50 = vld [vmem:[%s16969_s2 + $0x50c] ss:$16 sps:$4 sm:$0xff]  }
 0x15e   :  { %v2276_v46 = vpop.f32.mrf.mxu1  ;;  %2899 = vmatmul.mubr.bf16.gmra.mxu1 %v12686_v52  ;;  %v14033_v54 = vadd.f32 %v2272_v22, %v2112_v32  ;;  %v2116_v59 = vadd.f32 %v2115_v45, %v13717_v24  ;;  %2747 = vmatprep.mubr.bf16.mxu0 %v12687_v60  ;;  %v11710_v45 = vld [vmem:[%s16969_s2 + $0x528] ss:$16 sps:$4 sm:$0xff]  }
 0x15f   :  { %2908 = vmatprep.mubr.bf16.mxu1 %v12688_v61  ;;  %v2117_v62 = vpop.f32.mrf.mxu0  ;;  %2992 = vmatpush2.bf16.msra.mxu0 %v11701_v28  ;;  %v12689_v60 = vld [vmem:[%s16967_s0 + $0x188] ss:$28 sps:$4 sm:$0xff]   ;;  %v12690_v61 = vld [vmem:[%s16967_s0 + $0x190] ss:$28 sps:$4 sm:$0xff]  }
 0x160   :  { %v2278_v1 = vpop.f32.mrf.mxu1  ;;  %v14045_v7 = vadd.f32 %v2276_v46, %v2116_v59  ;;  %v2118_v9 = vadd.f32 %v2117_v62, %v13722_v26  ;;  %2993 = vmatprep.subr.bf16.mxu0 %v11709_v40 }
 0x161   :  { %v2119_v12 = vpop.f32.mrf.mxu0 }
 0x162   :  { %v2280_v18 = vpop.f32.mrf.mxu1  ;;  %v14051_v19 = vadd.f32 %v2278_v1, %v2118_v9  ;;  %v2120_v22 = vadd.f32 %v2119_v12, %v13717_v24  ;;  %v12692_v9 = vld [vmem:[%s16967_s0 + $0x1cc] ss:$28 sps:$4 sm:$0xff]  }
 0x163   :  { %v2121_v28 = vpop.f32.mrf.mxu0  ;;  %2994 = vmatpush2.bf16.msra.mxu0 %v11707_v4  ;;  %v12691_v4 = vld [vmem:[%s16967_s0 + $0x1c4] ss:$28 sps:$4 sm:$0xff]  }
 0x164   :  { %v2282_v32 = vpop.f32.mrf.mxu1  ;;  %v14057_v46 = vadd.f32 %v2280_v18, %v2120_v22  ;;  %v2122_v40 = vadd.f32 %v2121_v28, %v13722_v26  ;;  %2995 = vmatprep.subr.bf16.mxu0 %v11712_v10  ;;  %v11716_v18 = vld [vmem:[%s16969_s2 + $0x508] ss:$16 sps:$4 sm:$0xff]  }
 0x165   :  { %v2125_v52 = vpop.f32.mrf.mxu0  ;;  %2748 = vmatmul.mubr.bf16.gmra.mxu0 %v12689_v60 }
 0x166   :  { %v2286_v59 = vpop.f32.mrf.mxu1  ;;  %2909 = vmatmul.mubr.bf16.gmra.mxu1 %v12690_v61  ;;  %v14069_v62 = vadd.f32 %v2282_v32, %v2122_v40  ;;  %v2126_v1 = vadd.f32 %v2125_v52, %v13717_v24  ;;  %2757 = vmatprep.mubr.bf16.mxu0 %v12691_v4  ;;  %v11721_v32 = vld [vmem:[#allocation2 + $0x74] ss:$8 sps:$4 sm:$0xff]  }
 0x167   :  { %2918 = vmatprep.mubr.bf16.mxu1 %v12692_v9  ;;  %v2127_v10 = vpop.f32.mrf.mxu0  ;;  %2996 = vmatpush2.bf16.msra.mxu0 %v11710_v45 }
 0x168   :  { %v2288_v12 = vpop.f32.mrf.mxu1  ;;  %v14081_v22 = vadd.f32 %v2286_v59, %v2126_v1  ;;  %v2128_v28 = vadd.f32 %v2127_v10, %v13722_v26  ;;  %2997 = vmatprep.subr.bf16.mxu0 %v11718_v50  ;;  %v12693_v50 = vld [vmem:[%s16967_s0 + $0x1c0] ss:$28 sps:$4 sm:$0xff]   ;;  %v12694_v10 = vld [vmem:[%s16967_s0 + $0x1c8] ss:$28 sps:$4 sm:$0xff]  }
 0x169   :  { %v2129_v40 = vpop.f32.mrf.mxu0 }
 0x16a   :  { %v2290_v52 = vpop.f32.mrf.mxu1  ;;  %v14084_v60 = vadd.f32 %v2288_v12, %v2128_v28  ;;  %v2130_v61 = vadd.f32 %v2129_v40, %v13717_v24  ;;  %v12695_v28 = vld [vmem:[%s16967_s0 + $0x1fc] ss:$28 sps:$4 sm:$0xff]  }
 0x16b   :  { %v2131_v4 = vpop.f32.mrf.mxu0  ;;  %2998 = vmatpush2.bf16.msra.mxu0 %v11716_v18 }
 0x16c   :  { %v2292_v9 = vpop.f32.mrf.mxu1  ;;  %v14087_v45 = vadd.f32 %v2290_v52, %v2130_v61  ;;  %v2132_v41 = vadd.f32 %v2131_v4, %v13722_v26  ;;  %3837 = vmatprep.subr.bf16.mxu0 %v11721_v32  ;;  %v12696_v32 = vld [vmem:[%s16967_s0 + $0x204] ss:$28 sps:$4 sm:$0xff]  }
 0x16d   :  { %v2135_v59 = vpop.f32.mrf.mxu0  ;;  %2758 = vmatmul.mubr.bf16.gmra.mxu0 %v12693_v50 }
 0x16e   :  { %v2296_v1 = vpop.f32.mrf.mxu1  ;;  %2919 = vmatmul.mubr.bf16.gmra.mxu1 %v12694_v10  ;;  %v14096_v12 = vadd.f32 %v2292_v9, %v2132_v41  ;;  %v2136_v18 = vadd.f32 %v2135_v59, %v13717_v24  ;;  %2767 = vmatprep.mubr.bf16.mxu0 %v12695_v28 }
 0x16f   :  { %2928 = vmatprep.mubr.bf16.mxu1 %v12696_v32  ;;  %v2137_v40 = vpop.f32.mrf.mxu0 }
 0x170   :  { %v2298_v52 = vpop.f32.mrf.mxu1  ;;  %v14105_v61 = vadd.f32 %v2296_v1, %v2136_v18  ;;  %v2138_v4 = vadd.f32 %v2137_v40, %v13722_v26  ;;  %v12697_v1 = vld [vmem:[%s16967_s0 + $0x1f8] ss:$28 sps:$4 sm:$0xff]   ;;  %v12698_v18 = vld [vmem:[%s16967_s0 + $0x200] ss:$28 sps:$4 sm:$0xff]  }
 0x171   :  { %v2139_v41 = vpop.f32.mrf.mxu0 }
 0x172   :  { %v2300_v9 = vpop.f32.mrf.mxu1  ;;  %v14108_v50 = vadd.f32 %v2298_v52, %v2138_v4  ;;  %v2140_v59 = vadd.f32 %v2139_v41, %v13717_v24  ;;  %v12699_v4 = vld [vmem:[%s16967_s0 + $0x234] ss:$28 sps:$4 sm:$0xff]   ;;  %v12700_v41 = vld [vmem:[%s16967_s0 + $0x23c] ss:$28 sps:$4 sm:$0xff]  }
 0x173   :  { %v2141_v10 = vpop.f32.mrf.mxu0 }
 0x174   :  { %v2302_v23 = vpop.f32.mrf.mxu1  ;;  %v14111_v28 = vadd.f32 %v2300_v9, %v2140_v59  ;;  %v2142_v20 = vadd.f32 %v2141_v10, %v13722_v26 }
 0x175   :  { %v2145_v42 = vpop.f32.mrf.mxu0  ;;  %2768 = vmatmul.mubr.bf16.gmra.mxu0 %v12697_v1 }
 0x176   :  { %17044 = vst [vmem:[#allocation13_spill] sm:$0xff] %v14111_v28  ;;  %v2306_v32 = vpop.f32.mrf.mxu1  ;;  %2929 = vmatmul.mubr.bf16.gmra.mxu1 %v12698_v18  ;;  %v14120_v40 = vadd.f32 %v2302_v23, %v2142_v20  ;;  %v2146_v52 = vadd.f32 %v2145_v42, %v13717_v24  ;;  %2777 = vmatprep.mubr.bf16.mxu0 %v12699_v4 }
 0x177   :  { %2938 = vmatprep.mubr.bf16.mxu1 %v12700_v41  ;;  %v2147_v9 = vpop.f32.mrf.mxu0 }
 0x178   :  { %17045 = vst [vmem:[#allocation14_spill] sm:$0xff] %v14120_v40  ;;  %v2308_v59 = vpop.f32.mrf.mxu1  ;;  %v14129_v10 = vadd.f32 %v2306_v32, %v2146_v52  ;;  %v2148_v1 = vadd.f32 %v2147_v9, %v13722_v26  ;;  %v12701_v32 = vld [vmem:[%s16967_s0 + $0x230] ss:$28 sps:$4 sm:$0xff]   ;;  %v12702_v52 = vld [vmem:[%s16967_s0 + $0x238] ss:$28 sps:$4 sm:$0xff]  }
 0x179   :  { %v2149_v20 = vpop.f32.mrf.mxu0 }
 0x17a   :  { %v2310_v23 = vpop.f32.mrf.mxu1  ;;  %v14132_v18 = vadd.f32 %v2308_v59, %v2148_v1  ;;  %v2150_v42 = vadd.f32 %v2149_v20, %v13717_v24  ;;  %v12704_v1 = vld [vmem:[%s16967_s0 + $0x274] ss:$28 sps:$4 sm:$0xff]  }
 0x17b   :  { %v2151_v25 = vpop.f32.mrf.mxu0 }
 0x17c   :  { %v2312_v17 = vpop.f32.mrf.mxu1  ;;  %v14135_v4 = vadd.f32 %v2310_v23, %v2150_v42  ;;  %v2152_v40 = vadd.f32 %v2151_v25, %v13722_v26  ;;  %v12703_v25 = vld [vmem:[%s16967_s0 + $0x26c] ss:$28 sps:$4 sm:$0xff]  }
 0x17d   :  { %v2155_v28 = vpop.f32.mrf.mxu0  ;;  %2778 = vmatmul.mubr.bf16.gmra.mxu0 %v12701_v32 }
 0x17e   :  { %17046 = vst [vmem:[#allocation15_spill] sm:$0xff] %v14135_v4  ;;  %v2316_v41 = vpop.f32.mrf.mxu1  ;;  %2939 = vmatmul.mubr.bf16.gmra.mxu1 %v12702_v52  ;;  %v14144_v9 = vadd.f32 %v2312_v17, %v2152_v40  ;;  %v2156_v59 = vadd.f32 %v2155_v28, %v13717_v24  ;;  %2787 = vmatprep.mubr.bf16.mxu0 %v12703_v25  ;;  %v11769_v17 = vld [vmem:[#allocation2 + $0x174] ss:$8 sps:$4 sm:$0xff]  }
 0x17f   :  { %2948 = vmatprep.mubr.bf16.mxu1 %v12704_v1  ;;  %v2157_v20 = vpop.f32.mrf.mxu0  ;;  %3998 = vmatprep.subr.bf16.mxu1 %v11769_v17  ;;  %v12705_v1 = vld [vmem:[%s16967_s0 + $0x268] ss:$28 sps:$4 sm:$0xff]  }
 0x180   :  { %17047 = vst [vmem:[#allocation16_spill] sm:$0xff] %v14144_v9  ;;  %v2318_v23 = vpop.f32.mrf.mxu1  ;;  %v14153_v42 = vadd.f32 %v2316_v41, %v2156_v59  ;;  %v2158_v32 = vadd.f32 %v2157_v20, %v13722_v26  ;;  %v12706_v41 = vld [vmem:[%s16967_s0 + $0x270] ss:$28 sps:$4 sm:$0xff]  }
 0x181   :  { %v2159_v40 = vpop.f32.mrf.mxu0 }
 0x182   :  { %v2320_v52 = vpop.f32.mrf.mxu1  ;;  %v14156_v24 = vadd.f32 %v2318_v23, %v2158_v32 }
 0x183   :  { %v2160_v28 = vpop.f32.mrf.mxu0 }
 0x184   :  { %17048 = vst [vmem:[#allocation17_spill] sm:$0xff] %v14156_v24  ;;  %v2321_v9 = vpop.f32.mrf.mxu1 }
 0x185   :  { %v2357_v25 = vpop.f32.mrf.mxu0  ;;  %2788 = vmatmul.mubr.bf16.gmra.mxu0 %v12705_v1 }
 0x186   :  { %v2518_v4 = vpop.f32.mrf.mxu1  ;;  %2949 = vmatmul.mubr.bf16.gmra.mxu1 %v12706_v41  ;;  %v2358_v26 = vadd.f32 %v2357_v25, %v13730_v33  ;;  %2797 = vmatprep.mubr.bf16.mxu0 %v13378_v36 }
 0x187   :  { %2958 = vmatprep.mubr.bf16.mxu1 %v13380_v37  ;;  %v2359_v59 = vpop.f32.mrf.mxu0 }
 0x188   :  { %v2520_v9 = vpop.f32.mrf.mxu1  ;;  %v2519_v20 = vadd.f32 %v2518_v4, %v2358_v26  ;;  %v2360_v23 = vadd.f32 %v2359_v59, %v13735_v43  ;;  %v17049_v26 = vmov 0  }
 0x189   :  { %v2361_v32 = vpop.f32.mrf.mxu0 }
 0x18a   :  { %v2522_v17 = vpop.f32.mrf.mxu1  ;;  %v2521_v40 = vadd.f32 %v2520_v9, %v2360_v23  ;;  %v2362_v52 = vadd.f32 %v2361_v32, %v13738_v47  ;;  %v3289_v36 = vmax.f32 %v2519_v20, 0.0  ;;  %v12707_v47 = vld [vmem:[%s16967_s0 + $0x14] ss:$28 sps:$4 sm:$0xff]  }
 0x18b   :  { %v2363_v28 = vpop.f32.mrf.mxu0 }
 0x18c   :  { %v2524_v1 = vpop.f32.mrf.mxu1  ;;  %v2523_v24 = vadd.f32 %v2522_v17, %v2362_v52  ;;  %v2364_v41 = vadd.f32 %v2363_v28, %v13742_v51  ;;  %v3290_v59 = vmax.f32 %v2521_v40, 0.0 }
 0x18d   :  { %v2367_v33 = vpop.f32.mrf.mxu0  ;;  %2798 = vmatmul.mubr.bf16.gmra.mxu0 %v13384_v38 }
 0x18e   :  { %v2528_v25 = vpop.f32.mrf.mxu1  ;;  %2959 = vmatmul.mubr.bf16.gmra.mxu1 %v13386_v39  ;;  %v3293_v37 = vmax.f32 %v2523_v24, 0.0  ;;  %v2525_v4 = vadd.f32 %v2524_v1, %v2364_v41  ;;  %v2368_v43 = vadd.f32 %v2367_v33, %v13751_v57  ;;  %2999 = vmatprep.mubr.bf16.mxu0 %v12707_v47  ;;  %v11719_v41 = vld [vmem:[#allocation2 + $0x70] ss:$8 sps:$4 sm:$0xff]  }
 0x18f   :  { %3160 = vmatprep.mubr.bf16.mxu1 %v17049_v26  ;;  %v2369_v51 = vpop.f32.mrf.mxu0  ;;  %v11767_v33 = vld [vmem:[#allocation2 + $0x170] ss:$8 sps:$4 sm:$0xff]  }
 0x190   :  { %v2530_v9 = vpop.f32.mrf.mxu1  ;;  %v14177_v23 = vpack.c.bf16 %v3293_v37, %v3289_v36  ;;  %v3294_v38 = vmax.f32 %v2525_v4, 0.0  ;;  %v2529_v32 = vadd.f32 %v2528_v25, %v2368_v43  ;;  %v2370_v39 = vadd.f32 %v2369_v51, %v13760_v63  ;;  %v11724_v36 = vld [vmem:[#allocation2 + $0x64] ss:$8 sps:$4 sm:$0xff]  }
 0x191   :  { %v2371_v24 = vpop.f32.mrf.mxu0  ;;  %v11772_v37 = vld [vmem:[#allocation2 + $0x164] ss:$8 sps:$4 sm:$0xff]  }
 0x192   :  { %v2532_v20 = vpop.f32.mrf.mxu1  ;;  %v2531_v17 = vadd.f32 %v2530_v9, %v2370_v39  ;;  %v2372_v57 = vadd.f32 %v2371_v24, %v13769_v5  ;;  %v14181_v52 = vpack.c.bf16 %v3294_v38, %v3290_v59  ;;  %v12708_v63 = vld [vmem:[%s16967_s0 + $0x10] ss:$28 sps:$4 sm:$0xff]   ;;  %v12709_v5 = vld [vmem:[%s16967_s0 + $0x18] ss:$28 sps:$4 sm:$0xff]   ;;  %v3297_v43 = vmax.f32 %v2529_v32, 0.0 }
 0x193   :  { %v2373_v28 = vpop.f32.mrf.mxu0 }
 0x194   :  { %v2534_v1 = vpop.f32.mrf.mxu1  ;;  %v2533_v40 = vadd.f32 %v2532_v20, %v2372_v57  ;;  %v2374_v47 = vadd.f32 %v2373_v28, %v13790_v15  ;;  %v12710_v15 = vld [vmem:[%s16967_s0 + $0x4c] ss:$28 sps:$4 sm:$0xff]   ;;  %v3298_v38 = vmax.f32 %v2531_v17, 0.0 }
 0x195   :  { %v2377_v4 = vpop.f32.mrf.mxu0  ;;  %3000 = vmatmul.mubr.bf16.vlgmr.msra.gmra.mxu0 %v12708_v63  ;;  %v11722_v20 = vld [vmem:[#allocation2 + $0x60] ss:$8 sps:$4 sm:$0xff]  }
 0x196   :  { %v2538_v25 = vpop.f32.mrf.mxu1  ;;  %3161 = vmatmul.mubr.bf16.vlgmr.msra.gmra.mxu1 %v12709_v5  ;;  %v3301_v59 = vmax.f32 %v2533_v40, 0.0  ;;  %v2535_v51 = vadd.f32 %v2534_v1, %v2374_v47  ;;  %v2378_v9 = vadd.f32 %v2377_v4, %v13799_v27  ;;  %3009 = vmatprep.mubr.bf16.mxu0 %v12710_v15  ;;  %v11770_v57 = vld [vmem:[#allocation2 + $0x160] ss:$8 sps:$4 sm:$0xff]   ;;  %v11727_v40 = vld [vmem:[#allocation2 + $0x54] ss:$8 sps:$4 sm:$0xff]  }
 0x197   :  { %3170 = vmatprep.mubr.bf16.mxu1 %v17049_v26  ;;  %v2379_v39 = vpop.f32.mrf.mxu0  ;;  %3838 = vmatpush1.bf16.msra.mxu0 %v11719_v41  ;;  %v11775_v47 = vld [vmem:[#allocation2 + $0x154] ss:$8 sps:$4 sm:$0xff]  }
 0x198   :  { %v2540_v24 = vpop.f32.mrf.mxu1  ;;  %3999 = vmatpush1.bf16.msra.mxu1 %v11767_v33  ;;  %v14195_v28 = vpack.c.bf16 %v3301_v59, %v3297_v43  ;;  %v3302_v32 = vmax.f32 %v2535_v51, 0.0  ;;  %v2539_v1 = vadd.f32 %v2538_v25, %v2378_v9  ;;  %v2380_v27 = vadd.f32 %v2379_v39, %v13808_v34  ;;  %3839 = vmatprep.subr.bf16.mxu0 %v11724_v36  ;;  %v11725_v43 = vld [vmem:[#allocation2 + $0x50] ss:$8 sps:$4 sm:$0xff]   ;;  %v11730_v36 = vld [vmem:[#allocation2 + $0x44] ss:$8 sps:$4 sm:$0xff]  }
 0x199   :  { %4000 = vmatprep.subr.bf16.mxu1 %v11772_v37  ;;  %v2381_v4 = vpop.f32.mrf.mxu0  ;;  %v11773_v59 = vld [vmem:[#allocation2 + $0x150] ss:$8 sps:$4 sm:$0xff]   ;;  %v11778_v37 = vld [vmem:[#allocation2 + $0x144] ss:$8 sps:$4 sm:$0xff]  }
 0x19a   :  { %v2542_v63 = vpop.f32.mrf.mxu1  ;;  %v2541_v5 = vadd.f32 %v2540_v24, %v2380_v27  ;;  %v2382_v17 = vadd.f32 %v2381_v4, %v13817_v48  ;;  %v14199_v15 = vpack.c.bf16 %v3302_v32, %v3298_v38  ;;  %v12711_v48 = vld [vmem:[%s16967_s0 + $0x48] ss:$28 sps:$4 sm:$0xff]   ;;  %v12712_v38 = vld [vmem:[%s16967_s0 + $0x50] ss:$28 sps:$4 sm:$0xff]   ;;  %v3305_v39 = vmax.f32 %v2539_v1, 0.0 }
 0x19b   :  { %v2383_v41 = vpop.f32.mrf.mxu0  ;;  %3840 = vmatpush1.bf16.msra.mxu0 %v11722_v20  ;;  %v11776_v4 = vld [vmem:[#allocation2 + $0x140] ss:$8 sps:$4 sm:$0xff]  }
 0x19c   :  { %v2544_v33 = vpop.f32.mrf.mxu1  ;;  %4001 = vmatpush1.bf16.msra.mxu1 %v11770_v57  ;;  %v2543_v25 = vadd.f32 %v2542_v63, %v2382_v17  ;;  %v2384_v34 = vadd.f32 %v2383_v41, %v13832_v58  ;;  %3841 = vmatprep.subr.bf16.mxu0 %v11727_v40  ;;  %v12713_v57 = vld [vmem:[%s16967_s0 + $0x84] ss:$28 sps:$4 sm:$0xff]   ;;  %v3306_v32 = vmax.f32 %v2541_v5, 0.0  ;;  %v11733_v41 = vld [vmem:[#allocation2 + $0x34] ss:$8 sps:$4 sm:$0xff]  }
 0x19d   :  { %4002 = vmatprep.subr.bf16.mxu1 %v11775_v47  ;;  %v2387_v51 = vpop.f32.mrf.mxu0  ;;  %3010 = vmatmul.mubr.bf16.gmra.mxu0 %v12711_v48  ;;  %v11728_v47 = vld [vmem:[#allocation2 + $0x40] ss:$8 sps:$4 sm:$0xff]  }
 0x19e   :  { %v2548_v9 = vpop.f32.mrf.mxu1  ;;  %3171 = vmatmul.mubr.bf16.gmra.mxu1 %v12712_v38  ;;  %v3309_v24 = vmax.f32 %v2543_v25, 0.0  ;;  %v2545_v20 = vadd.f32 %v2544_v33, %v2384_v34  ;;  %v2388_v58 = vadd.f32 %v2387_v51, %v13844_v2  ;;  %3019 = vmatprep.mubr.bf16.mxu0 %v12713_v57  ;;  %v11781_v33 = vld [vmem:[#allocation2 + $0x134] ss:$8 sps:$4 sm:$0xff]   ;;  %v11731_v38 = vld [vmem:[#allocation2 + $0x30] ss:$8 sps:$4 sm:$0xff]  }
 0x19f   :  { %3180 = vmatprep.mubr.bf16.mxu1 %v17049_v26  ;;  %v2389_v27 = vpop.f32.mrf.mxu0  ;;  %3842 = vmatpush1.bf16.msra.mxu0 %v11725_v43 }
 0x1a0   :  { %v2550_v40 = vpop.f32.mrf.mxu1  ;;  %4003 = vmatpush1.bf16.msra.mxu1 %v11773_v59  ;;  %v14213_v63 = vpack.c.bf16 %v3309_v24, %v3305_v39  ;;  %v3310_v1 = vmax.f32 %v2545_v20, 0.0  ;;  %v2549_v17 = vadd.f32 %v2548_v9, %v2388_v58  ;;  %v2390_v2 = vadd.f32 %v2389_v27, %v13850_v8  ;;  %3843 = vmatprep.subr.bf16.mxu0 %v11730_v36  ;;  %v11779_v39 = vld [vmem:[#allocation2 + $0x130] ss:$8 sps:$4 sm:$0xff]   ;;  %v11736_v36 = vld [vmem:[#allocation2 + $0x24] ss:$8 sps:$4 sm:$0xff]  }
 0x1a1   :  { %4004 = vmatprep.subr.bf16.mxu1 %v11778_v37  ;;  %v2391_v25 = vpop.f32.mrf.mxu0  ;;  %v11784_v37 = vld [vmem:[#allocation2 + $0x124] ss:$8 sps:$4 sm:$0xff]  }
 0x1a2   :  { %v2552_v34 = vpop.f32.mrf.mxu1  ;;  %v2551_v51 = vadd.f32 %v2550_v40, %v2390_v2  ;;  %v2392_v5 = vadd.f32 %v2391_v25, %v13862_v16  ;;  %v14217_v48 = vpack.c.bf16 %v3310_v1, %v3306_v32  ;;  %v12714_v16 = vld [vmem:[%s16967_s0 + $0x80] ss:$28 sps:$4 sm:$0xff]   ;;  %v12715_v58 = vld [vmem:[%s16967_s0 + $0x88] ss:$28 sps:$4 sm:$0xff]   ;;  %v3313_v57 = vmax.f32 %v2549_v17, 0.0 }
 0x1a3   :  { %v2393_v43 = vpop.f32.mrf.mxu0  ;;  %3844 = vmatpush1.bf16.msra.mxu0 %v11728_v47  ;;  %v12716_v40 = vld [vmem:[%s16967_s0 + $0xbc] ss:$28 sps:$4 sm:$0xff]   ;;  %v11734_v2 = vld [vmem:[#allocation2 + $0x20] ss:$8 sps:$4 sm:$0xff]  }
 0x1a4   :  { %v2554_v59 = vpop.f32.mrf.mxu1  ;;  %4005 = vmatpush1.bf16.msra.mxu1 %v11776_v4  ;;  %v2553_v9 = vadd.f32 %v2552_v34, %v2392_v5  ;;  %v2394_v8 = vadd.f32 %v2393_v43, %v13877_v31  ;;  %3845 = vmatprep.subr.bf16.mxu0 %v11733_v41  ;;  %v3314_v47 = vmax.f32 %v2551_v51, 0.0  ;;  %v11782_v41 = vld [vmem:[#allocation2 + $0x120] ss:$8 sps:$4 sm:$0xff]   ;;  %v11739_v34 = vld [vmem:[#allocation2 + $0x14] ss:$8 sps:$4 sm:$0xff]  }
 0x1a5   :  { %4006 = vmatprep.subr.bf16.mxu1 %v11781_v33  ;;  %v2397_v24 = vpop.f32.mrf.mxu0  ;;  %3020 = vmatmul.mubr.bf16.gmra.mxu0 %v12714_v16  ;;  %v11787_v5 = vld [vmem:[#allocation2 + $0x114] ss:$8 sps:$4 sm:$0xff]   ;;  %v11785_v16 = vld [vmem:[#allocation2 + $0x110] ss:$8 sps:$4 sm:$0xff]  }
 0x1a6   :  { %v2558_v20 = vpop.f32.mrf.mxu1  ;;  %3181 = vmatmul.mubr.bf16.gmra.mxu1 %v12715_v58  ;;  %v3317_v32 = vmax.f32 %v2553_v9, 0.0  ;;  %v2555_v27 = vadd.f32 %v2554_v59, %v2394_v8  ;;  %v2398_v31 = vadd.f32 %v2397_v24, %v13889_v49  ;;  %3029 = vmatprep.mubr.bf16.mxu0 %v12716_v40  ;;  %v11737_v24 = vld [vmem:[#allocation2 + $0x10] ss:$8 sps:$4 sm:$0xff]  }
 0x1a7   :  { %3190 = vmatprep.mubr.bf16.mxu1 %v17049_v26  ;;  %v2399_v4 = vpop.f32.mrf.mxu0  ;;  %3846 = vmatpush1.bf16.msra.mxu0 %v11731_v38  ;;  %v12719_v40 = vld [vmem:[%s16967_s0 + $0xf4] ss:$28 sps:$4 sm:$0xff]  }
 0x1a8   :  { %v2560_v1 = vpop.f32.mrf.mxu1  ;;  %4007 = vmatpush1.bf16.msra.mxu1 %v11779_v39  ;;  %v14231_v33 = vpack.c.bf16 %v3317_v32, %v3313_v57  ;;  %v3318_v17 = vmax.f32 %v2555_v27, 0.0  ;;  %v2559_v25 = vadd.f32 %v2558_v20, %v2398_v31  ;;  %v2400_v49 = vadd.f32 %v2399_v4, %v13898_v56  ;;  %3847 = vmatprep.subr.bf16.mxu0 %v11736_v36  ;;  %v11742_v36 = vld [vmem:[#allocation2 + $0x4] ss:$8 sps:$4 sm:$0xff]   ;;  %v12718_v57 = vld [vmem:[%s16967_s0 + $0xc0] ss:$28 sps:$4 sm:$0xff]  }
 0x1a9   :  { %4008 = vmatprep.subr.bf16.mxu1 %v11784_v37  ;;  %v2401_v43 = vpop.f32.mrf.mxu0 }
 0x1aa   :  { %v2562_v59 = vpop.f32.mrf.mxu1  ;;  %v2561_v9 = vadd.f32 %v2560_v1, %v2400_v49  ;;  %v2402_v51 = vadd.f32 %v2401_v43, %v13910_v3  ;;  %v14235_v8 = vpack.c.bf16 %v3318_v17, %v3314_v47  ;;  %v12717_v3 = vld [vmem:[%s16967_s0 + $0xb8] ss:$28 sps:$4 sm:$0xff]   ;;  %v3321_v32 = vmax.f32 %v2559_v25, 0.0  ;;  %v11790_v47 = vld [vmem:[#allocation2 + $0x104] ss:$8 sps:$4 sm:$0xff]  }
 0x1ab   :  { %v2403_v38 = vpop.f32.mrf.mxu0  ;;  %3848 = vmatpush1.bf16.msra.mxu0 %v11734_v2  ;;  %v11788_v17 = vld [vmem:[#allocation2 + $0x100] ss:$8 sps:$4 sm:$0xff]  }
 0x1ac   :  { %v2564_v39 = vpop.f32.mrf.mxu1  ;;  %4009 = vmatpush1.bf16.msra.mxu1 %v11782_v41  ;;  %v2563_v20 = vadd.f32 %v2562_v59, %v2402_v51  ;;  %v2404_v56 = vadd.f32 %v2403_v38, %v13925_v13  ;;  %3849 = vmatprep.subr.bf16.mxu0 %v11739_v34  ;;  %v3322_v4 = vmax.f32 %v2561_v9, 0.0  ;;  %v11740_v41 = vld [vmem:[#allocation2] ss:$8 sps:$4 sm:$0xff]  }
 0x1ad   :  { %4010 = vmatprep.subr.bf16.mxu1 %v11787_v5  ;;  %v2407_v37 = vpop.f32.mrf.mxu0  ;;  %3030 = vmatmul.mubr.bf16.gmra.mxu0 %v12717_v3  ;;  %v11745_v5 = vld [vmem:[#allocation2 + $0xf4] ss:$8 sps:$4 sm:$0xff]  }
 0x1ae   :  { %v2568_v58 = vpop.f32.mrf.mxu1  ;;  %3191 = vmatmul.mubr.bf16.gmra.mxu1 %v12718_v57  ;;  %v3325_v27 = vmax.f32 %v2563_v20, 0.0  ;;  %v2565_v31 = vadd.f32 %v2564_v39, %v2404_v56  ;;  %v2408_v13 = vadd.f32 %v2407_v37, %v13937_v29  ;;  %3039 = vmatprep.mubr.bf16.mxu0 %v12719_v40  ;;  %v11793_v37 = vld [vmem:[#allocation2 + $0x1f4] ss:$8 sps:$4 sm:$0xff]  }
 0x1af   :  { %3200 = vmatprep.mubr.bf16.mxu1 %v17049_v26  ;;  %v2409_v1 = vpop.f32.mrf.mxu0  ;;  %3850 = vmatpush1.bf16.msra.mxu0 %v11737_v24  ;;  %v12721_v57 = vld [vmem:[%s16967_s0 + $0xf8] ss:$28 sps:$4 sm:$0xff]  }
 0x1b0   :  { %v2570_v2 = vpop.f32.mrf.mxu1  ;;  %4011 = vmatpush1.bf16.msra.mxu1 %v11785_v16  ;;  %v14249_v25 = vpack.c.bf16 %v3325_v27, %v3321_v32  ;;  %v3326_v49 = vmax.f32 %v2565_v31, 0.0  ;;  %v2569_v34 = vadd.f32 %v2568_v58, %v2408_v13  ;;  %v2410_v29 = vadd.f32 %v2409_v1, %v13943_v44  ;;  %3851 = vmatprep.subr.bf16.mxu0 %v11742_v36  ;;  %v11743_v16 = vld [vmem:[#allocation2 + $0xf0] ss:$8 sps:$4 sm:$0xff]   ;;  %v11748_v44 = vld [vmem:[#allocation2 + $0xe4] ss:$8 sps:$4 sm:$0xff]  }
 0x1b1   :  { %4012 = vmatprep.subr.bf16.mxu1 %v11790_v47  ;;  %v2411_v43 = vpop.f32.mrf.mxu0  ;;  %v11791_v36 = vld [vmem:[#allocation2 + $0x1f0] ss:$8 sps:$4 sm:$0xff]   ;;  %v12722_v13 = vld [vmem:[%s16967_s0 + $0x12c] ss:$28 sps:$4 sm:$0xff]  }
 0x1b2   :  { %v2572_v59 = vpop.f32.mrf.mxu1  ;;  %v2571_v51 = vadd.f32 %v2570_v2, %v2410_v29  ;;  %v2412_v9 = vadd.f32 %v2411_v43, %v13949_v53  ;;  %v14253_v38 = vpack.c.bf16 %v3326_v49, %v3322_v4  ;;  %v12720_v53 = vld [vmem:[%s16967_s0 + $0xf0] ss:$28 sps:$4 sm:$0xff]   ;;  %v3329_v32 = vmax.f32 %v2569_v34, 0.0  ;;  %v11746_v1 = vld [vmem:[#allocation2 + $0xe0] ss:$8 sps:$4 sm:$0xff]  }
 0x1b3   :  { %v2413_v39 = vpop.f32.mrf.mxu0  ;;  %3852 = vmatpush1.bf16.msra.mxu0 %v11740_v41 }
 0x1b4   :  { %v2574_v24 = vpop.f32.mrf.mxu1  ;;  %4013 = vmatpush1.bf16.msra.mxu1 %v11788_v17  ;;  %v2573_v20 = vadd.f32 %v2572_v59, %v2412_v9  ;;  %v2414_v56 = vadd.f32 %v2413_v39, %v13961_v0  ;;  %3853 = vmatprep.subr.bf16.mxu0 %v11745_v5  ;;  %v3330_v40 = vmax.f32 %v2571_v51, 0.0  ;;  %v11796_v51 = vld [vmem:[#allocation2 + $0x1e4] ss:$8 sps:$4 sm:$0xff]  }
 0x1b5   :  { %v2417_v58 = vpop.f32.mrf.mxu0  ;;  %3040 = vmatmul.mubr.bf16.gmra.mxu0 %v12720_v53  ;;  %4014 = vmatprep.subr.bf16.mxu1 %v11793_v37  ;;  %v12724_v37 = vld [vmem:[%s16967_s0 + $0x130] ss:$28 sps:$4 sm:$0xff]  }
 0x1b6   :  { %v2578_v3 = vpop.f32.mrf.mxu1  ;;  %3201 = vmatmul.mubr.bf16.gmra.mxu1 %v12721_v57  ;;  %v3333_v27 = vmax.f32 %v2573_v20, 0.0  ;;  %v2575_v31 = vadd.f32 %v2574_v24, %v2414_v56  ;;  %v2418_v0 = vadd.f32 %v2417_v58, %v13973_v11  ;;  %3049 = vmatprep.mubr.bf16.mxu0 %v12722_v13  ;;  %v11751_v11 = vld [vmem:[#allocation2 + $0xd4] ss:$8 sps:$4 sm:$0xff]   ;;  %v11749_v24 = vld [vmem:[#allocation2 + $0xd0] ss:$8 sps:$4 sm:$0xff]  }
 0x1b7   :  { %3210 = vmatprep.mubr.bf16.mxu1 %v17049_v26  ;;  %v2419_v47 = vpop.f32.mrf.mxu0  ;;  %3854 = vmatpush2.bf16.msra.mxu0 %v11743_v16  ;;  %v11794_v16 = vld [vmem:[#allocation2 + $0x1e0] ss:$8 sps:$4 sm:$0xff]   ;;  %v11757_v13 = vld [vmem:[#allocation2 + $0xb4] ss:$8 sps:$4 sm:$0xff]  }
 0x1b8   :  { %v2580_v4 = vpop.f32.mrf.mxu1  ;;  %v14267_v2 = vpack.c.bf16 %v3333_v27, %v3329_v32  ;;  %v3334_v41 = vmax.f32 %v2575_v31, 0.0  ;;  %v2579_v17 = vadd.f32 %v2578_v3, %v2418_v0  ;;  %v2420_v49 = vadd.f32 %v2419_v47, %v13979_v21  ;;  %3855 = vmatprep.subr.bf16.mxu0 %v11748_v44  ;;  %4015 = vmatpush2.bf16.msra.mxu1 %v11791_v36  ;;  %v11754_v21 = vld [vmem:[#allocation2 + $0xc4] ss:$8 sps:$4 sm:$0xff]   ;;  %v11752_v0 = vld [vmem:[#allocation2 + $0xc0] ss:$8 sps:$4 sm:$0xff]  }
 0x1b9   :  { %v2421_v34 = vpop.f32.mrf.mxu0  ;;  %4016 = vmatprep.subr.bf16.mxu1 %v11796_v51  ;;  %v12725_v57 = vld [vmem:[%s16967_s0 + $0x164] ss:$28 sps:$4 sm:$0xff]   ;;  %v11755_v51 = vld [vmem:[#allocation2 + $0xb0] ss:$8 sps:$4 sm:$0xff]  }
 0x1ba   :  { %v2582_v29 = vpop.f32.mrf.mxu1  ;;  %v2581_v5 = vadd.f32 %v2580_v4, %v2420_v49  ;;  %v2422_v43 = vadd.f32 %v2421_v34, %v13985_v35  ;;  %v14271_v59 = vpack.c.bf16 %v3334_v41, %v3330_v40  ;;  %v12723_v35 = vld [vmem:[%s16967_s0 + $0x128] ss:$28 sps:$4 sm:$0xff]   ;;  %v3337_v58 = vmax.f32 %v2579_v17, 0.0  ;;  %v11799_v41 = vld [vmem:[#allocation2 + $0x1d4] ss:$8 sps:$4 sm:$0xff]  }
 0x1bb   :  { %v2423_v9 = vpop.f32.mrf.mxu0  ;;  %3856 = vmatpush2.bf16.msra.mxu0 %v11746_v1  ;;  %v11797_v1 = vld [vmem:[#allocation2 + $0x1d0] ss:$8 sps:$4 sm:$0xff]  }
 0x1bc   :  { %v2584_v39 = vpop.f32.mrf.mxu1  ;;  %v2583_v20 = vadd.f32 %v2582_v29, %v2422_v43  ;;  %v2424_v56 = vadd.f32 %v2423_v9, %v13997_v55  ;;  %3857 = vmatprep.subr.bf16.mxu0 %v11751_v11  ;;  %v3338_v32 = vmax.f32 %v2581_v5, 0.0  ;;  %4017 = vmatpush2.bf16.msra.mxu1 %v11794_v16 }
 0x1bd   :  { %v2427_v44 = vpop.f32.mrf.mxu0  ;;  %3050 = vmatmul.mubr.bf16.gmra.mxu0 %v12723_v35  ;;  %4018 = vmatprep.subr.bf16.mxu1 %v11799_v41 }
 0x1be   :  { %v2588_v36 = vpop.f32.mrf.mxu1  ;;  %3211 = vmatmul.mubr.bf16.gmra.mxu1 %v12724_v37  ;;  %v3341_v3 = vmax.f32 %v2583_v20, 0.0  ;;  %v2585_v53 = vadd.f32 %v2584_v39, %v2424_v56  ;;  %v2428_v55 = vadd.f32 %v2427_v44, %v14009_v6  ;;  %3059 = vmatprep.mubr.bf16.mxu0 %v12725_v57  ;;  %v12726_v20 = vld [vmem:[%s16967_s0 + $0x160] ss:$28 sps:$4 sm:$0xff]  }
 0x1bf   :  { %3220 = vmatprep.mubr.bf16.mxu1 %v17049_v26  ;;  %v2429_v27 = vpop.f32.mrf.mxu0  ;;  %3858 = vmatpush2.bf16.msra.mxu0 %v11749_v24 }
 0x1c0   :  { %v2590_v31 = vpop.f32.mrf.mxu1  ;;  %v14285_v40 = vpack.c.bf16 %v3341_v3, %v3337_v58  ;;  %v3342_v47 = vmax.f32 %v2585_v53, 0.0  ;;  %v2589_v4 = vadd.f32 %v2588_v36, %v2428_v55  ;;  %v2430_v6 = vadd.f32 %v2429_v27, %v14015_v14  ;;  %3859 = vmatprep.subr.bf16.mxu0 %v11754_v21  ;;  %4019 = vmatpush2.bf16.msra.mxu1 %v11797_v1  ;;  %v11760_v14 = vld [vmem:[#allocation2 + $0xa4] ss:$8 sps:$4 sm:$0xff]   ;;  %v11758_v3 = vld [vmem:[#allocation2 + $0xa0] ss:$8 sps:$4 sm:$0xff]  }
 0x1c1   :  { %v2431_v17 = vpop.f32.mrf.mxu0  ;;  %v11763_v53 = vld [vmem:[#allocation2 + $0x94] ss:$8 sps:$4 sm:$0xff]  }
 0x1c2   :  { %v2592_v49 = vpop.f32.mrf.mxu1  ;;  %v2591_v11 = vadd.f32 %v2590_v31, %v2430_v6  ;;  %v2432_v34 = vadd.f32 %v2431_v17, %v14021_v30  ;;  %v14289_v29 = vpack.c.bf16 %v3342_v47, %v3338_v32  ;;  %v12727_v30 = vld [vmem:[%s16967_s0 + $0x168] ss:$28 sps:$4 sm:$0xff]   ;;  %v3345_v56 = vmax.f32 %v2589_v4, 0.0  ;;  %v11761_v17 = vld [vmem:[#allocation2 + $0x90] ss:$8 sps:$4 sm:$0xff]  }
 0x1c3   :  { %v2433_v5 = vpop.f32.mrf.mxu0  ;;  %3860 = vmatpush2.bf16.msra.mxu0 %v11752_v0  ;;  %v11802_v31 = vld [vmem:[#allocation2 + $0x1c4] ss:$8 sps:$4 sm:$0xff]  }
 0x1c4   :  { %v2594_v43 = vpop.f32.mrf.mxu1  ;;  %v2593_v9 = vadd.f32 %v2592_v49, %v2432_v34  ;;  %v2434_v39 = vadd.f32 %v2433_v5, %v14033_v54  ;;  %3861 = vmatprep.subr.bf16.mxu0 %v11757_v13  ;;  %v12728_v54 = vld [vmem:[%s16967_s0 + $0x19c] ss:$28 sps:$4 sm:$0xff]   ;;  %v3346_v35 = vmax.f32 %v2591_v11, 0.0  ;;  %4020 = vmatprep.subr.bf16.mxu1 %v11802_v31 }
 0x1c5   :  { %v2437_v24 = vpop.f32.mrf.mxu0  ;;  %3060 = vmatmul.mubr.bf16.gmra.mxu0 %v12726_v20 }
 0x1c6   :  { %v2598_v16 = vpop.f32.mrf.mxu1  ;;  %3221 = vmatmul.mubr.bf16.gmra.mxu1 %v12727_v30  ;;  %v3349_v21 = vmax.f32 %v2593_v9, 0.0  ;;  %v2595_v44 = vadd.f32 %v2594_v43, %v2434_v39  ;;  %v2438_v36 = vadd.f32 %v2437_v24, %v14045_v7  ;;  %3069 = vmatprep.mubr.bf16.mxu0 %v12728_v54  ;;  %v11800_v7 = vld [vmem:[#allocation2 + $0x1c0] ss:$8 sps:$4 sm:$0xff]   ;;  %v12729_v43 = vld [vmem:[%s16967_s0 + $0x198] ss:$28 sps:$4 sm:$0xff]  }
 0x1c7   :  { %3230 = vmatprep.mubr.bf16.mxu1 %v17049_v26  ;;  %v2439_v37 = vpop.f32.mrf.mxu0  ;;  %3862 = vmatpush2.bf16.msra.mxu0 %v11755_v51  ;;  %v11803_v24 = vld [vmem:[#allocation2 + $0x1b0] ss:$8 sps:$4 sm:$0xff]  }
 0x1c8   :  { %v2600_v58 = vpop.f32.mrf.mxu1  ;;  %v14303_v55 = vpack.c.bf16 %v3349_v21, %v3345_v56  ;;  %v3350_v57 = vmax.f32 %v2595_v44, 0.0  ;;  %v2599_v32 = vadd.f32 %v2598_v16, %v2438_v36  ;;  %v2440_v27 = vadd.f32 %v2439_v37, %v14051_v19  ;;  %3863 = vmatprep.subr.bf16.mxu0 %v11760_v14  ;;  %4021 = vmatpush2.bf16.msra.mxu1 %v11800_v7  ;;  %v11766_v19 = vld [vmem:[#allocation2 + $0x84] ss:$8 sps:$4 sm:$0xff]   ;;  %v11805_v16 = vld [vmem:[#allocation2 + $0x1b4] ss:$8 sps:$4 sm:$0xff]  }
 0x1c9   :  { %v2441_v0 = vpop.f32.mrf.mxu0  ;;  %v11764_v21 = vld [vmem:[#allocation2 + $0x80] ss:$8 sps:$4 sm:$0xff]   ;;  %4022 = vmatprep.subr.bf16.mxu1 %v11805_v16 }
 0x1ca   :  { %v2602_v13 = vpop.f32.mrf.mxu1  ;;  %v2601_v47 = vadd.f32 %v2600_v58, %v2440_v27  ;;  %v2442_v4 = vadd.f32 %v2441_v0, %v14057_v46  ;;  %v14307_v6 = vpack.c.bf16 %v3350_v57, %v3346_v35  ;;  %v12730_v46 = vld [vmem:[%s16967_s0 + $0x1a0] ss:$28 sps:$4 sm:$0xff]   ;;  %v3353_v51 = vmax.f32 %v2599_v32, 0.0  ;;  %v11808_v57 = vld [vmem:[#allocation2 + $0x1a4] ss:$8 sps:$4 sm:$0xff]  }
 0x1cb   :  { %v2443_v1 = vpop.f32.mrf.mxu0  ;;  %3864 = vmatpush2.bf16.msra.mxu0 %v11758_v3  ;;  %v11806_v7 = vld [vmem:[#allocation2 + $0x1a0] ss:$8 sps:$4 sm:$0xff]  }
 0x1cc   :  { %v2604_v41 = vpop.f32.mrf.mxu1  ;;  %v2603_v49 = vadd.f32 %v2602_v13, %v2442_v4  ;;  %v2444_v11 = vadd.f32 %v2443_v1, %v14069_v62  ;;  %3865 = vmatprep.subr.bf16.mxu0 %v11763_v53  ;;  %v12731_v62 = vld [vmem:[%s16967_s0 + $0x1d4] ss:$28 sps:$4 sm:$0xff]   ;;  %v3354_v20 = vmax.f32 %v2601_v47, 0.0  ;;  %4023 = vmatpush2.bf16.msra.mxu1 %v11803_v24 }
 0x1cd   :  { %v2447_v34 = vpop.f32.mrf.mxu0  ;;  %3070 = vmatmul.mubr.bf16.gmra.mxu0 %v12729_v43  ;;  %4024 = vmatprep.subr.bf16.mxu1 %v11808_v57  ;;  %v12732_v47 = vld [vmem:[%s16967_s0 + $0x1d0] ss:$28 sps:$4 sm:$0xff]  }
 0x1ce   :  { %v2608_v5 = vpop.f32.mrf.mxu1  ;;  %3231 = vmatmul.mubr.bf16.gmra.mxu1 %v12730_v46  ;;  %v3357_v9 = vmax.f32 %v2603_v49, 0.0  ;;  %v2605_v39 = vadd.f32 %v2604_v41, %v2444_v11  ;;  %v2448_v14 = vadd.f32 %v2447_v34, %v14081_v22  ;;  %3079 = vmatprep.mubr.bf16.mxu0 %v12731_v62 }
 0x1cf   :  { %3240 = vmatprep.mubr.bf16.mxu1 %v17049_v26  ;;  %v2449_v30 = vpop.f32.mrf.mxu0  ;;  %3866 = vmatpush2.bf16.msra.mxu0 %v11761_v17 }
 0x1d0   :  { %v2610_v56 = vpop.f32.mrf.mxu1  ;;  %v14321_v44 = vpack.c.bf16 %v3357_v9, %v3353_v51  ;;  %v3358_v36 = vmax.f32 %v2605_v39, 0.0  ;;  %v2609_v54 = vadd.f32 %v2608_v5, %v2448_v14  ;;  %v2450_v22 = vadd.f32 %v2449_v30, %v14084_v60  ;;  %3867 = vmatprep.subr.bf16.mxu0 %v11766_v19  ;;  %4025 = vmatpush2.bf16.msra.mxu1 %v11806_v7  ;;  %v17050_v39 = vld [vmem:[#allocation13_spill] sm:$0xff] }
 0x1d1   :  { %v2451_v35 = vpop.f32.mrf.mxu0 }
 0x1d2   :  { %v2612_v37 = vpop.f32.mrf.mxu1  ;;  %v2611_v58 = vadd.f32 %v2610_v56, %v2450_v22  ;;  %v2452_v3 = vadd.f32 %v2451_v35, %v14087_v45  ;;  %v14325_v53 = vpack.c.bf16 %v3358_v36, %v3354_v20  ;;  %v12733_v45 = vld [vmem:[%s16967_s0 + $0x1d8] ss:$28 sps:$4 sm:$0xff]   ;;  %v3361_v4 = vmax.f32 %v2609_v54, 0.0  ;;  %v12736_v35 = vld [vmem:[%s16967_s0 + $0x210] ss:$28 sps:$4 sm:$0xff]  }
 0x1d3   :  { %v2453_v32 = vpop.f32.mrf.mxu0  ;;  %3868 = vmatpush2.bf16.msra.mxu0 %v11764_v21  ;;  %v11811_v20 = vld [vmem:[#allocation2 + $0x194] ss:$8 sps:$4 sm:$0xff]   ;;  %v11809_v36 = vld [vmem:[#allocation2 + $0x190] ss:$8 sps:$4 sm:$0xff]  }
 0x1d4   :  { %v2614_v27 = vpop.f32.mrf.mxu1  ;;  %v2613_v31 = vadd.f32 %v2612_v37, %v2452_v3  ;;  %v2454_v0 = vadd.f32 %v2453_v32, %v14096_v12  ;;  %v12734_v12 = vld [vmem:[%s16967_s0 + $0x20c] ss:$28 sps:$4 sm:$0xff]   ;;  %v3362_v49 = vmax.f32 %v2611_v58, 0.0  ;;  %v17051_v56 = vld [vmem:[#allocation14_spill] sm:$0xff]  ;;  %v12737_v32 = vld [vmem:[%s16967_s0 + $0x244] ss:$28 sps:$4 sm:$0xff]   ;;  %4026 = vmatprep.subr.bf16.mxu1 %v11811_v20 }
 0x1d5   :  { %v2457_v60 = vpop.f32.mrf.mxu0  ;;  %3080 = vmatmul.mubr.bf16.gmra.mxu0 %v12732_v47  ;;  %4027 = vmatpush2.bf16.msra.mxu1 %v11809_v36 }
 0x1d6   :  { %v2618_v13 = vpop.f32.mrf.mxu1  ;;  %3241 = vmatmul.mubr.bf16.gmra.mxu1 %v12733_v45  ;;  %v3365_v1 = vmax.f32 %v2613_v31, 0.0  ;;  %v2615_v41 = vadd.f32 %v2614_v27, %v2454_v0  ;;  %v2458_v17 = vadd.f32 %v2457_v60, %v14105_v61  ;;  %3089 = vmatprep.mubr.bf16.mxu0 %v12734_v12  ;;  %v11814_v0 = vld [vmem:[#allocation2 + $0x184] ss:$8 sps:$4 sm:$0xff]  }
 0x1d7   :  { %3250 = vmatprep.mubr.bf16.mxu1 %v17049_v26  ;;  %v2459_v11 = vpop.f32.mrf.mxu0  ;;  %4028 = vmatprep.subr.bf16.mxu1 %v11814_v0 }
 0x1d8   :  { %v2620_v19 = vpop.f32.mrf.mxu1  ;;  %v14339_v34 = vpack.c.bf16 %v3365_v1, %v3361_v4  ;;  %v3366_v5 = vmax.f32 %v2615_v41, 0.0  ;;  %v2619_v43 = vadd.f32 %v2618_v13, %v2458_v17  ;;  %v2460_v46 = vadd.f32 %v2459_v11, %v14108_v50  ;;  %v12735_v50 = vld [vmem:[%s16967_s0 + $0x208] ss:$28 sps:$4 sm:$0xff]   ;;  %v17052_v17 = vld [vmem:[#allocation15_spill] sm:$0xff] }
 0x1d9   :  { %v2461_v51 = vpop.f32.mrf.mxu0 }
 0x1da   :  { %v2622_v9 = vpop.f32.mrf.mxu1  ;;  %v2621_v61 = vadd.f32 %v2620_v19, %v2460_v46  ;;  %v2462_v14 = vadd.f32 %v2461_v51, %v17050_v39  ;;  %v14343_v62 = vpack.c.bf16 %v3366_v5, %v3362_v49  ;;  %v3369_v37 = vmax.f32 %v2619_v43, 0.0  ;;  %v17053_v43 = vld [vmem:[#allocation16_spill] sm:$0xff] }
 0x1db   :  { %v2463_v24 = vpop.f32.mrf.mxu0  ;;  %v17054_v39 = vld [vmem:[#allocation8_spill] sm:$0xff] }
 0x1dc   :  { %v2624_v16 = vpop.f32.mrf.mxu1  ;;  %v2623_v30 = vadd.f32 %v2622_v9, %v2462_v14  ;;  %v2464_v21 = vadd.f32 %v2463_v24, %v17051_v56  ;;  %v3370_v27 = vmax.f32 %v2621_v61, 0.0  ;;  %v12739_v61 = vld [vmem:[%s16967_s0 + $0x248] ss:$28 sps:$4 sm:$0xff]   ;;  %v14371_v14 = vsub.s32 2, %v17054_v39  ;;  %v12740_v56 = vld [vmem:[%s16967_s0 + $0x27c] ss:$28 sps:$4 sm:$0xff]  }
 0x1dd   :  { %v2467_v54 = vpop.f32.mrf.mxu0  ;;  %3090 = vmatmul.mubr.bf16.gmra.mxu0 %v12735_v50 }
 0x1de   :  { %v2628_v22 = vpop.f32.mrf.mxu1  ;;  %3251 = vmatmul.mubr.bf16.gmra.mxu1 %v12736_v35  ;;  %v3373_v58 = vmax.f32 %v2623_v30, 0.0  ;;  %v2625_v3 = vadd.f32 %v2624_v16, %v2464_v21  ;;  %v2468_v57 = vadd.f32 %v2467_v54, %v14129_v10  ;;  %3099 = vmatprep.mubr.bf16.mxu0 %v12737_v32  ;;  %v11812_v10 = vld [vmem:[#allocation2 + $0x180] ss:$8 sps:$4 sm:$0xff]   ;;  %17055 = vst [vmem:[#allocation13_spill] sm:$0xff] %v14371_v14 }
 0x1df   :  { %3260 = vmatprep.mubr.bf16.mxu1 %v17049_v26  ;;  %v2469_v7 = vpop.f32.mrf.mxu0  ;;  %4029 = vmatpush2.bf16.msra.mxu1 %v11812_v10 }
 0x1e0   :  { %v2630_v31 = vpop.f32.mrf.mxu1  ;;  %v14357_v60 = vpack.c.bf16 %v3373_v58, %v3369_v37  ;;  %v3374_v13 = vmax.f32 %v2625_v3, 0.0  ;;  %v2629_v47 = vadd.f32 %v2628_v22, %v2468_v57  ;;  %v2470_v45 = vadd.f32 %v2469_v7, %v14132_v18  ;;  %v12738_v18 = vld [vmem:[%s16967_s0 + $0x240] ss:$28 sps:$4 sm:$0xff]   ;;  %v17057_v58 = vld [vmem:[#allocation17_spill] sm:$0xff] }
 0x1e1   :  { %v2471_v4 = vpop.f32.mrf.mxu0  ;;  %v14379_v22 = vsub.s32 3, %v17054_v39 }
 0x1e2   :  { %v2632_v1 = vpop.f32.mrf.mxu1  ;;  %v2631_v41 = vadd.f32 %v2630_v31, %v2470_v45  ;;  %v2472_v12 = vadd.f32 %v2471_v4, %v17052_v17  ;;  %v14361_v49 = vpack.c.bf16 %v3374_v13, %v3370_v27  ;;  %v3377_v24 = vmax.f32 %v2629_v47, 0.0  ;;  %v12741_v27 = vld [vmem:[%s16970_s3] sm:$0xf]  ;;  %v12742_v4 = vld [vmem:[%s16967_s0 + $0x278] ss:$28 sps:$4 sm:$0xff]  }
 0x1e3   :  { %v2473_v11 = vpop.f32.mrf.mxu0  ;;  %17056 = vst [vmem:[#allocation14_spill] sm:$0xff] %v14379_v22  ;;  %v14392_v7 = vrot.slane %v12741_v27, %v14371_v14  ;;  %v14397_v47 = vrot.slane %v12741_v27, %v14379_v22  ;;  %v17058_v17 = vld [vmem:[#allocation11_spill] sm:$0xff] }
 0x1e4   :  { %v2634_v19 = vpop.f32.mrf.mxu1  ;;  %v2633_v5 = vadd.f32 %v2632_v1, %v2472_v12  ;;  %v2474_v46 = vadd.f32 %v2473_v11, %v17053_v43  ;;  %v3378_v21 = vmax.f32 %v2631_v41, 0.0  ;;  %v12743_v1 = vld [vmem:[%s16967_s0 + $0x280] ss:$28 sps:$4 sm:$0xff]  }
 0x1e5   :  { %v2477_v51 = vpop.f32.mrf.mxu0  ;;  %3100 = vmatmul.mubr.bf16.gmra.mxu0 %v12738_v18 }
 0x1e6   :  { %v2638_v9 = vpop.f32.mrf.mxu1  ;;  %3261 = vmatmul.mubr.bf16.gmra.mxu1 %v12739_v61  ;;  %v3381_v16 = vmax.f32 %v2633_v5, 0.0  ;;  %v2635_v20 = vadd.f32 %v2634_v19, %v2474_v46  ;;  %v2478_v30 = vadd.f32 %v2477_v51, %v14153_v42  ;;  %3109 = vmatprep.mubr.bf16.mxu0 %v12740_v56  ;;  %v12744_v56 = vld [vmem:[%s16967_s0 + $0x2b8] ss:$0 sps:$4 sm:$0xff]  }
 0x1e7   :  { %3270 = vmatprep.mubr.bf16.mxu1 %v17049_v26  ;;  %v2479_v36 = vpop.f32.mrf.mxu0 }
 0x1e8   :  { %v2640_v54 = vpop.f32.mrf.mxu1  ;;  %v14381_v50 = vpack.c.bf16 %v3381_v16, %v3377_v24  ;;  %v3382_v35 = vmax.f32 %v2635_v20, 0.0  ;;  %v14383_v37 = vadd.f32 %v2638_v9, %v2478_v30  ;;  %v2480_v42 = vadd.f32 %v2479_v36, %v17057_v58  ;;  %v17059_v30 = vld [vmem:[#allocation12_spill] sm:$0xff] }
 0x1e9   :  { %v2481_v3 = vpop.f32.mrf.mxu0 }
 0x1ea   :  { %v2642_v57 = vpop.f32.mrf.mxu1  ;;  %v14386_v32 = vadd.f32 %v2640_v54, %v2480_v42  ;;  %v14394_v31 = vpack.c.bf16 %v3382_v35, %v3378_v21 }
 0x1eb   :  { %v2482_v0 = vpop.f32.mrf.mxu0 }
 0x1ec   :  { %v2643_v13 = vpop.f32.mrf.mxu1 }
 0x1ed   :  { %v2679_v45 = vpop.f32.mrf.mxu0  ;;  %3110 = vmatmul.mubr.bf16.gmra.mxu0 %v12742_v4 }
 0x1ee   :  { %v2840_v10 = vpop.f32.mrf.mxu1  ;;  %3271 = vmatmul.mubr.bf16.gmra.mxu1 %v12743_v1  ;;  %v2680_v41 = vadd.f32 %v2679_v45, %v14392_v7  ;;  %3119 = vmatprep.mubr.bf16.mxu0 %v17058_v17 }
 0x1ef   :  { %3280 = vmatprep.mubr.bf16.mxu1 %v17049_v26  ;;  %v2681_v12 = vpop.f32.mrf.mxu0 }
 0x1f0   :  { %v2842_v11 = vpop.f32.mrf.mxu1  ;;  %v14408_v19 = vadd.f32 %v2840_v10, %v2680_v41  ;;  %v2682_v5 = vadd.f32 %v2681_v12, %v14397_v47 }
 0x1f1   :  { %v2683_v43 = vpop.f32.mrf.mxu0 }
 0x1f2   :  { %v2844_v46 = vpop.f32.mrf.mxu1  ;;  %v14411_v51 = vadd.f32 %v2842_v11, %v2682_v5  ;;  %v2684_v9 = vadd.f32 %v2683_v43, %v14392_v7 }
 0x1f3   :  { %v14414_v18 = vpop.f32.mrf.mxu0 }
 0x1f4   :  { %v14416_v61 = vpop.f32.mrf.mxu1  ;;  %v14418_v24 = vadd.f32 %v2844_v46, %v2684_v9 }
 0x1f5   :  { %v2689_v16 = vpop.f32.mrf.mxu0  ;;  %3120 = vmatmul.mubr.bf16.gmra.mxu0 %v17059_v30 }
 0x1f6   :  { %v2850_v20 = vpop.f32.mrf.mxu1  ;;  %3281 = vmatmul.mubr.bf16.gmra.mxu1 %v12744_v56  ;;  %v2690_v21 = vadd.f32 %v2689_v16, %v14392_v7  ;;  %3869 = vmatprep.mubr.bf16.mxu0 %v14181_v52 }
 0x1f7   :  { %v2691_v36 = vpop.f32.mrf.mxu0 }
 0x1f8   :  { %v2852_v54 = vpop.f32.mrf.mxu1  ;;  %v14426_v35 = vadd.f32 %v2850_v20, %v2690_v21  ;;  %v2692_v58 = vadd.f32 %v2691_v36, %v14397_v47 }
 0x1f9   :  { %v2693_v42 = vpop.f32.mrf.mxu0 }
 0x1fa   :  { %v2854_v3 = vpop.f32.mrf.mxu1  ;;  %v14429_v57 = vadd.f32 %v2852_v54, %v2692_v58  ;;  %v2694_v27 = vadd.f32 %v2693_v42, %v14392_v7 }
 0x1fb   :  { %v14432_v0 = vpop.f32.mrf.mxu0 }
 0x1fc   :  { %v14434_v13 = vpop.f32.mrf.mxu1  ;;  %v14436_v45 = vadd.f32 %v2854_v3, %v2694_v27 }
 0x1fd   :  { %v2699_v10 = vpop.f32.mrf.mxu0  ;;  %3870 = vmatmul.mubr.bf16.vlgmr.msra.gmra.mxu0 %v14177_v23 }
 0x1fe   :  { %v2860_v52 = vpop.f32.mrf.mxu1  ;;  %v2700_v4 = vadd.f32 %v2699_v10, %v14392_v7  ;;  %3879 = vmatprep.mubr.bf16.mxu0 %v14199_v15 }
 0x1ff   :  { %v2701_v1 = vpop.f32.mrf.mxu0 }
 0x200   :  { %v2862_v41 = vpop.f32.mrf.mxu1  ;;  %v14441_v17 = vadd.f32 %v2860_v52, %v2700_v4  ;;  %v2702_v12 = vadd.f32 %v2701_v1, %v14397_v47 }
 0x201   :  { %v2703_v11 = vpop.f32.mrf.mxu0 }
 0x202   :  { %v2864_v5 = vpop.f32.mrf.mxu1  ;;  %v14444_v43 = vadd.f32 %v2862_v41, %v2702_v12  ;;  %v2704_v46 = vadd.f32 %v2703_v11, %v14392_v7 }
 0x203   :  { %v14447_v9 = vpop.f32.mrf.mxu0 }
 0x204   :  { %v14449_v16 = vpop.f32.mrf.mxu1  ;;  %v14451_v23 = vadd.f32 %v2864_v5, %v2704_v46 }
 0x205   :  { %v2709_v20 = vpop.f32.mrf.mxu0  ;;  %3880 = vmatmul.mubr.bf16.gmra.mxu0 %v14195_v28 }
 0x206   :  { %v2870_v15 = vpop.f32.mrf.mxu1  ;;  %v2710_v30 = vadd.f32 %v2709_v20, %v14392_v7  ;;  %3889 = vmatprep.mubr.bf16.mxu0 %v14217_v48 }
 0x207   :  { %v2711_v56 = vpop.f32.mrf.mxu0 }
 0x208   :  { %v2872_v21 = vpop.f32.mrf.mxu1  ;;  %v14456_v36 = vadd.f32 %v2870_v15, %v2710_v30  ;;  %v2712_v54 = vadd.f32 %v2711_v56, %v14397_v47 }
 0x209   :  { %v2713_v58 = vpop.f32.mrf.mxu0 }
 0x20a   :  { %v2874_v42 = vpop.f32.mrf.mxu1  ;;  %v14459_v3 = vadd.f32 %v2872_v21, %v2712_v54  ;;  %v2714_v27 = vadd.f32 %v2713_v58, %v14392_v7 }
 0x20b   :  { %v14462_v10 = vpop.f32.mrf.mxu0 }
 0x20c   :  { %v14464_v52 = vpop.f32.mrf.mxu1  ;;  %v14466_v28 = vadd.f32 %v2874_v42, %v2714_v27 }
 0x20d   :  { %v2719_v4 = vpop.f32.mrf.mxu0  ;;  %3890 = vmatmul.mubr.bf16.gmra.mxu0 %v14213_v63 }
 0x20e   :  { %v2880_v48 = vpop.f32.mrf.mxu1  ;;  %v2720_v1 = vadd.f32 %v2719_v4, %v14392_v7  ;;  %3899 = vmatprep.mubr.bf16.mxu0 %v14235_v8 }
 0x20f   :  { %v2721_v41 = vpop.f32.mrf.mxu0 }
 0x210   :  { %v2882_v12 = vpop.f32.mrf.mxu1  ;;  %v14471_v11 = vadd.f32 %v2880_v48, %v2720_v1  ;;  %v2722_v5 = vadd.f32 %v2721_v41, %v14397_v47 }
 0x211   :  { %v2723_v46 = vpop.f32.mrf.mxu0 }
 0x212   :  { %v2884_v20 = vpop.f32.mrf.mxu1  ;;  %v14474_v15 = vadd.f32 %v2882_v12, %v2722_v5  ;;  %v2724_v30 = vadd.f32 %v2723_v46, %v14392_v7 }
 0x213   :  { %v14477_v56 = vpop.f32.mrf.mxu0 }
 0x214   :  { %v14479_v21 = vpop.f32.mrf.mxu1  ;;  %v14481_v63 = vadd.f32 %v2884_v20, %v2724_v30 }
 0x215   :  { %v2729_v54 = vpop.f32.mrf.mxu0  ;;  %3900 = vmatmul.mubr.bf16.gmra.mxu0 %v14231_v33 }
 0x216   :  { %v2890_v8 = vpop.f32.mrf.mxu1  ;;  %v2730_v58 = vadd.f32 %v2729_v54, %v14392_v7  ;;  %3909 = vmatprep.mubr.bf16.mxu0 %v14253_v38 }
 0x217   :  { %v2731_v42 = vpop.f32.mrf.mxu0 }
 0x218   :  { %v2892_v27 = vpop.f32.mrf.mxu1  ;;  %v14486_v4 = vadd.f32 %v2890_v8, %v2730_v58  ;;  %v2732_v48 = vadd.f32 %v2731_v42, %v14397_v47 }
 0x219   :  { %v2733_v1 = vpop.f32.mrf.mxu0 }
 0x21a   :  { %v2894_v41 = vpop.f32.mrf.mxu1  ;;  %v14489_v12 = vadd.f32 %v2892_v27, %v2732_v48  ;;  %v2734_v5 = vadd.f32 %v2733_v1, %v14392_v7 }
 0x21b   :  { %v14492_v46 = vpop.f32.mrf.mxu0 }
 0x21c   :  { %v14494_v20 = vpop.f32.mrf.mxu1  ;;  %v14496_v33 = vadd.f32 %v2894_v41, %v2734_v5 }
 0x21d   :  { %v2739_v30 = vpop.f32.mrf.mxu0  ;;  %3910 = vmatmul.mubr.bf16.gmra.mxu0 %v14249_v25 }
 0x21e   :  { %v2900_v38 = vpop.f32.mrf.mxu1  ;;  %v2740_v54 = vadd.f32 %v2739_v30, %v14392_v7  ;;  %3919 = vmatprep.mubr.bf16.mxu0 %v14271_v59 }
 0x21f   :  { %v2741_v8 = vpop.f32.mrf.mxu0 }
 0x220   :  { %v2902_v58 = vpop.f32.mrf.mxu1  ;;  %v14501_v42 = vadd.f32 %v2900_v38, %v2740_v54  ;;  %v2742_v27 = vadd.f32 %v2741_v8, %v14397_v47 }
 0x221   :  { %v2743_v48 = vpop.f32.mrf.mxu0 }
 0x222   :  { %v2904_v1 = vpop.f32.mrf.mxu1  ;;  %v14504_v39 = vadd.f32 %v2902_v58, %v2742_v27  ;;  %v2744_v41 = vadd.f32 %v2743_v48, %v14392_v7 }
 0x223   :  { %v14507_v5 = vpop.f32.mrf.mxu0 }
 0x224   :  { %v14509_v14 = vpop.f32.mrf.mxu1  ;;  %v14511_v25 = vadd.f32 %v2904_v1, %v2744_v41 }
 0x225   :  { %v2749_v30 = vpop.f32.mrf.mxu0  ;;  %3920 = vmatmul.mubr.bf16.gmra.mxu0 %v14267_v2 }
 0x226   :  { %17060 = vst [vmem:[#allocation15_spill] sm:$0xff] %v14511_v25  ;;  %v2910_v59 = vpop.f32.mrf.mxu1  ;;  %v2750_v38 = vadd.f32 %v2749_v30, %v14392_v7  ;;  %3929 = vmatprep.mubr.bf16.mxu0 %v14289_v29 }
 0x227   :  { %v2751_v54 = vpop.f32.mrf.mxu0 }
 0x228   :  { %v2912_v8 = vpop.f32.mrf.mxu1  ;;  %v14516_v58 = vadd.f32 %v2910_v59, %v2750_v38  ;;  %v2752_v27 = vadd.f32 %v2751_v54, %v14397_v47 }
 0x229   :  { %v2753_v48 = vpop.f32.mrf.mxu0 }
 0x22a   :  { %17061 = vst [vmem:[#allocation16_spill] sm:$0xff] %v14516_v58  ;;  %v2914_v22 = vpop.f32.mrf.mxu1  ;;  %v14519_v26 = vadd.f32 %v2912_v8, %v2752_v27  ;;  %v2754_v1 = vadd.f32 %v2753_v48, %v14392_v7 }
 0x22b   :  { %v14522_v41 = vpop.f32.mrf.mxu0 }
 0x22c   :  { %17062 = vst [vmem:[#allocation17_spill] sm:$0xff] %v14519_v26  ;;  %v14524_v25 = vpop.f32.mrf.mxu1  ;;  %v14526_v2 = vadd.f32 %v2914_v22, %v2754_v1 }
 0x22d   :  { %v2759_v30 = vpop.f32.mrf.mxu0  ;;  %3930 = vmatmul.mubr.bf16.gmra.mxu0 %v14285_v40 }
 0x22e   :  { %17063 = vst [vmem:[#allocation11_spill] sm:$0xff] %v14526_v2  ;;  %v2920_v29 = vpop.f32.mrf.mxu1  ;;  %v2760_v59 = vadd.f32 %v2759_v30, %v14392_v7  ;;  %3939 = vmatprep.mubr.bf16.mxu0 %v14307_v6 }
 0x22f   :  { %v2761_v38 = vpop.f32.mrf.mxu0 }
 0x230   :  { %v2922_v54 = vpop.f32.mrf.mxu1  ;;  %v14531_v8 = vadd.f32 %v2920_v29, %v2760_v59  ;;  %v2762_v27 = vadd.f32 %v2761_v38, %v14397_v47 }
 0x231   :  { %v2763_v48 = vpop.f32.mrf.mxu0 }
 0x232   :  { %17064 = vst [vmem:[#allocation12_spill] sm:$0xff] %v14531_v8  ;;  %v2924_v26 = vpop.f32.mrf.mxu1  ;;  %v14534_v58 = vadd.f32 %v2922_v54, %v2762_v27  ;;  %v2764_v22 = vadd.f32 %v2763_v48, %v14392_v7 }
 0x233   :  { %v14537_v1 = vpop.f32.mrf.mxu0 }
 0x234   :  { %17065 = vst [vmem:[#allocation18_spill] sm:$0xff] %v14534_v58  ;;  %v14539_v2 = vpop.f32.mrf.mxu1  ;;  %v14541_v40 = vadd.f32 %v2924_v26, %v2764_v22 }
 0x235   :  { %v2769_v30 = vpop.f32.mrf.mxu0  ;;  %3940 = vmatmul.mubr.bf16.gmra.mxu0 %v14303_v55 }
 0x236   :  { %17066 = vst [vmem:[#allocation19_spill] sm:$0xff] %v14541_v40  ;;  %v2930_v6 = vpop.f32.mrf.mxu1  ;;  %v2770_v29 = vadd.f32 %v2769_v30, %v14392_v7  ;;  %3949 = vmatprep.mubr.bf16.mxu0 %v14325_v53 }
 0x237   :  { %v2771_v59 = vpop.f32.mrf.mxu0 }
 0x238   :  { %v2932_v38 = vpop.f32.mrf.mxu1  ;;  %v14546_v54 = vadd.f32 %v2930_v6, %v2770_v29  ;;  %v2772_v27 = vadd.f32 %v2771_v59, %v14397_v47 }
 0x239   :  { %v2773_v48 = vpop.f32.mrf.mxu0 }
 0x23a   :  { %17067 = vst [vmem:[#allocation20_spill] sm:$0xff] %v14546_v54  ;;  %v2934_v58 = vpop.f32.mrf.mxu1  ;;  %v14549_v8 = vadd.f32 %v2932_v38, %v2772_v27  ;;  %v2774_v26 = vadd.f32 %v2773_v48, %v14392_v7 }
 0x23b   :  { %v14552_v22 = vpop.f32.mrf.mxu0 }
 0x23c   :  { %17068 = vst [vmem:[#allocation21_spill] sm:$0xff] %v14549_v8  ;;  %v14554_v40 = vpop.f32.mrf.mxu1  ;;  %v14556_v55 = vadd.f32 %v2934_v58, %v2774_v26 }
 0x23d   :  { %v2779_v30 = vpop.f32.mrf.mxu0  ;;  %3950 = vmatmul.mubr.bf16.gmra.mxu0 %v14321_v44 }
 0x23e   :  { %17069 = vst [vmem:[#allocation22_spill] sm:$0xff] %v14556_v55  ;;  %v2940_v53 = vpop.f32.mrf.mxu1  ;;  %v2780_v6 = vadd.f32 %v2779_v30, %v14392_v7  ;;  %3959 = vmatprep.mubr.bf16.mxu0 %v14343_v62 }
 0x23f   :  { %v2781_v29 = vpop.f32.mrf.mxu0 }
 0x240   :  { %v2942_v59 = vpop.f32.mrf.mxu1  ;;  %v14561_v38 = vadd.f32 %v2940_v53, %v2780_v6  ;;  %v2782_v27 = vadd.f32 %v2781_v29, %v14397_v47 }
 0x241   :  { %v2783_v48 = vpop.f32.mrf.mxu0 }
 0x242   :  { %17070 = vst [vmem:[#allocation23_spill] sm:$0xff] %v14561_v38  ;;  %v2944_v8 = vpop.f32.mrf.mxu1  ;;  %v14564_v54 = vadd.f32 %v2942_v59, %v2782_v27  ;;  %v2784_v58 = vadd.f32 %v2783_v48, %v14392_v7 }
 0x243   :  { %v14567_v26 = vpop.f32.mrf.mxu0 }
 0x244   :  { %17071 = vst [vmem:[#allocation24_spill] sm:$0xff] %v14564_v54  ;;  %v14569_v55 = vpop.f32.mrf.mxu1  ;;  %v14571_v44 = vadd.f32 %v2944_v8, %v2784_v58 }
 0x245   :  { %v2789_v30 = vpop.f32.mrf.mxu0  ;;  %3960 = vmatmul.mubr.bf16.gmra.mxu0 %v14339_v34 }
 0x246   :  { %17072 = vst [vmem:[#allocation25_spill] sm:$0xff] %v14571_v44  ;;  %v2950_v62 = vpop.f32.mrf.mxu1  ;;  %v2790_v53 = vadd.f32 %v2789_v30, %v14392_v7  ;;  %3969 = vmatprep.mubr.bf16.mxu0 %v14361_v49  ;;  %v11815_v49 = vld [vmem:[%s16973_s6 + $0x78] sm:$0xff]  }
 0x247   :  { %v2791_v6 = vpop.f32.mrf.mxu0  ;;  %v11816_v30 = vld [vmem:[%s16973_s6 + $0x38] sm:$0xff]   ;;  %10966 = vmatprep.subr.bf16.mxu0 %v11815_v49  ;;  %v3385_v49 = vmax.f32 %v14383_v37, 0.0  ;;  %v11818_v37 = vld [vmem:[%s16973_s6 + $0x30] sm:$0xff]  }
 0x248   :  { %v2952_v29 = vpop.f32.mrf.mxu1  ;;  %v14576_v59 = vadd.f32 %v2950_v62, %v2790_v53  ;;  %v2792_v27 = vadd.f32 %v2791_v6, %v14397_v47  ;;  %10967 = vmatpush3.bf16.msra.mxu0 %v11816_v30 }
 0x249   :  { %v2793_v48 = vpop.f32.mrf.mxu0 }
 0x24a   :  { %17073 = vst [vmem:[#allocation26_spill] sm:$0xff] %v14576_v59  ;;  %v2954_v54 = vpop.f32.mrf.mxu1  ;;  %v14579_v38 = vadd.f32 %v2952_v29, %v2792_v27  ;;  %v2794_v8 = vadd.f32 %v2793_v48, %v14392_v7  ;;  %v3386_v27 = vmax.f32 %v14386_v32, 0.0 }
 0x24b   :  { %v14582_v58 = vpop.f32.mrf.mxu0 }
 0x24c   :  { %17074 = vst [vmem:[#allocation27_spill] sm:$0xff] %v14579_v38  ;;  %17075 = vst [vmem:[#allocation28_spill] sm:$0xff] %v14582_v58  ;;  %v14584_v44 = vpop.f32.mrf.mxu1  ;;  %v14586_v34 = vadd.f32 %v2954_v54, %v2794_v8  ;;  %v3438_v58 = vpack.c.bf16 %v3386_v27, %v3386_v27 }
 0x24d   :  { %17076 = vst [vmem:[#allocation29_spill] sm:$0xff] %v14584_v44  ;;  %v2799_v62 = vpop.f32.mrf.mxu0  ;;  %3970 = vmatmul.mubr.bf16.gmra.mxu0 %v14357_v60 }
 0x24e   :  { %17077 = vst [vmem:[#allocation30_spill] sm:$0xff] %v14586_v34  ;;  %v2960_v53 = vpop.f32.mrf.mxu1  ;;  %v2800_v6 = vadd.f32 %v2799_v62, %v14392_v7  ;;  %3979 = vmatprep.mubr.bf16.mxu0 %v14394_v31  ;;  %v2686_v31 = vadd.f32 %v14414_v18, %v14397_v47 }
 0x24f   :  { %v2801_v29 = vpop.f32.mrf.mxu0 }
 0x250   :  { %v2962_v54 = vpop.f32.mrf.mxu1  ;;  %v14598_v48 = vadd.f32 %v2960_v53, %v2800_v6  ;;  %v2802_v8 = vadd.f32 %v2801_v29, %v14397_v47 }
 0x251   :  { %v2803_v34 = vpop.f32.mrf.mxu0 }
 0x252   :  { %v2964_v44 = vpop.f32.mrf.mxu1  ;;  %v14601_v38 = vadd.f32 %v2962_v54, %v2802_v8 }
 0x253   :  { %v2804_v59 = vpop.f32.mrf.mxu0 }
 0x254   :  { %17078 = vst [vmem:[#allocation31_spill] sm:$0xff] %v14601_v38  ;;  %v2965_v60 = vpop.f32.mrf.mxu1  ;;  %v11817_v59 = vld [vmem:[%s16973_s6 + $0x70] sm:$0xff]  }
 0x255   :  { %v3001_v7 = vpop.f32.mrf.mxu0  ;;  %3980 = vmatmul.mubr.bf16.gmra.mxu0 %v14381_v50  ;;  %v2847_v50 = vadd.f32 %v14416_v61, %v2686_v31  ;;  %10968 = vmatprep.subr.bf16.mxu0 %v11817_v59  ;;  %v2696_v60 = vadd.f32 %v14432_v0, %v14397_v47 }
 0x256   :  { %v3162_v62 = vpop.f32.mrf.mxu1  ;;  %v3002_v32 = vadd.f32 %v3001_v7, %v14408_v19  ;;  %3989 = vmatprep.mubr.bf16.mxu0 %v3438_v58  ;;  %v3437_v19 = vpack.c.bf16 %v3385_v49, %v3385_v49  ;;  %10969 = vmatpush3.bf16.msra.mxu0 %v11818_v37 }
 0x257   :  { %v3003_v30 = vpop.f32.mrf.mxu0 }
 0x258   :  { %v3164_v34 = vpop.f32.mrf.mxu1  ;;  %v3004_v44 = vadd.f32 %v3003_v30, %v14411_v51  ;;  %v3163_v29 = vadd.f32 %v3162_v62, %v3002_v32 }
 0x259   :  { %v3005_v53 = vpop.f32.mrf.mxu0 }
 0x25a   :  { %v3166_v6 = vpop.f32.mrf.mxu1  ;;  %v3006_v18 = vadd.f32 %v3005_v53, %v14418_v24  ;;  %v3165_v51 = vadd.f32 %v3164_v34, %v3004_v44  ;;  %v3291_v62 = vmax.f32 %v3163_v29, 0.0 }
 0x25b   :  { %v3007_v58 = vpop.f32.mrf.mxu0 }
 0x25c   :  { %v3168_v54 = vpop.f32.mrf.mxu1  ;;  %v3167_v27 = vadd.f32 %v3166_v6, %v3006_v18  ;;  %v3008_v8 = vadd.f32 %v3007_v58, %v2847_v50  ;;  %v3292_v49 = vmax.f32 %v3165_v51, 0.0  ;;  %v2857_v50 = vadd.f32 %v14434_v13, %v2696_v60 }
 0x25d   :  { %v3011_v7 = vpop.f32.mrf.mxu0  ;;  %3990 = vmatmul.mubr.bf16.gmra.mxu0 %v3437_v19  ;;  %v2706_v51 = vadd.f32 %v14447_v9, %v14397_v47 }
 0x25e   :  { %v3172_v61 = vpop.f32.mrf.mxu1  ;;  %v3295_v24 = vmax.f32 %v3167_v27, 0.0  ;;  %v3169_v31 = vadd.f32 %v3168_v54, %v3008_v8  ;;  %v3012_v32 = vadd.f32 %v3011_v7, %v14426_v35 }
 0x25f   :  { %v3013_v30 = vpop.f32.mrf.mxu0 }
 0x260   :  { %v3174_v59 = vpop.f32.mrf.mxu1  ;;  %v3391_v53 = vpack.c.bf16 %v3295_v24, %v3291_v62  ;;  %v3296_v38 = vmax.f32 %v3169_v31, 0.0  ;;  %v3014_v34 = vadd.f32 %v3013_v30, %v14429_v57  ;;  %v3173_v0 = vadd.f32 %v3172_v61, %v3012_v32 }
 0x261   :  { %v3015_v44 = vpop.f32.mrf.mxu0 }
 0x262   :  { %v3176_v6 = vpop.f32.mrf.mxu1  ;;  %v3016_v18 = vadd.f32 %v3015_v44, %v14436_v45  ;;  %v3392_v37 = vpack.c.bf16 %v3296_v38, %v3292_v49  ;;  %v3175_v58 = vadd.f32 %v3174_v59, %v3014_v34  ;;  %v3299_v57 = vmax.f32 %v3173_v0, 0.0  ;;  %v11819_v45 = vld [vmem:[%s16973_s6 + $0x68] sm:$0xff]  }
 0x263   :  { %v3017_v29 = vpop.f32.mrf.mxu0  ;;  %v11820_v38 = vld [vmem:[%s16973_s6 + $0x28] sm:$0xff]   ;;  %10970 = vmatprep.subr.bf16.mxu0 %v11819_v45 }
 0x264   :  { %v3178_v19 = vpop.f32.mrf.mxu1  ;;  %v3177_v54 = vadd.f32 %v3176_v6, %v3016_v18  ;;  %v3018_v35 = vadd.f32 %v3017_v29, %v2857_v50  ;;  %4030 = vmatprep.mubr.bf16.mxu1 %v3392_v37  ;;  %v3300_v24 = vmax.f32 %v3175_v58, 0.0  ;;  %10971 = vmatpush3.bf16.msra.mxu0 %v11820_v38  ;;  %v2716_v37 = vadd.f32 %v14462_v10, %v14397_v47 }
 0x265   :  { %v3021_v27 = vpop.f32.mrf.mxu0  ;;  %4031 = vmatmul.mubr.bf16.vlgmr.msra.gmra.mxu1 %v3391_v53 }
 0x266   :  { %v3182_v8 = vpop.f32.mrf.mxu1  ;;  %v3303_v7 = vmax.f32 %v3177_v54, 0.0  ;;  %v3179_v62 = vadd.f32 %v3178_v19, %v3018_v35  ;;  %v3022_v13 = vadd.f32 %v3021_v27, %v14441_v17  ;;  %v2867_v17 = vadd.f32 %v14449_v16, %v2706_v51 }
 0x267   :  { %v3023_v60 = vpop.f32.mrf.mxu0 }
 0x268   :  { %v3184_v61 = vpop.f32.mrf.mxu1  ;;  %v3395_v9 = vpack.c.bf16 %v3303_v7, %v3299_v57  ;;  %v3304_v31 = vmax.f32 %v3179_v62, 0.0  ;;  %v3024_v32 = vadd.f32 %v3023_v60, %v14444_v43  ;;  %v3183_v49 = vadd.f32 %v3182_v8, %v3022_v13  ;;  %v11821_v60 = vld [vmem:[%s16973_s6 + $0x60] sm:$0xff]  }
 0x269   :  { %v3025_v30 = vpop.f32.mrf.mxu0  ;;  %v2877_v13 = vadd.f32 %v14464_v52, %v2716_v37  ;;  %10972 = vmatprep.subr.bf16.mxu0 %v11821_v60  ;;  %v2726_v52 = vadd.f32 %v14477_v56, %v14397_v47 }
 0x26a   :  { %v3186_v59 = vpop.f32.mrf.mxu1  ;;  %v3026_v53 = vadd.f32 %v3025_v30, %v14451_v23  ;;  %v3396_v34 = vpack.c.bf16 %v3304_v31, %v3300_v24  ;;  %v3185_v50 = vadd.f32 %v3184_v61, %v3024_v32  ;;  %v3307_v19 = vmax.f32 %v3183_v49, 0.0 }
 0x26b   :  { %v3027_v44 = vpop.f32.mrf.mxu0  ;;  %v2887_v56 = vadd.f32 %v14479_v21, %v2726_v52 }
 0x26c   :  { %v3188_v6 = vpop.f32.mrf.mxu1  ;;  %v3187_v0 = vadd.f32 %v3186_v59, %v3026_v53  ;;  %v3028_v18 = vadd.f32 %v3027_v44, %v2867_v17  ;;  %4040 = vmatprep.mubr.bf16.mxu1 %v3396_v34  ;;  %v3308_v51 = vmax.f32 %v3185_v50, 0.0 }
 0x26d   :  { %v3031_v43 = vpop.f32.mrf.mxu0  ;;  %4041 = vmatmul.mubr.bf16.gmra.mxu1 %v3395_v9 }
 0x26e   :  { %v3192_v29 = vpop.f32.mrf.mxu1  ;;  %v3311_v58 = vmax.f32 %v3187_v0, 0.0  ;;  %v3189_v54 = vadd.f32 %v3188_v6, %v3028_v18  ;;  %v3032_v16 = vadd.f32 %v3031_v43, %v14456_v36 }
 0x26f   :  { %v3033_v35 = vpop.f32.mrf.mxu0 }
 0x270   :  { %v3194_v23 = vpop.f32.mrf.mxu1  ;;  %v3399_v27 = vpack.c.bf16 %v3311_v58, %v3307_v19  ;;  %v3312_v8 = vmax.f32 %v3189_v54, 0.0  ;;  %v3034_v57 = vadd.f32 %v3033_v35, %v14459_v3  ;;  %v3193_v10 = vadd.f32 %v3192_v29, %v3032_v16  ;;  %v11822_v3 = vld [vmem:[%s16973_s6 + $0x20] sm:$0xff]  }
 0x271   :  { %v3035_v7 = vpop.f32.mrf.mxu0  ;;  %10973 = vmatpush3.bf16.msra.mxu0 %v11822_v3 }
 0x272   :  { %v3196_v62 = vpop.f32.mrf.mxu1  ;;  %v3036_v45 = vadd.f32 %v3035_v7, %v14466_v28  ;;  %v3400_v38 = vpack.c.bf16 %v3312_v8, %v3308_v51  ;;  %v3195_v24 = vadd.f32 %v3194_v23, %v3034_v57  ;;  %v3315_v30 = vmax.f32 %v3193_v10, 0.0 }
 0x273   :  { %v3037_v36 = vpop.f32.mrf.mxu0  ;;  %v2736_v23 = vadd.f32 %v14492_v46, %v14397_v47  ;;  %v11824_v46 = vld [vmem:[%s16973_s6 + $0x18] sm:$0xff]  }
 0x274   :  { %v3198_v61 = vpop.f32.mrf.mxu1  ;;  %v3197_v9 = vadd.f32 %v3196_v62, %v3036_v45  ;;  %v3038_v31 = vadd.f32 %v3037_v36, %v2877_v13  ;;  %4050 = vmatprep.mubr.bf16.mxu1 %v3400_v38  ;;  %v3316_v44 = vmax.f32 %v3195_v24, 0.0  ;;  %v11823_v38 = vld [vmem:[%s16973_s6 + $0x58] sm:$0xff]  }
 0x275   :  { %v3041_v28 = vpop.f32.mrf.mxu0  ;;  %4051 = vmatmul.mubr.bf16.gmra.mxu1 %v3399_v27  ;;  %10974 = vmatprep.subr.bf16.mxu0 %v11823_v38 }
 0x276   :  { %v3202_v32 = vpop.f32.mrf.mxu1  ;;  %v3319_v59 = vmax.f32 %v3197_v9, 0.0  ;;  %v3199_v17 = vadd.f32 %v3198_v61, %v3038_v31  ;;  %v3042_v49 = vadd.f32 %v3041_v28, %v14471_v11  ;;  %v2897_v61 = vadd.f32 %v14494_v20, %v2736_v23  ;;  %10975 = vmatpush3.bf16.msra.mxu0 %v11824_v46 }
 0x277   :  { %v3043_v53 = vpop.f32.mrf.mxu0 }
 0x278   :  { %v3204_v34 = vpop.f32.mrf.mxu1  ;;  %v3403_v6 = vpack.c.bf16 %v3319_v59, %v3315_v30  ;;  %v3320_v50 = vmax.f32 %v3199_v17, 0.0  ;;  %v3044_v0 = vadd.f32 %v3043_v53, %v14474_v15  ;;  %v3203_v43 = vadd.f32 %v3202_v32, %v3042_v49 }
 0x279   :  { %v3045_v18 = vpop.f32.mrf.mxu0  ;;  %v2746_v32 = vadd.f32 %v14507_v5, %v14397_v47 }
 0x27a   :  { %v3206_v37 = vpop.f32.mrf.mxu1  ;;  %v3046_v29 = vadd.f32 %v3045_v18, %v14481_v63  ;;  %v3404_v19 = vpack.c.bf16 %v3320_v50, %v3316_v44  ;;  %v3205_v16 = vadd.f32 %v3204_v34, %v3044_v0  ;;  %v3323_v15 = vmax.f32 %v3203_v43, 0.0  ;;  %v17079_v43 = vld [vmem:[#allocation15_spill] sm:$0xff] }
 0x27b   :  { %v3047_v58 = vpop.f32.mrf.mxu0 }
 0x27c   :  { %v3208_v54 = vpop.f32.mrf.mxu1  ;;  %v3207_v11 = vadd.f32 %v3206_v37, %v3046_v29  ;;  %v3048_v35 = vadd.f32 %v3047_v58, %v2887_v56  ;;  %4060 = vmatprep.mubr.bf16.mxu1 %v3404_v19  ;;  %v3324_v62 = vmax.f32 %v3205_v16, 0.0  ;;  %v2907_v56 = vadd.f32 %v14509_v14, %v2746_v32 }
 0x27d   :  { %v3051_v51 = vpop.f32.mrf.mxu0  ;;  %4061 = vmatmul.mubr.bf16.gmra.mxu1 %v3403_v6 }
 0x27e   :  { %v3212_v27 = vpop.f32.mrf.mxu1  ;;  %v3327_v8 = vmax.f32 %v3207_v11, 0.0  ;;  %v3209_v57 = vadd.f32 %v3208_v54, %v3048_v35  ;;  %v3052_v21 = vadd.f32 %v3051_v51, %v14486_v4  ;;  %v11825_v35 = vld [vmem:[%s16973_s6 + $0x50] sm:$0xff]  }
 0x27f   :  { %v3053_v7 = vpop.f32.mrf.mxu0  ;;  %10976 = vmatprep.subr.bf16.mxu0 %v11825_v35 }
 0x280   :  { %v3214_v63 = vpop.f32.mrf.mxu1  ;;  %v3407_v13 = vpack.c.bf16 %v3327_v8, %v3323_v15  ;;  %v3328_v10 = vmax.f32 %v3209_v57, 0.0  ;;  %v3054_v45 = vadd.f32 %v3053_v7, %v14489_v12  ;;  %v3213_v4 = vadd.f32 %v3212_v27, %v3052_v21  ;;  %v17080_v8 = vld [vmem:[#allocation16_spill] sm:$0xff]  ;;  %v11826_v21 = vld [vmem:[%s16973_s6 + $0x10] sm:$0xff]  }
 0x281   :  { %v3055_v60 = vpop.f32.mrf.mxu0  ;;  %10977 = vmatpush3.bf16.msra.mxu0 %v11826_v21 }
 0x282   :  { %v3216_v36 = vpop.f32.mrf.mxu1  ;;  %v3056_v24 = vadd.f32 %v3055_v60, %v14496_v33  ;;  %v3408_v9 = vpack.c.bf16 %v3328_v10, %v3324_v62  ;;  %v3215_v12 = vadd.f32 %v3214_v63, %v3054_v45  ;;  %v3331_v17 = vmax.f32 %v3213_v4, 0.0  ;;  %v17081_v45 = vld [vmem:[#allocation17_spill] sm:$0xff] }
 0x283   :  { %v3057_v31 = vpop.f32.mrf.mxu0 }
 0x284   :  { %v3218_v3 = vpop.f32.mrf.mxu1  ;;  %v3217_v52 = vadd.f32 %v3216_v36, %v3056_v24  ;;  %v3058_v28 = vadd.f32 %v3057_v31, %v2897_v61  ;;  %4070 = vmatprep.mubr.bf16.mxu1 %v3408_v9  ;;  %v3332_v44 = vmax.f32 %v3215_v12, 0.0  ;;  %v17082_v61 = vld [vmem:[#allocation11_spill] sm:$0xff] }
 0x285   :  { %v3061_v30 = vpop.f32.mrf.mxu0  ;;  %4071 = vmatmul.mubr.bf16.gmra.mxu1 %v3407_v13 }
 0x286   :  { %v3222_v59 = vpop.f32.mrf.mxu1  ;;  %v3335_v20 = vmax.f32 %v3217_v52, 0.0  ;;  %v3219_v49 = vadd.f32 %v3218_v3, %v3058_v28  ;;  %v3062_v33 = vadd.f32 %v3061_v30, %v14501_v42  ;;  %v2766_v28 = vadd.f32 %v14537_v1, %v14397_v47 }
 0x287   :  { %v3063_v53 = vpop.f32.mrf.mxu0 }
 0x288   :  { %v3224_v34 = vpop.f32.mrf.mxu1  ;;  %v3411_v6 = vpack.c.bf16 %v3335_v20, %v3331_v17  ;;  %v3336_v50 = vmax.f32 %v3219_v49, 0.0  ;;  %v3064_v0 = vadd.f32 %v3063_v53, %v14504_v39  ;;  %v3223_v5 = vadd.f32 %v3222_v59, %v3062_v33 }
 0x289   :  { %v3065_v18 = vpop.f32.mrf.mxu0  ;;  %v2756_v39 = vadd.f32 %v14522_v41, %v14397_v47 }
 0x28a   :  { %v3226_v37 = vpop.f32.mrf.mxu1  ;;  %v3066_v29 = vadd.f32 %v3065_v18, %v17079_v43  ;;  %v3412_v19 = vpack.c.bf16 %v3336_v50, %v3332_v44  ;;  %v3225_v16 = vadd.f32 %v3224_v34, %v3064_v0  ;;  %v3339_v14 = vmax.f32 %v3223_v5, 0.0  ;;  %v17084_v50 = vld [vmem:[#allocation18_spill] sm:$0xff]  ;;  %v17085_v5 = vld [vmem:[#allocation19_spill] sm:$0xff] }
 0x28b   :  { %v3067_v58 = vpop.f32.mrf.mxu0  ;;  %v2917_v60 = vadd.f32 %v14524_v25, %v2756_v39  ;;  %v17083_v25 = vld [vmem:[#allocation12_spill] sm:$0xff] }
 0x28c   :  { %v3228_v54 = vpop.f32.mrf.mxu1  ;;  %v3227_v11 = vadd.f32 %v3226_v37, %v3066_v29  ;;  %v3068_v42 = vadd.f32 %v3067_v58, %v2907_v56  ;;  %4080 = vmatprep.mubr.bf16.mxu1 %v3412_v19  ;;  %v3340_v62 = vmax.f32 %v3225_v16, 0.0  ;;  %v2927_v56 = vadd.f32 %v14539_v2, %v2766_v28  ;;  %v11827_v19 = vld [vmem:[%s16973_s6 + $0x48] sm:$0xff]  }
 0x28d   :  { %v3071_v23 = vpop.f32.mrf.mxu0  ;;  %4081 = vmatmul.mubr.bf16.gmra.mxu1 %v3411_v6  ;;  %v11828_v58 = vld [vmem:[%s16973_s6 + $0x8] sm:$0xff]   ;;  %10978 = vmatprep.subr.bf16.mxu0 %v11827_v19  ;;  %v2776_v2 = vadd.f32 %v14552_v22, %v14397_v47 }
 0x28e   :  { %v3232_v51 = vpop.f32.mrf.mxu1  ;;  %v3343_v27 = vmax.f32 %v3227_v11, 0.0  ;;  %v3229_v15 = vadd.f32 %v3228_v54, %v3068_v42  ;;  %v3072_v57 = vadd.f32 %v3071_v23, %v17080_v8  ;;  %10979 = vmatpush3.bf16.msra.mxu0 %v11828_v58 }
 0x28f   :  { %v3073_v7 = vpop.f32.mrf.mxu0  ;;  %v2937_v22 = vadd.f32 %v14554_v40, %v2776_v2  ;;  %v17089_v40 = vld [vmem:[#allocation23_spill] sm:$0xff] }
 0x290   :  { %v3234_v63 = vpop.f32.mrf.mxu1  ;;  %v3415_v13 = vpack.c.bf16 %v3343_v27, %v3339_v14  ;;  %v3344_v10 = vmax.f32 %v3229_v15, 0.0  ;;  %v3074_v41 = vadd.f32 %v3073_v7, %v17081_v45  ;;  %v3233_v36 = vadd.f32 %v3232_v51, %v3072_v57  ;;  %v17086_v15 = vld [vmem:[#allocation20_spill] sm:$0xff] }
 0x291   :  { %v3075_v38 = vpop.f32.mrf.mxu0 }
 0x292   :  { %v3236_v46 = vpop.f32.mrf.mxu1  ;;  %v3076_v4 = vadd.f32 %v3075_v38, %v17082_v61  ;;  %v3416_v24 = vpack.c.bf16 %v3344_v10, %v3340_v62  ;;  %v3235_v3 = vadd.f32 %v3234_v63, %v3074_v41  ;;  %v3347_v59 = vmax.f32 %v3233_v36, 0.0 }
 0x293   :  { %v3077_v9 = vpop.f32.mrf.mxu0 }
 0x294   :  { %v3238_v31 = vpop.f32.mrf.mxu1  ;;  %v3237_v12 = vadd.f32 %v3236_v46, %v3076_v4  ;;  %v3078_v52 = vadd.f32 %v3077_v9, %v2917_v60  ;;  %4090 = vmatprep.mubr.bf16.mxu1 %v3416_v24  ;;  %v3348_v34 = vmax.f32 %v3235_v3, 0.0  ;;  %v17088_v46 = vld [vmem:[#allocation22_spill] sm:$0xff]  ;;  %v2786_v3 = vadd.f32 %v14567_v26, %v14397_v47 }
 0x295   :  { %v3081_v32 = vpop.f32.mrf.mxu0  ;;  %4091 = vmatmul.mubr.bf16.gmra.mxu1 %v3415_v13  ;;  %v17087_v13 = vld [vmem:[#allocation21_spill] sm:$0xff] }
 0x296   :  { %v3242_v30 = vpop.f32.mrf.mxu1  ;;  %v3351_v17 = vmax.f32 %v3237_v12, 0.0  ;;  %v3239_v20 = vadd.f32 %v3238_v31, %v3078_v52  ;;  %v3082_v49 = vadd.f32 %v3081_v32, %v17083_v25 }
 0x297   :  { %v3083_v33 = vpop.f32.mrf.mxu0 }
 0x298   :  { %v3244_v53 = vpop.f32.mrf.mxu1  ;;  %v3419_v44 = vpack.c.bf16 %v3351_v17, %v3347_v59  ;;  %v3352_v6 = vmax.f32 %v3239_v20, 0.0  ;;  %v3084_v0 = vadd.f32 %v3083_v33, %v17084_v50  ;;  %v3243_v1 = vadd.f32 %v3242_v30, %v3082_v49 }
 0x299   :  { %v3085_v18 = vpop.f32.mrf.mxu0  ;;  %v2947_v50 = vadd.f32 %v14569_v55, %v2786_v3 }
 0x29a   :  { %v3246_v37 = vpop.f32.mrf.mxu1  ;;  %v3086_v43 = vadd.f32 %v3085_v18, %v17085_v5  ;;  %v3420_v29 = vpack.c.bf16 %v3352_v6, %v3348_v34  ;;  %v3245_v11 = vadd.f32 %v3244_v53, %v3084_v0  ;;  %v3355_v51 = vmax.f32 %v3243_v1, 0.0  ;;  %v17090_v53 = vld [vmem:[#allocation24_spill] sm:$0xff]  ;;  %v17091_v18 = vld [vmem:[#allocation25_spill] sm:$0xff] }
 0x29b   :  { %v3087_v54 = vpop.f32.mrf.mxu0  ;;  %v11830_v1 = vld [vmem:[%s16973_s6] sm:$0xff]  }
 0x29c   :  { %v3248_v16 = vpop.f32.mrf.mxu1  ;;  %v3247_v42 = vadd.f32 %v3246_v37, %v3086_v43  ;;  %v3088_v35 = vadd.f32 %v3087_v54, %v2927_v56  ;;  %4100 = vmatprep.mubr.bf16.mxu1 %v3420_v29  ;;  %v3356_v7 = vmax.f32 %v3245_v11, 0.0  ;;  %v17092_v54 = vld [vmem:[#allocation28_spill] sm:$0xff] }
 0x29d   :  { %v3091_v39 = vpop.f32.mrf.mxu0  ;;  %4101 = vmatmul.mubr.bf16.gmra.mxu1 %v3419_v44  ;;  %v11829_v44 = vld [vmem:[%s16973_s6 + $0x40] sm:$0xff]  }
 0x29e   :  { %v3252_v23 = vpop.f32.mrf.mxu1  ;;  %v3359_v14 = vmax.f32 %v3247_v42, 0.0  ;;  %v3249_v27 = vadd.f32 %v3248_v16, %v3088_v35  ;;  %v3092_v8 = vadd.f32 %v3091_v39, %v17086_v15  ;;  %10980 = vmatprep.subr.bf16.mxu0 %v11829_v44  ;;  %v2796_v16 = vadd.f32 %v17092_v54, %v14397_v47  ;;  %v17093_v39 = vld [vmem:[#allocation26_spill] sm:$0xff] }
 0x29f   :  { %v3093_v57 = vpop.f32.mrf.mxu0  ;;  %10981 = vmatpush3.bf16.msra.mxu0 %v11830_v1  ;;  %v17098_v1 = vmov 0  }
 0x2a0   :  { %v3254_v21 = vpop.f32.mrf.mxu1  ;;  %v3423_v63 = vpack.c.bf16 %v3359_v14, %v3355_v51  ;;  %v3360_v62 = vmax.f32 %v3249_v27, 0.0  ;;  %v3094_v10 = vadd.f32 %v3093_v57, %v17087_v13  ;;  %v3253_v38 = vadd.f32 %v3252_v23, %v3092_v8  ;;  %v17094_v57 = vld [vmem:[#allocation27_spill] sm:$0xff] }
 0x2a1   :  { %v3095_v45 = vpop.f32.mrf.mxu0 }
 0x2a2   :  { %v3256_v41 = vpop.f32.mrf.mxu1  ;;  %v3096_v60 = vadd.f32 %v3095_v45, %v17088_v46  ;;  %v3424_v36 = vpack.c.bf16 %v3360_v62, %v3356_v7  ;;  %v3255_v24 = vadd.f32 %v3254_v21, %v3094_v10  ;;  %v3363_v28 = vmax.f32 %v3253_v38, 0.0  ;;  %v17095_v62 = vld [vmem:[#allocation29_spill] sm:$0xff]  ;;  %v17096_v10 = vld [vmem:[#allocation30_spill] sm:$0xff] }
 0x2a3   :  { %v3097_v61 = vpop.f32.mrf.mxu0  ;;  %v2957_v13 = vadd.f32 %v17095_v62, %v2796_v16 }
 0x2a4   :  { %v3258_v4 = vpop.f32.mrf.mxu1  ;;  %v3257_v9 = vadd.f32 %v3256_v41, %v3096_v60  ;;  %v3098_v31 = vadd.f32 %v3097_v61, %v2937_v22  ;;  %4110 = vmatprep.mubr.bf16.mxu1 %v3424_v36  ;;  %v3364_v25 = vmax.f32 %v3255_v24, 0.0 }
 0x2a5   :  { %v3101_v12 = vpop.f32.mrf.mxu0  ;;  %4111 = vmatmul.mubr.bf16.gmra.mxu1 %v3423_v63 }
 0x2a6   :  { %v3262_v52 = vpop.f32.mrf.mxu1  ;;  %v3367_v32 = vmax.f32 %v3257_v9, 0.0  ;;  %v3259_v30 = vadd.f32 %v3258_v4, %v3098_v31  ;;  %v3102_v59 = vadd.f32 %v3101_v12, %v17089_v40  ;;  %v17097_v40 = vld [vmem:[#allocation31_spill] sm:$0xff] }
 0x2a7   :  { %v3103_v17 = vpop.f32.mrf.mxu0 }
 0x2a8   :  { %v3264_v20 = vpop.f32.mrf.mxu1  ;;  %v3427_v49 = vpack.c.bf16 %v3367_v32, %v3363_v28  ;;  %v3368_v33 = vmax.f32 %v3259_v30, 0.0  ;;  %v3104_v34 = vadd.f32 %v3103_v17, %v17090_v53  ;;  %v3263_v0 = vadd.f32 %v3262_v52, %v3102_v59 }
 0x2a9   :  { %v3105_v26 = vpop.f32.mrf.mxu0 }
 0x2aa   :  { %v3266_v6 = vpop.f32.mrf.mxu1  ;;  %v3106_v37 = vadd.f32 %v3105_v26, %v17091_v18  ;;  %v3428_v56 = vpack.c.bf16 %v3368_v33, %v3364_v25  ;;  %v3265_v29 = vadd.f32 %v3264_v20, %v3104_v34  ;;  %v3371_v42 = vmax.f32 %v3263_v0, 0.0 }
 0x2ab   :  { %v3107_v5 = vpop.f32.mrf.mxu0 }
 0x2ac   :  { %v3268_v43 = vpop.f32.mrf.mxu1  ;;  %v3267_v19 = vadd.f32 %v3266_v6, %v3106_v37  ;;  %v3108_v58 = vadd.f32 %v3107_v5, %v2947_v50  ;;  %4120 = vmatprep.mubr.bf16.mxu1 %v3428_v56  ;;  %v3372_v27 = vmax.f32 %v3265_v29, 0.0 }
 0x2ad   :  { %v3111_v55 = vpop.f32.mrf.mxu0  ;;  %4121 = vmatmul.mubr.bf16.gmra.mxu1 %v3427_v49 }
 0x2ae   :  { %v3272_v11 = vpop.f32.mrf.mxu1  ;;  %v3375_v35 = vmax.f32 %v3267_v19, 0.0  ;;  %v3269_v2 = vadd.f32 %v3268_v43, %v3108_v58  ;;  %v3112_v23 = vadd.f32 %v3111_v55, %v17093_v39 }
 0x2af   :  { %v3113_v51 = vpop.f32.mrf.mxu0 }
 0x2b0   :  { %v3274_v14 = vpop.f32.mrf.mxu1  ;;  %v3431_v15 = vpack.c.bf16 %v3375_v35, %v3371_v42  ;;  %v3376_v8 = vmax.f32 %v3269_v2, 0.0  ;;  %v3114_v21 = vadd.f32 %v3113_v51, %v17094_v57  ;;  %v3273_v47 = vadd.f32 %v3272_v11, %v3112_v23 }
 0x2b1   :  { %v3115_v7 = vpop.f32.mrf.mxu0 }
 0x2b2   :  { %v3276_v63 = vpop.f32.mrf.mxu1  ;;  %v3116_v45 = vadd.f32 %v3115_v7, %v17096_v10  ;;  %v3432_v41 = vpack.c.bf16 %v3376_v8, %v3372_v27  ;;  %v3275_v46 = vadd.f32 %v3274_v14, %v3114_v21  ;;  %v3379_v24 = vmax.f32 %v3273_v47, 0.0 }
 0x2b3   :  { %v3117_v22 = vpop.f32.mrf.mxu0 }
 0x2b4   :  { %v3278_v38 = vpop.f32.mrf.mxu1  ;;  %v3277_v60 = vadd.f32 %v3276_v63, %v3116_v45  ;;  %v3118_v36 = vadd.f32 %v3117_v22, %v2957_v13  ;;  %4130 = vmatprep.mubr.bf16.mxu1 %v3432_v41  ;;  %v3380_v28 = vmax.f32 %v3275_v46, 0.0 }
 0x2b5   :  { %v3121_v61 = vpop.f32.mrf.mxu0  ;;  %4131 = vmatmul.mubr.bf16.gmra.mxu1 %v3431_v15 }
 0x2b6   :  { %v3282_v4 = vpop.f32.mrf.mxu1  ;;  %v3383_v9 = vmax.f32 %v3277_v60, 0.0  ;;  %v3279_v31 = vadd.f32 %v3278_v38, %v3118_v36  ;;  %v3122_v3 = vadd.f32 %v3121_v61, %v14598_v48 }
 0x2b7   :  { %v3123_v12 = vpop.f32.mrf.mxu0 }
 0x2b8   :  { %v3284_v52 = vpop.f32.mrf.mxu1  ;;  %v3435_v32 = vpack.c.bf16 %v3383_v9, %v3379_v24  ;;  %v3384_v30 = vmax.f32 %v3279_v31, 0.0  ;;  %v3124_v59 = vadd.f32 %v3123_v12, %v17097_v40  ;;  %v3283_v33 = vadd.f32 %v3282_v4, %v3122_v3 }
 0x2b9   :  { %v3125_v17 = vpop.f32.mrf.mxu0 }
 0x2ba   :  { %v3286_v20 = vpop.f32.mrf.mxu1  ;;  %v3285_v25 = vadd.f32 %v3284_v52, %v3124_v59  ;;  %v3436_v49 = vpack.c.bf16 %v3384_v30, %v3380_v28  ;;  %v3387_v6 = vmax.f32 %v3283_v33, 0.0  ;;  %v3505_v30 = vld [vmem:[%s16972_s5] sm:$0x3]  ;;  %v17105_v17 = vld [vmem:[#allocation9_spill] sm:$0xff] }
 0x2bb   :  { %v3126_v53 = vpop.f32.mrf.mxu0  ;;  %v14820_v20 = vrot.slane %v3505_v30, %v17105_v17 }
 0x2bc   :  { %v3287_v34 = vpop.f32.mrf.mxu1  ;;  %v3388_v44 = vmax.f32 %v3285_v25, 0.0  ;;  %4140 = vmatprep.mubr.bf16.mxu1 %v3436_v49  ;;  %v3439_v18 = vpack.c.bf16 %v3387_v6, %v3387_v6  ;;  %v17106_v49 = vld [vmem:[#allocation10_spill] sm:$0xff] }
 0x2bd   :  { %v14721_v26 = vpop.f32.mrf.mxu0  ;;  %4141 = vmatmul.mubr.bf16.gmra.mxu1 %v3435_v32  ;;  %v14823_v33 = vrot.slane %v3505_v30, %v17106_v49 }
 0x2be   :  { %v3440_v48 = vpack.c.bf16 %v3388_v44, %v3388_v44  ;;  %v3872_v34 = vadd.f32 %v14721_v26, %v14820_v20 }
 0x2bf   :  { %v3873_v50 = vpop.f32.mrf.mxu0 }
 0x2c0   :  { %4150 = vmatprep.mubr.bf16.mxu1 %v3440_v48  ;;  %v3874_v48 = vadd.f32 %v3873_v50, %v14823_v33 }
 0x2c1   :  { %v3875_v0 = vpop.f32.mrf.mxu0 }
 0x2c2   :  { %v3876_v6 = vadd.f32 %v3875_v0, %v14820_v20 }
 0x2c3   :  { %v3877_v37 = vpop.f32.mrf.mxu0 }
 0x2c5   :  { %v14723_v56 = vpop.f32.mrf.mxu0  ;;  %4151 = vmatmul.mubr.bf16.gmra.mxu1 %v3439_v18 }
 0x2c6   :  { %4926 = vmatprep.mubr.bf16.mxu1 %v17098_v1 }
 0x2c7   :  { %v14726_v5 = vpop.f32.mrf.mxu0 }
 0x2c8   :  { %v3884_v0 = vadd.f32 %v14726_v5, %v14823_v33 }
 0x2c9   :  { %v14728_v43 = vpop.f32.mrf.mxu0 }
 0x2cb   :  { %v14730_v29 = vpop.f32.mrf.mxu0 }
 0x2cd   :  { %v14732_v19 = vpop.f32.mrf.mxu0 }
 0x2ce   :  { %v3892_v5 = vadd.f32 %v14732_v19, %v14820_v20 }
 0x2cf   :  { %v14734_v58 = vpop.f32.mrf.mxu0 }
 0x2d1   :  { %v14736_v54 = vpop.f32.mrf.mxu0 }
 0x2d3   :  { %v14738_v16 = vpop.f32.mrf.mxu0 }
 0x2d5   :  { %v14740_v55 = vpop.f32.mrf.mxu0 }
 0x2d7   :  { %v14742_v11 = vpop.f32.mrf.mxu0 }
 0x2d9   :  { %v14744_v42 = vpop.f32.mrf.mxu0 }
 0x2db   :  { %v14746_v35 = vpop.f32.mrf.mxu0 }
 0x2dd   :  { %v14748_v2 = vpop.f32.mrf.mxu0 }
 0x2df   :  { %v14750_v39 = vpop.f32.mrf.mxu0 }
 0x2e1   :  { %v14752_v23 = vpop.f32.mrf.mxu0 }
 0x2e3   :  { %v14754_v51 = vpop.f32.mrf.mxu0 }
 0x2e5   :  { %v14756_v14 = vpop.f32.mrf.mxu0 }
 0x2e7   :  { %v14758_v27 = vpop.f32.mrf.mxu0 }
 0x2e9   :  { %v14760_v15 = vpop.f32.mrf.mxu0 }
 0x2eb   :  { %v14762_v8 = vpop.f32.mrf.mxu0 }
 0x2ed   :  { %v14764_v57 = vpop.f32.mrf.mxu0 }
 0x2ef   :  { %v14766_v21 = vpop.f32.mrf.mxu0 }
 0x2f1   :  { %v14768_v7 = vpop.f32.mrf.mxu0 }
 0x2f3   :  { %v14770_v63 = vpop.f32.mrf.mxu0 }
 0x2f5   :  { %v14772_v62 = vpop.f32.mrf.mxu0 }
 0x2f7   :  { %v14774_v13 = vpop.f32.mrf.mxu0 }
 0x2f9   :  { %v14776_v47 = vpop.f32.mrf.mxu0 }
 0x2fb   :  { %v14778_v10 = vpop.f32.mrf.mxu0 }
 0x2fd   :  { %v14780_v45 = vpop.f32.mrf.mxu0 }
 0x2ff   :  { %v14782_v41 = vpop.f32.mrf.mxu0 }
 0x301   :  { %v14784_v22 = vpop.f32.mrf.mxu0 }
 0x303   :  { %v14786_v38 = vpop.f32.mrf.mxu0 }
 0x305   :  { %v14788_v46 = vpop.f32.mrf.mxu0 }
 0x307   :  { %v14790_v60 = vpop.f32.mrf.mxu0 }
 0x309   :  { %v14792_v36 = vpop.f32.mrf.mxu0 }
 0x30b   :  { %v14794_v61 = vpop.f32.mrf.mxu0 }
 0x30d   :  { %v14796_v4 = vpop.f32.mrf.mxu0 }
 0x30f   :  { %v14798_v24 = vpop.f32.mrf.mxu0 }
 0x311   :  { %v14800_v9 = vpop.f32.mrf.mxu0 }
 0x313   :  { %v14802_v31 = vpop.f32.mrf.mxu0 }
 0x315   :  { %v14804_v3 = vpop.f32.mrf.mxu0 }
 0x316   :  { %17099 = vst [vmem:[#allocation15_spill] sm:$0xff] %v14804_v3 }
 0x317   :  { %v14806_v12 = vpop.f32.mrf.mxu0 }
 0x318   :  { %17100 = vst [vmem:[#allocation16_spill] sm:$0xff] %v14806_v12 }
 0x319   :  { %v14808_v52 = vpop.f32.mrf.mxu0 }
 0x31a   :  { %17101 = vst [vmem:[#allocation17_spill] sm:$0xff] %v14808_v52  ;;  %v3882_v52 = vadd.f32 %v14723_v56, %v14820_v20 }
 0x31b   :  { %v14810_v28 = vpop.f32.mrf.mxu0 }
 0x31c   :  { %17102 = vst [vmem:[#allocation11_spill] sm:$0xff] %v14810_v28 }
 0x31d   :  { %v14812_v32 = vpop.f32.mrf.mxu0 }
 0x31e   :  { %17103 = vst [vmem:[#allocation12_spill] sm:$0xff] %v14812_v32 }
 0x31f   :  { %v14817_v40 = vpop.f32.mrf.mxu0 }
 0x320   :  { %17104 = vst [vmem:[#allocation18_spill] sm:$0xff] %v14817_v40 }
 0x321   :  { %v3995_v59 = vpop.f32.mrf.mxu0 }
 0x322   :  { %v3878_v59 = vadd.f32 %v3877_v37, %v14823_v33  ;;  %v3886_v37 = vadd.f32 %v14728_v43, %v14820_v20 }
 0x323   :  { %v3996_v25 = vpop.f32.mrf.mxu0 }
 0x325   :  { %v4032_v53 = vpop.f32.mrf.mxu1 }
 0x326   :  { %v4033_v18 = vadd.f32 %v4032_v53, %v3872_v34 }
 0x327   :  { %v4034_v44 = vpop.f32.mrf.mxu1 }
 0x328   :  { %v4035_v32 = vadd.f32 %v4034_v44, %v3874_v48  ;;  %v4159_v25 = vmax.f32 %v4033_v18, 0.0 }
 0x329   :  { %v4036_v1 = vpop.f32.mrf.mxu1 }
 0x32a   :  { %v4037_v17 = vadd.f32 %v4036_v1, %v3876_v6  ;;  %v4160_v26 = vmax.f32 %v4035_v32, 0.0 }
 0x32b   :  { %v4038_v40 = vpop.f32.mrf.mxu1 }
 0x32c   :  { %v4161_v28 = vmax.f32 %v4037_v17, 0.0  ;;  %v4039_v30 = vadd.f32 %v4038_v40, %v3878_v59  ;;  %v3888_v40 = vadd.f32 %v14730_v29, %v14823_v33  ;;  %v3896_v29 = vadd.f32 %v14736_v54, %v14820_v20 }
 0x32d   :  { %v4042_v49 = vpop.f32.mrf.mxu1 }
 0x32e   :  { %v4209_v12 = vpack.c.bf16 %v4161_v28, %v4159_v25  ;;  %v4162_v3 = vmax.f32 %v4039_v30, 0.0  ;;  %v4043_v53 = vadd.f32 %v4042_v49, %v3882_v52  ;;  %v3894_v49 = vadd.f32 %v14734_v58, %v14823_v33 }
 0x32f   :  { %v4044_v50 = vpop.f32.mrf.mxu1  ;;  %v3898_v30 = vadd.f32 %v14738_v16, %v14823_v33  ;;  %v3902_v58 = vadd.f32 %v14740_v55, %v14820_v20  ;;  %v3906_v16 = vadd.f32 %v14744_v42, %v14820_v20 }
 0x330   :  { %v4210_v1 = vpack.c.bf16 %v4162_v3, %v4160_v26  ;;  %v4045_v17 = vadd.f32 %v4044_v50, %v3884_v0  ;;  %v4163_v28 = vmax.f32 %v4043_v53, 0.0 }
 0x331   :  { %v4046_v34 = vpop.f32.mrf.mxu1 }
 0x332   :  { %v4047_v44 = vadd.f32 %v4046_v34, %v3886_v37  ;;  %4402 = vmatprep.mubr.bf16.mxu0 %v4210_v1  ;;  %v4164_v18 = vmax.f32 %v4045_v17, 0.0 }
 0x333   :  { %v4048_v56 = vpop.f32.mrf.mxu1  ;;  %4403 = vmatmul.mubr.bf16.vlgmr.msra.gmra.mxu0 %v4209_v12 }
 0x334   :  { %v4165_v32 = vmax.f32 %v4047_v44, 0.0  ;;  %v4049_v48 = vadd.f32 %v4048_v56, %v3888_v40  ;;  %v3904_v44 = vadd.f32 %v14742_v11, %v14823_v33  ;;  %v3912_v11 = vadd.f32 %v14748_v2, %v14820_v20 }
 0x335   :  { %v4052_v6 = vpop.f32.mrf.mxu1 }
 0x336   :  { %v4211_v43 = vpack.c.bf16 %v4165_v32, %v4163_v28  ;;  %v4166_v52 = vmax.f32 %v4049_v48, 0.0  ;;  %v4053_v59 = vadd.f32 %v4052_v6, %v3892_v5  ;;  %v3908_v48 = vadd.f32 %v14746_v35, %v14823_v33 }
 0x337   :  { %v4054_v3 = vpop.f32.mrf.mxu1  ;;  %v3916_v35 = vadd.f32 %v14752_v23, %v14820_v20 }
 0x338   :  { %v4212_v25 = vpack.c.bf16 %v4166_v52, %v4164_v18  ;;  %v4055_v26 = vadd.f32 %v4054_v3, %v3894_v49  ;;  %v4167_v0 = vmax.f32 %v4053_v59, 0.0 }
 0x339   :  { %v4056_v12 = vpop.f32.mrf.mxu1 }
 0x33a   :  { %v4057_v50 = vadd.f32 %v4056_v12, %v3896_v29  ;;  %4410 = vmatprep.mubr.bf16.mxu0 %v4212_v25  ;;  %v4168_v34 = vmax.f32 %v4055_v26, 0.0  ;;  %v3914_v25 = vadd.f32 %v14750_v39, %v14823_v33  ;;  %v3922_v39 = vadd.f32 %v14756_v14, %v14820_v20 }
 0x33b   :  { %v4058_v19 = vpop.f32.mrf.mxu1  ;;  %4411 = vmatmul.mubr.bf16.gmra.mxu0 %v4211_v43 }
 0x33c   :  { %v4169_v37 = vmax.f32 %v4057_v50, 0.0  ;;  %v4059_v53 = vadd.f32 %v4058_v19, %v3898_v30  ;;  %v3918_v50 = vadd.f32 %v14754_v51, %v14823_v33  ;;  %v3926_v51 = vadd.f32 %v14760_v15, %v14820_v20 }
 0x33d   :  { %v4062_v1 = vpop.f32.mrf.mxu1 }
 0x33e   :  { %v4213_v54 = vpack.c.bf16 %v4169_v37, %v4167_v0  ;;  %v4170_v40 = vmax.f32 %v4059_v53, 0.0  ;;  %v4063_v56 = vadd.f32 %v4062_v1, %v3902_v58 }
 0x33f   :  { %v4064_v17 = vpop.f32.mrf.mxu1 }
 0x340   :  { %v4214_v28 = vpack.c.bf16 %v4170_v40, %v4168_v34  ;;  %v4065_v6 = vadd.f32 %v4064_v17, %v3904_v44  ;;  %v4171_v18 = vmax.f32 %v4063_v56, 0.0  ;;  %v3924_v17 = vadd.f32 %v14758_v27, %v14823_v33 }
 0x341   :  { %v4066_v32 = vpop.f32.mrf.mxu1  ;;  %v3932_v27 = vadd.f32 %v14764_v57, %v14820_v20 }
 0x342   :  { %v4067_v5 = vadd.f32 %v4066_v32, %v3906_v16  ;;  %4418 = vmatprep.mubr.bf16.mxu0 %v4214_v28  ;;  %v4172_v49 = vmax.f32 %v4065_v6, 0.0  ;;  %v3928_v28 = vadd.f32 %v14762_v8, %v14823_v33  ;;  %v3936_v8 = vadd.f32 %v14768_v7, %v14820_v20 }
 0x343   :  { %v4068_v55 = vpop.f32.mrf.mxu1  ;;  %4419 = vmatmul.mubr.bf16.gmra.mxu0 %v4213_v54 }
 0x344   :  { %v4173_v43 = vmax.f32 %v4067_v5, 0.0  ;;  %v4069_v52 = vadd.f32 %v4068_v55, %v3908_v48 }
 0x345   :  { %v4072_v3 = vpop.f32.mrf.mxu1 }
 0x346   :  { %v4215_v42 = vpack.c.bf16 %v4173_v43, %v4171_v18  ;;  %v4174_v29 = vmax.f32 %v4069_v52, 0.0  ;;  %v4073_v12 = vadd.f32 %v4072_v3, %v3912_v11  ;;  %v3934_v11 = vadd.f32 %v14766_v21, %v14823_v33 }
 0x347   :  { %v4074_v59 = vpop.f32.mrf.mxu1  ;;  %v3942_v21 = vadd.f32 %v14772_v62, %v14820_v20 }
 0x348   :  { %v4216_v30 = vpack.c.bf16 %v4174_v29, %v4172_v49  ;;  %v4075_v19 = vadd.f32 %v4074_v59, %v3914_v25  ;;  %v4175_v37 = vmax.f32 %v4073_v12, 0.0  ;;  %v3938_v59 = vadd.f32 %v14770_v63, %v14823_v33 }
 0x349   :  { %v4076_v26 = vpop.f32.mrf.mxu1  ;;  %v3946_v63 = vadd.f32 %v14776_v47, %v14820_v20 }
 0x34a   :  { %v4077_v0 = vadd.f32 %v4076_v26, %v3916_v35  ;;  %4426 = vmatprep.mubr.bf16.mxu0 %v4216_v30  ;;  %v4176_v34 = vmax.f32 %v4075_v19, 0.0 }
 0x34b   :  { %v4078_v2 = vpop.f32.mrf.mxu1  ;;  %4427 = vmatmul.mubr.bf16.gmra.mxu0 %v4215_v42 }
 0x34c   :  { %v4177_v53 = vmax.f32 %v4077_v0, 0.0  ;;  %v4079_v1 = vadd.f32 %v4078_v2, %v3918_v50 }
 0x34d   :  { %v4082_v58 = vpop.f32.mrf.mxu1 }
 0x34e   :  { %v4217_v23 = vpack.c.bf16 %v4177_v53, %v4175_v37  ;;  %v4178_v54 = vmax.f32 %v4079_v1, 0.0  ;;  %v4083_v44 = vadd.f32 %v4082_v58, %v3922_v39  ;;  %v3944_v37 = vadd.f32 %v14774_v13, %v14823_v33 }
 0x34f   :  { %v4084_v40 = vpop.f32.mrf.mxu1  ;;  %v3948_v39 = vadd.f32 %v14778_v10, %v14823_v33  ;;  %v3952_v13 = vadd.f32 %v14780_v45, %v14820_v20  ;;  %v3956_v10 = vadd.f32 %v14784_v22, %v14820_v20 }
 0x350   :  { %v4218_v16 = vpack.c.bf16 %v4178_v54, %v4176_v34  ;;  %v4085_v32 = vadd.f32 %v4084_v40, %v3924_v17  ;;  %v4179_v6 = vmax.f32 %v4083_v44, 0.0 }
 0x351   :  { %v4086_v56 = vpop.f32.mrf.mxu1 }
 0x352   :  { %v4087_v48 = vadd.f32 %v4086_v56, %v3926_v51  ;;  %4434 = vmatprep.mubr.bf16.mxu0 %v4218_v16  ;;  %v4180_v43 = vmax.f32 %v4085_v32, 0.0 }
 0x353   :  { %v4088_v14 = vpop.f32.mrf.mxu1  ;;  %4435 = vmatmul.mubr.bf16.gmra.mxu0 %v4217_v23 }
 0x354   :  { %v4181_v5 = vmax.f32 %v4087_v48, 0.0  ;;  %v4089_v55 = vadd.f32 %v4088_v14, %v3928_v28  ;;  %v3954_v28 = vadd.f32 %v14782_v41, %v14823_v33  ;;  %v3962_v41 = vadd.f32 %v14788_v46, %v14820_v20 }
 0x355   :  { %v4092_v18 = vpop.f32.mrf.mxu1 }
 0x356   :  { %v4219_v15 = vpack.c.bf16 %v4181_v5, %v4179_v6  ;;  %v4182_v52 = vmax.f32 %v4089_v55, 0.0  ;;  %v4093_v49 = vadd.f32 %v4092_v18, %v3932_v27  ;;  %v3958_v6 = vadd.f32 %v14786_v38, %v14823_v33 }
 0x357   :  { %v4094_v3 = vpop.f32.mrf.mxu1  ;;  %v3966_v38 = vadd.f32 %v14792_v36, %v14820_v20 }
 0x358   :  { %v4220_v42 = vpack.c.bf16 %v4182_v52, %v4180_v43  ;;  %v4095_v25 = vadd.f32 %v4094_v3, %v3934_v11  ;;  %v4183_v12 = vmax.f32 %v4093_v49, 0.0 }
 0x359   :  { %v4096_v29 = vpop.f32.mrf.mxu1 }
 0x35a   :  { %v4097_v35 = vadd.f32 %v4096_v29, %v3936_v8  ;;  %4442 = vmatprep.mubr.bf16.mxu0 %v4220_v42  ;;  %v4184_v19 = vmax.f32 %v4095_v25, 0.0  ;;  %v3964_v8 = vadd.f32 %v14790_v60, %v14823_v33  ;;  %v3972_v60 = vadd.f32 %v14796_v4, %v14820_v20 }
 0x35b   :  { %v4098_v57 = vpop.f32.mrf.mxu1  ;;  %4443 = vmatmul.mubr.bf16.gmra.mxu0 %v4219_v15 }
 0x35c   :  { %v4185_v30 = vmax.f32 %v4097_v35, 0.0  ;;  %v4099_v26 = vadd.f32 %v4098_v57, %v3938_v59  ;;  %v3968_v59 = vadd.f32 %v14794_v61, %v14823_v33  ;;  %v3976_v61 = vadd.f32 %v14800_v9, %v14820_v20 }
 0x35d   :  { %v4102_v50 = vpop.f32.mrf.mxu1 }
 0x35e   :  { %v4221_v7 = vpack.c.bf16 %v4185_v30, %v4183_v12  ;;  %v4186_v0 = vmax.f32 %v4099_v26, 0.0  ;;  %v4103_v53 = vadd.f32 %v4102_v50, %v3942_v21 }
 0x35f   :  { %v4104_v2 = vpop.f32.mrf.mxu1 }
 0x360   :  { %v4222_v1 = vpack.c.bf16 %v4186_v0, %v4184_v19  ;;  %v4105_v34 = vadd.f32 %v4104_v2, %v3944_v37  ;;  %v4187_v54 = vmax.f32 %v4103_v53, 0.0 }
 0x361   :  { %v4106_v58 = vpop.f32.mrf.mxu1 }
 0x362   :  { %v4107_v23 = vadd.f32 %v4106_v58, %v3946_v63  ;;  %4450 = vmatprep.mubr.bf16.mxu0 %v4222_v1  ;;  %v4188_v44 = vmax.f32 %v4105_v34, 0.0  ;;  %v3978_v63 = vadd.f32 %v14802_v31, %v14823_v33  ;;  %v17109_v31 = vld [vmem:[#allocation17_spill] sm:$0xff] }
 0x363   :  { %v4108_v62 = vpop.f32.mrf.mxu1  ;;  %4451 = vmatmul.mubr.bf16.gmra.mxu0 %v4221_v7  ;;  %v3974_v7 = vadd.f32 %v14798_v24, %v14823_v33  ;;  %v17107_v24 = vld [vmem:[#allocation15_spill] sm:$0xff] }
 0x364   :  { %v4189_v40 = vmax.f32 %v4107_v23, 0.0  ;;  %v4109_v17 = vadd.f32 %v4108_v62, %v3948_v39  ;;  %v3982_v62 = vadd.f32 %v17107_v24, %v14820_v20 }
 0x365   :  { %v4112_v51 = vpop.f32.mrf.mxu1 }
 0x366   :  { %v4223_v47 = vpack.c.bf16 %v4189_v40, %v4187_v54  ;;  %v4190_v16 = vmax.f32 %v4109_v17, 0.0  ;;  %v4113_v32 = vadd.f32 %v4112_v51, %v3952_v13  ;;  %v17108_v51 = vld [vmem:[#allocation16_spill] sm:$0xff] }
 0x367   :  { %v4114_v56 = vpop.f32.mrf.mxu1  ;;  %v3984_v13 = vadd.f32 %v17108_v51, %v14823_v33 }
 0x368   :  { %v4224_v48 = vpack.c.bf16 %v4190_v16, %v4188_v44  ;;  %v4115_v5 = vadd.f32 %v4114_v56, %v3954_v28  ;;  %v4191_v18 = vmax.f32 %v4113_v32, 0.0  ;;  %v3986_v44 = vadd.f32 %v17109_v31, %v14820_v20  ;;  %v17110_v28 = vld [vmem:[#allocation11_spill] sm:$0xff] }
 0x369   :  { %v4116_v14 = vpop.f32.mrf.mxu1 }
 0x36a   :  { %v4117_v55 = vadd.f32 %v4116_v14, %v3956_v10  ;;  %4458 = vmatprep.mubr.bf16.mxu0 %v4224_v48  ;;  %v4192_v52 = vmax.f32 %v4115_v5, 0.0  ;;  %v3988_v10 = vadd.f32 %v17110_v28, %v14823_v33 }
 0x36b   :  { %v4118_v45 = vpop.f32.mrf.mxu1  ;;  %4459 = vmatmul.mubr.bf16.gmra.mxu0 %v4223_v47 }
 0x36c   :  { %v4193_v27 = vmax.f32 %v4117_v55, 0.0  ;;  %v4119_v43 = vadd.f32 %v4118_v45, %v3958_v6 }
 0x36d   :  { %v4122_v15 = vpop.f32.mrf.mxu1 }
 0x36e   :  { %v4225_v22 = vpack.c.bf16 %v4193_v27, %v4191_v18  ;;  %v4194_v3 = vmax.f32 %v4119_v43, 0.0  ;;  %v4123_v49 = vadd.f32 %v4122_v15, %v3962_v41  ;;  %v17111_v18 = vld [vmem:[#allocation18_spill] sm:$0xff] }
 0x36f   :  { %v4124_v11 = vpop.f32.mrf.mxu1  ;;  %v3994_v27 = vadd.f32 %v17111_v18, %v14823_v33  ;;  %v11831_v33 = vld [vmem:[%s16975_s8 + $0x30] ss:$8 sps:$4 sm:$0xff]  }
 0x370   :  { %v4226_v42 = vpack.c.bf16 %v4194_v3, %v4192_v52  ;;  %v4125_v25 = vadd.f32 %v4124_v11, %v3964_v8  ;;  %v4195_v57 = vmax.f32 %v4123_v49, 0.0  ;;  %v17112_v52 = vld [vmem:[#allocation12_spill] sm:$0xff] }
 0x371   :  { %v4126_v29 = vpop.f32.mrf.mxu1 }
 0x372   :  { %v4127_v35 = vadd.f32 %v4126_v29, %v3966_v38  ;;  %4466 = vmatprep.mubr.bf16.mxu0 %v4226_v42  ;;  %v4196_v50 = vmax.f32 %v4125_v25, 0.0 }
 0x373   :  { %v4128_v46 = vpop.f32.mrf.mxu1  ;;  %4467 = vmatmul.mubr.bf16.gmra.mxu0 %v4225_v22  ;;  %v3992_v22 = vadd.f32 %v17112_v52, %v14820_v20  ;;  %v11833_v20 = vld [vmem:[%s16975_s8 + $0x34] ss:$8 sps:$4 sm:$0xff]  }
 0x374   :  { %v4197_v12 = vmax.f32 %v4127_v35, 0.0  ;;  %v4129_v30 = vadd.f32 %v4128_v46, %v3968_v59  ;;  %4902 = vmatprep.subr.bf16.mxu1 %v11833_v20  ;;  %v11834_v46 = vld [vmem:[%s16975_s8 + $0x20] ss:$8 sps:$4 sm:$0xff]  }
 0x375   :  { %v4132_v26 = vpop.f32.mrf.mxu1  ;;  %4903 = vmatpush1.bf16.msra.mxu1 %v11831_v33 }
 0x376   :  { %v4227_v36 = vpack.c.bf16 %v4197_v12, %v4195_v57  ;;  %v4198_v21 = vmax.f32 %v4129_v30, 0.0  ;;  %v4133_v0 = vadd.f32 %v4132_v26, %v3972_v60  ;;  %v11836_v57 = vld [vmem:[%s16975_s8 + $0x24] ss:$8 sps:$4 sm:$0xff]   ;;  %v11837_v12 = vld [vmem:[%s16975_s8 + $0x10] ss:$8 sps:$4 sm:$0xff]  }
 0x377   :  { %v4134_v19 = vpop.f32.mrf.mxu1  ;;  %4904 = vmatprep.subr.bf16.mxu1 %v11836_v57  ;;  %v11839_v30 = vld [vmem:[%s16975_s8 + $0x14] ss:$8 sps:$4 sm:$0xff]   ;;  %v11840_v26 = vld [vmem:[%s16975_s8] ss:$8 sps:$4 sm:$0xff]   ;;  %v11842_v60 = vld [vmem:[%s16975_s8 + $0x4] ss:$8 sps:$4 sm:$0xff]  }
 0x378   :  { %v4228_v2 = vpack.c.bf16 %v4198_v21, %v4196_v50  ;;  %v4135_v53 = vadd.f32 %v4134_v19, %v3974_v7  ;;  %v4199_v58 = vmax.f32 %v4133_v0, 0.0 }
 0x379   :  { %v4136_v37 = vpop.f32.mrf.mxu1  ;;  %4905 = vmatpush1.bf16.msra.mxu1 %v11834_v46 }
 0x37a   :  { %v4137_v1 = vadd.f32 %v4136_v37, %v3976_v61  ;;  %4474 = vmatprep.mubr.bf16.mxu0 %v4228_v2  ;;  %v4200_v54 = vmax.f32 %v4135_v53, 0.0  ;;  %4906 = vmatprep.subr.bf16.mxu1 %v11839_v30 }
 0x37b   :  { %v4138_v4 = vpop.f32.mrf.mxu1  ;;  %4475 = vmatmul.mubr.bf16.gmra.mxu0 %v4227_v36  ;;  %v14949_v36 = vld [vmem:[%s16974_s7] ss:$0 sm:$0xff] }
 0x37c   :  { %v4201_v39 = vmax.f32 %v4137_v1, 0.0  ;;  %v4139_v34 = vadd.f32 %v4138_v4, %v3978_v63 }
 0x37d   :  { %v4142_v23 = vpop.f32.mrf.mxu1  ;;  %4907 = vmatpush1.bf16.msra.mxu1 %v11837_v12 }
 0x37e   :  { %v4229_v9 = vpack.c.bf16 %v4201_v39, %v4199_v58  ;;  %v4202_v40 = vmax.f32 %v4139_v34, 0.0  ;;  %v4143_v47 = vadd.f32 %v4142_v23, %v3982_v62  ;;  %4908 = vmatprep.subr.bf16.mxu1 %v11842_v60 }
 0x37f   :  { %v4144_v17 = vpop.f32.mrf.mxu1 }
 0x380   :  { %v4230_v16 = vpack.c.bf16 %v4202_v40, %v4200_v54  ;;  %v4145_v32 = vadd.f32 %v4144_v17, %v3984_v13  ;;  %v4203_v6 = vmax.f32 %v4143_v47, 0.0 }
 0x381   :  { %v4146_v56 = vpop.f32.mrf.mxu1  ;;  %4909 = vmatpush1.bf16.msra.mxu1 %v11840_v26 }
 0x382   :  { %v4147_v48 = vadd.f32 %v4146_v56, %v3986_v44  ;;  %4482 = vmatprep.mubr.bf16.mxu0 %v4230_v16  ;;  %v4204_v43 = vmax.f32 %v4145_v32, 0.0 }
 0x383   :  { %v4148_v14 = vpop.f32.mrf.mxu1  ;;  %4483 = vmatmul.mubr.bf16.gmra.mxu0 %v4229_v9 }
 0x384   :  { %v4205_v5 = vmax.f32 %v4147_v48, 0.0  ;;  %v4149_v55 = vadd.f32 %v4148_v14, %v3988_v10 }
 0x385   :  { %v4152_v45 = vpop.f32.mrf.mxu1 }
 0x386   :  { %v4231_v15 = vpack.c.bf16 %v4205_v5, %v4203_v6  ;;  %v4206_v41 = vmax.f32 %v4149_v55, 0.0  ;;  %v4153_v38 = vadd.f32 %v4152_v45, %v3992_v22 }
 0x387   :  { %v4154_v3 = vpop.f32.mrf.mxu1 }
 0x388   :  { %v4155_v11 = vadd.f32 %v4154_v3, %v3994_v27  ;;  %v4232_v8 = vpack.c.bf16 %v4206_v41, %v4204_v43  ;;  %v4207_v25 = vmax.f32 %v4153_v38, 0.0 }
 0x389   :  { %v4156_v49 = vpop.f32.mrf.mxu1 }
 0x38a   :  { %v4208_v42 = vmax.f32 %v4155_v11, 0.0  ;;  %4490 = vmatprep.mubr.bf16.mxu0 %v4232_v8  ;;  %v4233_v35 = vpack.c.bf16 %v4207_v25, %v4207_v25 }
 0x38b   :  { %v4157_v29 = vpop.f32.mrf.mxu1  ;;  %4491 = vmatmul.mubr.bf16.gmra.mxu0 %v4231_v15 }
 0x38c   :  { %v4234_v59 = vpack.c.bf16 %v4208_v42, %v4208_v42 }
 0x38e   :  { %4498 = vmatprep.mubr.bf16.mxu0 %v4234_v59 }
 0x393   :  { %4499 = vmatmul.mubr.bf16.gmra.mxu0 %v4233_v35 }
 0x3f3   :  { %v10982_v50 = vpop.f32.mrf.mxu0 }
 0x3f5   :  { %v10983_v21 = vpop.f32.mrf.mxu0 }
 0x3f6   :  { %v10984_v19 = vadd.f32 %v10983_v21, %v10982_v50 }
 0x3f7   :  { %v10985_v7 = vpop.f32.mrf.mxu0 }
 0x3f8   :  { %v14952_v61 = vadd.f32 %v10984_v19, %v14949_v36 }
 0x3f9   :  { %v10986_v0 = vpop.f32.mrf.mxu0 }
 0x3fa   :  { %4506 = vst [vmem:[%s16982_s15] sm:$0xff] %v14952_v61  ;;  %v4531_v2 = vmul.f32 0.5, %v14952_v61  ;;  %v10987_v37 = vadd.f32 %v10986_v0, %v10985_v7 }
 0x3fb   :  { %v10988_v63 = vpop.f32.mrf.mxu0 }
 0x3fc   :  { %v4556_v53 = vmul.f32 1.442695, %v4531_v2  ;;  %v14960_v1 = vadd.f32 %v10987_v37, %v14949_v36 }
 0x3fd   :  { %v10989_v4 = vpop.f32.mrf.mxu0 }
 0x3fe   :  { %12259 = vpow2.f32 %v4556_v53  ;;  %4507 = vst [vmem:[%s16982_s15 + $0x8] sm:$0xff] %v14960_v1  ;;  %v4532_v58 = vmul.f32 0.5, %v14960_v1  ;;  %v10990_v39 = vadd.f32 %v10989_v4, %v10988_v63 }
 0x3ff   :  { %v10991_v34 = vpop.f32.mrf.mxu0 }
 0x400   :  { %v4558_v23 = vmul.f32 1.442695, %v4532_v58  ;;  %v14968_v24 = vadd.f32 %v10990_v39, %v14949_v36 }
 0x401   :  { %v10992_v62 = vpop.f32.mrf.mxu0 }
 0x402   :  { %12261 = vpow2.f32 %v4558_v23  ;;  %4508 = vst [vmem:[%s16982_s15 + $0x10] sm:$0xff] %v14968_v24  ;;  %v4533_v54 = vmul.f32 0.5, %v14968_v24  ;;  %v10993_v9 = vadd.f32 %v10992_v62, %v10991_v34 }
 0x403   :  { %v10994_v40 = vpop.f32.mrf.mxu0 }
 0x404   :  { %v4560_v17 = vmul.f32 1.442695, %v4533_v54  ;;  %v14976_v51 = vadd.f32 %v10993_v9, %v14949_v36 }
 0x405   :  { %v10995_v13 = vpop.f32.mrf.mxu0 }
 0x406   :  { %12263 = vpow2.f32 %v4560_v17  ;;  %4509 = vst [vmem:[%s16982_s15 + $0x18] sm:$0xff] %v14976_v51  ;;  %v4534_v31 = vmul.f32 0.5, %v14976_v51  ;;  %v10996_v44 = vadd.f32 %v10995_v13, %v10994_v40 }
 0x407   :  { %v10997_v47 = vpop.f32.mrf.mxu0 }
 0x408   :  { %v4562_v16 = vmul.f32 1.442695, %v4534_v31  ;;  %v14984_v56 = vadd.f32 %v10996_v44, %v14949_v36 }
 0x409   :  { %v10998_v28 = vpop.f32.mrf.mxu0 }
 0x40a   :  { %12265 = vpow2.f32 %v4562_v16  ;;  %4510 = vst [vmem:[%s16982_s15 + $0x20] sm:$0xff] %v14984_v56  ;;  %v4535_v10 = vmul.f32 0.5, %v14984_v56  ;;  %v10999_v32 = vadd.f32 %v10998_v28, %v10997_v47 }
 0x40b   :  { %v12260_v48 = vpop.eup %12259  ;;  %v11000_v14 = vpop.f32.mrf.mxu0 }
 0x40c   :  { %v4564_v6 = vmul.f32 1.442695, %v4535_v10  ;;  %v14992_v5 = vadd.f32 %v10999_v32, %v14949_v36  ;;  %4656 = vrot.lane.b32.xlu0 %v12260_v48, %s12799_s22 }
 0x40d   :  { %v11001_v55 = vpop.f32.mrf.mxu0 }
 0x40e   :  { %12267 = vpow2.f32 %v4564_v6  ;;  %4511 = vst [vmem:[%s16982_s15 + $0x28] sm:$0xff] %v14992_v5  ;;  %v4536_v45 = vmul.f32 0.5, %v14992_v5  ;;  %v11002_v18 = vadd.f32 %v11001_v55, %v11000_v14 }
 0x40f   :  { %v12262_v27 = vpop.eup %12261  ;;  %v11003_v43 = vpop.f32.mrf.mxu0 }
 0x410   :  { %v4566_v15 = vmul.f32 1.442695, %v4536_v45  ;;  %v15001_v41 = vadd.f32 %v11002_v18, %v14949_v36  ;;  %4658 = vrot.lane.b32.xlu0 %v12262_v27, %s12799_s22 }
 0x411   :  { %v11004_v52 = vpop.f32.mrf.mxu0 }
 0x412   :  { %12269 = vpow2.f32 %v4566_v15  ;;  %4512 = vst [vmem:[%s16982_s15 + $0x30] sm:$0xff] %v15001_v41  ;;  %v4537_v22 = vmul.f32 0.5, %v15001_v41  ;;  %v11005_v3 = vadd.f32 %v11004_v52, %v11003_v43 }
 0x413   :  { %v12264_v11 = vpop.eup %12263  ;;  %v11006_v8 = vpop.f32.mrf.mxu0 }
 0x414   :  { %v4568_v38 = vmul.f32 1.442695, %v4537_v22  ;;  %v15010_v49 = vadd.f32 %v11005_v3, %v14949_v36  ;;  %4660 = vrot.lane.b32.xlu1 %v12264_v11, %s12799_s22 }
 0x415   :  { %v11007_v42 = vpop.f32.mrf.mxu0 }
 0x416   :  { %12271 = vpow2.f32 %v4568_v38  ;;  %4513 = vst [vmem:[%s16982_s15 + $0x38] sm:$0xff] %v15010_v49  ;;  %v4538_v29 = vmul.f32 0.5, %v15010_v49  ;;  %v11008_v59 = vadd.f32 %v11007_v42, %v11006_v8 }
 0x417   :  { %v12266_v25 = vpop.eup %12265  ;;  %v11009_v35 = vpop.f32.mrf.mxu0 }
 0x418   :  { %v4570_v33 = vmul.f32 1.442695, %v4538_v29  ;;  %v15019_v20 = vadd.f32 %v11008_v59, %v14949_v36  ;;  %4662 = vrot.lane.b32.xlu1 %v12266_v25, %s12799_s22 }
 0x419   :  { %v11010_v46 = vpop.f32.mrf.mxu0 }
 0x41a   :  { %12273 = vpow2.f32 %v4570_v33  ;;  %4514 = vst [vmem:[%s16982_s15 + $0x40] sm:$0xff] %v15019_v20  ;;  %v4539_v57 = vmul.f32 0.5, %v15019_v20  ;;  %v11011_v12 = vadd.f32 %v11010_v46, %v11009_v35 }
 0x41b   :  { %v12268_v30 = vpop.eup %12267  ;;  %v11012_v26 = vpop.f32.mrf.mxu0 }
 0x41c   :  { %v4572_v60 = vmul.f32 1.442695, %v4539_v57  ;;  %v15028_v50 = vadd.f32 %v11011_v12, %v14949_v36  ;;  %4664 = vrot.lane.b32.xlu0 %v12268_v30, %s12799_s22 }
 0x41d   :  { %v11013_v21 = vpop.f32.mrf.mxu0 }
 0x41e   :  { %12275 = vpow2.f32 %v4572_v60  ;;  %4515 = vst [vmem:[%s16982_s15 + $0x48] sm:$0xff] %v15028_v50  ;;  %v4540_v19 = vmul.f32 0.5, %v15028_v50  ;;  %v11014_v7 = vadd.f32 %v11013_v21, %v11012_v26 }
 0x41f   :  { %v12270_v0 = vpop.eup %12269  ;;  %v11015_v2 = vpop.f32.mrf.mxu0 }
 0x420   :  { %v4574_v37 = vmul.f32 1.442695, %v4540_v19  ;;  %v15037_v63 = vadd.f32 %v11014_v7, %v14949_v36  ;;  %4666 = vrot.lane.b32.xlu1 %v12270_v0, %s12799_s22 }
 0x421   :  { %v11016_v53 = vpop.f32.mrf.mxu0 }
 0x422   :  { %12277 = vpow2.f32 %v4574_v37  ;;  %4516 = vst [vmem:[%s16982_s15 + $0x50] sm:$0xff] %v15037_v63  ;;  %v4541_v4 = vmul.f32 0.5, %v15037_v63  ;;  %v11017_v58 = vadd.f32 %v11016_v53, %v11015_v2 }
 0x423   :  { %v12272_v39 = vpop.eup %12271  ;;  %v11018_v34 = vpop.f32.mrf.mxu0 }
 0x424   :  { %v4576_v23 = vmul.f32 1.442695, %v4541_v4  ;;  %v15046_v62 = vadd.f32 %v11017_v58, %v14949_v36  ;;  %4668 = vrot.lane.b32.xlu0 %v12272_v39, %s12799_s22 }
 0x425   :  { %v11019_v54 = vpop.f32.mrf.mxu0 }
 0x426   :  { %12279 = vpow2.f32 %v4576_v23  ;;  %4517 = vst [vmem:[%s16982_s15 + $0x58] sm:$0xff] %v15046_v62  ;;  %v4542_v9 = vmul.f32 0.5, %v15046_v62  ;;  %v11020_v40 = vadd.f32 %v11019_v54, %v11018_v34 }
 0x427   :  { %v12274_v17 = vpop.eup %12273  ;;  %v11021_v13 = vpop.f32.mrf.mxu0 }
 0x428   :  { %v4578_v31 = vmul.f32 1.442695, %v4542_v9  ;;  %v15055_v44 = vadd.f32 %v11020_v40, %v14949_v36  ;;  %4670 = vrot.lane.b32.xlu1 %v12274_v17, %s12799_s22 }
 0x429   :  { %v11022_v47 = vpop.f32.mrf.mxu0 }
 0x42a   :  { %12281 = vpow2.f32 %v4578_v31  ;;  %4518 = vst [vmem:[%s16982_s15 + $0x60] sm:$0xff] %v15055_v44  ;;  %v4543_v16 = vmul.f32 0.5, %v15055_v44  ;;  %v11023_v28 = vadd.f32 %v11022_v47, %v11021_v13 }
 0x42b   :  { %v12276_v10 = vpop.eup %12275  ;;  %v11024_v32 = vpop.f32.mrf.mxu0 }
 0x42c   :  { %v4580_v48 = vmul.f32 1.442695, %v4543_v16  ;;  %v15064_v14 = vadd.f32 %v11023_v28, %v14949_v36  ;;  %4672 = vrot.lane.b32.xlu0 %v12276_v10, %s12799_s22 }
 0x42d   :  { %v11025_v6 = vpop.f32.mrf.mxu0 }
 0x42e   :  { %12283 = vpow2.f32 %v4580_v48  ;;  %4519 = vst [vmem:[%s16982_s15 + $0x68] sm:$0xff] %v15064_v14  ;;  %v4544_v55 = vmul.f32 0.5, %v15064_v14  ;;  %v11026_v45 = vadd.f32 %v11025_v6, %v11024_v32 }
 0x42f   :  { %v12278_v18 = vpop.eup %12277  ;;  %v11027_v27 = vpop.f32.mrf.mxu0 }
 0x430   :  { %v4582_v43 = vmul.f32 1.442695, %v4544_v55  ;;  %v15073_v15 = vadd.f32 %v11026_v45, %v14949_v36  ;;  %4674 = vrot.lane.b32.xlu1 %v12278_v18, %s12799_s22 }
 0x431   :  { %v11028_v52 = vpop.f32.mrf.mxu0 }
 0x432   :  { %12285 = vpow2.f32 %v4582_v43  ;;  %4520 = vst [vmem:[%s16982_s15 + $0x70] sm:$0xff] %v15073_v15  ;;  %v4545_v22 = vmul.f32 0.5, %v15073_v15  ;;  %v11029_v3 = vadd.f32 %v11028_v52, %v11027_v27 }
 0x433   :  { %v12280_v11 = vpop.eup %12279  ;;  %v11030_v8 = vpop.f32.mrf.mxu0 }
 0x434   :  { %v4584_v38 = vmul.f32 1.442695, %v4545_v22  ;;  %v15082_v42 = vadd.f32 %v11029_v3, %v14949_v36  ;;  %4676 = vrot.lane.b32.xlu0 %v12280_v11, %s12799_s22 }
 0x435   :  { %v11031_v29 = vpop.f32.mrf.mxu0 }
 0x436   :  { %12287 = vpow2.f32 %v4584_v38  ;;  %4521 = vst [vmem:[%s16982_s15 + $0x78] sm:$0xff] %v15082_v42  ;;  %v4546_v59 = vmul.f32 0.5, %v15082_v42  ;;  %v11032_v25 = vadd.f32 %v11031_v29, %v11030_v8 }
 0x437   :  { %v12282_v35 = vpop.eup %12281  ;;  %v11033_v33 = vpop.f32.mrf.mxu0 }
 0x438   :  { %v4586_v46 = vmul.f32 1.442695, %v4546_v59  ;;  %v15091_v57 = vadd.f32 %v11032_v25, %v14949_v36  ;;  %4678 = vrot.lane.b32.xlu1 %v12282_v35, %s12799_s22 }
 0x439   :  { %v11034_v12 = vpop.f32.mrf.mxu0 }
 0x43a   :  { %12289 = vpow2.f32 %v4586_v46  ;;  %4522 = vst [vmem:[%s16982_s15 + $0x80] sm:$0xff] %v15091_v57  ;;  %v4547_v30 = vmul.f32 0.5, %v15091_v57  ;;  %v11035_v26 = vadd.f32 %v11034_v12, %v11033_v33 }
 0x43b   :  { %v12284_v60 = vpop.eup %12283  ;;  %v11036_v21 = vpop.f32.mrf.mxu0 }
 0x43c   :  { %v4588_v19 = vmul.f32 1.442695, %v4547_v30  ;;  %v15100_v7 = vadd.f32 %v11035_v26, %v14949_v36  ;;  %4680 = vrot.lane.b32.xlu0 %v12284_v60, %s12799_s22 }
 0x43d   :  { %v11037_v0 = vpop.f32.mrf.mxu0 }
 0x43e   :  { %12291 = vpow2.f32 %v4588_v19  ;;  %4523 = vst [vmem:[%s16982_s15 + $0x88] sm:$0xff] %v15100_v7  ;;  %v4548_v2 = vmul.f32 0.5, %v15100_v7  ;;  %v11038_v37 = vadd.f32 %v11037_v0, %v11036_v21 }
 0x43f   :  { %v12286_v53 = vpop.eup %12285  ;;  %v11039_v4 = vpop.f32.mrf.mxu0 }
 0x440   :  { %v4590_v58 = vmul.f32 1.442695, %v4548_v2  ;;  %v15109_v39 = vadd.f32 %v11038_v37, %v14949_v36  ;;  %4682 = vrot.lane.b32.xlu1 %v12286_v53, %s12799_s22 }
 0x441   :  { %v11040_v34 = vpop.f32.mrf.mxu0 }
 0x442   :  { %12293 = vpow2.f32 %v4590_v58  ;;  %4524 = vst [vmem:[%s16982_s15 + $0x90] sm:$0xff] %v15109_v39  ;;  %v4549_v23 = vmul.f32 0.5, %v15109_v39  ;;  %v11041_v54 = vadd.f32 %v11040_v34, %v11039_v4 }
 0x443   :  { %v12288_v9 = vpop.eup %12287  ;;  %v11042_v40 = vpop.f32.mrf.mxu0 }
 0x444   :  { %v4592_v17 = vmul.f32 1.442695, %v4549_v23  ;;  %v15118_v13 = vadd.f32 %v11041_v54, %v14949_v36  ;;  %4684 = vrot.lane.b32.xlu0 %v12288_v9, %s12799_s22 }
 0x445   :  { %v11043_v31 = vpop.f32.mrf.mxu0 }
 0x446   :  { %12295 = vpow2.f32 %v4592_v17  ;;  %4525 = vst [vmem:[%s16982_s15 + $0x98] sm:$0xff] %v15118_v13  ;;  %v4550_v47 = vmul.f32 0.5, %v15118_v13  ;;  %v11044_v16 = vadd.f32 %v11043_v31, %v11042_v40  ;;  %v11843_v40 = vld [vmem:[#allocation4 + $0xe0] ss:$16 sps:$4 sm:$0xff]   ;;  %v11845_v17 = vld [vmem:[#allocation4 + $0xe4] ss:$16 sps:$4 sm:$0xff]  }
 0x447   :  { %v12290_v28 = vpop.eup %12289  ;;  %v11045_v10 = vpop.f32.mrf.mxu0  ;;  %v11848_v31 = vld [vmem:[#allocation4 + $0xec] ss:$16 sps:$4 sm:$0xff]   ;;  %5537 = vmatprep.subr.bf16.mxu0 %v11845_v17 }
 0x448   :  { %v4594_v32 = vmul.f32 1.442695, %v4550_v47  ;;  %v15127_v48 = vadd.f32 %v11044_v16, %v14949_v36  ;;  %4686 = vrot.lane.b32.xlu1 %v12290_v28, %s12799_s22  ;;  %v11851_v47 = vld [vmem:[#allocation4 + $0xc4] ss:$16 sps:$4 sm:$0xff]   ;;  %5538 = vmatpush1.bf16.msra.mxu0 %v11843_v40  ;;  %v11849_v28 = vld [vmem:[#allocation4 + $0xc0] ss:$16 sps:$4 sm:$0xff]  }
 0x449   :  { %v11046_v6 = vpop.f32.mrf.mxu0  ;;  %5698 = vmatprep.subr.bf16.mxu1 %v11848_v31  ;;  %5539 = vmatprep.subr.bf16.mxu0 %v11851_v47  ;;  %v11897_v40 = vld [vmem:[#allocation4 + $0x1c0] ss:$16 sps:$4 sm:$0xff]   ;;  %v11905_v47 = vld [vmem:[#allocation4 + $0x1a4] ss:$16 sps:$4 sm:$0xff]  }
 0x44a   :  { %12297 = vpow2.f32 %v4594_v32  ;;  %4526 = vst [vmem:[%s16982_s15 + $0xa0] sm:$0xff] %v15127_v48  ;;  %v4551_v55 = vmul.f32 0.5, %v15127_v48  ;;  %v11047_v45 = vadd.f32 %v11046_v6, %v11045_v10  ;;  %v11857_v10 = vld [vmem:[#allocation4 + $0xa4] ss:$16 sps:$4 sm:$0xff]   ;;  %v11855_v32 = vld [vmem:[#allocation4 + $0xa0] ss:$16 sps:$4 sm:$0xff]  }
 0x44b   :  { %v12292_v18 = vpop.eup %12291  ;;  %v11048_v27 = vpop.f32.mrf.mxu0  ;;  %v11863_v6 = vld [vmem:[#allocation4 + $0x84] ss:$16 sps:$4 sm:$0xff]  }
 0x44c   :  { %v4596_v43 = vmul.f32 1.442695, %v4551_v55  ;;  %v15136_v52 = vadd.f32 %v11047_v45, %v14949_v36  ;;  %4688 = vrot.lane.b32.xlu0 %v12292_v18, %s12799_s22  ;;  %5540 = vmatpush1.bf16.msra.mxu0 %v11849_v28  ;;  %v11861_v55 = vld [vmem:[#allocation4 + $0x80] ss:$16 sps:$4 sm:$0xff]   ;;  %v11869_v45 = vld [vmem:[#allocation4 + $0x64] ss:$16 sps:$4 sm:$0xff]  }
 0x44d   :  { %v11049_v22 = vpop.f32.mrf.mxu0  ;;  %5541 = vmatprep.subr.bf16.mxu0 %v11857_v10  ;;  %v11867_v18 = vld [vmem:[#allocation4 + $0x60] ss:$16 sps:$4 sm:$0xff]   ;;  %v11858_v10 = vld [vmem:[#allocation4 + $0xa8] ss:$16 sps:$4 sm:$0xff]  }
 0x44e   :  { %12299 = vpow2.f32 %v4596_v43  ;;  %4527 = vst [vmem:[%s16982_s15 + $0xa8] sm:$0xff] %v15136_v52  ;;  %v4552_v3 = vmul.f32 0.5, %v15136_v52  ;;  %v11050_v11 = vadd.f32 %v11049_v22, %v11048_v27  ;;  %v11875_v27 = vld [vmem:[#allocation4 + $0x44] ss:$16 sps:$4 sm:$0xff]   ;;  %v11873_v43 = vld [vmem:[#allocation4 + $0x40] ss:$16 sps:$4 sm:$0xff]  }
 0x44f   :  { %v12294_v8 = vpop.eup %12293  ;;  %v11051_v38 = vpop.f32.mrf.mxu0  ;;  %v11881_v22 = vld [vmem:[#allocation4 + $0x24] ss:$16 sps:$4 sm:$0xff]  }
 0x450   :  { %v4598_v29 = vmul.f32 1.442695, %v4552_v3  ;;  %v15145_v59 = vadd.f32 %v11050_v11, %v14949_v36  ;;  %4690 = vrot.lane.b32.xlu1 %v12294_v8, %s12799_s22  ;;  %5542 = vmatpush1.bf16.msra.mxu0 %v11855_v32  ;;  %v4606_v3 = vld [vmem:[%s16968_s1] sm:$0xff]  ;;  %v4607_v8 = vld [vmem:[%s16968_s1 + $0x8] sm:$0xff] }
 0x451   :  { %v11052_v25 = vpop.f32.mrf.mxu0  ;;  %5543 = vmatprep.subr.bf16.mxu0 %v11863_v6  ;;  %v11866_v6 = vld [vmem:[#allocation4 + $0x8c] ss:$16 sps:$4 sm:$0xff]  }
 0x452   :  { %12301 = vpow2.f32 %v4598_v29  ;;  %4528 = vst [vmem:[%s16982_s15 + $0xb0] sm:$0xff] %v15145_v59  ;;  %v4553_v35 = vmul.f32 0.5, %v15145_v59  ;;  %v11053_v33 = vadd.f32 %v11052_v25, %v11051_v38  ;;  %v11879_v38 = vld [vmem:[#allocation4 + $0x20] ss:$16 sps:$4 sm:$0xff]   ;;  %v11887_v25 = vld [vmem:[#allocation4 + $0x4] ss:$16 sps:$4 sm:$0xff]  }
 0x453   :  { %v12296_v46 = vpop.eup %12295  ;;  %v11054_v12 = vpop.f32.mrf.mxu0 }
 0x454   :  { %v4600_v30 = vmul.f32 1.442695, %v4553_v35  ;;  %v15154_v26 = vadd.f32 %v11053_v33, %v14949_v36  ;;  %4692 = vrot.lane.b32.xlu0 %v12296_v46, %s12799_s22  ;;  %5544 = vmatpush1.bf16.msra.mxu0 %v11861_v55  ;;  %v11885_v46 = vld [vmem:[#allocation4] ss:$16 sps:$4 sm:$0xff]   ;;  %v4611_v55 = vld [vmem:[%s16968_s1 + $0x28] sm:$0xff] }
 0x455   :  { %v11055_v60 = vpop.f32.mrf.mxu0  ;;  %5545 = vmatprep.subr.bf16.mxu0 %v11869_v45 }
 0x456   :  { %12303 = vpow2.f32 %v4600_v30  ;;  %4529 = vst [vmem:[%s16982_s15 + $0xb8] sm:$0xff] %v15154_v26  ;;  %v4554_v21 = vmul.f32 0.5, %v15154_v26  ;;  %v11056_v19 = vadd.f32 %v11055_v60, %v11054_v12  ;;  %v11893_v60 = vld [vmem:[#allocation4 + $0x1e4] ss:$16 sps:$4 sm:$0xff]  }
 0x457   :  { %v12298_v0 = vpop.eup %12297  ;;  %v11057_v2 = vpop.f32.mrf.mxu0 }
 0x458   :  { %v4602_v37 = vmul.f32 1.442695, %v4554_v21  ;;  %v15163_v53 = vadd.f32 %v11056_v19, %v14949_v36  ;;  %4694 = vrot.lane.b32.xlu1 %v12298_v0, %s12799_s22  ;;  %5546 = vmatpush1.bf16.msra.mxu0 %v11867_v18  ;;  %v4608_v21 = vld [vmem:[%s16968_s1 + $0x10] sm:$0xff]  ;;  %v11846_v0 = vld [vmem:[#allocation4 + $0xe8] ss:$16 sps:$4 sm:$0xff]  }
 0x459   :  { %v11058_v4 = vpop.f32.mrf.mxu0  ;;  %5547 = vmatprep.subr.bf16.mxu0 %v11875_v27  ;;  %v11864_v27 = vld [vmem:[#allocation4 + $0x88] ss:$16 sps:$4 sm:$0xff]  }
 0x45a   :  { %12305 = vpow2.f32 %v4602_v37  ;;  %4530 = vst [vmem:[%s16982_s15 + $0xc0] sm:$0xff] %v15163_v53  ;;  %v4555_v58 = vmul.f32 0.5, %v15163_v53  ;;  %v11854_v37 = vld [vmem:[#allocation4 + $0xcc] ss:$16 sps:$4 sm:$0xff]  }
 0x45b   :  { %v12300_v34 = vpop.eup %12299  ;;  %v4609_v4 = vld [vmem:[%s16968_s1 + $0x18] sm:$0xff] }
 0x45c   :  { %v4604_v23 = vmul.f32 1.442695, %v4555_v58  ;;  %4696 = vrot.lane.b32.xlu0 %v12300_v34, %s12799_s22  ;;  %5548 = vmatpush1.bf16.msra.mxu0 %v11873_v43  ;;  %v11891_v58 = vld [vmem:[#allocation4 + $0x1e0] ss:$16 sps:$4 sm:$0xff]  }
 0x45d   :  { %5549 = vmatprep.subr.bf16.mxu0 %v11881_v22  ;;  %v11872_v22 = vld [vmem:[#allocation4 + $0x6c] ss:$16 sps:$4 sm:$0xff]  }
 0x45e   :  { %12307 = vpow2.f32 %v4604_v23  ;;  %v17113_v23 = vmov 0  }
 0x45f   :  { %v12302_v54 = vpop.eup %12301 }
 0x460   :  { %4698 = vrot.lane.b32.xlu1 %v12302_v54, %s12799_s22  ;;  %5550 = vmatpush1.bf16.msra.mxu0 %v11879_v38  ;;  %v11852_v54 = vld [vmem:[#allocation4 + $0xc8] ss:$16 sps:$4 sm:$0xff]   ;;  %v11917_v38 = vld [vmem:[#allocation4 + $0x164] ss:$16 sps:$4 sm:$0xff]  }
 0x461   :  { %5551 = vmatprep.subr.bf16.mxu0 %v11887_v25 }
 0x463   :  { %v12304_v36 = vpop.eup %12303 }
 0x464   :  { %4700 = vrot.lane.b32.xlu0 %v12304_v36, %s12799_s22  ;;  %5552 = vmatpush1.bf16.msra.mxu0 %v11885_v46  ;;  %v11878_v46 = vld [vmem:[#allocation4 + $0x4c] ss:$16 sps:$4 sm:$0xff]  }
 0x465   :  { %5553 = vmatprep.subr.bf16.mxu0 %v11893_v60 }
 0x467   :  { %v12306_v9 = vpop.eup %12305 }
 0x468   :  { %4702 = vrot.lane.b32.xlu1 %v12306_v9, %s12799_s22  ;;  %v11860_v9 = vld [vmem:[#allocation4 + $0xac] ss:$16 sps:$4 sm:$0xff]   ;;  %5554 = vmatpush2.bf16.msra.mxu0 %v11891_v58  ;;  %v4614_v58 = vld [vmem:[%s16968_s1 + $0x40] sm:$0xff] }
 0x46b   :  { %v12308_v16 = vpop.eup %12307 }
 0x46c   :  { %4704 = vrot.lane.b32.xlu0 %v12308_v16, %s12799_s22  ;;  %v4610_v16 = vld [vmem:[%s16968_s1 + $0x20] sm:$0xff] }
 0x47e   :  { %v4657_v11 = vpop.permute.xlu0 %4656 }
 0x47f   :  { %v4731_v29 = vmul.f32 %v4657_v11, %v4606_v3  ;;  %v11909_v3 = vld [vmem:[#allocation4 + $0x180] ss:$16 sps:$4 sm:$0xff]  }
 0x481   :  { %v4756_v12 = vadd.f32 %v4731_v29, %v14952_v61  ;;  %v4612_v29 = vld [vmem:[%s16968_s1 + $0x30] sm:$0xff] }
 0x482   :  { %v4659_v35 = vpop.permute.xlu0 %4658 }
 0x483   :  { %v4732_v33 = vmul.f32 %v4659_v35, %v4607_v8  ;;  %v11870_v35 = vld [vmem:[#allocation4 + $0x68] ss:$16 sps:$4 sm:$0xff]  }
 0x485   :  { %v4757_v30 = vadd.f32 %v4732_v33, %v14960_v1  ;;  %v11899_v1 = vld [vmem:[#allocation4 + $0x1c4] ss:$16 sps:$4 sm:$0xff]  }
 0x486   :  { %v4661_v19 = vpop.permute.xlu1 %4660  ;;  %5555 = vmatprep.subr.bf16.mxu0 %v11899_v1  ;;  %v11882_v1 = vld [vmem:[#allocation4 + $0x28] ss:$16 sps:$4 sm:$0xff]  }
 0x487   :  { %v4781_v2 = vpack.c.bf16 %v4757_v30, %v4756_v12  ;;  %v4733_v61 = vmul.f32 %v4661_v19, %v4608_v21  ;;  %5556 = vmatpush2.bf16.msra.mxu0 %v11897_v40  ;;  %v4613_v12 = vld [vmem:[%s16968_s1 + $0x38] sm:$0xff] }
 0x488   :  { %5557 = vmatprep.subr.bf16.mxu0 %v11905_v47  ;;  %v11876_v21 = vld [vmem:[#allocation4 + $0x48] ss:$16 sps:$4 sm:$0xff]  }
 0x489   :  { %10465 = vmatmul.mubr.msk.bf16.vlgmr.msra.gmra.mxu1 %vm4854_vm0, %v4781_v2  ;;  %v4758_v17 = vadd.f32 %v4733_v61, %v14968_v24  ;;  %v11903_v24 = vld [vmem:[#allocation4 + $0x1a0] ss:$16 sps:$4 sm:$0xff]  }
 0x48a   :  { %v4663_v34 = vpop.permute.xlu1 %4662  ;;  %4936 = vmatprep.mubr.bf16.mxu1 %v17113_v23  ;;  %5699 = vmatpush1.bf16.msra.mxu1 %v11846_v0  ;;  %v11884_v0 = vld [vmem:[#allocation4 + $0x2c] ss:$16 sps:$4 sm:$0xff]   ;;  %v11921_v2 = vld [vmem:[#allocation4 + $0x140] ss:$16 sps:$4 sm:$0xff]  }
 0x48b   :  { %v4734_v36 = vmul.f32 %v4663_v34, %v4609_v4  ;;  %5700 = vmatprep.subr.bf16.mxu1 %v11854_v37  ;;  %5558 = vmatpush2.bf16.msra.mxu0 %v11903_v24 }
 0x48d   :  { %v4759_v31 = vadd.f32 %v4734_v36, %v14976_v51  ;;  %v11911_v51 = vld [vmem:[#allocation4 + $0x184] ss:$16 sps:$4 sm:$0xff]   ;;  %v4615_v36 = vld [vmem:[%s16968_s1 + $0x48] sm:$0xff] }
 0x48e   :  { %v4665_v28 = vpop.permute.xlu0 %4664  ;;  %5701 = vmatpush1.bf16.msra.mxu1 %v11852_v54  ;;  %5559 = vmatprep.subr.bf16.mxu0 %v11911_v51  ;;  %v11890_v54 = vld [vmem:[#allocation4 + $0xc] ss:$16 sps:$4 sm:$0xff]  }
 0x48f   :  { %v4782_v32 = vpack.c.bf16 %v4759_v31, %v4758_v17  ;;  %5702 = vmatprep.subr.bf16.mxu1 %v11860_v9  ;;  %v4735_v45 = vmul.f32 %v4665_v28, %v4610_v16  ;;  %5560 = vmatpush2.bf16.msra.mxu0 %v11909_v3  ;;  %v11896_v17 = vld [vmem:[#allocation4 + $0x1ec] ss:$16 sps:$4 sm:$0xff]   ;;  %v4616_v16 = vld [vmem:[%s16968_s1 + $0x50] sm:$0xff]  ;;  %v11906_v3 = vld [vmem:[#allocation4 + $0x1a8] ss:$16 sps:$4 sm:$0xff]  }
 0x490   :  { %5561 = vmatprep.subr.bf16.mxu0 %v11917_v38  ;;  %v11908_v51 = vld [vmem:[#allocation4 + $0x1ac] ss:$16 sps:$4 sm:$0xff]  }
 0x491   :  { %10466 = vmatmul.mubr.msk.bf16.gmra.mxu1 %vm4854_vm0, %v4782_v32  ;;  %v4760_v11 = vadd.f32 %v4735_v45, %v14984_v56  ;;  %v11915_v56 = vld [vmem:[#allocation4 + $0x160] ss:$16 sps:$4 sm:$0xff]   ;;  %v4619_v38 = vld [vmem:[%s16968_s1 + $0x68] sm:$0xff] }
 0x492   :  { %v4667_v18 = vpop.permute.xlu1 %4666  ;;  %4946 = vmatprep.mubr.bf16.mxu1 %v17113_v23  ;;  %5703 = vmatpush1.bf16.msra.mxu1 %v11858_v10  ;;  %v11894_v10 = vld [vmem:[#allocation4 + $0x1e8] ss:$16 sps:$4 sm:$0xff]  }
 0x493   :  { %v4736_v43 = vmul.f32 %v4667_v18, %v4611_v55  ;;  %5704 = vmatprep.subr.bf16.mxu1 %v11866_v6  ;;  %5562 = vmatpush2.bf16.msra.mxu0 %v11915_v56  ;;  %v11902_v6 = vld [vmem:[#allocation4 + $0x1cc] ss:$16 sps:$4 sm:$0xff]  }
 0x494   :  { %v4617_v55 = vld [vmem:[%s16968_s1 + $0x58] sm:$0xff] }
 0x495   :  { %v4761_v8 = vadd.f32 %v4736_v43, %v14992_v5  ;;  %v11923_v5 = vld [vmem:[#allocation4 + $0x144] ss:$16 sps:$4 sm:$0xff]  }
 0x496   :  { %v4669_v25 = vpop.permute.xlu0 %4668  ;;  %5705 = vmatpush1.bf16.msra.mxu1 %v11864_v27  ;;  %5563 = vmatprep.subr.bf16.mxu0 %v11923_v5  ;;  %v4618_v43 = vld [vmem:[%s16968_s1 + $0x60] sm:$0xff] }
 0x497   :  { %v4783_v33 = vpack.c.bf16 %v4761_v8, %v4760_v11  ;;  %5706 = vmatprep.subr.bf16.mxu1 %v11872_v22  ;;  %v4737_v30 = vmul.f32 %v4669_v25, %v4612_v29  ;;  %5564 = vmatpush2.bf16.msra.mxu0 %v11921_v2  ;;  %v11914_v8 = vld [vmem:[#allocation4 + $0x18c] ss:$16 sps:$4 sm:$0xff]  }
 0x499   :  { %10467 = vmatmul.mubr.msk.bf16.gmra.mxu1 %vm4854_vm0, %v4783_v33  ;;  %v4762_v37 = vadd.f32 %v4737_v30, %v15001_v41  ;;  %v11918_v30 = vld [vmem:[#allocation4 + $0x168] ss:$16 sps:$4 sm:$0xff]  }
 0x49a   :  { %v4671_v60 = vpop.permute.xlu1 %4670  ;;  %4956 = vmatprep.mubr.bf16.mxu1 %v17113_v23  ;;  %5707 = vmatpush1.bf16.msra.mxu1 %v11870_v35  ;;  %v11920_v35 = vld [vmem:[#allocation4 + $0x16c] ss:$16 sps:$4 sm:$0xff]  }
 0x49b   :  { %v4738_v19 = vmul.f32 %v4671_v60, %v4613_v12  ;;  %5708 = vmatprep.subr.bf16.mxu1 %v11878_v46  ;;  %v4620_v12 = vld [vmem:[%s16968_s1 + $0x70] sm:$0xff]  ;;  %v11926_v60 = vld [vmem:[#allocation4 + $0x14c] ss:$16 sps:$4 sm:$0xff]  }
 0x49d   :  { %v4763_v4 = vadd.f32 %v4738_v19, %v15010_v49  ;;  %v11888_v49 = vld [vmem:[#allocation4 + $0x8] ss:$16 sps:$4 sm:$0xff]  }
 0x49e   :  { %v4673_v61 = vpop.permute.xlu0 %4672  ;;  %5709 = vmatpush1.bf16.msra.mxu1 %v11876_v21  ;;  %v4621_v21 = vld [vmem:[%s16968_s1 + $0x78] sm:$0xff] }
 0x49f   :  { %v4784_v34 = vpack.c.bf16 %v4763_v4, %v4762_v37  ;;  %5710 = vmatprep.subr.bf16.mxu1 %v11884_v0  ;;  %v4739_v9 = vmul.f32 %v4673_v61, %v4614_v58  ;;  %v4622_v4 = vld [vmem:[%s16968_s1 + $0x80] sm:$0xff] }
 0x4a1   :  { %10468 = vmatmul.mubr.msk.bf16.gmra.mxu1 %vm4854_vm0, %v4784_v34  ;;  %v4764_v31 = vadd.f32 %v4739_v9, %v15019_v20  ;;  %v4624_v9 = vld [vmem:[%s16968_s1 + $0x90] sm:$0xff] }
 0x4a2   :  { %v4675_v41 = vpop.permute.xlu1 %4674  ;;  %4966 = vmatprep.mubr.bf16.mxu1 %v17113_v23  ;;  %5711 = vmatpush1.bf16.msra.mxu1 %v11882_v1  ;;  %v4623_v1 = vld [vmem:[%s16968_s1 + $0x88] sm:$0xff] }
 0x4a3   :  { %v4740_v40 = vmul.f32 %v4675_v41, %v4615_v36  ;;  %5712 = vmatprep.subr.bf16.mxu1 %v11890_v54 }
 0x4a5   :  { %v4765_v47 = vadd.f32 %v4740_v40, %v15028_v50  ;;  %v11900_v50 = vld [vmem:[#allocation4 + $0x1c8] ss:$16 sps:$4 sm:$0xff]  }
 0x4a6   :  { %v4677_v28 = vpop.permute.xlu0 %4676  ;;  %5713 = vmatpush1.bf16.msra.mxu1 %v11888_v49  ;;  %v4625_v40 = vld [vmem:[%s16968_s1 + $0x98] sm:$0xff] }
 0x4a7   :  { %v4785_v32 = vpack.c.bf16 %v4765_v47, %v4764_v31  ;;  %5714 = vmatprep.subr.bf16.mxu1 %v11896_v17  ;;  %v4741_v24 = vmul.f32 %v4677_v28, %v4616_v16  ;;  %v11929_v16 = vld [vmem:[#allocation4 + $0x124] ss:$16 sps:$4 sm:$0xff]  }
 0x4a8   :  { %5565 = vmatprep.subr.bf16.mxu0 %v11929_v16 }
 0x4a9   :  { %10469 = vmatmul.mubr.msk.bf16.gmra.mxu1 %vm4854_vm0, %v4785_v32  ;;  %v4766_v18 = vadd.f32 %v4741_v24, %v15037_v63  ;;  %v4626_v32 = vld [vmem:[%s16968_s1 + $0xa0] sm:$0xff] }
 0x4aa   :  { %v4679_v20 = vpop.permute.xlu1 %4678  ;;  %4976 = vmatprep.mubr.bf16.mxu1 %v17113_v23  ;;  %5715 = vmatpush2.bf16.msra.mxu1 %v11894_v10  ;;  %v11932_v10 = vld [vmem:[#allocation4 + $0x12c] ss:$16 sps:$4 sm:$0xff]  }
 0x4ab   :  { %v4742_v45 = vmul.f32 %v4679_v20, %v4617_v55  ;;  %5716 = vmatprep.subr.bf16.mxu1 %v11902_v6  ;;  %v11930_v55 = vld [vmem:[#allocation4 + $0x128] ss:$16 sps:$4 sm:$0xff]  }
 0x4ac   :  { %v4627_v20 = vld [vmem:[%s16968_s1 + $0xa8] sm:$0xff] }
 0x4ad   :  { %v4767_v27 = vadd.f32 %v4742_v45, %v15046_v62  ;;  %v11912_v62 = vld [vmem:[#allocation4 + $0x188] ss:$16 sps:$4 sm:$0xff]  }
 0x4ae   :  { %v4681_v22 = vpop.permute.xlu0 %4680  ;;  %5717 = vmatpush2.bf16.msra.mxu1 %v11900_v50 }
 0x4af   :  { %v4786_v11 = vpack.c.bf16 %v4767_v27, %v4766_v18  ;;  %5718 = vmatprep.subr.bf16.mxu1 %v11908_v51  ;;  %v4743_v29 = vmul.f32 %v4681_v22, %v4618_v43  ;;  %v11933_v51 = vld [vmem:[#allocation4 + $0x100] ss:$16 sps:$4 sm:$0xff]   ;;  %v11936_v18 = vld [vmem:[#allocation4 + $0x108] ss:$16 sps:$4 sm:$0xff]  }
 0x4b1   :  { %10470 = vmatmul.mubr.msk.bf16.gmra.mxu1 %vm4854_vm0, %v4786_v11  ;;  %v4768_v33 = vadd.f32 %v4743_v29, %v15055_v44 }
 0x4b2   :  { %v4683_v63 = vpop.permute.xlu1 %4682  ;;  %4986 = vmatprep.mubr.bf16.mxu1 %v17113_v23  ;;  %5719 = vmatpush2.bf16.msra.mxu1 %v11906_v3  ;;  %v4628_v3 = vld [vmem:[%s16968_s1 + $0xb0] sm:$0xff] }
 0x4b3   :  { %v4744_v25 = vmul.f32 %v4683_v63, %v4619_v38  ;;  %5720 = vmatprep.subr.bf16.mxu1 %v11914_v8  ;;  %v4629_v38 = vld [vmem:[%s16968_s1 + $0xb8] sm:$0xff] }
 0x4b5   :  { %v4769_v46 = vadd.f32 %v4744_v25, %v15064_v14  ;;  %v11924_v14 = vld [vmem:[#allocation4 + $0x148] ss:$16 sps:$4 sm:$0xff]  }
 0x4b6   :  { %v4685_v56 = vpop.permute.xlu0 %4684  ;;  %5721 = vmatpush2.bf16.msra.mxu1 %v11912_v62 }
 0x4b7   :  { %v4787_v5 = vpack.c.bf16 %v4769_v46, %v4768_v33  ;;  %5722 = vmatprep.subr.bf16.mxu1 %v11920_v35  ;;  %v4745_v19 = vmul.f32 %v4685_v56, %v4620_v12 }
 0x4b9   :  { %10471 = vmatmul.mubr.msk.bf16.gmra.mxu1 %vm4854_vm0, %v4787_v5  ;;  %v4770_v2 = vadd.f32 %v4745_v19, %v15073_v15  ;;  %v17114_v5 = vld [vmem:[#allocation10_spill] sm:$0xff] }
 0x4ba   :  { %v4687_v44 = vpop.permute.xlu1 %4686  ;;  %4996 = vmatprep.mubr.bf16.mxu1 %v17113_v23  ;;  %5723 = vmatpush2.bf16.msra.mxu1 %v11918_v30  ;;  %v11941_v30 = vld [vmem:[%s16979_s12 + $0x18c] ss:$28 sps:$4 sm:$0xff]  }
 0x4bb   :  { %v4746_v0 = vmul.f32 %v4687_v44, %v4621_v21  ;;  %5724 = vmatprep.subr.bf16.mxu1 %v11926_v60  ;;  %v17115_v60 = vld [vmem:[#allocation9_spill] sm:$0xff] }
 0x4bd   :  { %v4771_v37 = vadd.f32 %v4746_v0, %v15082_v42 }
 0x4be   :  { %v4689_v58 = vpop.permute.xlu0 %4688  ;;  %5725 = vmatpush2.bf16.msra.mxu1 %v11924_v14 }
 0x4bf   :  { %v4788_v61 = vpack.c.bf16 %v4771_v37, %v4770_v2  ;;  %v4747_v34 = vmul.f32 %v4689_v58, %v4622_v4  ;;  %5726 = vmatprep.subr.bf16.mxu1 %v11932_v10  ;;  %v11948_v10 = vld [vmem:[%s16979_s12 + $0x4d0] ss:$28 sps:$4 sm:$0xff]  }
 0x4c1   :  { %10472 = vmatmul.mubr.msk.bf16.gmra.mxu1 %vm4854_vm0, %v4788_v61  ;;  %v4772_v42 = vadd.f32 %v4747_v34, %v15091_v57  ;;  %v11927_v57 = vld [vmem:[#allocation4 + $0x120] ss:$16 sps:$4 sm:$0xff]  }
 0x4c2   :  { %v4691_v54 = vpop.permute.xlu1 %4690  ;;  %5006 = vmatprep.mubr.bf16.mxu1 %v17113_v23  ;;  %5566 = vmatpush2.bf16.msra.mxu0 %v11927_v57 }
 0x4c3   :  { %v4748_v15 = vmul.f32 %v4691_v54, %v4623_v1  ;;  %5727 = vmatpush2.bf16.msra.mxu1 %v11930_v55  ;;  %v11953_v55 = vld [vmem:[%s16979_s12 + $0x11c] ss:$28 sps:$4 sm:$0xff]  }
 0x4c5   :  { %v4773_v36 = vadd.f32 %v4748_v15, %v15100_v7 }
 0x4c6   :  { %v4693_v41 = vpop.permute.xlu0 %4692 }
 0x4c7   :  { %v4789_v49 = vpack.c.bf16 %v4773_v36, %v4772_v42  ;;  %v4749_v17 = vmul.f32 %v4693_v41, %v4624_v9  ;;  %v11939_v36 = vld [vmem:[%s16979_s12 + $0x188] ss:$28 sps:$4 sm:$0xff]  }
 0x4c8   :  { %v11942_v9 = vld [vmem:[%s16979_s12 + $0x508] ss:$28 sps:$4 sm:$0xff]  }
 0x4c9   :  { %10473 = vmatmul.mubr.msk.bf16.gmra.mxu1 %vm4854_vm0, %v4789_v49  ;;  %v4774_v7 = vadd.f32 %v4749_v17, %v15109_v39  ;;  %v11935_v39 = vld [vmem:[#allocation4 + $0x104] ss:$16 sps:$4 sm:$0xff]  }
 0x4ca   :  { %v4695_v31 = vpop.permute.xlu1 %4694  ;;  %5016 = vmatprep.mubr.bf16.mxu1 %v17113_v23  ;;  %5567 = vmatprep.subr.bf16.mxu0 %v11935_v39  ;;  %v11950_v17 = vld [vmem:[%s16979_s12 + $0x4d4] ss:$28 sps:$4 sm:$0xff]  }
 0x4cb   :  { %v4750_v47 = vmul.f32 %v4695_v31, %v4625_v40  ;;  %5568 = vmatpush2.bf16.msra.mxu0 %v11933_v51  ;;  %v11947_v40 = vld [vmem:[%s16979_s12 + $0x154] ss:$28 sps:$4 sm:$0xff]  }
 0x4cc   :  { %7456 = vmatprep.subr.bf16.mxu0 %v11941_v30  ;;  %v11951_v51 = vld [vmem:[%s16979_s12 + $0x118] ss:$28 sps:$4 sm:$0xff]  }
 0x4cd   :  { %v4775_v28 = vadd.f32 %v4750_v47, %v15118_v13  ;;  %v11938_v13 = vld [vmem:[#allocation4 + $0x10c] ss:$16 sps:$4 sm:$0xff]  }
 0x4ce   :  { %v4697_v6 = vpop.permute.xlu0 %4696  ;;  %5728 = vmatprep.subr.bf16.mxu1 %v11938_v13 }
 0x4cf   :  { %v4790_v24 = vpack.c.bf16 %v4775_v28, %v4774_v7  ;;  %v4751_v50 = vmul.f32 %v4697_v6, %v4626_v32  ;;  %5729 = vmatpush2.bf16.msra.mxu1 %v11936_v18  ;;  %v11945_v28 = vld [vmem:[%s16979_s12 + $0x150] ss:$28 sps:$4 sm:$0xff]   ;;  %v11954_v18 = vld [vmem:[%s16979_s12 + $0x498] ss:$28 sps:$4 sm:$0xff]  }
 0x4d1   :  { %10474 = vmatmul.mubr.msk.bf16.gmra.mxu1 %vm4854_vm0, %v4790_v24  ;;  %v4776_v43 = vadd.f32 %v4751_v50, %v15127_v48  ;;  %v4630_v48 = vld [vmem:[%s16968_s1 + $0xc0] sm:$0xff]  ;;  %v11956_v24 = vld [vmem:[%s16979_s12 + $0x49c] ss:$28 sps:$4 sm:$0xff]  }
 0x4d2   :  { %v4699_v45 = vpop.permute.xlu1 %4698  ;;  %5026 = vmatprep.mubr.bf16.mxu1 %v17113_v23 }
 0x4d3   :  { %v4752_v27 = vmul.f32 %v4699_v45, %v4627_v20 }
 0x4d5   :  { %v4777_v22 = vadd.f32 %v4752_v27, %v15136_v52 }
 0x4d6   :  { %v4701_v11 = vpop.permute.xlu0 %4700 }
 0x4d7   :  { %v4791_v8 = vpack.c.bf16 %v4777_v22, %v4776_v43  ;;  %v4753_v29 = vmul.f32 %v4701_v11, %v4628_v3  ;;  %v11959_v22 = vld [vmem:[%s16979_s12 + $0xe4] ss:$28 sps:$4 sm:$0xff]  }
 0x4d8   :  { %v11962_v3 = vld [vmem:[%s16979_s12 + $0x464] ss:$28 sps:$4 sm:$0xff]  }
 0x4d9   :  { %10475 = vmatmul.mubr.msk.bf16.gmra.mxu1 %vm4854_vm0, %v4791_v8  ;;  %v4778_v52 = vadd.f32 %v4753_v29, %v15145_v59  ;;  %v11944_v59 = vld [vmem:[%s16979_s12 + $0x50c] ss:$28 sps:$4 sm:$0xff]  }
 0x4da   :  { %v4703_v63 = vpop.permute.xlu1 %4702  ;;  %5036 = vmatprep.mubr.bf16.mxu1 %v17113_v23  ;;  %7617 = vmatprep.subr.bf16.mxu1 %v11944_v59 }
 0x4db   :  { %v4754_v62 = vmul.f32 %v4703_v63, %v4629_v38 }
 0x4dd   :  { %v4779_v25 = vadd.f32 %v4754_v62, %v15154_v26  ;;  %v4802_v26 = vld [vmem:[%s16976_s9] sm:$0x3] }
 0x4de   :  { %v4705_v35 = vpop.permute.xlu0 %4704  ;;  %v15314_v21 = vrot.slane %v4802_v26, %v17115_v60  ;;  %v11957_v62 = vld [vmem:[%s16979_s12 + $0xe0] ss:$28 sps:$4 sm:$0xff]  }
 0x4df   :  { %v4792_v33 = vpack.c.bf16 %v4779_v25, %v4778_v52  ;;  %v4755_v46 = vmul.f32 %v4705_v35, %v4630_v48  ;;  %v11960_v48 = vld [vmem:[%s16979_s12 + $0x460] ss:$28 sps:$4 sm:$0xff]   ;;  %v11965_v35 = vld [vmem:[%s16979_s12 + $0xac] ss:$28 sps:$4 sm:$0xff]  }
 0x4e1   :  { %10476 = vmatmul.mubr.msk.bf16.gmra.mxu1 %vm4854_vm0, %v4792_v33  ;;  %v4780_v12 = vadd.f32 %v4755_v46, %v15163_v53  ;;  %v15311_v53 = vrot.slane %v4802_v26, %v17114_v5  ;;  %v11968_v33 = vld [vmem:[%s16979_s12 + $0x42c] ss:$28 sps:$4 sm:$0xff]  }
 0x4e2   :  { %5046 = vmatprep.mubr.bf16.mxu1 %v17113_v23  ;;  %v11963_v26 = vld [vmem:[%s16979_s12 + $0xa8] ss:$28 sps:$4 sm:$0xff]  }
 0x4e3   :  { %v4793_v56 = vpack.c.bf16 %v4780_v12, %v4780_v12 }
 0x4e9   :  { %10477 = vmatmul.mubr.msk.bf16.gmra.mxu1 %vm4854_vm0, %v4793_v56 }
 0x549   :  { %v4928_v23 = vpop.f32.mrf.mxu1 }
 0x54a   :  { %v4929_v2 = vadd.f32 %v4928_v23, %v15314_v21  ;;  %v11966_v23 = vld [vmem:[%s16979_s12 + $0x428] ss:$28 sps:$4 sm:$0xff]  }
 0x54b   :  { %v4930_v19 = vpop.f32.mrf.mxu1 }
 0x54c   :  { %v4931_v14 = vadd.f32 %v4930_v19, %v15311_v53  ;;  %v5055_v54 = vmax.f32 %v4929_v2, 0.0 }
 0x54d   :  { %v4932_v44 = vpop.f32.mrf.mxu1 }
 0x54e   :  { %v4933_v0 = vadd.f32 %v4932_v44, %v15314_v21  ;;  %v5056_v1 = vmax.f32 %v4931_v14, 0.0  ;;  %v11971_v14 = vld [vmem:[%s16979_s12 + $0x74] ss:$28 sps:$4 sm:$0xff]  }
 0x54f   :  { %v4934_v37 = vpop.f32.mrf.mxu1 }
 0x550   :  { %v4935_v4 = vadd.f32 %v4934_v37, %v15311_v53  ;;  %v5057_v58 = vmax.f32 %v4933_v0, 0.0  ;;  %v11974_v0 = vld [vmem:[%s16979_s12 + $0x3f4] ss:$28 sps:$4 sm:$0xff]  }
 0x551   :  { %v4938_v61 = vpop.f32.mrf.mxu1 }
 0x552   :  { %v5058_v34 = vmax.f32 %v4935_v4, 0.0  ;;  %v5105_v41 = vpack.c.bf16 %v5057_v58, %v5055_v54  ;;  %v4939_v57 = vadd.f32 %v4938_v61, %v15314_v21 }
 0x553   :  { %v4940_v15 = vpop.f32.mrf.mxu1 }
 0x554   :  { %v5106_v42 = vpack.c.bf16 %v5058_v34, %v5056_v1  ;;  %v4941_v31 = vadd.f32 %v4940_v15, %v15311_v53  ;;  %v5059_v39 = vmax.f32 %v4939_v57, 0.0  ;;  %v11969_v1 = vld [vmem:[%s16979_s12 + $0x70] ss:$28 sps:$4 sm:$0xff]  }
 0x555   :  { %v4942_v49 = vpop.f32.mrf.mxu1  ;;  %v11972_v34 = vld [vmem:[%s16979_s12 + $0x3f0] ss:$28 sps:$4 sm:$0xff]  }
 0x556   :  { %v4943_v47 = vadd.f32 %v4942_v49, %v15314_v21  ;;  %5569 = vmatprep.mubr.bf16.mxu0 %v5106_v42  ;;  %5730 = vmatprep.mubr.bf16.mxu1 %v5106_v42  ;;  %v5060_v20 = vmax.f32 %v4941_v31, 0.0  ;;  %v11977_v42 = vld [vmem:[%s16979_s12 + $0x3c] ss:$28 sps:$4 sm:$0xff]  }
 0x557   :  { %v4944_v16 = vpop.f32.mrf.mxu1  ;;  %5570 = vmatmul.mubr.bf16.vlgmr.msra.gmra.mxu0 %v5105_v41  ;;  %5731 = vmatmul.mubr.bf16.vlgmr.msra.gmra.mxu1 %v5105_v41  ;;  %v11975_v31 = vld [vmem:[%s16979_s12 + $0x38] ss:$28 sps:$4 sm:$0xff]  }
 0x558   :  { %v4945_v7 = vadd.f32 %v4944_v16, %v15311_v53  ;;  %7457 = vmatpush1.bf16.msra.mxu0 %v11939_v36  ;;  %7618 = vmatpush1.bf16.msra.mxu1 %v11942_v9  ;;  %v5061_v32 = vmax.f32 %v4943_v47, 0.0  ;;  %v11980_v36 = vld [vmem:[%s16979_s12 + $0x3bc] ss:$28 sps:$4 sm:$0xff]  }
 0x559   :  { %v4948_v6 = vpop.f32.mrf.mxu1  ;;  %7458 = vmatprep.subr.bf16.mxu0 %v11947_v40  ;;  %7619 = vmatprep.subr.bf16.mxu1 %v11950_v17  ;;  %v11978_v47 = vld [vmem:[%s16979_s12 + $0x3b8] ss:$28 sps:$4 sm:$0xff]  }
 0x55a   :  { %v5062_v50 = vmax.f32 %v4945_v7, 0.0  ;;  %v5107_v27 = vpack.c.bf16 %v5061_v32, %v5059_v39  ;;  %v4949_v38 = vadd.f32 %v4948_v6, %v15314_v21  ;;  %v11983_v7 = vld [vmem:[%s16979_s12 + $0x4] ss:$28 sps:$4 sm:$0xff]  }
 0x55b   :  { %v4950_v13 = vpop.f32.mrf.mxu1 }
 0x55c   :  { %v5108_v45 = vpack.c.bf16 %v5062_v50, %v5060_v20  ;;  %7459 = vmatpush1.bf16.msra.mxu0 %v11945_v28  ;;  %7620 = vmatpush1.bf16.msra.mxu1 %v11948_v10  ;;  %v4951_v11 = vadd.f32 %v4950_v13, %v15311_v53  ;;  %v5063_v56 = vmax.f32 %v4949_v38, 0.0  ;;  %v11986_v28 = vld [vmem:[%s16979_s12 + $0x384] ss:$28 sps:$4 sm:$0xff]  }
 0x55d   :  { %v4952_v43 = vpop.f32.mrf.mxu1  ;;  %7460 = vmatprep.subr.bf16.mxu0 %v11953_v55  ;;  %7621 = vmatprep.subr.bf16.mxu1 %v11956_v24  ;;  %v11981_v20 = vld [vmem:[%s16979_s12] ss:$28 sps:$4 sm:$0xff]  }
 0x55e   :  { %v4953_v8 = vadd.f32 %v4952_v43, %v15314_v21  ;;  %5579 = vmatprep.mubr.bf16.mxu0 %v5108_v45  ;;  %5740 = vmatprep.mubr.bf16.mxu1 %v5108_v45  ;;  %v5064_v46 = vmax.f32 %v4951_v11, 0.0  ;;  %v11984_v50 = vld [vmem:[%s16979_s12 + $0x380] ss:$28 sps:$4 sm:$0xff]   ;;  %v11989_v45 = vld [vmem:[%s16979_s12 + $0x34c] ss:$28 sps:$4 sm:$0xff]  }
 0x55f   :  { %v4954_v29 = vpop.f32.mrf.mxu1  ;;  %5580 = vmatmul.mubr.bf16.gmra.mxu0 %v5107_v27  ;;  %5741 = vmatmul.mubr.bf16.gmra.mxu1 %v5107_v27  ;;  %v11987_v11 = vld [vmem:[%s16979_s12 + $0x348] ss:$28 sps:$4 sm:$0xff]  }
 0x560   :  { %v4955_v63 = vadd.f32 %v4954_v29, %v15311_v53  ;;  %7461 = vmatpush1.bf16.msra.mxu0 %v11951_v51  ;;  %7622 = vmatpush1.bf16.msra.mxu1 %v11954_v18  ;;  %v5065_v52 = vmax.f32 %v4953_v8, 0.0  ;;  %v11992_v51 = vld [vmem:[%s16979_s12 + $0x6cc] ss:$28 sps:$4 sm:$0xff]  }
 0x561   :  { %v4958_v25 = vpop.f32.mrf.mxu1  ;;  %7462 = vmatprep.subr.bf16.mxu0 %v11959_v22  ;;  %7623 = vmatprep.subr.bf16.mxu1 %v11962_v3  ;;  %v11990_v8 = vld [vmem:[%s16979_s12 + $0x6c8] ss:$28 sps:$4 sm:$0xff]  }
 0x562   :  { %v5066_v12 = vmax.f32 %v4955_v63, 0.0  ;;  %v5109_v19 = vpack.c.bf16 %v5065_v52, %v5063_v56  ;;  %v4959_v4 = vadd.f32 %v4958_v25, %v15314_v21  ;;  %v11995_v63 = vld [vmem:[%s16979_s12 + $0x314] ss:$28 sps:$4 sm:$0xff]  }
 0x563   :  { %v4960_v30 = vpop.f32.mrf.mxu1 }
 0x564   :  { %v5110_v59 = vpack.c.bf16 %v5066_v12, %v5064_v46  ;;  %7463 = vmatpush1.bf16.msra.mxu0 %v11957_v62  ;;  %7624 = vmatpush1.bf16.msra.mxu1 %v11960_v48  ;;  %v4961_v2 = vadd.f32 %v4960_v30, %v15311_v53  ;;  %v5067_v49 = vmax.f32 %v4959_v4, 0.0  ;;  %v11998_v62 = vld [vmem:[%s16979_s12 + $0x694] ss:$28 sps:$4 sm:$0xff]  }
 0x565   :  { %v4962_v44 = vpop.f32.mrf.mxu1  ;;  %7464 = vmatprep.subr.bf16.mxu0 %v11965_v35  ;;  %7625 = vmatprep.subr.bf16.mxu1 %v11968_v33  ;;  %v11993_v46 = vld [vmem:[%s16979_s12 + $0x310] ss:$28 sps:$4 sm:$0xff]  }
 0x566   :  { %v4963_v37 = vadd.f32 %v4962_v44, %v15314_v21  ;;  %5589 = vmatprep.mubr.bf16.mxu0 %v5110_v59  ;;  %5750 = vmatprep.mubr.bf16.mxu1 %v5110_v59  ;;  %v5068_v9 = vmax.f32 %v4961_v2, 0.0  ;;  %v11996_v12 = vld [vmem:[%s16979_s12 + $0x690] ss:$28 sps:$4 sm:$0xff]   ;;  %v12001_v59 = vld [vmem:[%s16979_s12 + $0x2dc] ss:$28 sps:$4 sm:$0xff]  }
 0x567   :  { %v4964_v58 = vpop.f32.mrf.mxu1  ;;  %5590 = vmatmul.mubr.bf16.gmra.mxu0 %v5109_v19  ;;  %5751 = vmatmul.mubr.bf16.gmra.mxu1 %v5109_v19  ;;  %v11999_v2 = vld [vmem:[%s16979_s12 + $0x2d8] ss:$28 sps:$4 sm:$0xff]  }
 0x568   :  { %v4965_v61 = vadd.f32 %v4964_v58, %v15311_v53  ;;  %7465 = vmatpush1.bf16.msra.mxu0 %v11963_v26  ;;  %7626 = vmatpush1.bf16.msra.mxu1 %v11966_v23  ;;  %v5069_v54 = vmax.f32 %v4963_v37, 0.0  ;;  %v12004_v26 = vld [vmem:[%s16979_s12 + $0x65c] ss:$28 sps:$4 sm:$0xff]  }
 0x569   :  { %v4968_v15 = vpop.f32.mrf.mxu1  ;;  %7466 = vmatprep.subr.bf16.mxu0 %v11971_v14  ;;  %7627 = vmatprep.subr.bf16.mxu1 %v11974_v0  ;;  %v12002_v37 = vld [vmem:[%s16979_s12 + $0x658] ss:$28 sps:$4 sm:$0xff]  }
 0x56a   :  { %v5070_v41 = vmax.f32 %v4965_v61, 0.0  ;;  %v5111_v57 = vpack.c.bf16 %v5069_v54, %v5067_v49  ;;  %v4969_v6 = vadd.f32 %v4968_v15, %v15314_v21  ;;  %v12007_v61 = vld [vmem:[%s16979_s12 + $0x2a4] ss:$28 sps:$4 sm:$0xff]  }
 0x56b   :  { %v4970_v40 = vpop.f32.mrf.mxu1 }
 0x56c   :  { %v5112_v17 = vpack.c.bf16 %v5070_v41, %v5068_v9  ;;  %7467 = vmatpush1.bf16.msra.mxu0 %v11969_v1  ;;  %7628 = vmatpush1.bf16.msra.mxu1 %v11972_v34  ;;  %v4971_v10 = vadd.f32 %v4970_v40, %v15311_v53  ;;  %v5071_v43 = vmax.f32 %v4969_v6, 0.0  ;;  %v12010_v1 = vld [vmem:[%s16979_s12 + $0x624] ss:$28 sps:$4 sm:$0xff]  }
 0x56d   :  { %v4972_v16 = vpop.f32.mrf.mxu1  ;;  %7468 = vmatprep.subr.bf16.mxu0 %v11977_v42  ;;  %7629 = vmatprep.subr.bf16.mxu1 %v11980_v36  ;;  %v12005_v9 = vld [vmem:[%s16979_s12 + $0x2a0] ss:$28 sps:$4 sm:$0xff]  }
 0x56e   :  { %v4973_v32 = vadd.f32 %v4972_v16, %v15314_v21  ;;  %5599 = vmatprep.mubr.bf16.mxu0 %v5112_v17  ;;  %5760 = vmatprep.mubr.bf16.mxu1 %v5112_v17  ;;  %v5072_v18 = vmax.f32 %v4971_v10, 0.0  ;;  %v12008_v41 = vld [vmem:[%s16979_s12 + $0x620] ss:$28 sps:$4 sm:$0xff]   ;;  %v12013_v17 = vld [vmem:[%s16979_s12 + $0x26c] ss:$28 sps:$4 sm:$0xff]  }
 0x56f   :  { %v4974_v55 = vpop.f32.mrf.mxu1  ;;  %5600 = vmatmul.mubr.bf16.gmra.mxu0 %v5111_v57  ;;  %5761 = vmatmul.mubr.bf16.gmra.mxu1 %v5111_v57  ;;  %v12011_v10 = vld [vmem:[%s16979_s12 + $0x268] ss:$28 sps:$4 sm:$0xff]  }
 0x570   :  { %v4975_v24 = vadd.f32 %v4974_v55, %v15311_v53  ;;  %7469 = vmatpush1.bf16.msra.mxu0 %v11975_v31  ;;  %7630 = vmatpush1.bf16.msra.mxu1 %v11978_v47  ;;  %v5073_v39 = vmax.f32 %v4973_v32, 0.0  ;;  %v12016_v31 = vld [vmem:[%s16979_s12 + $0x5ec] ss:$28 sps:$4 sm:$0xff]  }
 0x571   :  { %v4978_v13 = vpop.f32.mrf.mxu1  ;;  %7470 = vmatprep.subr.bf16.mxu0 %v11983_v7  ;;  %7631 = vmatprep.subr.bf16.mxu1 %v11986_v28  ;;  %v12014_v32 = vld [vmem:[%s16979_s12 + $0x5e8] ss:$28 sps:$4 sm:$0xff]  }
 0x572   :  { %v5074_v27 = vmax.f32 %v4975_v24, 0.0  ;;  %v5113_v38 = vpack.c.bf16 %v5073_v39, %v5071_v43  ;;  %v4979_v25 = vadd.f32 %v4978_v13, %v15314_v21  ;;  %v12019_v24 = vld [vmem:[%s16979_s12 + $0x234] ss:$28 sps:$4 sm:$0xff]  }
 0x573   :  { %v4980_v22 = vpop.f32.mrf.mxu1 }
 0x574   :  { %v5114_v3 = vpack.c.bf16 %v5074_v27, %v5072_v18  ;;  %7471 = vmatpush1.bf16.msra.mxu0 %v11981_v20  ;;  %7632 = vmatpush1.bf16.msra.mxu1 %v11984_v50  ;;  %v4981_v48 = vadd.f32 %v4980_v22, %v15311_v53  ;;  %v5075_v44 = vmax.f32 %v4979_v25, 0.0  ;;  %v12022_v20 = vld [vmem:[%s16979_s12 + $0x5b4] ss:$28 sps:$4 sm:$0xff]  }
 0x575   :  { %v4982_v29 = vpop.f32.mrf.mxu1  ;;  %7472 = vmatprep.subr.bf16.mxu0 %v11989_v45  ;;  %7633 = vmatprep.subr.bf16.mxu1 %v11992_v51  ;;  %v12017_v18 = vld [vmem:[%s16979_s12 + $0x230] ss:$28 sps:$4 sm:$0xff]  }
 0x576   :  { %v4983_v52 = vadd.f32 %v4982_v29, %v15314_v21  ;;  %5609 = vmatprep.mubr.bf16.mxu0 %v5114_v3  ;;  %5770 = vmatprep.mubr.bf16.mxu1 %v5114_v3  ;;  %v5076_v23 = vmax.f32 %v4981_v48, 0.0  ;;  %v12020_v27 = vld [vmem:[%s16979_s12 + $0x5b0] ss:$28 sps:$4 sm:$0xff]  }
 0x577   :  { %v4984_v35 = vpop.f32.mrf.mxu1  ;;  %5610 = vmatmul.mubr.bf16.gmra.mxu0 %v5113_v38  ;;  %5771 = vmatmul.mubr.bf16.gmra.mxu1 %v5113_v38 }
 0x578   :  { %v4985_v33 = vadd.f32 %v4984_v35, %v15311_v53  ;;  %7473 = vmatpush2.bf16.msra.mxu0 %v11987_v11  ;;  %7634 = vmatpush2.bf16.msra.mxu1 %v11990_v8  ;;  %v5077_v56 = vmax.f32 %v4983_v52, 0.0 }
 0x579   :  { %v4988_v30 = vpop.f32.mrf.mxu1  ;;  %7474 = vmatprep.subr.bf16.mxu0 %v11995_v63  ;;  %7635 = vmatprep.subr.bf16.mxu1 %v11998_v62 }
 0x57a   :  { %v5078_v19 = vmax.f32 %v4985_v33, 0.0  ;;  %v5115_v4 = vpack.c.bf16 %v5077_v56, %v5075_v44  ;;  %v4989_v15 = vadd.f32 %v4988_v30, %v15314_v21 }
 0x57b   :  { %v4990_v14 = vpop.f32.mrf.mxu1 }
 0x57c   :  { %v5116_v0 = vpack.c.bf16 %v5078_v19, %v5076_v23  ;;  %7475 = vmatpush2.bf16.msra.mxu0 %v11993_v46  ;;  %7636 = vmatpush2.bf16.msra.mxu1 %v11996_v12  ;;  %v4991_v34 = vadd.f32 %v4990_v14, %v15311_v53  ;;  %v5079_v16 = vmax.f32 %v4989_v15, 0.0  ;;  %v12025_v15 = vld [vmem:[%s16979_s12 + $0x1fc] ss:$28 sps:$4 sm:$0xff]  }
 0x57d   :  { %v4992_v58 = vpop.f32.mrf.mxu1  ;;  %7476 = vmatprep.subr.bf16.mxu0 %v12001_v59  ;;  %7637 = vmatprep.subr.bf16.mxu1 %v12004_v26 }
 0x57e   :  { %v4993_v54 = vadd.f32 %v4992_v58, %v15314_v21  ;;  %5619 = vmatprep.mubr.bf16.mxu0 %v5116_v0  ;;  %5780 = vmatprep.mubr.bf16.mxu1 %v5116_v0  ;;  %v5080_v47 = vmax.f32 %v4991_v34, 0.0 }
 0x57f   :  { %v4994_v42 = vpop.f32.mrf.mxu1  ;;  %5620 = vmatmul.mubr.bf16.gmra.mxu0 %v5115_v4  ;;  %5781 = vmatmul.mubr.bf16.gmra.mxu1 %v5115_v4 }
 0x580   :  { %v4995_v36 = vadd.f32 %v4994_v42, %v15311_v53  ;;  %7477 = vmatpush2.bf16.msra.mxu0 %v11999_v2  ;;  %7638 = vmatpush2.bf16.msra.mxu1 %v12002_v37  ;;  %v5081_v49 = vmax.f32 %v4993_v54, 0.0  ;;  %v12023_v54 = vld [vmem:[%s16979_s12 + $0x1f8] ss:$28 sps:$4 sm:$0xff]  }
 0x581   :  { %v4998_v40 = vpop.f32.mrf.mxu1  ;;  %7478 = vmatprep.subr.bf16.mxu0 %v12007_v61  ;;  %7639 = vmatprep.subr.bf16.mxu1 %v12010_v1 }
 0x582   :  { %v5082_v57 = vmax.f32 %v4995_v36, 0.0  ;;  %v5117_v6 = vpack.c.bf16 %v5081_v49, %v5079_v16  ;;  %v4999_v13 = vadd.f32 %v4998_v40, %v15314_v21  ;;  %v12026_v49 = vld [vmem:[%s16979_s12 + $0x578] ss:$28 sps:$4 sm:$0xff]  }
 0x583   :  { %v5000_v7 = vpop.f32.mrf.mxu1 }
 0x584   :  { %v5118_v28 = vpack.c.bf16 %v5082_v57, %v5080_v47  ;;  %7479 = vmatpush2.bf16.msra.mxu0 %v12005_v9  ;;  %7640 = vmatpush2.bf16.msra.mxu1 %v12008_v41  ;;  %v5001_v50 = vadd.f32 %v5000_v7, %v15311_v53  ;;  %v5083_v8 = vmax.f32 %v4999_v13, 0.0  ;;  %v12028_v9 = vld [vmem:[%s16979_s12 + $0x57c] ss:$28 sps:$4 sm:$0xff]  }
 0x585   :  { %v5002_v55 = vpop.f32.mrf.mxu1  ;;  %7480 = vmatprep.subr.bf16.mxu0 %v12013_v17  ;;  %7641 = vmatprep.subr.bf16.mxu1 %v12016_v31 }
 0x586   :  { %v5003_v39 = vadd.f32 %v5002_v55, %v15314_v21  ;;  %5629 = vmatprep.mubr.bf16.mxu0 %v5118_v28  ;;  %5790 = vmatprep.mubr.bf16.mxu1 %v5118_v28  ;;  %v5084_v3 = vmax.f32 %v5001_v50, 0.0  ;;  %v12031_v28 = vld [vmem:[%s16979_s12 + $0x1c4] ss:$28 sps:$4 sm:$0xff]  }
 0x587   :  { %v5004_v45 = vpop.f32.mrf.mxu1  ;;  %5630 = vmatmul.mubr.bf16.gmra.mxu0 %v5117_v6  ;;  %5791 = vmatmul.mubr.bf16.gmra.mxu1 %v5117_v6  ;;  %v12029_v55 = vld [vmem:[%s16979_s12 + $0x1c0] ss:$28 sps:$4 sm:$0xff]  }
 0x588   :  { %v5005_v51 = vadd.f32 %v5004_v45, %v15311_v53  ;;  %7481 = vmatpush2.bf16.msra.mxu0 %v12011_v10  ;;  %7642 = vmatpush2.bf16.msra.mxu1 %v12014_v32  ;;  %v5085_v43 = vmax.f32 %v5003_v39, 0.0  ;;  %v12034_v10 = vld [vmem:[%s16979_s12 + $0x544] ss:$28 sps:$4 sm:$0xff]  }
 0x589   :  { %v5008_v22 = vpop.f32.mrf.mxu1  ;;  %7482 = vmatprep.subr.bf16.mxu0 %v12019_v24  ;;  %7643 = vmatprep.subr.bf16.mxu1 %v12022_v20  ;;  %v12032_v24 = vld [vmem:[%s16979_s12 + $0x540] ss:$28 sps:$4 sm:$0xff]  }
 0x58a   :  { %v5086_v11 = vmax.f32 %v5005_v51, 0.0  ;;  %v5119_v63 = vpack.c.bf16 %v5085_v43, %v5083_v8  ;;  %v5009_v25 = vadd.f32 %v5008_v22, %v15314_v21 }
 0x58b   :  { %v5010_v38 = vpop.f32.mrf.mxu1 }
 0x58c   :  { %v5120_v29 = vpack.c.bf16 %v5086_v11, %v5084_v3  ;;  %7483 = vmatpush2.bf16.msra.mxu0 %v12017_v18  ;;  %7644 = vmatpush2.bf16.msra.mxu1 %v12020_v27  ;;  %v5011_v48 = vadd.f32 %v5010_v38, %v15311_v53  ;;  %v5087_v59 = vmax.f32 %v5009_v25, 0.0  ;;  %v12040_v25 = vld [vmem:[%s16979_s12 + $0x514] ss:$28 sps:$4 sm:$0xff]  }
 0x58d   :  { %v5012_v62 = vpop.f32.mrf.mxu1  ;;  %7484 = vmatprep.subr.bf16.mxu0 %v12025_v15  ;;  %7645 = vmatprep.subr.bf16.mxu1 %v12028_v9 }
 0x58e   :  { %v5013_v52 = vadd.f32 %v5012_v62, %v15314_v21  ;;  %5639 = vmatprep.mubr.bf16.mxu0 %v5120_v29  ;;  %5800 = vmatprep.mubr.bf16.mxu1 %v5120_v29  ;;  %v5088_v56 = vmax.f32 %v5011_v48, 0.0  ;;  %v12037_v62 = vld [vmem:[%s16979_s12 + $0x194] ss:$28 sps:$4 sm:$0xff]  }
 0x58f   :  { %v5014_v35 = vpop.f32.mrf.mxu1  ;;  %5640 = vmatmul.mubr.bf16.gmra.mxu0 %v5119_v63  ;;  %5801 = vmatmul.mubr.bf16.gmra.mxu1 %v5119_v63 }
 0x590   :  { %v5015_v33 = vadd.f32 %v5014_v35, %v15311_v53  ;;  %v5089_v46 = vmax.f32 %v5013_v52, 0.0  ;;  %7485 = vmatpush2.bf16.msra.mxu0 %v12023_v54  ;;  %7646 = vmatpush2.bf16.msra.mxu1 %v12026_v49 }
 0x591   :  { %v5018_v12 = vpop.f32.mrf.mxu1  ;;  %7486 = vmatprep.subr.bf16.mxu0 %v12031_v28  ;;  %7647 = vmatprep.subr.bf16.mxu1 %v12034_v10 }
 0x592   :  { %v5090_v30 = vmax.f32 %v5015_v33, 0.0  ;;  %v5121_v19 = vpack.c.bf16 %v5089_v46, %v5087_v59  ;;  %v5019_v2 = vadd.f32 %v5018_v12, %v15314_v21 }
 0x593   :  { %v5020_v26 = vpop.f32.mrf.mxu1 }
 0x594   :  { %v5122_v23 = vpack.c.bf16 %v5090_v30, %v5088_v56  ;;  %v5021_v14 = vadd.f32 %v5020_v26, %v15311_v53  ;;  %v5091_v42 = vmax.f32 %v5019_v2, 0.0  ;;  %7487 = vmatpush2.bf16.msra.mxu0 %v12029_v55  ;;  %7648 = vmatpush2.bf16.msra.mxu1 %v12032_v24 }
 0x595   :  { %v5022_v44 = vpop.f32.mrf.mxu1  ;;  %7778 = vmatprep.subr.bf16.mxu0 %v12037_v62  ;;  %7939 = vmatprep.subr.bf16.mxu1 %v12040_v25 }
 0x596   :  { %v5023_v0 = vadd.f32 %v5022_v44, %v15314_v21  ;;  %5649 = vmatprep.mubr.bf16.mxu0 %v5122_v23  ;;  %5810 = vmatprep.mubr.bf16.mxu1 %v5122_v23  ;;  %v5092_v1 = vmax.f32 %v5021_v14, 0.0 }
 0x597   :  { %v5024_v37 = vpop.f32.mrf.mxu1  ;;  %5650 = vmatmul.mubr.bf16.gmra.mxu0 %v5121_v19  ;;  %5811 = vmatmul.mubr.bf16.gmra.mxu1 %v5121_v19 }
 0x598   :  { %v5025_v4 = vadd.f32 %v5024_v37, %v15311_v53  ;;  %v5093_v58 = vmax.f32 %v5023_v0, 0.0  ;;  %v17116_v0 = vld [vmem:[#allocation14_spill] sm:$0xff] }
 0x599   :  { %v5028_v61 = vpop.f32.mrf.mxu1 }
 0x59a   :  { %v5094_v34 = vmax.f32 %v5025_v4, 0.0  ;;  %v5123_v40 = vpack.c.bf16 %v5093_v58, %v5091_v42  ;;  %v5029_v57 = vadd.f32 %v5028_v61, %v15314_v21  ;;  %v17117_v4 = vld [vmem:[#allocation13_spill] sm:$0xff] }
 0x59b   :  { %v5030_v36 = vpop.f32.mrf.mxu1 }
 0x59c   :  { %v5124_v41 = vpack.c.bf16 %v5094_v34, %v5092_v1  ;;  %v5031_v31 = vadd.f32 %v5030_v36, %v15311_v53  ;;  %v5095_v39 = vmax.f32 %v5029_v57, 0.0 }
 0x59d   :  { %v5032_v17 = vpop.f32.mrf.mxu1 }
 0x59e   :  { %v5033_v47 = vadd.f32 %v5032_v17, %v15314_v21  ;;  %5659 = vmatprep.mubr.bf16.mxu0 %v5124_v41  ;;  %5820 = vmatprep.mubr.bf16.mxu1 %v5124_v41  ;;  %v5096_v20 = vmax.f32 %v5031_v31, 0.0 }
 0x59f   :  { %v5034_v16 = vpop.f32.mrf.mxu1  ;;  %5660 = vmatmul.mubr.bf16.gmra.mxu0 %v5123_v40  ;;  %5821 = vmatmul.mubr.bf16.gmra.mxu1 %v5123_v40 }
 0x5a0   :  { %v5035_v7 = vadd.f32 %v5034_v16, %v15311_v53  ;;  %v5097_v32 = vmax.f32 %v5033_v47, 0.0 }
 0x5a1   :  { %v5038_v6 = vpop.f32.mrf.mxu1 }
 0x5a2   :  { %v5098_v50 = vmax.f32 %v5035_v7, 0.0  ;;  %v5125_v51 = vpack.c.bf16 %v5097_v32, %v5095_v39  ;;  %v5039_v22 = vadd.f32 %v5038_v6, %v15314_v21 }
 0x5a3   :  { %v5040_v13 = vpop.f32.mrf.mxu1 }
 0x5a4   :  { %v5126_v45 = vpack.c.bf16 %v5098_v50, %v5096_v20  ;;  %v5041_v27 = vadd.f32 %v5040_v13, %v15311_v53  ;;  %v5099_v48 = vmax.f32 %v5039_v22, 0.0 }
 0x5a5   :  { %v5042_v18 = vpop.f32.mrf.mxu1 }
 0x5a6   :  { %v5043_v43 = vadd.f32 %v5042_v18, %v15314_v21  ;;  %5669 = vmatprep.mubr.bf16.mxu0 %v5126_v45  ;;  %5830 = vmatprep.mubr.bf16.mxu1 %v5126_v45  ;;  %v5100_v29 = vmax.f32 %v5041_v27, 0.0  ;;  %v12038_v18 = vld [vmem:[%s16979_s12 + $0x510] ss:$28 sps:$4 sm:$0xff]  }
 0x5a7   :  { %v5044_v3 = vpop.f32.mrf.mxu1  ;;  %5670 = vmatmul.mubr.bf16.gmra.mxu0 %v5125_v51  ;;  %5831 = vmatmul.mubr.bf16.gmra.mxu1 %v5125_v51  ;;  %v12035_v51 = vld [vmem:[%s16979_s12 + $0x190] ss:$28 sps:$4 sm:$0xff]  }
 0x5a8   :  { %v5045_v11 = vadd.f32 %v5044_v3, %v15311_v53  ;;  %v5101_v8 = vmax.f32 %v5043_v43, 0.0 }
 0x5a9   :  { %v5048_v38 = vpop.f32.mrf.mxu1 }
 0x5aa   :  { %v5102_v63 = vmax.f32 %v5045_v11, 0.0  ;;  %v5127_v46 = vpack.c.bf16 %v5101_v8, %v5099_v48  ;;  %v5049_v12 = vadd.f32 %v5048_v38, %v15314_v21  ;;  %v12043_v8 = vld [vmem:[%s16979_s12 + $0x15c] ss:$28 sps:$4 sm:$0xff]  }
 0x5ab   :  { %v5050_v52 = vpop.f32.mrf.mxu1  ;;  %v12046_v38 = vld [vmem:[%s16979_s12 + $0x4dc] ss:$28 sps:$4 sm:$0xff]  }
 0x5ac   :  { %v5051_v35 = vadd.f32 %v5050_v52, %v15311_v53  ;;  %v5128_v33 = vpack.c.bf16 %v5102_v63, %v5100_v29  ;;  %v5103_v23 = vmax.f32 %v5049_v12, 0.0  ;;  %v5195_v53 = vld [vmem:[%s16978_s11] sm:$0xf]  ;;  %v12041_v12 = vld [vmem:[%s16979_s12 + $0x158] ss:$28 sps:$4 sm:$0xff]  }
 0x5ad   :  { %v5052_v56 = vpop.f32.mrf.mxu1  ;;  %v15562_v14 = vrot.slane %v5195_v53, %v17114_v5  ;;  %v15565_v2 = vrot.slane %v5195_v53, %v17116_v0  ;;  %v15568_v37 = vrot.slane %v5195_v53, %v17115_v60  ;;  %v15571_v58 = vrot.slane %v5195_v53, %v17117_v4 }
 0x5ae   :  { %v5104_v30 = vmax.f32 %v5051_v35, 0.0  ;;  %5679 = vmatprep.mubr.bf16.mxu0 %v5128_v33  ;;  %5840 = vmatprep.mubr.bf16.mxu1 %v5128_v33  ;;  %v5129_v19 = vpack.c.bf16 %v5103_v23, %v5103_v23  ;;  %v12044_v23 = vld [vmem:[%s16979_s12 + $0x4d8] ss:$28 sps:$4 sm:$0xff]  }
 0x5af   :  { %v5053_v59 = vpop.f32.mrf.mxu1  ;;  %5680 = vmatmul.mubr.bf16.gmra.mxu0 %v5127_v46  ;;  %5841 = vmatmul.mubr.bf16.gmra.mxu1 %v5127_v46 }
 0x5b0   :  { %v5130_v26 = vpack.c.bf16 %v5104_v30, %v5104_v30 }
 0x5b2   :  { %5689 = vmatprep.mubr.bf16.mxu0 %v5130_v26  ;;  %5850 = vmatprep.mubr.bf16.mxu1 %v5130_v26 }
 0x5b7   :  { %5690 = vmatmul.mubr.bf16.gmra.mxu0 %v5129_v19  ;;  %5851 = vmatmul.mubr.bf16.gmra.mxu1 %v5129_v19  ;;  %v12049_v19 = vld [vmem:[%s16979_s12 + $0x124] ss:$28 sps:$4 sm:$0xff]  }
 0x617   :  { %v5571_v21 = vpop.f32.mrf.mxu0  ;;  %v5732_v44 = vpop.f32.mrf.mxu1 }
 0x618   :  { %v5572_v41 = vadd.f32 %v5571_v21, %v15568_v37  ;;  %v5733_v49 = vadd.f32 %v5732_v44, %v15571_v58 }
 0x619   :  { %v5573_v61 = vpop.f32.mrf.mxu0  ;;  %v5734_v1 = vpop.f32.mrf.mxu1 }
 0x61a   :  { %v5574_v15 = vadd.f32 %v5573_v61, %v15562_v14  ;;  %v5735_v42 = vadd.f32 %v5734_v1, %v15565_v2  ;;  %v5859_v24 = vmax.f32 %v5572_v41, 0.0  ;;  %v5861_v20 = vmax.f32 %v5733_v49, 0.0  ;;  %v12052_v41 = vld [vmem:[%s16979_s12 + $0x4a4] ss:$28 sps:$4 sm:$0xff]  }
 0x61b   :  { %v5575_v34 = vpop.f32.mrf.mxu0  ;;  %v5736_v54 = vpop.f32.mrf.mxu1 }
 0x61c   :  { %v5576_v36 = vadd.f32 %v5575_v34, %v15568_v37  ;;  %v5737_v9 = vadd.f32 %v5736_v54, %v15571_v58  ;;  %v5860_v10 = vmax.f32 %v5574_v15, 0.0  ;;  %v5862_v32 = vmax.f32 %v5735_v42, 0.0 }
 0x61d   :  { %v5577_v40 = vpop.f32.mrf.mxu0  ;;  %v5738_v17 = vpop.f32.mrf.mxu1 }
 0x61e   :  { %v5578_v31 = vadd.f32 %v5577_v40, %v15562_v14  ;;  %v5739_v47 = vadd.f32 %v5738_v17, %v15565_v2  ;;  %v5863_v57 = vmax.f32 %v5576_v36, 0.0  ;;  %v5865_v16 = vmax.f32 %v5737_v9, 0.0  ;;  %v12047_v9 = vld [vmem:[%s16979_s12 + $0x120] ss:$28 sps:$4 sm:$0xff]  }
 0x61f   :  { %v5581_v7 = vpop.f32.mrf.mxu0  ;;  %v5742_v28 = vpop.f32.mrf.mxu1 }
 0x620   :  { %v5864_v6 = vmax.f32 %v5578_v31, 0.0  ;;  %v5866_v55 = vmax.f32 %v5739_v47, 0.0  ;;  %v15591_v27 = vpack.c.bf16 %v5863_v57, %v5859_v24  ;;  %v15593_v43 = vpack.c.bf16 %v5865_v16, %v5861_v20  ;;  %v12050_v57 = vld [vmem:[%s16979_s12 + $0x4a0] ss:$28 sps:$4 sm:$0xff]   ;;  %v12055_v16 = vld [vmem:[%s16979_s12 + $0xec] ss:$28 sps:$4 sm:$0xff]  }
 0x621   :  { %v5583_v50 = vpop.f32.mrf.mxu0  ;;  %v5744_v39 = vpop.f32.mrf.mxu1  ;;  %v5582_v48 = vadd.f32 %v5581_v7, %v15568_v37  ;;  %v5743_v52 = vadd.f32 %v5742_v28, %v15571_v58 }
 0x622   :  { %v15581_v13 = vpack.c.bf16 %v5864_v6, %v5860_v10  ;;  %v15583_v45 = vpack.c.bf16 %v5866_v55, %v5862_v32  ;;  %17118 = vst [vmem:[#allocation19_spill] sm:$0xff] %v15591_v27  ;;  %17119 = vst [vmem:[#allocation20_spill] sm:$0xff] %v15593_v43  ;;  %v5584_v22 = vadd.f32 %v5583_v50, %v15562_v14  ;;  %v12058_v32 = vld [vmem:[%s16979_s12 + $0x46c] ss:$28 sps:$4 sm:$0xff]  }
 0x623   :  { %v5585_v3 = vpop.f32.mrf.mxu0  ;;  %v5746_v11 = vpop.f32.mrf.mxu1  ;;  %v5745_v29 = vadd.f32 %v5744_v39, %v15565_v2  ;;  %v5867_v1 = vmax.f32 %v5582_v48, 0.0  ;;  %v5869_v34 = vmax.f32 %v5743_v52, 0.0 }
 0x624   :  { %v5586_v63 = vadd.f32 %v5585_v3, %v15568_v37  ;;  %v5747_v62 = vadd.f32 %v5746_v11, %v15571_v58  ;;  %7488 = vmatprep.mubr.bf16.mxu0 %v15581_v13  ;;  %7649 = vmatprep.mubr.bf16.mxu1 %v15583_v45  ;;  %v5868_v53 = vmax.f32 %v5584_v22, 0.0 }
 0x625   :  { %v5587_v25 = vpop.f32.mrf.mxu0  ;;  %v5748_v35 = vpop.f32.mrf.mxu1  ;;  %7489 = vmatmul.mubr.bf16.vlgmr.msra.gmra.mxu0 %v15591_v27  ;;  %7650 = vmatmul.mubr.bf16.vlgmr.msra.gmra.mxu1 %v15593_v43  ;;  %v5870_v21 = vmax.f32 %v5745_v29, 0.0 }
 0x626   :  { %v5588_v33 = vadd.f32 %v5587_v25, %v15562_v14  ;;  %v5749_v46 = vadd.f32 %v5748_v35, %v15565_v2  ;;  %7779 = vmatpush1.bf16.msra.mxu0 %v12035_v51  ;;  %7940 = vmatpush1.bf16.msra.mxu1 %v12038_v18  ;;  %v5871_v56 = vmax.f32 %v5586_v63, 0.0  ;;  %v5873_v30 = vmax.f32 %v5747_v62, 0.0  ;;  %v12053_v51 = vld [vmem:[%s16979_s12 + $0xe8] ss:$28 sps:$4 sm:$0xff]  }
 0x627   :  { %v5591_v59 = vpop.f32.mrf.mxu0  ;;  %v5752_v26 = vpop.f32.mrf.mxu1  ;;  %7780 = vmatprep.subr.bf16.mxu0 %v12043_v8  ;;  %7941 = vmatprep.subr.bf16.mxu1 %v12046_v38  ;;  %v12056_v8 = vld [vmem:[%s16979_s12 + $0x468] ss:$28 sps:$4 sm:$0xff]   ;;  %v12061_v38 = vld [vmem:[%s16979_s12 + $0xb4] ss:$28 sps:$4 sm:$0xff]  }
 0x628   :  { %v5872_v44 = vmax.f32 %v5588_v33, 0.0  ;;  %v5874_v61 = vmax.f32 %v5749_v46, 0.0  ;;  %v15632_v49 = vpack.c.bf16 %v5871_v56, %v5867_v1  ;;  %v15634_v40 = vpack.c.bf16 %v5873_v30, %v5869_v34  ;;  %v12059_v56 = vld [vmem:[%s16979_s12 + $0xb0] ss:$28 sps:$4 sm:$0xff]  }
 0x629   :  { %v5593_v54 = vpop.f32.mrf.mxu0  ;;  %v5754_v15 = vpop.f32.mrf.mxu1  ;;  %v5592_v6 = vadd.f32 %v5591_v59, %v15568_v37  ;;  %v5753_v55 = vadd.f32 %v5752_v26, %v15571_v58  ;;  %v12064_v30 = vld [vmem:[%s16979_s12 + $0x434] ss:$28 sps:$4 sm:$0xff]  }
 0x62a   :  { %v15622_v42 = vpack.c.bf16 %v5872_v44, %v5868_v53  ;;  %v15624_v36 = vpack.c.bf16 %v5874_v61, %v5870_v21  ;;  %7781 = vmatpush1.bf16.msra.mxu0 %v12041_v12  ;;  %17122 = vst [vmem:[#allocation23_spill] sm:$0xff] %v15634_v40  ;;  %v5594_v17 = vadd.f32 %v5593_v54, %v15562_v14  ;;  %v12062_v21 = vld [vmem:[%s16979_s12 + $0x430] ss:$28 sps:$4 sm:$0xff]   ;;  %v12067_v44 = vld [vmem:[%s16979_s12 + $0x7c] ss:$28 sps:$4 sm:$0xff]  }
 0x62b   :  { %v5595_v31 = vpop.f32.mrf.mxu0  ;;  %v5756_v47 = vpop.f32.mrf.mxu1  ;;  %7942 = vmatpush1.bf16.msra.mxu1 %v12044_v23  ;;  %7782 = vmatprep.subr.bf16.mxu0 %v12049_v19  ;;  %v5755_v7 = vadd.f32 %v5754_v15, %v15565_v2  ;;  %v5875_v52 = vmax.f32 %v5592_v6, 0.0  ;;  %v5877_v25 = vmax.f32 %v5753_v55, 0.0  ;;  %v12070_v54 = vld [vmem:[%s16979_s12 + $0x3fc] ss:$28 sps:$4 sm:$0xff]   ;;  %v12073_v6 = vld [vmem:[%s16979_s12 + $0x44] ss:$28 sps:$4 sm:$0xff]  }
 0x62c   :  { %17120 = vst [vmem:[#allocation21_spill] sm:$0xff] %v15622_v42  ;;  %17121 = vst [vmem:[#allocation22_spill] sm:$0xff] %v15624_v36  ;;  %v5596_v28 = vadd.f32 %v5595_v31, %v15568_v37  ;;  %v5757_v10 = vadd.f32 %v5756_v47, %v15571_v58  ;;  %7498 = vmatprep.mubr.bf16.mxu0 %v15622_v42  ;;  %7659 = vmatprep.mubr.bf16.mxu1 %v15624_v36  ;;  %v5876_v29 = vmax.f32 %v5594_v17, 0.0 }
 0x62d   :  { %v5597_v24 = vpop.f32.mrf.mxu0  ;;  %v5758_v20 = vpop.f32.mrf.mxu1  ;;  %7499 = vmatmul.mubr.bf16.gmra.mxu0 %v15632_v49  ;;  %7660 = vmatmul.mubr.bf16.gmra.mxu1 %v15634_v40  ;;  %v5878_v63 = vmax.f32 %v5755_v7, 0.0 }
 0x62e   :  { %v5598_v50 = vadd.f32 %v5597_v24, %v15562_v14  ;;  %v5759_v39 = vadd.f32 %v5758_v20, %v15565_v2  ;;  %7783 = vmatpush1.bf16.msra.mxu0 %v12047_v9  ;;  %7943 = vmatprep.subr.bf16.mxu1 %v12052_v41  ;;  %v5879_v18 = vmax.f32 %v5596_v28, 0.0  ;;  %v5881_v22 = vmax.f32 %v5757_v10, 0.0 }
 0x62f   :  { %v5601_v3 = vpop.f32.mrf.mxu0  ;;  %v5762_v11 = vpop.f32.mrf.mxu1  ;;  %7944 = vmatpush1.bf16.msra.mxu1 %v12050_v57  ;;  %7784 = vmatprep.subr.bf16.mxu0 %v12055_v16  ;;  %v12065_v57 = vld [vmem:[%s16979_s12 + $0x78] ss:$28 sps:$4 sm:$0xff]  }
 0x630   :  { %v5880_v62 = vmax.f32 %v5598_v50, 0.0  ;;  %v5882_v48 = vmax.f32 %v5759_v39, 0.0  ;;  %7945 = vmatprep.subr.bf16.mxu1 %v12058_v32  ;;  %v15676_v59 = vpack.c.bf16 %v5879_v18, %v5875_v52  ;;  %v15678_v26 = vpack.c.bf16 %v5881_v22, %v5877_v25  ;;  %v12068_v32 = vld [vmem:[%s16979_s12 + $0x3f8] ss:$28 sps:$4 sm:$0xff]   ;;  %v12074_v25 = vld [vmem:[%s16979_s12 + $0x3c0] ss:$28 sps:$4 sm:$0xff]  }
 0x631   :  { %v5603_v35 = vpop.f32.mrf.mxu0  ;;  %v5764_v33 = vpop.f32.mrf.mxu1  ;;  %v5602_v15 = vadd.f32 %v5601_v3, %v15568_v37  ;;  %v5763_v9 = vadd.f32 %v5762_v11, %v15571_v58 }
 0x632   :  { %v15666_v46 = vpack.c.bf16 %v5880_v62, %v5876_v29  ;;  %v15668_v12 = vpack.c.bf16 %v5882_v48, %v5878_v63  ;;  %7785 = vmatpush1.bf16.msra.mxu0 %v12053_v51  ;;  %v5604_v23 = vadd.f32 %v5603_v35, %v15562_v14  ;;  %v5765_v61 = vadd.f32 %v5764_v33, %v15565_v2  ;;  %v12079_v35 = vld [vmem:[%s16979_s12 + $0xc] ss:$28 sps:$4 sm:$0xff]  }
 0x633   :  { %v5605_v19 = vpop.f32.mrf.mxu0  ;;  %v5766_v53 = vpop.f32.mrf.mxu1  ;;  %7946 = vmatpush1.bf16.msra.mxu1 %v12056_v8  ;;  %7786 = vmatprep.subr.bf16.mxu0 %v12061_v38  ;;  %v5883_v39 = vmax.f32 %v5602_v15, 0.0  ;;  %v5885_v51 = vmax.f32 %v5763_v9, 0.0  ;;  %v12071_v8 = vld [vmem:[%s16979_s12 + $0x40] ss:$28 sps:$4 sm:$0xff]  }
 0x634   :  { %17123 = vst [vmem:[#allocation24_spill] sm:$0xff] %v15666_v46  ;;  %17124 = vst [vmem:[#allocation25_spill] sm:$0xff] %v15668_v12  ;;  %v5606_v1 = vadd.f32 %v5605_v19, %v15568_v37  ;;  %v5767_v34 = vadd.f32 %v5766_v53, %v15571_v58  ;;  %7508 = vmatprep.mubr.bf16.mxu0 %v15666_v46  ;;  %7669 = vmatprep.mubr.bf16.mxu1 %v15668_v12  ;;  %v5884_v55 = vmax.f32 %v5604_v23, 0.0  ;;  %v12076_v38 = vld [vmem:[%s16979_s12 + $0x3c4] ss:$28 sps:$4 sm:$0xff]  }
 0x635   :  { %v5607_v41 = vpop.f32.mrf.mxu0  ;;  %v5768_v17 = vpop.f32.mrf.mxu1  ;;  %7509 = vmatmul.mubr.bf16.gmra.mxu0 %v15676_v59  ;;  %7670 = vmatmul.mubr.bf16.gmra.mxu1 %v15678_v26  ;;  %v5886_v24 = vmax.f32 %v5765_v61, 0.0  ;;  %v12082_v23 = vld [vmem:[%s16979_s12 + $0x38c] ss:$28 sps:$4 sm:$0xff]  }
 0x636   :  { %v5608_v31 = vadd.f32 %v5607_v41, %v15562_v14  ;;  %v5769_v47 = vadd.f32 %v5768_v17, %v15565_v2  ;;  %7787 = vmatpush1.bf16.msra.mxu0 %v12059_v56  ;;  %7947 = vmatprep.subr.bf16.mxu1 %v12064_v30  ;;  %v5887_v16 = vmax.f32 %v5606_v1, 0.0  ;;  %v5889_v7 = vmax.f32 %v5767_v34, 0.0  ;;  %v12077_v34 = vld [vmem:[%s16979_s12 + $0x8] ss:$28 sps:$4 sm:$0xff]  }
 0x637   :  { %v5611_v28 = vpop.f32.mrf.mxu0  ;;  %v5772_v10 = vpop.f32.mrf.mxu1  ;;  %7948 = vmatpush1.bf16.msra.mxu1 %v12062_v21  ;;  %7788 = vmatprep.subr.bf16.mxu0 %v12067_v44  ;;  %v12080_v17 = vld [vmem:[%s16979_s12 + $0x388] ss:$28 sps:$4 sm:$0xff]  }
 0x638   :  { %v5888_v20 = vmax.f32 %v5608_v31, 0.0  ;;  %v5890_v50 = vmax.f32 %v5769_v47, 0.0  ;;  %7949 = vmatprep.subr.bf16.mxu1 %v12070_v54  ;;  %v15720_v29 = vpack.c.bf16 %v5887_v16, %v5883_v39  ;;  %v15722_v63 = vpack.c.bf16 %v5889_v7, %v5885_v51  ;;  %v12085_v31 = vld [vmem:[%s16979_s12 + $0x354] ss:$28 sps:$4 sm:$0xff]  }
 0x639   :  { %v5613_v18 = vpop.f32.mrf.mxu0  ;;  %v5774_v22 = vpop.f32.mrf.mxu1  ;;  %v5612_v19 = vadd.f32 %v5611_v28, %v15568_v37  ;;  %v5773_v53 = vadd.f32 %v5772_v10, %v15571_v58 }
 0x63a   :  { %v15710_v3 = vpack.c.bf16 %v5888_v20, %v5884_v55  ;;  %v15712_v11 = vpack.c.bf16 %v5890_v50, %v5886_v24  ;;  %7789 = vmatpush1.bf16.msra.mxu0 %v12065_v57  ;;  %v5614_v62 = vadd.f32 %v5613_v18, %v15562_v14  ;;  %v5775_v33 = vadd.f32 %v5774_v22, %v15565_v2  ;;  %v12083_v20 = vld [vmem:[%s16979_s12 + $0x350] ss:$28 sps:$4 sm:$0xff]  }
 0x63b   :  { %v5615_v48 = vpop.f32.mrf.mxu0  ;;  %v5776_v52 = vpop.f32.mrf.mxu1  ;;  %7950 = vmatpush1.bf16.msra.mxu1 %v12068_v32  ;;  %7790 = vmatprep.subr.bf16.mxu0 %v12073_v6  ;;  %v5891_v28 = vmax.f32 %v5612_v19, 0.0  ;;  %v5893_v10 = vmax.f32 %v5773_v53, 0.0  ;;  %v12088_v50 = vld [vmem:[%s16979_s12 + $0x6d4] ss:$28 sps:$4 sm:$0xff]  }
 0x63c   :  { %v5616_v56 = vadd.f32 %v5615_v48, %v15568_v37  ;;  %v5777_v30 = vadd.f32 %v5776_v52, %v15571_v58  ;;  %7518 = vmatprep.mubr.bf16.mxu0 %v15710_v3  ;;  %7679 = vmatprep.mubr.bf16.mxu1 %v15712_v11  ;;  %v5892_v47 = vmax.f32 %v5614_v62, 0.0  ;;  %v5894_v57 = vmax.f32 %v5775_v33, 0.0  ;;  %v12091_v62 = vld [vmem:[%s16979_s12 + $0x31c] ss:$28 sps:$4 sm:$0xff]  }
 0x63d   :  { %v5617_v21 = vpop.f32.mrf.mxu0  ;;  %v5778_v44 = vpop.f32.mrf.mxu1  ;;  %7519 = vmatmul.mubr.bf16.gmra.mxu0 %v15720_v29  ;;  %7680 = vmatmul.mubr.bf16.gmra.mxu1 %v15722_v63 }
 0x63e   :  { %v5618_v61 = vadd.f32 %v5617_v21, %v15562_v14  ;;  %v5779_v1 = vadd.f32 %v5778_v44, %v15565_v2  ;;  %7791 = vmatpush1.bf16.msra.mxu0 %v12071_v8  ;;  %7951 = vmatprep.subr.bf16.mxu1 %v12076_v38  ;;  %v5895_v54 = vmax.f32 %v5616_v56, 0.0  ;;  %v5897_v15 = vmax.f32 %v5777_v30, 0.0  ;;  %v12086_v38 = vld [vmem:[%s16979_s12 + $0x6d0] ss:$28 sps:$4 sm:$0xff]   ;;  %v12089_v21 = vld [vmem:[%s16979_s12 + $0x318] ss:$28 sps:$4 sm:$0xff]  }
 0x63f   :  { %v5621_v9 = vpop.f32.mrf.mxu0  ;;  %v5782_v41 = vpop.f32.mrf.mxu1  ;;  %7952 = vmatpush1.bf16.msra.mxu1 %v12074_v25  ;;  %7792 = vmatprep.subr.bf16.mxu0 %v12079_v35  ;;  %v12094_v35 = vld [vmem:[%s16979_s12 + $0x69c] ss:$28 sps:$4 sm:$0xff]  }
 0x640   :  { %v5896_v16 = vmax.f32 %v5618_v61, 0.0  ;;  %v5898_v7 = vmax.f32 %v5779_v1, 0.0  ;;  %7953 = vmatprep.subr.bf16.mxu1 %v12082_v23  ;;  %v15764_v39 = vpack.c.bf16 %v5895_v54, %v5891_v28  ;;  %v15766_v51 = vpack.c.bf16 %v5897_v15, %v5893_v10  ;;  %v12092_v54 = vld [vmem:[%s16979_s12 + $0x698] ss:$28 sps:$4 sm:$0xff]   ;;  %v12097_v15 = vld [vmem:[%s16979_s12 + $0x2e4] ss:$28 sps:$4 sm:$0xff]  }
 0x641   :  { %v5623_v32 = vpop.f32.mrf.mxu0  ;;  %v5784_v6 = vpop.f32.mrf.mxu1  ;;  %v5622_v33 = vadd.f32 %v5621_v9, %v15568_v37  ;;  %v5783_v56 = vadd.f32 %v5782_v41, %v15571_v58 }
 0x642   :  { %v15754_v55 = vpack.c.bf16 %v5896_v16, %v5892_v47  ;;  %v15756_v24 = vpack.c.bf16 %v5898_v7, %v5894_v57  ;;  %7793 = vmatpush1.bf16.msra.mxu0 %v12077_v34  ;;  %v5624_v18 = vadd.f32 %v5623_v32, %v15562_v14  ;;  %v5785_v48 = vadd.f32 %v5784_v6, %v15565_v2  ;;  %v12095_v32 = vld [vmem:[%s16979_s12 + $0x2e0] ss:$28 sps:$4 sm:$0xff]  }
 0x643   :  { %v5625_v22 = vpop.f32.mrf.mxu0  ;;  %v5786_v8 = vpop.f32.mrf.mxu1  ;;  %7954 = vmatpush1.bf16.msra.mxu1 %v12080_v17  ;;  %7794 = vmatprep.subr.bf16.mxu0 %v12085_v31  ;;  %v5899_v47 = vmax.f32 %v5622_v33, 0.0  ;;  %v5901_v57 = vmax.f32 %v5783_v56, 0.0  ;;  %v12100_v6 = vld [vmem:[%s16979_s12 + $0x664] ss:$28 sps:$4 sm:$0xff]  }
 0x644   :  { %v5626_v52 = vadd.f32 %v5625_v22, %v15568_v37  ;;  %v5787_v25 = vadd.f32 %v5786_v8, %v15571_v58  ;;  %7528 = vmatprep.mubr.bf16.mxu0 %v15754_v55  ;;  %7689 = vmatprep.mubr.bf16.mxu1 %v15756_v24  ;;  %v5900_v9 = vmax.f32 %v5624_v18, 0.0  ;;  %v5902_v41 = vmax.f32 %v5785_v48, 0.0 }
 0x645   :  { %v5627_v30 = vpop.f32.mrf.mxu0  ;;  %v5788_v23 = vpop.f32.mrf.mxu1  ;;  %7529 = vmatmul.mubr.bf16.gmra.mxu0 %v15764_v39  ;;  %7690 = vmatmul.mubr.bf16.gmra.mxu1 %v15766_v51 }
 0x646   :  { %v5628_v19 = vadd.f32 %v5627_v30, %v15562_v14  ;;  %v5789_v53 = vadd.f32 %v5788_v23, %v15565_v2  ;;  %7795 = vmatpush2.bf16.msra.mxu0 %v12083_v20  ;;  %7955 = vmatprep.subr.bf16.mxu1 %v12088_v50  ;;  %v5903_v44 = vmax.f32 %v5626_v52, 0.0  ;;  %v5905_v61 = vmax.f32 %v5787_v25, 0.0 }
 0x647   :  { %v5631_v1 = vpop.f32.mrf.mxu0  ;;  %v5792_v34 = vpop.f32.mrf.mxu1  ;;  %7956 = vmatpush2.bf16.msra.mxu1 %v12086_v38  ;;  %7796 = vmatprep.subr.bf16.mxu0 %v12091_v62  ;;  %v12098_v38 = vld [vmem:[%s16979_s12 + $0x660] ss:$28 sps:$4 sm:$0xff]   ;;  %v12103_v62 = vld [vmem:[%s16979_s12 + $0x2ac] ss:$28 sps:$4 sm:$0xff]  }
 0x648   :  { %v5904_v17 = vmax.f32 %v5628_v19, 0.0  ;;  %v5906_v31 = vmax.f32 %v5789_v53, 0.0  ;;  %7957 = vmatprep.subr.bf16.mxu1 %v12094_v35  ;;  %v15808_v20 = vpack.c.bf16 %v5903_v44, %v5899_v47  ;;  %v15810_v50 = vpack.c.bf16 %v5905_v61, %v5901_v57  ;;  %v12106_v35 = vld [vmem:[%s16979_s12 + $0x62c] ss:$28 sps:$4 sm:$0xff]  }
 0x649   :  { %v5633_v16 = vpop.f32.mrf.mxu0  ;;  %v5794_v7 = vpop.f32.mrf.mxu1  ;;  %v5632_v33 = vadd.f32 %v5631_v1, %v15568_v37  ;;  %v5793_v56 = vadd.f32 %v5792_v34, %v15571_v58 }
 0x64a   :  { %v15798_v28 = vpack.c.bf16 %v5904_v17, %v5900_v9  ;;  %v15800_v10 = vpack.c.bf16 %v5906_v31, %v5902_v41  ;;  %7797 = vmatpush2.bf16.msra.mxu0 %v12089_v21  ;;  %v5634_v18 = vadd.f32 %v5633_v16, %v15562_v14  ;;  %v5795_v48 = vadd.f32 %v5794_v7, %v15565_v2  ;;  %v12101_v21 = vld [vmem:[%s16979_s12 + $0x2a8] ss:$28 sps:$4 sm:$0xff]  }
 0x64b   :  { %v5635_v22 = vpop.f32.mrf.mxu0  ;;  %v5796_v8 = vpop.f32.mrf.mxu1  ;;  %7958 = vmatpush2.bf16.msra.mxu1 %v12092_v54  ;;  %7798 = vmatprep.subr.bf16.mxu0 %v12097_v15  ;;  %v12104_v54 = vld [vmem:[%s16979_s12 + $0x628] ss:$28 sps:$4 sm:$0xff]   ;;  %v12109_v15 = vld [vmem:[%s16979_s12 + $0x274] ss:$28 sps:$4 sm:$0xff]   ;;  %v5907_v47 = vmax.f32 %v5632_v33, 0.0  ;;  %v5909_v57 = vmax.f32 %v5793_v56, 0.0 }
 0x64c   :  { %17125 = vst [vmem:[#allocation28_spill] sm:$0xff] %v15800_v10  ;;  %v5636_v52 = vadd.f32 %v5635_v22, %v15568_v37  ;;  %v5797_v25 = vadd.f32 %v5796_v8, %v15571_v58  ;;  %7538 = vmatprep.mubr.bf16.mxu0 %v15798_v28  ;;  %7699 = vmatprep.mubr.bf16.mxu1 %v15800_v10  ;;  %v5908_v9 = vmax.f32 %v5634_v18, 0.0  ;;  %v5910_v41 = vmax.f32 %v5795_v48, 0.0  ;;  %v12107_v22 = vld [vmem:[%s16979_s12 + $0x270] ss:$28 sps:$4 sm:$0xff]  }
 0x64d   :  { %v5637_v30 = vpop.f32.mrf.mxu0  ;;  %v5798_v23 = vpop.f32.mrf.mxu1  ;;  %7539 = vmatmul.mubr.bf16.gmra.mxu0 %v15808_v20  ;;  %7700 = vmatmul.mubr.bf16.gmra.mxu1 %v15810_v50  ;;  %v12112_v18 = vld [vmem:[%s16979_s12 + $0x5f4] ss:$28 sps:$4 sm:$0xff]  }
 0x64e   :  { %v5638_v19 = vadd.f32 %v5637_v30, %v15562_v14  ;;  %v5799_v53 = vadd.f32 %v5798_v23, %v15565_v2  ;;  %7799 = vmatpush2.bf16.msra.mxu0 %v12095_v32  ;;  %7959 = vmatprep.subr.bf16.mxu1 %v12100_v6  ;;  %v5911_v44 = vmax.f32 %v5636_v52, 0.0  ;;  %v5913_v61 = vmax.f32 %v5797_v25, 0.0  ;;  %v12110_v25 = vld [vmem:[%s16979_s12 + $0x5f0] ss:$28 sps:$4 sm:$0xff]   ;;  %v12118_v23 = vld [vmem:[%s16979_s12 + $0x5bc] ss:$28 sps:$4 sm:$0xff]  }
 0x64f   :  { %v5641_v1 = vpop.f32.mrf.mxu0  ;;  %v5802_v34 = vpop.f32.mrf.mxu1  ;;  %7960 = vmatpush2.bf16.msra.mxu1 %v12098_v38  ;;  %7800 = vmatprep.subr.bf16.mxu0 %v12103_v62 }
 0x650   :  { %v5912_v17 = vmax.f32 %v5638_v19, 0.0  ;;  %v5914_v31 = vmax.f32 %v5799_v53, 0.0  ;;  %7961 = vmatprep.subr.bf16.mxu1 %v12106_v35  ;;  %v15852_v8 = vpack.c.bf16 %v5911_v44, %v5907_v47  ;;  %v15854_v38 = vpack.c.bf16 %v5913_v61, %v5909_v57  ;;  %v12115_v35 = vld [vmem:[%s16979_s12 + $0x23c] ss:$28 sps:$4 sm:$0xff]  }
 0x651   :  { %v5643_v16 = vpop.f32.mrf.mxu0  ;;  %v5804_v7 = vpop.f32.mrf.mxu1  ;;  %v5642_v19 = vadd.f32 %v5641_v1, %v15568_v37  ;;  %v5803_v53 = vadd.f32 %v5802_v34, %v15571_v58 }
 0x652   :  { %v15842_v32 = vpack.c.bf16 %v5912_v17, %v5908_v9  ;;  %v15844_v6 = vpack.c.bf16 %v5914_v31, %v5910_v41  ;;  %7801 = vmatpush2.bf16.msra.mxu0 %v12101_v21  ;;  %v5644_v62 = vadd.f32 %v5643_v16, %v15562_v14  ;;  %v5805_v33 = vadd.f32 %v5804_v7, %v15565_v2  ;;  %v12116_v17 = vld [vmem:[%s16979_s12 + $0x5b8] ss:$28 sps:$4 sm:$0xff]   ;;  %v12121_v31 = vld [vmem:[%s16979_s12 + $0x204] ss:$28 sps:$4 sm:$0xff]  }
 0x653   :  { %v5645_v48 = vpop.f32.mrf.mxu0  ;;  %v5806_v52 = vpop.f32.mrf.mxu1  ;;  %7962 = vmatpush2.bf16.msra.mxu1 %v12104_v54  ;;  %7802 = vmatprep.subr.bf16.mxu0 %v12109_v15  ;;  %v12113_v15 = vld [vmem:[%s16979_s12 + $0x238] ss:$28 sps:$4 sm:$0xff]  }
 0x654   :  { %v5646_v56 = vadd.f32 %v5645_v48, %v15568_v37  ;;  %v5807_v30 = vadd.f32 %v5806_v52, %v15571_v58  ;;  %7548 = vmatprep.mubr.bf16.mxu0 %v15842_v32  ;;  %7709 = vmatprep.mubr.bf16.mxu1 %v15844_v6  ;;  %v5916_v47 = vmax.f32 %v5644_v62, 0.0  ;;  %v5918_v57 = vmax.f32 %v5805_v33, 0.0  ;;  %v12124_v62 = vld [vmem:[%s16979_s12 + $0x584] ss:$28 sps:$4 sm:$0xff]  }
 0x655   :  { %v5647_v21 = vpop.f32.mrf.mxu0  ;;  %v5808_v44 = vpop.f32.mrf.mxu1  ;;  %7549 = vmatmul.mubr.bf16.gmra.mxu0 %v15852_v8  ;;  %7710 = vmatmul.mubr.bf16.gmra.mxu1 %v15854_v38 }
 0x656   :  { %v5648_v61 = vadd.f32 %v5647_v21, %v15562_v14  ;;  %v5809_v54 = vadd.f32 %v5808_v44, %v15565_v2  ;;  %7803 = vmatpush2.bf16.msra.mxu0 %v12107_v22  ;;  %7963 = vmatprep.subr.bf16.mxu1 %v12112_v18  ;;  %v5919_v9 = vmax.f32 %v5646_v56, 0.0  ;;  %v5921_v1 = vmax.f32 %v5807_v30, 0.0  ;;  %v12122_v21 = vld [vmem:[%s16979_s12 + $0x580] ss:$28 sps:$4 sm:$0xff]   ;;  %v12127_v44 = vld [vmem:[%s16979_s12 + $0x1cc] ss:$28 sps:$4 sm:$0xff]  }
 0x657   :  { %v5651_v41 = vpop.f32.mrf.mxu0  ;;  %v5812_v34 = vpop.f32.mrf.mxu1  ;;  %7964 = vmatpush2.bf16.msra.mxu1 %v12110_v25  ;;  %7804 = vmatprep.subr.bf16.mxu0 %v12115_v35  ;;  %v5915_v22 = vmax.f32 %v5642_v19, 0.0  ;;  %v5917_v18 = vmax.f32 %v5803_v53, 0.0  ;;  %v12119_v35 = vld [vmem:[%s16979_s12 + $0x200] ss:$28 sps:$4 sm:$0xff]  }
 0x658   :  { %v5920_v16 = vmax.f32 %v5648_v61, 0.0  ;;  %v5922_v7 = vmax.f32 %v5809_v54, 0.0  ;;  %7965 = vmatprep.subr.bf16.mxu1 %v12118_v23 }
 0x659   :  { %v5653_v48 = vpop.f32.mrf.mxu0  ;;  %v5814_v52 = vpop.f32.mrf.mxu1  ;;  %v15896_v33 = vpack.c.bf16 %v5919_v9, %v5915_v22  ;;  %v15898_v30 = vpack.c.bf16 %v5921_v1, %v5917_v18  ;;  %v12130_v9 = vld [vmem:[%s16979_s12 + $0x54c] ss:$28 sps:$4 sm:$0xff]   ;;  %v5652_v1 = vadd.f32 %v5651_v41, %v15568_v37 }
 0x65a   :  { %v15886_v56 = vpack.c.bf16 %v5920_v16, %v5916_v47  ;;  %v15888_v25 = vpack.c.bf16 %v5922_v7, %v5918_v57  ;;  %7805 = vmatpush2.bf16.msra.mxu0 %v12113_v15  ;;  %v5654_v23 = vadd.f32 %v5653_v48, %v15562_v14  ;;  %v5815_v61 = vadd.f32 %v5814_v52, %v15565_v2  ;;  %v12125_v7 = vld [vmem:[%s16979_s12 + $0x1c8] ss:$28 sps:$4 sm:$0xff]   ;;  %v12133_v52 = vld [vmem:[%s16979_s12 + $0x19c] ss:$28 sps:$4 sm:$0xff]  }
 0x65b   :  { %v5655_v19 = vpop.f32.mrf.mxu0  ;;  %v5816_v53 = vpop.f32.mrf.mxu1  ;;  %7966 = vmatpush2.bf16.msra.mxu1 %v12116_v17  ;;  %7806 = vmatprep.subr.bf16.mxu0 %v12121_v31  ;;  %v5813_v17 = vadd.f32 %v5812_v34, %v15571_v58  ;;  %v12128_v48 = vld [vmem:[%s16979_s12 + $0x548] ss:$28 sps:$4 sm:$0xff]  }
 0x65c   :  { %v5656_v54 = vadd.f32 %v5655_v19, %v15568_v37  ;;  %v5817_v15 = vadd.f32 %v5816_v53, %v15571_v58  ;;  %7558 = vmatprep.mubr.bf16.mxu0 %v15886_v56  ;;  %7719 = vmatprep.mubr.bf16.mxu1 %v15888_v25 }
 0x65d   :  { %v5657_v31 = vpop.f32.mrf.mxu0  ;;  %v5818_v47 = vpop.f32.mrf.mxu1  ;;  %7559 = vmatmul.mubr.bf16.gmra.mxu0 %v15896_v33  ;;  %7720 = vmatmul.mubr.bf16.gmra.mxu1 %v15898_v30 }
 0x65e   :  { %v5658_v57 = vadd.f32 %v5657_v31, %v15562_v14  ;;  %v5819_v16 = vadd.f32 %v5818_v47, %v15565_v2  ;;  %7807 = vmatpush2.bf16.msra.mxu0 %v12119_v35  ;;  %7967 = vmatprep.subr.bf16.mxu1 %v12124_v62  ;;  %v5927_v22 = vmax.f32 %v5656_v54, 0.0  ;;  %v5929_v41 = vmax.f32 %v5817_v15, 0.0 }
 0x65f   :  { %v5661_v18 = vpop.f32.mrf.mxu0  ;;  %v5822_v34 = vpop.f32.mrf.mxu1  ;;  %7968 = vmatpush2.bf16.msra.mxu1 %v12122_v21  ;;  %7808 = vmatprep.subr.bf16.mxu0 %v12127_v44  ;;  %v5924_v35 = vmax.f32 %v5654_v23, 0.0  ;;  %v5926_v62 = vmax.f32 %v5815_v61, 0.0  ;;  %v5923_v31 = vmax.f32 %v5652_v1, 0.0  ;;  %v5925_v54 = vmax.f32 %v5813_v17, 0.0  ;;  %v12136_v44 = vld [vmem:[%s16979_s12 + $0x51c] ss:$28 sps:$4 sm:$0xff]  }
 0x660   :  { %v5928_v19 = vmax.f32 %v5658_v57, 0.0  ;;  %v5930_v53 = vmax.f32 %v5819_v16, 0.0  ;;  %7969 = vmatprep.subr.bf16.mxu1 %v12130_v9 }
 0x661   :  { %v5663_v15 = vpop.f32.mrf.mxu0  ;;  %v5824_v47 = vpop.f32.mrf.mxu1  ;;  %v15937_v4 = vpack.c.bf16 %v5927_v22, %v5923_v31  ;;  %v15939_v23 = vpack.c.bf16 %v5929_v41, %v5925_v54  ;;  %v5823_v22 = vadd.f32 %v5822_v34, %v15571_v58 }
 0x662   :  { %v15930_v0 = vpack.c.bf16 %v5928_v19, %v5924_v35  ;;  %v15932_v21 = vpack.c.bf16 %v5930_v53, %v5926_v62  ;;  %7809 = vmatpush2.bf16.msra.mxu0 %v12125_v7  ;;  %v5664_v61 = vadd.f32 %v5663_v15, %v15562_v14  ;;  %v5825_v17 = vadd.f32 %v5824_v47, %v15565_v2 }
 0x663   :  { %17126 = vst [vmem:[#allocation26_spill] sm:$0xff] %v15939_v23  ;;  %v5665_v9 = vpop.f32.mrf.mxu0  ;;  %v5826_v1 = vpop.f32.mrf.mxu1  ;;  %7970 = vmatpush2.bf16.msra.mxu1 %v12128_v48  ;;  %8100 = vmatprep.subr.bf16.mxu0 %v12133_v52  ;;  %v5662_v7 = vadd.f32 %v5661_v18, %v15568_v37 }
 0x664   :  { %v5666_v57 = vadd.f32 %v5665_v9, %v15568_v37  ;;  %v5827_v16 = vadd.f32 %v5826_v1, %v15571_v58  ;;  %7568 = vmatprep.mubr.bf16.mxu0 %v15930_v0  ;;  %7729 = vmatprep.mubr.bf16.mxu1 %v15932_v21  ;;  %v5932_v54 = vmax.f32 %v5664_v61, 0.0  ;;  %v5934_v15 = vmax.f32 %v5825_v17, 0.0 }
 0x665   :  { %v5667_v41 = vpop.f32.mrf.mxu0  ;;  %v5828_v35 = vpop.f32.mrf.mxu1  ;;  %7569 = vmatmul.mubr.bf16.gmra.mxu0 %v15937_v4  ;;  %7730 = vmatmul.mubr.bf16.gmra.mxu1 %v15939_v23  ;;  %v5931_v34 = vmax.f32 %v5662_v7, 0.0  ;;  %v5933_v9 = vmax.f32 %v5823_v22, 0.0 }
 0x666   :  { %v5668_v48 = vadd.f32 %v5667_v41, %v15562_v14  ;;  %v5829_v52 = vadd.f32 %v5828_v35, %v15565_v2  ;;  %8261 = vmatprep.subr.bf16.mxu1 %v12136_v44  ;;  %v5935_v62 = vmax.f32 %v5666_v57, 0.0  ;;  %v5937_v19 = vmax.f32 %v5827_v16, 0.0 }
 0x667   :  { %v5671_v53 = vpop.f32.mrf.mxu0  ;;  %v5832_v31 = vpop.f32.mrf.mxu1 }
 0x668   :  { %v5936_v18 = vmax.f32 %v5668_v48, 0.0  ;;  %v5938_v47 = vmax.f32 %v5829_v52, 0.0  ;;  %v15957_v41 = vpack.c.bf16 %v5935_v62, %v5931_v34  ;;  %v15959_v35 = vpack.c.bf16 %v5937_v19, %v5933_v9 }
 0x669   :  { %v5673_v1 = vpop.f32.mrf.mxu0  ;;  %v5834_v5 = vpop.f32.mrf.mxu1  ;;  %v5672_v22 = vadd.f32 %v5671_v53, %v15568_v37  ;;  %v5833_v48 = vadd.f32 %v5832_v31, %v15571_v58 }
 0x66a   :  { %v15953_v60 = vpack.c.bf16 %v5936_v18, %v5932_v54  ;;  %v15955_v23 = vpack.c.bf16 %v5938_v47, %v5934_v15  ;;  %17129 = vst [vmem:[#allocation30_spill] sm:$0xff] %v15957_v41  ;;  %17130 = vst [vmem:[#allocation31_spill] sm:$0xff] %v15959_v35  ;;  %v5674_v44 = vadd.f32 %v5673_v1, %v15562_v14 }
 0x66b   :  { %v5675_v57 = vpop.f32.mrf.mxu0  ;;  %v5836_v16 = vpop.f32.mrf.mxu1  ;;  %v5835_v61 = vadd.f32 %v5834_v5, %v15565_v2  ;;  %v5941_v31 = vmax.f32 %v5833_v48, 0.0 }
 0x66c   :  { %17127 = vst [vmem:[#allocation27_spill] sm:$0xff] %v15953_v60  ;;  %17128 = vst [vmem:[#allocation29_spill] sm:$0xff] %v15955_v23  ;;  %v5676_v17 = vadd.f32 %v5675_v57, %v15568_v37  ;;  %v5837_v7 = vadd.f32 %v5836_v16, %v15571_v58  ;;  %7578 = vmatprep.mubr.bf16.mxu0 %v15953_v60  ;;  %7739 = vmatprep.mubr.bf16.mxu1 %v15955_v23  ;;  %v5940_v34 = vmax.f32 %v5674_v44, 0.0 }
 0x66d   :  { %v5677_v52 = vpop.f32.mrf.mxu0  ;;  %v5838_v62 = vpop.f32.mrf.mxu1  ;;  %7579 = vmatmul.mubr.bf16.gmra.mxu0 %v15957_v41  ;;  %7740 = vmatmul.mubr.bf16.gmra.mxu1 %v15959_v35  ;;  %v5942_v9 = vmax.f32 %v5835_v61, 0.0  ;;  %v5939_v57 = vmax.f32 %v5672_v22, 0.0 }
 0x66e   :  { %v5678_v5 = vadd.f32 %v5677_v52, %v15562_v14  ;;  %v5839_v19 = vadd.f32 %v5838_v62, %v15565_v2  ;;  %v5943_v54 = vmax.f32 %v5676_v17, 0.0  ;;  %v5945_v15 = vmax.f32 %v5837_v7, 0.0 }
 0x66f   :  { %v5681_v18 = vpop.f32.mrf.mxu0  ;;  %v5842_v47 = vpop.f32.mrf.mxu1 }
 0x670   :  { %v5944_v1 = vmax.f32 %v5678_v5, 0.0  ;;  %v5946_v53 = vmax.f32 %v5839_v19, 0.0  ;;  %v15977_v35 = vpack.c.bf16 %v5943_v54, %v5939_v57  ;;  %v15979_v52 = vpack.c.bf16 %v5945_v15, %v5941_v31 }
 0x671   :  { %v5683_v16 = vpop.f32.mrf.mxu0  ;;  %v5844_v23 = vpop.f32.mrf.mxu1  ;;  %v5682_v48 = vadd.f32 %v5681_v18, %v15568_v37  ;;  %v5843_v5 = vadd.f32 %v5842_v47, %v15571_v58 }
 0x672   :  { %v15973_v60 = vpack.c.bf16 %v5944_v1, %v5940_v34  ;;  %v15975_v41 = vpack.c.bf16 %v5946_v53, %v5942_v9  ;;  %17133 = vst [vmem:[#allocation17_spill] sm:$0xff] %v15977_v35  ;;  %17134 = vst [vmem:[#allocation11_spill] sm:$0xff] %v15979_v52  ;;  %v5684_v17 = vadd.f32 %v5683_v16, %v15562_v14 }
 0x673   :  { %v5685_v7 = vpop.f32.mrf.mxu0  ;;  %v5846_v62 = vpop.f32.mrf.mxu1  ;;  %v5845_v44 = vadd.f32 %v5844_v23, %v15565_v2  ;;  %v5949_v47 = vmax.f32 %v5843_v5, 0.0 }
 0x674   :  { %17131 = vst [vmem:[#allocation15_spill] sm:$0xff] %v15973_v60  ;;  %17132 = vst [vmem:[#allocation16_spill] sm:$0xff] %v15975_v41  ;;  %v5686_v61 = vadd.f32 %v5685_v7, %v15568_v37  ;;  %v5847_v22 = vadd.f32 %v5846_v62, %v15571_v58  ;;  %7588 = vmatprep.mubr.bf16.mxu0 %v15973_v60  ;;  %7749 = vmatprep.mubr.bf16.mxu1 %v15975_v41  ;;  %v5948_v57 = vmax.f32 %v5684_v17, 0.0 }
 0x675   :  { %v5687_v19 = vpop.f32.mrf.mxu0  ;;  %v5848_v54 = vpop.f32.mrf.mxu1  ;;  %7589 = vmatmul.mubr.bf16.gmra.mxu0 %v15977_v35  ;;  %7750 = vmatmul.mubr.bf16.gmra.mxu1 %v15979_v52  ;;  %v5950_v31 = vmax.f32 %v5845_v44, 0.0  ;;  %v5947_v7 = vmax.f32 %v5682_v48, 0.0 }
 0x676   :  { %v5688_v23 = vadd.f32 %v5687_v19, %v15562_v14  ;;  %v5849_v15 = vadd.f32 %v5848_v54, %v15565_v2  ;;  %v5951_v34 = vmax.f32 %v5686_v61, 0.0  ;;  %v5953_v9 = vmax.f32 %v5847_v22, 0.0 }
 0x677   :  { %v5691_v1 = vpop.f32.mrf.mxu0  ;;  %v5852_v53 = vpop.f32.mrf.mxu1 }
 0x678   :  { %v5952_v16 = vmax.f32 %v5688_v23, 0.0  ;;  %v5954_v18 = vmax.f32 %v5849_v15, 0.0  ;;  %v15999_v61 = vpack.c.bf16 %v5951_v34, %v5947_v7  ;;  %v16001_v22 = vpack.c.bf16 %v5953_v9, %v5949_v47  ;;  %v12140_v7 = vld [vmem:[%s16979_s12 + $0x4e0] ss:$28 sps:$4 sm:$0xff]   ;;  %v12145_v47 = vld [vmem:[%s16979_s12 + $0x12c] ss:$28 sps:$4 sm:$0xff]  }
 0x679   :  { %v5693_v62 = vpop.f32.mrf.mxu0  ;;  %v5854_v41 = vpop.f32.mrf.mxu1  ;;  %v5692_v17 = vadd.f32 %v5691_v1, %v15568_v37  ;;  %v5853_v44 = vadd.f32 %v5852_v53, %v15571_v58  ;;  %v12131_v1 = vld [vmem:[%s16979_s12 + $0x198] ss:$28 sps:$4 sm:$0xff]  }
 0x67a   :  { %v15993_v60 = vpack.c.bf16 %v5952_v16, %v5948_v57  ;;  %v15995_v35 = vpack.c.bf16 %v5954_v18, %v5950_v31  ;;  %v5694_v19 = vadd.f32 %v5693_v62, %v15562_v14  ;;  %v5855_v54 = vadd.f32 %v5854_v41, %v15565_v2  ;;  %17137 = vst [vmem:[#allocation32_spill] sm:$0xff] %v15999_v61  ;;  %v12134_v53 = vld [vmem:[%s16979_s12 + $0x518] ss:$28 sps:$4 sm:$0xff]   ;;  %v12139_v31 = vld [vmem:[%s16979_s12 + $0x164] ss:$28 sps:$4 sm:$0xff]  }
 0x67b   :  { %17138 = vst [vmem:[#allocation33_spill] sm:$0xff] %v16001_v22  ;;  %v5695_v48 = vpop.f32.mrf.mxu0  ;;  %v5856_v5 = vpop.f32.mrf.mxu1  ;;  %v5955_v37 = vmax.f32 %v5692_v17, 0.0  ;;  %v5957_v58 = vmax.f32 %v5853_v44, 0.0  ;;  %v12142_v16 = vld [vmem:[%s16979_s12 + $0x4e4] ss:$28 sps:$4 sm:$0xff]  }
 0x67c   :  { %17135 = vst [vmem:[#allocation18_spill] sm:$0xff] %v15993_v60  ;;  %17136 = vst [vmem:[#allocation12_spill] sm:$0xff] %v15995_v35  ;;  %v5956_v23 = vmax.f32 %v5694_v19, 0.0  ;;  %v5958_v15 = vmax.f32 %v5855_v54, 0.0  ;;  %7598 = vmatprep.mubr.bf16.mxu0 %v15993_v60  ;;  %7759 = vmatprep.mubr.bf16.mxu1 %v15995_v35  ;;  %v12137_v18 = vld [vmem:[%s16979_s12 + $0x160] ss:$28 sps:$4 sm:$0xff]  }
 0x67d   :  { %v5696_v57 = vpop.f32.mrf.mxu0  ;;  %v5857_v14 = vpop.f32.mrf.mxu1  ;;  %7599 = vmatmul.mubr.bf16.gmra.mxu0 %v15999_v61  ;;  %7760 = vmatmul.mubr.bf16.gmra.mxu1 %v16001_v22  ;;  %v16015_v34 = vpack.c.bf16 %v5955_v37, %v5955_v37  ;;  %v16017_v9 = vpack.c.bf16 %v5957_v58, %v5957_v58  ;;  %v12148_v62 = vld [vmem:[%s16979_s12 + $0x4ac] ss:$28 sps:$4 sm:$0xff]   ;;  %v12151_v17 = vld [vmem:[%s16979_s12 + $0xf4] ss:$28 sps:$4 sm:$0xff]   ;;  %v12163_v37 = vld [vmem:[%s16979_s12 + $0x84] ss:$28 sps:$4 sm:$0xff]  }
 0x67e   :  { %v16009_v2 = vpack.c.bf16 %v5956_v23, %v5956_v23  ;;  %v16011_v41 = vpack.c.bf16 %v5958_v15, %v5958_v15  ;;  %v12143_v19 = vld [vmem:[%s16979_s12 + $0x128] ss:$28 sps:$4 sm:$0xff]   ;;  %v12154_v44 = vld [vmem:[%s16979_s12 + $0x474] ss:$28 sps:$4 sm:$0xff]   ;;  %v12157_v23 = vld [vmem:[%s16979_s12 + $0xbc] ss:$28 sps:$4 sm:$0xff]  }
 0x67f   :  { %v12146_v54 = vld [vmem:[%s16979_s12 + $0x4a8] ss:$28 sps:$4 sm:$0xff]   ;;  %v12149_v48 = vld [vmem:[%s16979_s12 + $0xf0] ss:$28 sps:$4 sm:$0xff]   ;;  %v12160_v15 = vld [vmem:[%s16979_s12 + $0x43c] ss:$28 sps:$4 sm:$0xff]  }
 0x680   :  { %17139 = vst [vmem:[#allocation34_spill] sm:$0xff] %v16009_v2  ;;  %17140 = vst [vmem:[#allocation35_spill] sm:$0xff] %v16011_v41  ;;  %7608 = vmatprep.mubr.bf16.mxu0 %v16009_v2  ;;  %7769 = vmatprep.mubr.bf16.mxu1 %v16011_v41  ;;  %v12152_v5 = vld [vmem:[%s16979_s12 + $0x470] ss:$28 sps:$4 sm:$0xff]   ;;  %v12155_v57 = vld [vmem:[%s16979_s12 + $0xb8] ss:$28 sps:$4 sm:$0xff]  }
 0x681   :  { %v12158_v14 = vld [vmem:[%s16979_s12 + $0x438] ss:$28 sps:$4 sm:$0xff]   ;;  %v12166_v58 = vld [vmem:[%s16979_s12 + $0x404] ss:$28 sps:$4 sm:$0xff]  }
 0x685   :  { %7609 = vmatmul.mubr.bf16.gmra.mxu0 %v16015_v34  ;;  %7770 = vmatmul.mubr.bf16.gmra.mxu1 %v16017_v9 }
 0x686   :  { %7810 = vmatprep.mubr.bf16.mxu0 %v15581_v13  ;;  %7971 = vmatprep.mubr.bf16.mxu1 %v15583_v45 }
 0x68d   :  { %7811 = vmatmul.mubr.bf16.vlgmr.msra.gmra.mxu0 %v15591_v27  ;;  %7972 = vmatmul.mubr.bf16.vlgmr.msra.gmra.mxu1 %v15593_v43 }
 0x68e   :  { %7820 = vmatprep.mubr.bf16.mxu0 %v15622_v42  ;;  %7981 = vmatprep.mubr.bf16.mxu1 %v15624_v36 }
 0x68f   :  { %8101 = vmatpush1.bf16.msra.mxu0 %v12131_v1  ;;  %8262 = vmatpush1.bf16.msra.mxu1 %v12134_v53  ;;  %v12161_v1 = vld [vmem:[%s16979_s12 + $0x80] ss:$28 sps:$4 sm:$0xff]  }
 0x690   :  { %8102 = vmatprep.subr.bf16.mxu0 %v12139_v31  ;;  %8263 = vmatprep.subr.bf16.mxu1 %v12142_v16  ;;  %v12164_v53 = vld [vmem:[%s16979_s12 + $0x400] ss:$28 sps:$4 sm:$0xff]   ;;  %v12169_v31 = vld [vmem:[%s16979_s12 + $0x4c] ss:$28 sps:$4 sm:$0xff]  }
 0x691   :  { %v12172_v16 = vld [vmem:[%s16979_s12 + $0x3cc] ss:$28 sps:$4 sm:$0xff]  }
 0x693   :  { %8103 = vmatpush1.bf16.msra.mxu0 %v12137_v18  ;;  %8264 = vmatpush1.bf16.msra.mxu1 %v12140_v7  ;;  %v12167_v18 = vld [vmem:[%s16979_s12 + $0x48] ss:$28 sps:$4 sm:$0xff]  }
 0x694   :  { %8104 = vmatprep.subr.bf16.mxu0 %v12145_v47  ;;  %8265 = vmatprep.subr.bf16.mxu1 %v12148_v62  ;;  %v12170_v7 = vld [vmem:[%s16979_s12 + $0x3c8] ss:$28 sps:$4 sm:$0xff]   ;;  %v12175_v47 = vld [vmem:[%s16979_s12 + $0x14] ss:$28 sps:$4 sm:$0xff]  }
 0x695   :  { %7821 = vmatmul.mubr.bf16.gmra.mxu0 %v15632_v49  ;;  %7982 = vmatmul.mubr.bf16.gmra.mxu1 %v15634_v40  ;;  %v12178_v62 = vld [vmem:[%s16979_s12 + $0x394] ss:$28 sps:$4 sm:$0xff]  }
 0x696   :  { %7830 = vmatprep.mubr.bf16.mxu0 %v15666_v46  ;;  %7991 = vmatprep.mubr.bf16.mxu1 %v15668_v12 }
 0x697   :  { %8105 = vmatpush1.bf16.msra.mxu0 %v12143_v19  ;;  %8266 = vmatpush1.bf16.msra.mxu1 %v12146_v54  ;;  %v12173_v19 = vld [vmem:[%s16979_s12 + $0x10] ss:$28 sps:$4 sm:$0xff]  }
 0x698   :  { %8106 = vmatprep.subr.bf16.mxu0 %v12151_v17  ;;  %8267 = vmatprep.subr.bf16.mxu1 %v12154_v44  ;;  %v12176_v54 = vld [vmem:[%s16979_s12 + $0x390] ss:$28 sps:$4 sm:$0xff]   ;;  %v12181_v17 = vld [vmem:[%s16979_s12 + $0x35c] ss:$28 sps:$4 sm:$0xff]  }
 0x699   :  { %v12184_v44 = vld [vmem:[%s16979_s12 + $0x6dc] ss:$28 sps:$4 sm:$0xff]  }
 0x69b   :  { %8107 = vmatpush1.bf16.msra.mxu0 %v12149_v48  ;;  %8268 = vmatpush1.bf16.msra.mxu1 %v12152_v5  ;;  %v12179_v48 = vld [vmem:[%s16979_s12 + $0x358] ss:$28 sps:$4 sm:$0xff]  }
 0x69c   :  { %8108 = vmatprep.subr.bf16.mxu0 %v12157_v23  ;;  %8269 = vmatprep.subr.bf16.mxu1 %v12160_v15  ;;  %v12182_v5 = vld [vmem:[%s16979_s12 + $0x6d8] ss:$28 sps:$4 sm:$0xff]   ;;  %v12187_v23 = vld [vmem:[%s16979_s12 + $0x324] ss:$28 sps:$4 sm:$0xff]  }
 0x69d   :  { %7831 = vmatmul.mubr.bf16.gmra.mxu0 %v15676_v59  ;;  %7992 = vmatmul.mubr.bf16.gmra.mxu1 %v15678_v26  ;;  %v12190_v15 = vld [vmem:[%s16979_s12 + $0x6a4] ss:$28 sps:$4 sm:$0xff]  }
 0x69e   :  { %7840 = vmatprep.mubr.bf16.mxu0 %v15710_v3  ;;  %8001 = vmatprep.mubr.bf16.mxu1 %v15712_v11 }
 0x69f   :  { %8109 = vmatpush1.bf16.msra.mxu0 %v12155_v57  ;;  %8270 = vmatpush1.bf16.msra.mxu1 %v12158_v14  ;;  %v12185_v57 = vld [vmem:[%s16979_s12 + $0x320] ss:$28 sps:$4 sm:$0xff]  }
 0x6a0   :  { %8110 = vmatprep.subr.bf16.mxu0 %v12163_v37  ;;  %8271 = vmatprep.subr.bf16.mxu1 %v12166_v58  ;;  %v12188_v14 = vld [vmem:[%s16979_s12 + $0x6a0] ss:$28 sps:$4 sm:$0xff]   ;;  %v12193_v37 = vld [vmem:[%s16979_s12 + $0x2ec] ss:$28 sps:$4 sm:$0xff]  }
 0x6a1   :  { %v12196_v58 = vld [vmem:[%s16979_s12 + $0x66c] ss:$28 sps:$4 sm:$0xff]  }
 0x6a3   :  { %8111 = vmatpush1.bf16.msra.mxu0 %v12161_v1  ;;  %8272 = vmatpush1.bf16.msra.mxu1 %v12164_v53  ;;  %v12191_v1 = vld [vmem:[%s16979_s12 + $0x2e8] ss:$28 sps:$4 sm:$0xff]  }
 0x6a4   :  { %8112 = vmatprep.subr.bf16.mxu0 %v12169_v31  ;;  %8273 = vmatprep.subr.bf16.mxu1 %v12172_v16  ;;  %v12194_v53 = vld [vmem:[%s16979_s12 + $0x668] ss:$28 sps:$4 sm:$0xff]   ;;  %v12199_v31 = vld [vmem:[%s16979_s12 + $0x2b4] ss:$28 sps:$4 sm:$0xff]  }
 0x6a5   :  { %7841 = vmatmul.mubr.bf16.gmra.mxu0 %v15720_v29  ;;  %8002 = vmatmul.mubr.bf16.gmra.mxu1 %v15722_v63  ;;  %v12202_v16 = vld [vmem:[%s16979_s12 + $0x634] ss:$28 sps:$4 sm:$0xff]  }
 0x6a6   :  { %7850 = vmatprep.mubr.bf16.mxu0 %v15754_v55  ;;  %8011 = vmatprep.mubr.bf16.mxu1 %v15756_v24 }
 0x6a7   :  { %8113 = vmatpush1.bf16.msra.mxu0 %v12167_v18  ;;  %8274 = vmatpush1.bf16.msra.mxu1 %v12170_v7  ;;  %v12197_v18 = vld [vmem:[%s16979_s12 + $0x2b0] ss:$28 sps:$4 sm:$0xff]  }
 0x6a8   :  { %8114 = vmatprep.subr.bf16.mxu0 %v12175_v47  ;;  %8275 = vmatprep.subr.bf16.mxu1 %v12178_v62  ;;  %v12200_v7 = vld [vmem:[%s16979_s12 + $0x630] ss:$28 sps:$4 sm:$0xff]   ;;  %v12205_v47 = vld [vmem:[%s16979_s12 + $0x27c] ss:$28 sps:$4 sm:$0xff]  }
 0x6a9   :  { %v12208_v62 = vld [vmem:[%s16979_s12 + $0x5fc] ss:$28 sps:$4 sm:$0xff]  }
 0x6ab   :  { %8115 = vmatpush1.bf16.msra.mxu0 %v12173_v19  ;;  %8276 = vmatpush1.bf16.msra.mxu1 %v12176_v54  ;;  %v12203_v19 = vld [vmem:[%s16979_s12 + $0x278] ss:$28 sps:$4 sm:$0xff]  }
 0x6ac   :  { %8116 = vmatprep.subr.bf16.mxu0 %v12181_v17  ;;  %8277 = vmatprep.subr.bf16.mxu1 %v12184_v44  ;;  %v12206_v54 = vld [vmem:[%s16979_s12 + $0x5f8] ss:$28 sps:$4 sm:$0xff]   ;;  %v12211_v17 = vld [vmem:[%s16979_s12 + $0x244] ss:$28 sps:$4 sm:$0xff]  }
 0x6ad   :  { %7851 = vmatmul.mubr.bf16.gmra.mxu0 %v15764_v39  ;;  %8012 = vmatmul.mubr.bf16.gmra.mxu1 %v15766_v51  ;;  %v12214_v44 = vld [vmem:[%s16979_s12 + $0x5c4] ss:$28 sps:$4 sm:$0xff]  }
 0x6ae   :  { %7860 = vmatprep.mubr.bf16.mxu0 %v15798_v28  ;;  %8021 = vmatprep.mubr.bf16.mxu1 %v15800_v10 }
 0x6af   :  { %8117 = vmatpush2.bf16.msra.mxu0 %v12179_v48  ;;  %8278 = vmatpush2.bf16.msra.mxu1 %v12182_v5  ;;  %v12209_v48 = vld [vmem:[%s16979_s12 + $0x240] ss:$28 sps:$4 sm:$0xff]  }
 0x6b0   :  { %8118 = vmatprep.subr.bf16.mxu0 %v12187_v23  ;;  %8279 = vmatprep.subr.bf16.mxu1 %v12190_v15  ;;  %v12212_v5 = vld [vmem:[%s16979_s12 + $0x5c0] ss:$28 sps:$4 sm:$0xff]   ;;  %v12217_v23 = vld [vmem:[%s16979_s12 + $0x20c] ss:$28 sps:$4 sm:$0xff]  }
 0x6b1   :  { %v12220_v15 = vld [vmem:[%s16979_s12 + $0x58c] ss:$28 sps:$4 sm:$0xff]  }
 0x6b3   :  { %8119 = vmatpush2.bf16.msra.mxu0 %v12185_v57  ;;  %8280 = vmatpush2.bf16.msra.mxu1 %v12188_v14  ;;  %v12215_v57 = vld [vmem:[%s16979_s12 + $0x208] ss:$28 sps:$4 sm:$0xff]  }
 0x6b4   :  { %8120 = vmatprep.subr.bf16.mxu0 %v12193_v37  ;;  %8281 = vmatprep.subr.bf16.mxu1 %v12196_v58  ;;  %v12218_v14 = vld [vmem:[%s16979_s12 + $0x588] ss:$28 sps:$4 sm:$0xff]   ;;  %v12223_v37 = vld [vmem:[%s16979_s12 + $0x1d4] ss:$28 sps:$4 sm:$0xff]  }
 0x6b5   :  { %7861 = vmatmul.mubr.bf16.gmra.mxu0 %v15808_v20  ;;  %8022 = vmatmul.mubr.bf16.gmra.mxu1 %v15810_v50  ;;  %v12226_v58 = vld [vmem:[%s16979_s12 + $0x554] ss:$28 sps:$4 sm:$0xff]  }
 0x6b6   :  { %7870 = vmatprep.mubr.bf16.mxu0 %v15842_v32  ;;  %8031 = vmatprep.mubr.bf16.mxu1 %v15844_v6 }
 0x6b7   :  { %8121 = vmatpush2.bf16.msra.mxu0 %v12191_v1  ;;  %8282 = vmatpush2.bf16.msra.mxu1 %v12194_v53  ;;  %v12221_v1 = vld [vmem:[%s16979_s12 + $0x1d0] ss:$28 sps:$4 sm:$0xff]  }
 0x6b8   :  { %8122 = vmatprep.subr.bf16.mxu0 %v12199_v31  ;;  %8283 = vmatprep.subr.bf16.mxu1 %v12202_v16  ;;  %v12224_v53 = vld [vmem:[%s16979_s12 + $0x550] ss:$28 sps:$4 sm:$0xff]   ;;  %v12227_v31 = vld [vmem:[%s16979_s12 + $0x360] ss:$28 sps:$4 sm:$0xff]  }
 0x6b9   :  { %v12229_v16 = vld [vmem:[%s16979_s12 + $0x6e0] ss:$28 sps:$4 sm:$0xff]  }
 0x6bb   :  { %8123 = vmatpush2.bf16.msra.mxu0 %v12197_v18  ;;  %8284 = vmatpush2.bf16.msra.mxu1 %v12200_v7  ;;  %v17141_v18 = vld [vmem:[#allocation26_spill] sm:$0xff]  ;;  %v17142_v7 = vld [vmem:[#allocation27_spill] sm:$0xff] }
 0x6bc   :  { %8124 = vmatprep.subr.bf16.mxu0 %v12205_v47  ;;  %8285 = vmatprep.subr.bf16.mxu1 %v12208_v62  ;;  %v17143_v47 = vld [vmem:[#allocation29_spill] sm:$0xff]  ;;  %v17144_v62 = vld [vmem:[#allocation30_spill] sm:$0xff] }
 0x6bd   :  { %7871 = vmatmul.mubr.bf16.gmra.mxu0 %v15852_v8  ;;  %8032 = vmatmul.mubr.bf16.gmra.mxu1 %v15854_v38 }
 0x6be   :  { %7880 = vmatprep.mubr.bf16.mxu0 %v15886_v56  ;;  %8041 = vmatprep.mubr.bf16.mxu1 %v15888_v25 }
 0x6bf   :  { %8125 = vmatpush2.bf16.msra.mxu0 %v12203_v19  ;;  %8286 = vmatpush2.bf16.msra.mxu1 %v12206_v54  ;;  %v17145_v19 = vld [vmem:[#allocation31_spill] sm:$0xff] }
 0x6c0   :  { %8126 = vmatprep.subr.bf16.mxu0 %v12211_v17  ;;  %8287 = vmatprep.subr.bf16.mxu1 %v12214_v44  ;;  %v17146_v54 = vld [vmem:[#allocation15_spill] sm:$0xff]  ;;  %v17147_v17 = vld [vmem:[#allocation16_spill] sm:$0xff]  ;;  %v17148_v44 = vld [vmem:[#allocation17_spill] sm:$0xff] }
 0x6c3   :  { %8127 = vmatpush2.bf16.msra.mxu0 %v12209_v48  ;;  %8288 = vmatpush2.bf16.msra.mxu1 %v12212_v5  ;;  %v6267_v48 = vld [vmem:[%s16980_s13] sm:$0xff]  ;;  %v17149_v5 = vld [vmem:[#allocation9_spill] sm:$0xff] }
 0x6c4   :  { %8128 = vmatprep.subr.bf16.mxu0 %v12217_v23  ;;  %8289 = vmatprep.subr.bf16.mxu1 %v12220_v15  ;;  %v16263_v23 = vrot.slane %v6267_v48, %v17149_v5  ;;  %v17150_v15 = vld [vmem:[#allocation10_spill] sm:$0xff] }
 0x6c5   :  { %7881 = vmatmul.mubr.bf16.gmra.mxu0 %v15896_v33  ;;  %8042 = vmatmul.mubr.bf16.gmra.mxu1 %v15898_v30 }
 0x6c6   :  { %7890 = vmatprep.mubr.bf16.mxu0 %v15930_v0  ;;  %8051 = vmatprep.mubr.bf16.mxu1 %v15932_v21 }
 0x6c7   :  { %8129 = vmatpush2.bf16.msra.mxu0 %v12215_v57  ;;  %8290 = vmatpush2.bf16.msra.mxu1 %v12218_v14  ;;  %v16266_v57 = vrot.slane %v6267_v48, %v17150_v15 }
 0x6c8   :  { %8130 = vmatprep.subr.bf16.mxu0 %v12223_v37  ;;  %8291 = vmatprep.subr.bf16.mxu1 %v12226_v58 }
 0x6cb   :  { %8131 = vmatpush2.bf16.msra.mxu0 %v12221_v1  ;;  %8292 = vmatpush2.bf16.msra.mxu1 %v12224_v53 }
 0x6cc   :  { %11060 = vmatprep.subr.bf16.mxu0 %v12227_v31  ;;  %11154 = vmatprep.subr.bf16.mxu1 %v12229_v16 }
 0x6cd   :  { %7891 = vmatmul.mubr.bf16.gmra.mxu0 %v15937_v4  ;;  %8052 = vmatmul.mubr.bf16.gmra.mxu1 %v17141_v18 }
 0x6ce   :  { %7900 = vmatprep.mubr.bf16.mxu0 %v17142_v7  ;;  %8061 = vmatprep.mubr.bf16.mxu1 %v17143_v47 }
 0x6d5   :  { %7901 = vmatmul.mubr.bf16.gmra.mxu0 %v17144_v62  ;;  %8062 = vmatmul.mubr.bf16.gmra.mxu1 %v17145_v19 }
 0x6d6   :  { %7910 = vmatprep.mubr.bf16.mxu0 %v17146_v54  ;;  %8071 = vmatprep.mubr.bf16.mxu1 %v17147_v17 }
 0x6dd   :  { %7911 = vmatmul.mubr.bf16.gmra.mxu0 %v17148_v44  ;;  %8072 = vmatmul.mubr.bf16.gmra.mxu1 %v15979_v52 }
 0x6de   :  { %7920 = vmatprep.mubr.bf16.mxu0 %v15993_v60  ;;  %8081 = vmatprep.mubr.bf16.mxu1 %v15995_v35 }
 0x6e5   :  { %v7490_v14 = vpop.f32.mrf.mxu0  ;;  %v7651_v37 = vpop.f32.mrf.mxu1  ;;  %7921 = vmatmul.mubr.bf16.gmra.mxu0 %v15999_v61  ;;  %8082 = vmatmul.mubr.bf16.gmra.mxu1 %v16001_v22 }
 0x6e6   :  { %v7491_v58 = vadd.f32 %v7490_v14, %v16263_v23  ;;  %7930 = vmatprep.mubr.bf16.mxu0 %v16009_v2  ;;  %8091 = vmatprep.mubr.bf16.mxu1 %v16011_v41 }
 0x6e7   :  { %v7492_v1 = vpop.f32.mrf.mxu0  ;;  %v7653_v53 = vpop.f32.mrf.mxu1 }
 0x6e8   :  { %v7652_v31 = vadd.f32 %v7651_v37, %v7491_v58  ;;  %v7493_v16 = vadd.f32 %v7492_v1, %v16266_v57 }
 0x6e9   :  { %v7494_v5 = vpop.f32.mrf.mxu0  ;;  %v7655_v48 = vpop.f32.mrf.mxu1 }
 0x6ea   :  { %v8694_v15 = vmul.f32 0.5, %v7652_v31  ;;  %v7654_v35 = vadd.f32 %v7653_v53, %v7493_v16  ;;  %v7495_v60 = vadd.f32 %v7494_v5, %v16263_v23 }
 0x6eb   :  { %v7496_v61 = vpop.f32.mrf.mxu0  ;;  %v7657_v52 = vpop.f32.mrf.mxu1 }
 0x6ec   :  { %12309 = vtanh.f32 %v8694_v15  ;;  %v8695_v22 = vmul.f32 0.5, %v7654_v35  ;;  %v7656_v14 = vadd.f32 %v7655_v48, %v7495_v60  ;;  %v7497_v2 = vadd.f32 %v7496_v61, %v16266_v57  ;;  %v12228_v15 = vld [vmem:[%s16979_s12 + $0x1a0] ss:$28 sps:$4 sm:$0xff]  }
 0x6ed   :  { %v7500_v44 = vpop.f32.mrf.mxu0  ;;  %v7661_v41 = vpop.f32.mrf.mxu1  ;;  %7931 = vmatmul.mubr.bf16.gmra.mxu0 %v16015_v34  ;;  %8092 = vmatmul.mubr.bf16.gmra.mxu1 %v16017_v9 }
 0x6ee   :  { %12311 = vtanh.f32 %v8695_v22  ;;  %v8701_v37 = vmul.f32 0.5, %v7656_v14  ;;  %v7658_v58 = vadd.f32 %v7657_v52, %v7497_v2  ;;  %v7501_v1 = vadd.f32 %v7500_v44, %v16263_v23  ;;  %8132 = vmatprep.mubr.bf16.mxu0 %v15581_v13  ;;  %8293 = vmatprep.mubr.bf16.mxu1 %v15583_v45  ;;  %v12230_v14 = vld [vmem:[%s16979_s12 + $0x520] ss:$28 sps:$4 sm:$0xff]  }
 0x6ef   :  { %v7502_v53 = vpop.f32.mrf.mxu0  ;;  %v7663_v35 = vpop.f32.mrf.mxu1 }
 0x6f0   :  { %12313 = vtanh.f32 %v8701_v37  ;;  %v8702_v60 = vmul.f32 0.5, %v7658_v58  ;;  %v7662_v61 = vadd.f32 %v7661_v41, %v7501_v1  ;;  %v7503_v31 = vadd.f32 %v7502_v53, %v16266_v57  ;;  %v12231_v1 = vld [vmem:[%s16979_s12 + $0x328] ss:$28 sps:$4 sm:$0xff]  }
 0x6f1   :  { %v7504_v16 = vpop.f32.mrf.mxu0  ;;  %v7665_v5 = vpop.f32.mrf.mxu1  ;;  %v12233_v53 = vld [vmem:[%s16979_s12 + $0x6a8] ss:$28 sps:$4 sm:$0xff]  }
 0x6f2   :  { %12315 = vtanh.f32 %v8702_v60  ;;  %v8708_v48 = vmul.f32 0.5, %v7662_v61  ;;  %v7664_v22 = vadd.f32 %v7663_v35, %v7503_v31  ;;  %v7505_v52 = vadd.f32 %v7504_v16, %v16263_v23 }
 0x6f3   :  { %v7506_v2 = vpop.f32.mrf.mxu0  ;;  %v7667_v44 = vpop.f32.mrf.mxu1 }
 0x6f4   :  { %12317 = vtanh.f32 %v8708_v48  ;;  %v8709_v41 = vmul.f32 0.5, %v7664_v22  ;;  %v7666_v37 = vadd.f32 %v7665_v5, %v7505_v52  ;;  %v7507_v58 = vadd.f32 %v7506_v2, %v16266_v57  ;;  %v12232_v22 = vld [vmem:[%s16979_s12 + $0x168] ss:$28 sps:$4 sm:$0xff]  }
 0x6f5   :  { %v7510_v35 = vpop.f32.mrf.mxu0  ;;  %v7671_v60 = vpop.f32.mrf.mxu1  ;;  %8133 = vmatmul.mubr.bf16.vlgmr.msra.gmra.mxu0 %v15591_v27  ;;  %8294 = vmatmul.mubr.bf16.vlgmr.msra.gmra.mxu1 %v15593_v43  ;;  %v12234_v52 = vld [vmem:[%s16979_s12 + $0x4e8] ss:$28 sps:$4 sm:$0xff]  }
 0x6f6   :  { %12319 = vtanh.f32 %v8709_v41  ;;  %v8715_v61 = vmul.f32 0.5, %v7666_v37  ;;  %v7668_v31 = vadd.f32 %v7667_v44, %v7507_v58  ;;  %v7511_v16 = vadd.f32 %v7510_v35, %v16263_v23  ;;  %8142 = vmatprep.mubr.bf16.mxu0 %v15622_v42  ;;  %8303 = vmatprep.mubr.bf16.mxu1 %v15624_v36  ;;  %v12238_v42 = vld [vmem:[%s16979_s12 + $0x4b0] ss:$28 sps:$4 sm:$0xff]  }
 0x6f7   :  { %11061 = vmatpush3.bf16.msra.mxu0 %v12228_v15  ;;  %v7512_v5 = vpop.f32.mrf.mxu0  ;;  %v7673_v48 = vpop.f32.mrf.mxu1  ;;  %11155 = vmatpush3.bf16.msra.mxu1 %v12230_v14  ;;  %v12235_v15 = vld [vmem:[%s16979_s12 + $0x2f0] ss:$28 sps:$4 sm:$0xff]  }
 0x6f8   :  { %12321 = vtanh.f32 %v8715_v61  ;;  %v8716_v2 = vmul.f32 0.5, %v7668_v31  ;;  %v7672_v44 = vadd.f32 %v7671_v60, %v7511_v16  ;;  %v7513_v41 = vadd.f32 %v7512_v5, %v16266_v57  ;;  %11062 = vmatprep.subr.bf16.mxu0 %v12231_v1  ;;  %11156 = vmatprep.subr.bf16.mxu1 %v12233_v53  ;;  %v12237_v14 = vld [vmem:[%s16979_s12 + $0x670] ss:$28 sps:$4 sm:$0xff]  }
 0x6f9   :  { %v12310_v37 = vpop.eup %12309  ;;  %v7514_v58 = vpop.f32.mrf.mxu0  ;;  %v12236_v5 = vld [vmem:[%s16979_s12 + $0x130] ss:$28 sps:$4 sm:$0xff]  }
 0x6fa   :  { %v7675_v35 = vpop.f32.mrf.mxu1  ;;  %v9044_v36 = vmul.f32 0.5, %v12310_v37  ;;  %12323 = vtanh.f32 %v8716_v2  ;;  %v8722_v61 = vmul.f32 0.5, %v7672_v44  ;;  %v7674_v31 = vadd.f32 %v7673_v48, %v7513_v41  ;;  %v12239_v48 = vld [vmem:[%s16979_s12 + $0x2b8] ss:$28 sps:$4 sm:$0xff]  }
 0x6fb   :  { %v12312_v60 = vpop.eup %12311  ;;  %v7515_v16 = vadd.f32 %v7514_v58, %v16263_v23  ;;  %v7516_v1 = vpop.f32.mrf.mxu0  ;;  %11063 = vmatpush3.bf16.msra.mxu0 %v12232_v22  ;;  %11157 = vmatpush3.bf16.msra.mxu1 %v12234_v52  ;;  %v12241_v22 = vld [vmem:[%s16979_s12 + $0x638] ss:$28 sps:$4 sm:$0xff]  }
 0x6fc   :  { %v7677_v53 = vpop.f32.mrf.mxu1  ;;  %v9045_v43 = vmul.f32 0.5, %v12312_v60  ;;  %12325 = vtanh.f32 %v8722_v61  ;;  %v8723_v2 = vmul.f32 0.5, %v7674_v31  ;;  %11064 = vmatprep.subr.bf16.mxu0 %v12235_v15  ;;  %11158 = vmatprep.subr.bf16.mxu1 %v12237_v14  ;;  %v9219_v44 = vadd.f32 0.5, %v9044_v36 }
 0x6fd   :  { %v12314_v52 = vpop.eup %12313  ;;  %v7676_v41 = vadd.f32 %v7675_v35, %v7515_v16  ;;  %v7517_v37 = vadd.f32 %v7516_v1, %v16266_v57  ;;  %v7520_v58 = vpop.f32.mrf.mxu0  ;;  %8143 = vmatmul.mubr.bf16.gmra.mxu0 %v15632_v49  ;;  %8304 = vmatmul.mubr.bf16.gmra.mxu1 %v15634_v40  ;;  %v12240_v1 = vld [vmem:[%s16979_s12 + $0xf8] ss:$28 sps:$4 sm:$0xff]  }
 0x6fe   :  { %v7681_v27 = vpop.f32.mrf.mxu1  ;;  %v9220_v15 = vadd.f32 0.5, %v9045_v43  ;;  %v9051_v14 = vmul.f32 0.5, %v12314_v52  ;;  %12327 = vtanh.f32 %v8723_v2  ;;  %v7521_v61 = vadd.f32 %v7520_v58, %v16263_v23  ;;  %8152 = vmatprep.mubr.bf16.mxu0 %v15666_v46  ;;  %8313 = vmatprep.mubr.bf16.mxu1 %v15668_v12  ;;  %v12242_v43 = vld [vmem:[%s16979_s12 + $0x478] ss:$28 sps:$4 sm:$0xff]  }
 0x6ff   :  { %v12316_v31 = vpop.eup %12315  ;;  %v8729_v36 = vmul.f32 0.5, %v7676_v41  ;;  %v7678_v35 = vadd.f32 %v7677_v53, %v7517_v37  ;;  %v7522_v60 = vpop.f32.mrf.mxu0  ;;  %11065 = vmatpush3.bf16.msra.mxu0 %v12236_v5  ;;  %11159 = vmatpush3.bf16.msra.mxu1 %v12238_v42  ;;  %v12243_v53 = vld [vmem:[%s16979_s12 + $0x280] ss:$28 sps:$4 sm:$0xff]  }
 0x700   :  { %v7683_v16 = vpop.f32.mrf.mxu1  ;;  %v10866_v2 = vpack.c.bf16 %v9220_v15, %v9219_v44  ;;  %v9052_v52 = vmul.f32 0.5, %v12316_v31  ;;  %v7682_v58 = vadd.f32 %v7681_v27, %v7521_v61  ;;  %11066 = vmatprep.subr.bf16.mxu0 %v12239_v48  ;;  %11160 = vmatprep.subr.bf16.mxu1 %v12241_v22  ;;  %v12245_v42 = vld [vmem:[%s16979_s12 + $0x600] ss:$28 sps:$4 sm:$0xff]   ;;  %v9226_v41 = vadd.f32 0.5, %v9051_v14 }
 0x701   :  { %v12318_v5 = vpop.eup %12317  ;;  %12329 = vtanh.f32 %v8729_v36  ;;  %v8730_v37 = vmul.f32 0.5, %v7678_v35  ;;  %v7523_v12 = vadd.f32 %v7522_v60, %v16266_v57  ;;  %v7524_v46 = vpop.f32.mrf.mxu0  ;;  %v12244_v36 = vld [vmem:[%s16979_s12 + $0xc0] ss:$28 sps:$4 sm:$0xff]  }
 0x702   :  { %v7685_v44 = vpop.f32.mrf.mxu1  ;;  %9951 = vst [vmem:[%s16981_s14] sm:$0xff] %v10866_v2  ;;  %v9227_v27 = vadd.f32 0.5, %v9052_v52  ;;  %v9058_v48 = vmul.f32 0.5, %v12318_v5  ;;  %v8736_v22 = vmul.f32 0.5, %v7682_v58  ;;  %v7525_v15 = vadd.f32 %v7524_v46, %v16263_v23  ;;  %v12246_v35 = vld [vmem:[%s16979_s12 + $0x440] ss:$28 sps:$4 sm:$0xff]  }
 0x703   :  { %v12320_v61 = vpop.eup %12319  ;;  %12331 = vtanh.f32 %v8730_v37  ;;  %v7684_v31 = vadd.f32 %v7683_v16, %v7523_v12  ;;  %v7526_v40 = vpop.f32.mrf.mxu0  ;;  %11067 = vmatpush3.bf16.msra.mxu0 %v12240_v1  ;;  %11161 = vmatpush3.bf16.msra.mxu1 %v12242_v43  ;;  %v12247_v46 = vld [vmem:[%s16979_s12 + $0x248] ss:$28 sps:$4 sm:$0xff]  }
 0x704   :  { %v7687_v14 = vpop.f32.mrf.mxu1  ;;  %v10870_v60 = vpack.c.bf16 %v9227_v27, %v9226_v41  ;;  %v9059_v2 = vmul.f32 0.5, %v12320_v61  ;;  %12333 = vtanh.f32 %v8736_v22  ;;  %11068 = vmatprep.subr.bf16.mxu0 %v12243_v53  ;;  %11162 = vmatprep.subr.bf16.mxu1 %v12245_v42  ;;  %v12249_v12 = vld [vmem:[%s16979_s12 + $0x5c8] ss:$28 sps:$4 sm:$0xff]   ;;  %v7686_v43 = vadd.f32 %v7685_v44, %v7525_v15 }
 0x705   :  { %v12322_v16 = vpop.eup %12321  ;;  %v8737_v1 = vmul.f32 0.5, %v7684_v31  ;;  %v7527_v52 = vadd.f32 %v7526_v40, %v16266_v57  ;;  %v7530_v58 = vpop.f32.mrf.mxu0  ;;  %8153 = vmatmul.mubr.bf16.gmra.mxu0 %v15676_v59  ;;  %8314 = vmatmul.mubr.bf16.gmra.mxu1 %v15678_v26  ;;  %v9233_v53 = vadd.f32 0.5, %v9058_v48  ;;  %v12248_v48 = vld [vmem:[%s16979_s12 + $0x88] ss:$28 sps:$4 sm:$0xff]  }
 0x706   :  { %v7691_v5 = vpop.f32.mrf.mxu1  ;;  %9955 = vst [vmem:[%s16981_s14 + $0x1c] sm:$0xff] %v10870_v60  ;;  %v9234_v42 = vadd.f32 0.5, %v9059_v2  ;;  %v9065_v41 = vmul.f32 0.5, %v12322_v16  ;;  %v7531_v37 = vadd.f32 %v7530_v58, %v16263_v23  ;;  %8162 = vmatprep.mubr.bf16.mxu0 %v15710_v3  ;;  %8323 = vmatprep.mubr.bf16.mxu1 %v15712_v11  ;;  %v8743_v44 = vmul.f32 0.5, %v7686_v43  ;;  %v12250_v61 = vld [vmem:[%s16979_s12 + $0x408] ss:$28 sps:$4 sm:$0xff]  }
 0x707   :  { %v12324_v40 = vpop.eup %12323  ;;  %12335 = vtanh.f32 %v8737_v1  ;;  %v7688_v27 = vadd.f32 %v7687_v14, %v7527_v52  ;;  %v7532_v22 = vpop.f32.mrf.mxu0  ;;  %11069 = vmatpush3.bf16.msra.mxu0 %v12244_v36  ;;  %11163 = vmatpush3.bf16.msra.mxu1 %v12246_v35  ;;  %v12251_v14 = vld [vmem:[%s16979_s12 + $0x210] ss:$28 sps:$4 sm:$0xff]  }
 0x708   :  { %v7693_v15 = vpop.f32.mrf.mxu1  ;;  %v10874_v31 = vpack.c.bf16 %v9234_v42, %v9233_v53  ;;  %v9066_v60 = vmul.f32 0.5, %v12324_v40  ;;  %v7692_v2 = vadd.f32 %v7691_v5, %v7531_v37  ;;  %11070 = vmatprep.subr.bf16.mxu0 %v12247_v46  ;;  %11164 = vmatprep.subr.bf16.mxu1 %v12249_v12  ;;  %v12253_v36 = vld [vmem:[%s16979_s12 + $0x590] ss:$28 sps:$4 sm:$0xff]   ;;  %v9240_v16 = vadd.f32 0.5, %v9065_v41 }
 0x709   :  { %v12326_v35 = vpop.eup %12325  ;;  %12337 = vtanh.f32 %v8743_v44  ;;  %v8744_v1 = vmul.f32 0.5, %v7688_v27  ;;  %v7533_v43 = vadd.f32 %v7532_v22, %v16266_v57  ;;  %v7534_v52 = vpop.f32.mrf.mxu0  ;;  %v12252_v44 = vld [vmem:[%s16979_s12 + $0x50] ss:$28 sps:$4 sm:$0xff]  }
 0x70a   :  { %v7695_v58 = vpop.f32.mrf.mxu1  ;;  %9959 = vst [vmem:[%s16981_s14 + $0x38] sm:$0xff] %v10874_v31  ;;  %v9241_v46 = vadd.f32 0.5, %v9066_v60  ;;  %v9072_v12 = vmul.f32 0.5, %v12326_v35  ;;  %v8750_v5 = vmul.f32 0.5, %v7692_v2  ;;  %v7535_v53 = vadd.f32 %v7534_v52, %v16263_v23  ;;  %v12254_v27 = vld [vmem:[%s16979_s12 + $0x3d0] ss:$28 sps:$4 sm:$0xff]  }
 0x70b   :  { %v12328_v42 = vpop.eup %12327  ;;  %12339 = vtanh.f32 %v8744_v1  ;;  %v7694_v37 = vadd.f32 %v7693_v15, %v7533_v43  ;;  %v7536_v40 = vpop.f32.mrf.mxu0  ;;  %11071 = vmatpush3.bf16.msra.mxu0 %v12248_v48  ;;  %11165 = vmatpush3.bf16.msra.mxu1 %v12250_v61  ;;  %v12255_v15 = vld [vmem:[%s16979_s12 + $0x1d8] ss:$28 sps:$4 sm:$0xff]  }
 0x70c   :  { %v7697_v41 = vpop.f32.mrf.mxu1  ;;  %v10878_v22 = vpack.c.bf16 %v9241_v46, %v9240_v16  ;;  %v9073_v31 = vmul.f32 0.5, %v12328_v42  ;;  %12341 = vtanh.f32 %v8750_v5  ;;  %11072 = vmatprep.subr.bf16.mxu0 %v12251_v14  ;;  %11166 = vmatprep.subr.bf16.mxu1 %v12253_v36  ;;  %v12257_v48 = vld [vmem:[%s16979_s12 + $0x558] ss:$28 sps:$4 sm:$0xff]   ;;  %v7696_v60 = vadd.f32 %v7695_v58, %v7535_v53 }
 0x70d   :  { %v8751_v61 = vmul.f32 0.5, %v7694_v37  ;;  %v7537_v2 = vadd.f32 %v7536_v40, %v16266_v57  ;;  %v7540_v35 = vpop.f32.mrf.mxu0  ;;  %8163 = vmatmul.mubr.bf16.gmra.mxu0 %v15720_v29  ;;  %8324 = vmatmul.mubr.bf16.gmra.mxu1 %v15722_v63  ;;  %v9247_v36 = vadd.f32 0.5, %v9072_v12  ;;  %v12256_v42 = vld [vmem:[%s16979_s12 + $0x18] ss:$28 sps:$4 sm:$0xff]  }
 0x70e   :  { %v7701_v1 = vpop.f32.mrf.mxu1  ;;  %v12330_v14 = vpop.eup %12329  ;;  %9963 = vst [vmem:[%s16981_s14 + $0x54] sm:$0xff] %v10878_v22  ;;  %v9248_v16 = vadd.f32 0.5, %v9073_v31  ;;  %v7541_v43 = vadd.f32 %v7540_v35, %v16263_v23  ;;  %8172 = vmatprep.mubr.bf16.mxu0 %v15754_v55  ;;  %8333 = vmatprep.mubr.bf16.mxu1 %v15756_v24  ;;  %v8757_v58 = vmul.f32 0.5, %v7696_v60  ;;  %v12258_v12 = vld [vmem:[%s16979_s12 + $0x398] ss:$28 sps:$4 sm:$0xff]  }
 0x70f   :  { %v9079_v52 = vmul.f32 0.5, %v12330_v14  ;;  %12343 = vtanh.f32 %v8751_v61  ;;  %v7698_v46 = vadd.f32 %v7697_v41, %v7537_v2  ;;  %v7542_v5 = vpop.f32.mrf.mxu0  ;;  %11073 = vmatpush3.bf16.msra.mxu0 %v12252_v44  ;;  %11167 = vmatpush3.bf16.msra.mxu1 %v12254_v27 }
 0x710   :  { %v7703_v53 = vpop.f32.mrf.mxu1  ;;  %v12332_v37 = vpop.eup %12331  ;;  %v10882_v40 = vpack.c.bf16 %v9248_v16, %v9247_v36  ;;  %v7702_v22 = vadd.f32 %v7701_v1, %v7541_v43  ;;  %v7543_v31 = vadd.f32 %v7542_v5, %v16266_v57  ;;  %11074 = vmatprep.subr.bf16.mxu0 %v12255_v15  ;;  %11168 = vmatprep.subr.bf16.mxu1 %v12257_v48  ;;  %12345 = vtanh.f32 %v8757_v58 }
 0x711   :  { %v12334_v41 = vpop.eup %12333  ;;  %v9080_v61 = vmul.f32 0.5, %v12332_v37  ;;  %v8758_v44 = vmul.f32 0.5, %v7698_v46  ;;  %v7544_v27 = vpop.f32.mrf.mxu0  ;;  %v9254_v36 = vadd.f32 0.5, %v9079_v52 }
 0x712   :  { %v7705_v60 = vpop.f32.mrf.mxu1  ;;  %9967 = vst [vmem:[%s16981_s14 + $0x70] sm:$0xff] %v10882_v40  ;;  %v8764_v2 = vmul.f32 0.5, %v7702_v22  ;;  %v7704_v35 = vadd.f32 %v7703_v53, %v7543_v31  ;;  %v7545_v14 = vadd.f32 %v7544_v27, %v16263_v23  ;;  %v9086_v16 = vmul.f32 0.5, %v12334_v41 }
 0x713   :  { %v9255_v1 = vadd.f32 0.5, %v9080_v61  ;;  %12347 = vtanh.f32 %v8758_v44  ;;  %v7546_v15 = vpop.f32.mrf.mxu0  ;;  %11075 = vmatpush3.bf16.msra.mxu0 %v12256_v42  ;;  %11169 = vmatpush3.bf16.msra.mxu1 %v12258_v12 }
 0x714   :  { %v7707_v48 = vpop.f32.mrf.mxu1  ;;  %v12336_v43 = vpop.eup %12335  ;;  %12349 = vtanh.f32 %v8764_v2  ;;  %v8765_v58 = vmul.f32 0.5, %v7704_v35  ;;  %v7706_v46 = vadd.f32 %v7705_v60, %v7545_v14  ;;  %v7547_v40 = vadd.f32 %v7546_v15, %v16266_v57 }
 0x715   :  { %v10886_v5 = vpack.c.bf16 %v9255_v1, %v9254_v36  ;;  %v9087_v37 = vmul.f32 0.5, %v12336_v43  ;;  %v7550_v22 = vpop.f32.mrf.mxu0  ;;  %8173 = vmatmul.mubr.bf16.gmra.mxu0 %v15764_v39  ;;  %8334 = vmatmul.mubr.bf16.gmra.mxu1 %v15766_v51  ;;  %v9261_v12 = vadd.f32 0.5, %v9086_v16 }
 0x716   :  { %v7711_v53 = vpop.f32.mrf.mxu1  ;;  %v12338_v52 = vpop.eup %12337  ;;  %12351 = vtanh.f32 %v8765_v58  ;;  %v8771_v31 = vmul.f32 0.5, %v7706_v46  ;;  %v7551_v42 = vadd.f32 %v7550_v22, %v16263_v23  ;;  %8182 = vmatprep.mubr.bf16.mxu0 %v15798_v28  ;;  %8343 = vmatprep.mubr.bf16.mxu1 %v15800_v10  ;;  %v7708_v44 = vadd.f32 %v7707_v48, %v7547_v40 }
 0x717   :  { %9971 = vst [vmem:[%s16981_s14 + $0x8c] sm:$0xff] %v10886_v5  ;;  %v9262_v41 = vadd.f32 0.5, %v9087_v37  ;;  %v9093_v61 = vmul.f32 0.5, %v12338_v52  ;;  %v7552_v27 = vpop.f32.mrf.mxu0 }
 0x718   :  { %v7713_v60 = vpop.f32.mrf.mxu1  ;;  %v12340_v2 = vpop.eup %12339  ;;  %12353 = vtanh.f32 %v8771_v31  ;;  %v7712_v35 = vadd.f32 %v7711_v53, %v7551_v42  ;;  %v7553_v14 = vadd.f32 %v7552_v27, %v16266_v57  ;;  %v8772_v43 = vmul.f32 0.5, %v7708_v44 }
 0x719   :  { %v12342_v36 = vpop.eup %12341  ;;  %v10890_v1 = vpack.c.bf16 %v9262_v41, %v9261_v12  ;;  %v9094_v15 = vmul.f32 0.5, %v12340_v2  ;;  %v7554_v58 = vpop.f32.mrf.mxu0  ;;  %v9268_v48 = vadd.f32 0.5, %v9093_v61 }
 0x71a   :  { %v7715_v46 = vpop.f32.mrf.mxu1  ;;  %v8778_v22 = vmul.f32 0.5, %v7712_v35  ;;  %v7714_v10 = vadd.f32 %v7713_v60, %v7553_v14  ;;  %v7555_v16 = vadd.f32 %v7554_v58, %v16263_v23  ;;  %v9100_v37 = vmul.f32 0.5, %v12342_v36 }
 0x71b   :  { %9975 = vst [vmem:[%s16981_s14 + $0xa8] sm:$0xff] %v10890_v1  ;;  %v9269_v5 = vadd.f32 0.5, %v9094_v15  ;;  %12355 = vtanh.f32 %v8772_v43  ;;  %v7556_v40 = vpop.f32.mrf.mxu0 }
 0x71c   :  { %v7717_v53 = vpop.f32.mrf.mxu1  ;;  %v12344_v52 = vpop.eup %12343  ;;  %12357 = vtanh.f32 %v8778_v22  ;;  %v8779_v31 = vmul.f32 0.5, %v7714_v10  ;;  %v7716_v42 = vadd.f32 %v7715_v46, %v7555_v16  ;;  %v7557_v44 = vadd.f32 %v7556_v40, %v16266_v57 }
 0x71d   :  { %v10894_v12 = vpack.c.bf16 %v9269_v5, %v9268_v48  ;;  %v9101_v41 = vmul.f32 0.5, %v12344_v52  ;;  %v7560_v27 = vpop.f32.mrf.mxu0  ;;  %8183 = vmatmul.mubr.bf16.gmra.mxu0 %v15808_v20  ;;  %8344 = vmatmul.mubr.bf16.gmra.mxu1 %v15810_v50  ;;  %v12346_v61 = vpop.eup %12345  ;;  %v9275_v10 = vadd.f32 0.5, %v9100_v37 }
 0x71e   :  { %v7721_v60 = vpop.f32.mrf.mxu1  ;;  %12359 = vtanh.f32 %v8779_v31  ;;  %v8785_v2 = vmul.f32 0.5, %v7716_v42  ;;  %v7561_v35 = vadd.f32 %v7560_v27, %v16263_v23  ;;  %8192 = vmatprep.mubr.bf16.mxu0 %v15842_v32  ;;  %8353 = vmatprep.mubr.bf16.mxu1 %v15844_v6  ;;  %v9107_v36 = vmul.f32 0.5, %v12346_v61 }
 0x71f   :  { %9979 = vst [vmem:[%s16981_s14 + $0xc4] sm:$0xff] %v10894_v12  ;;  %v9276_v14 = vadd.f32 0.5, %v9101_v41  ;;  %v7718_v1 = vadd.f32 %v7717_v53, %v7557_v44  ;;  %v7562_v15 = vpop.f32.mrf.mxu0 }
 0x720   :  { %v7723_v43 = vpop.f32.mrf.mxu1  ;;  %v12348_v58 = vpop.eup %12347  ;;  %12361 = vtanh.f32 %v8785_v2  ;;  %v7722_v46 = vadd.f32 %v7721_v60, %v7561_v35  ;;  %v7563_v22 = vadd.f32 %v7562_v15, %v16266_v57  ;;  %v9282_v53 = vadd.f32 0.5, %v9107_v36 }
 0x721   :  { %v12350_v16 = vpop.eup %12349  ;;  %v10898_v48 = vpack.c.bf16 %v9276_v14, %v9275_v10  ;;  %v9108_v5 = vmul.f32 0.5, %v12348_v58  ;;  %v8786_v40 = vmul.f32 0.5, %v7718_v1  ;;  %v7564_v52 = vpop.f32.mrf.mxu0 }
 0x722   :  { %v7725_v31 = vpop.f32.mrf.mxu1  ;;  %v9114_v42 = vmul.f32 0.5, %v12350_v16  ;;  %v8792_v27 = vmul.f32 0.5, %v7722_v46  ;;  %v7724_v12 = vadd.f32 %v7723_v43, %v7563_v22  ;;  %v7565_v37 = vadd.f32 %v7564_v52, %v16263_v23 }
 0x723   :  { %v12352_v41 = vpop.eup %12351  ;;  %9983 = vst [vmem:[%s16981_s14 + $0xe0] sm:$0xff] %v10898_v48  ;;  %v9283_v44 = vadd.f32 0.5, %v9108_v5  ;;  %12363 = vtanh.f32 %v8786_v40  ;;  %v7566_v60 = vpop.f32.mrf.mxu0 }
 0x724   :  { %v7727_v61 = vpop.f32.mrf.mxu1  ;;  %v9115_v2 = vmul.f32 0.5, %v12352_v41  ;;  %12365 = vtanh.f32 %v8792_v27  ;;  %v8793_v35 = vmul.f32 0.5, %v7724_v12  ;;  %v7726_v1 = vadd.f32 %v7725_v31, %v7565_v37 }
 0x725   :  { %v12354_v10 = vpop.eup %12353  ;;  %v10902_v14 = vpack.c.bf16 %v9283_v44, %v9282_v53  ;;  %v7567_v15 = vadd.f32 %v7566_v60, %v16266_v57  ;;  %v7570_v43 = vpop.f32.mrf.mxu0  ;;  %8193 = vmatmul.mubr.bf16.gmra.mxu0 %v15852_v8  ;;  %8354 = vmatmul.mubr.bf16.gmra.mxu1 %v15854_v38  ;;  %v9289_v46 = vadd.f32 0.5, %v9114_v42 }
 0x726   :  { %v7731_v58 = vpop.f32.mrf.mxu1  ;;  %v9290_v36 = vadd.f32 0.5, %v9115_v2  ;;  %12367 = vtanh.f32 %v8793_v35  ;;  %v7571_v22 = vadd.f32 %v7570_v43, %v16263_v23  ;;  %8202 = vmatprep.mubr.bf16.mxu0 %v15886_v56  ;;  %8363 = vmatprep.mubr.bf16.mxu1 %v15888_v25  ;;  %v9121_v16 = vmul.f32 0.5, %v12354_v10 }
 0x727   :  { %9987 = vst [vmem:[%s16981_s14 + $0xfc] sm:$0xff] %v10902_v14  ;;  %v8799_v48 = vmul.f32 0.5, %v7726_v1  ;;  %v7728_v5 = vadd.f32 %v7727_v61, %v7567_v15  ;;  %v7572_v40 = vpop.f32.mrf.mxu0 }
 0x728   :  { %v7733_v52 = vpop.f32.mrf.mxu1  ;;  %v12356_v31 = vpop.eup %12355  ;;  %v10906_v27 = vpack.c.bf16 %v9290_v36, %v9289_v46  ;;  %v7732_v42 = vadd.f32 %v7731_v58, %v7571_v22  ;;  %v7573_v12 = vadd.f32 %v7572_v40, %v16266_v57  ;;  %v9296_v1 = vadd.f32 0.5, %v9121_v16 }
 0x729   :  { %v12358_v37 = vpop.eup %12357  ;;  %v9122_v41 = vmul.f32 0.5, %v12356_v31  ;;  %12369 = vtanh.f32 %v8799_v48  ;;  %v8800_v53 = vmul.f32 0.5, %v7728_v5  ;;  %v7574_v44 = vpop.f32.mrf.mxu0 }
 0x72a   :  { %v7735_v60 = vpop.f32.mrf.mxu1  ;;  %9991 = vst [vmem:[%s16981_s14 + $0x118] sm:$0xff] %v10906_v27  ;;  %v9128_v2 = vmul.f32 0.5, %v12358_v37  ;;  %v8806_v35 = vmul.f32 0.5, %v7732_v42  ;;  %v7734_v61 = vadd.f32 %v7733_v52, %v7573_v12  ;;  %v7575_v10 = vadd.f32 %v7574_v44, %v16263_v23 }
 0x72b   :  { %v12360_v14 = vpop.eup %12359  ;;  %v9297_v15 = vadd.f32 0.5, %v9122_v41  ;;  %12371 = vtanh.f32 %v8800_v53  ;;  %v7576_v43 = vpop.f32.mrf.mxu0 }
 0x72c   :  { %v7737_v58 = vpop.f32.mrf.mxu1  ;;  %v9129_v46 = vmul.f32 0.5, %v12360_v14  ;;  %12373 = vtanh.f32 %v8806_v35  ;;  %v8807_v36 = vmul.f32 0.5, %v7734_v61  ;;  %v7736_v5 = vadd.f32 %v7735_v60, %v7575_v10 }
 0x72d   :  { %v12362_v22 = vpop.eup %12361  ;;  %v10910_v48 = vpack.c.bf16 %v9297_v15, %v9296_v1  ;;  %v7577_v40 = vadd.f32 %v7576_v43, %v16266_v57  ;;  %v7580_v31 = vpop.f32.mrf.mxu0  ;;  %8203 = vmatmul.mubr.bf16.gmra.mxu0 %v15896_v33  ;;  %8364 = vmatmul.mubr.bf16.gmra.mxu1 %v15898_v30  ;;  %v9303_v52 = vadd.f32 0.5, %v9128_v2 }
 0x72e   :  { %v7741_v27 = vpop.f32.mrf.mxu1  ;;  %v9304_v16 = vadd.f32 0.5, %v9129_v46  ;;  %12375 = vtanh.f32 %v8807_v36  ;;  %v7581_v42 = vadd.f32 %v7580_v31, %v16263_v23  ;;  %8212 = vmatprep.mubr.bf16.mxu0 %v15930_v0  ;;  %8373 = vmatprep.mubr.bf16.mxu1 %v15932_v21  ;;  %v9135_v12 = vmul.f32 0.5, %v12362_v22 }
 0x72f   :  { %9995 = vst [vmem:[%s16981_s14 + $0x134] sm:$0xff] %v10910_v48  ;;  %v8813_v37 = vmul.f32 0.5, %v7736_v5  ;;  %v7738_v41 = vadd.f32 %v7737_v58, %v7577_v40  ;;  %v7582_v53 = vpop.f32.mrf.mxu0 }
 0x730   :  { %v7743_v44 = vpop.f32.mrf.mxu1  ;;  %v12364_v60 = vpop.eup %12363  ;;  %v10914_v35 = vpack.c.bf16 %v9304_v16, %v9303_v52  ;;  %v7742_v2 = vadd.f32 %v7741_v27, %v7581_v42  ;;  %v7583_v61 = vadd.f32 %v7582_v53, %v16266_v57  ;;  %v9310_v5 = vadd.f32 0.5, %v9135_v12 }
 0x731   :  { %v12366_v10 = vpop.eup %12365  ;;  %v9136_v14 = vmul.f32 0.5, %v12364_v60  ;;  %12377 = vtanh.f32 %v8813_v37  ;;  %v8814_v1 = vmul.f32 0.5, %v7738_v41  ;;  %v7584_v15 = vpop.f32.mrf.mxu0 }
 0x732   :  { %v7745_v43 = vpop.f32.mrf.mxu1  ;;  %9999 = vst [vmem:[%s16981_s14 + $0x150] sm:$0xff] %v10914_v35  ;;  %v9142_v46 = vmul.f32 0.5, %v12366_v10  ;;  %v8820_v36 = vmul.f32 0.5, %v7742_v2  ;;  %v7744_v58 = vadd.f32 %v7743_v44, %v7583_v61  ;;  %v7585_v22 = vadd.f32 %v7584_v15, %v16263_v23 }
 0x733   :  { %v12368_v48 = vpop.eup %12367  ;;  %v9311_v40 = vadd.f32 0.5, %v9136_v14  ;;  %12379 = vtanh.f32 %v8814_v1  ;;  %v7586_v31 = vpop.f32.mrf.mxu0 }
 0x734   :  { %v7747_v27 = vpop.f32.mrf.mxu1  ;;  %v9143_v52 = vmul.f32 0.5, %v12368_v48  ;;  %12381 = vtanh.f32 %v8820_v36  ;;  %v8821_v16 = vmul.f32 0.5, %v7744_v58  ;;  %v7746_v37 = vadd.f32 %v7745_v43, %v7585_v22 }
 0x735   :  { %v10918_v42 = vpack.c.bf16 %v9311_v40, %v9310_v5  ;;  %v7587_v41 = vadd.f32 %v7586_v31, %v16266_v57  ;;  %v7590_v53 = vpop.f32.mrf.mxu0  ;;  %8213 = vmatmul.mubr.bf16.gmra.mxu0 %v15937_v4  ;;  %8374 = vmatmul.mubr.bf16.gmra.mxu1 %v17141_v18  ;;  %v9317_v35 = vadd.f32 0.5, %v9142_v46 }
 0x736   :  { %v7751_v60 = vpop.f32.mrf.mxu1  ;;  %v12370_v44 = vpop.eup %12369  ;;  %v9318_v12 = vadd.f32 0.5, %v9143_v52  ;;  %12383 = vtanh.f32 %v8821_v16  ;;  %v7591_v2 = vadd.f32 %v7590_v53, %v16263_v23  ;;  %8222 = vmatprep.mubr.bf16.mxu0 %v17142_v7  ;;  %8383 = vmatprep.mubr.bf16.mxu1 %v17143_v47  ;;  %v8827_v10 = vmul.f32 0.5, %v7746_v37 }
 0x737   :  { %10003 = vst [vmem:[%s16981_s14 + $0x16c] sm:$0xff] %v10918_v42  ;;  %v9149_v61 = vmul.f32 0.5, %v12370_v44  ;;  %v7748_v14 = vadd.f32 %v7747_v27, %v7587_v41  ;;  %v7592_v1 = vpop.f32.mrf.mxu0 }
 0x738   :  { %v7753_v15 = vpop.f32.mrf.mxu1  ;;  %v12372_v43 = vpop.eup %12371  ;;  %v10922_v36 = vpack.c.bf16 %v9318_v12, %v9317_v35  ;;  %v7752_v46 = vadd.f32 %v7751_v60, %v7591_v2  ;;  %v7593_v58 = vadd.f32 %v7592_v1, %v16266_v57  ;;  %12385 = vtanh.f32 %v8827_v10 }
 0x739   :  { %v12374_v22 = vpop.eup %12373  ;;  %v9150_v48 = vmul.f32 0.5, %v12372_v43  ;;  %v8828_v5 = vmul.f32 0.5, %v7748_v14  ;;  %v7594_v40 = vpop.f32.mrf.mxu0  ;;  %v9324_v41 = vadd.f32 0.5, %v9149_v61 }
 0x73a   :  { %v7755_v31 = vpop.f32.mrf.mxu1  ;;  %10007 = vst [vmem:[%s16981_s14 + $0x188] sm:$0xff] %v10922_v36  ;;  %v9156_v52 = vmul.f32 0.5, %v12374_v22  ;;  %v8834_v16 = vmul.f32 0.5, %v7752_v46  ;;  %v7754_v27 = vadd.f32 %v7753_v15, %v7593_v58  ;;  %v7595_v42 = vadd.f32 %v7594_v40, %v16263_v23 }
 0x73b   :  { %v12376_v37 = vpop.eup %12375  ;;  %v9325_v53 = vadd.f32 0.5, %v9150_v48  ;;  %12387 = vtanh.f32 %v8828_v5  ;;  %v7596_v60 = vpop.f32.mrf.mxu0 }
 0x73c   :  { %v7757_v44 = vpop.f32.mrf.mxu1  ;;  %v9157_v35 = vmul.f32 0.5, %v12376_v37  ;;  %12389 = vtanh.f32 %v8834_v16  ;;  %v8835_v12 = vmul.f32 0.5, %v7754_v27  ;;  %v7756_v10 = vadd.f32 %v7755_v31, %v7595_v42 }
 0x73d   :  { %v10926_v2 = vpack.c.bf16 %v9325_v53, %v9324_v41  ;;  %v7597_v14 = vadd.f32 %v7596_v60, %v16266_v57  ;;  %v7600_v1 = vpop.f32.mrf.mxu0  ;;  %8223 = vmatmul.mubr.bf16.gmra.mxu0 %v17144_v62  ;;  %8384 = vmatmul.mubr.bf16.gmra.mxu1 %v17145_v19  ;;  %v9331_v36 = vadd.f32 0.5, %v9156_v52 }
 0x73e   :  { %v7761_v43 = vpop.f32.mrf.mxu1  ;;  %v12378_v15 = vpop.eup %12377  ;;  %v9332_v61 = vadd.f32 0.5, %v9157_v35  ;;  %12391 = vtanh.f32 %v8835_v12  ;;  %v7601_v46 = vadd.f32 %v7600_v1, %v16263_v23  ;;  %8232 = vmatprep.mubr.bf16.mxu0 %v17146_v54  ;;  %8393 = vmatprep.mubr.bf16.mxu1 %v17147_v17  ;;  %v8841_v22 = vmul.f32 0.5, %v7756_v10 }
 0x73f   :  { %10011 = vst [vmem:[%s16981_s14 + $0x1a4] sm:$0xff] %v10926_v2  ;;  %v9163_v58 = vmul.f32 0.5, %v12378_v15  ;;  %v7758_v48 = vadd.f32 %v7757_v44, %v7597_v14  ;;  %v7602_v5 = vpop.f32.mrf.mxu0 }
 0x740   :  { %v7763_v40 = vpop.f32.mrf.mxu1  ;;  %v12380_v31 = vpop.eup %12379  ;;  %v10930_v16 = vpack.c.bf16 %v9332_v61, %v9331_v36  ;;  %v7762_v52 = vadd.f32 %v7761_v43, %v7601_v46  ;;  %v7603_v27 = vadd.f32 %v7602_v5, %v16266_v57  ;;  %12393 = vtanh.f32 %v8841_v22 }
 0x741   :  { %v12382_v42 = vpop.eup %12381  ;;  %v9164_v37 = vmul.f32 0.5, %v12380_v31  ;;  %v8842_v41 = vmul.f32 0.5, %v7758_v48  ;;  %v7604_v53 = vpop.f32.mrf.mxu0  ;;  %v9338_v14 = vadd.f32 0.5, %v9163_v58 }
 0x742   :  { %v7765_v60 = vpop.f32.mrf.mxu1  ;;  %10015 = vst [vmem:[%s16981_s14 + $0x1c0] sm:$0xff] %v10930_v16  ;;  %v9170_v35 = vmul.f32 0.5, %v12382_v42  ;;  %v8848_v12 = vmul.f32 0.5, %v7762_v52  ;;  %v7764_v44 = vadd.f32 %v7763_v40, %v7603_v27  ;;  %v7605_v2 = vadd.f32 %v7604_v53, %v16263_v23  ;;  %v17151_v16 = vld [vmem:[#allocation17_spill] sm:$0xff]  ;;  %v17152_v40 = vld [vmem:[#allocation11_spill] sm:$0xff] }
 0x743   :  { %v12384_v10 = vpop.eup %12383  ;;  %v9339_v1 = vadd.f32 0.5, %v9164_v37  ;;  %12395 = vtanh.f32 %v8842_v41  ;;  %v7606_v43 = vpop.f32.mrf.mxu0  ;;  %v17153_v37 = vld [vmem:[#allocation18_spill] sm:$0xff]  ;;  %v17154_v41 = vld [vmem:[#allocation12_spill] sm:$0xff] }
 0x744   :  { %v7767_v15 = vpop.f32.mrf.mxu1  ;;  %v9171_v36 = vmul.f32 0.5, %v12384_v10  ;;  %12397 = vtanh.f32 %v8848_v12  ;;  %v8849_v61 = vmul.f32 0.5, %v7764_v44  ;;  %v7766_v22 = vadd.f32 %v7765_v60, %v7605_v2 }
 0x745   :  { %v10934_v46 = vpack.c.bf16 %v9339_v1, %v9338_v14  ;;  %v7607_v48 = vadd.f32 %v7606_v43, %v16266_v57  ;;  %v7610_v5 = vpop.f32.mrf.mxu0  ;;  %8233 = vmatmul.mubr.bf16.gmra.mxu0 %v17151_v16  ;;  %8394 = vmatmul.mubr.bf16.gmra.mxu1 %v17152_v40  ;;  %v12386_v52 = vpop.eup %12385  ;;  %v9345_v27 = vadd.f32 0.5, %v9170_v35 }
 0x746   :  { %v7771_v31 = vpop.f32.mrf.mxu1  ;;  %v9346_v58 = vadd.f32 0.5, %v9171_v36  ;;  %12399 = vtanh.f32 %v8849_v61  ;;  %v7611_v42 = vadd.f32 %v7610_v5, %v16263_v23  ;;  %8242 = vmatprep.mubr.bf16.mxu0 %v17153_v37  ;;  %8403 = vmatprep.mubr.bf16.mxu1 %v17154_v41  ;;  %v9177_v53 = vmul.f32 0.5, %v12386_v52 }
 0x747   :  { %10019 = vst [vmem:[%s16981_s14 + $0x1dc] sm:$0xff] %v10934_v46  ;;  %v8855_v60 = vmul.f32 0.5, %v7766_v22  ;;  %v7768_v12 = vadd.f32 %v7767_v15, %v7607_v48  ;;  %v7612_v44 = vpop.f32.mrf.mxu0  ;;  %v12745_v48 = vld [vmem:[%s16980_s13] sm:$0xff] }
 0x748   :  { %v7773_v2 = vpop.f32.mrf.mxu1  ;;  %v12388_v10 = vpop.eup %12387  ;;  %v10938_v14 = vpack.c.bf16 %v9346_v58, %v9345_v27  ;;  %v7772_v35 = vadd.f32 %v7771_v31, %v7611_v42  ;;  %v7613_v1 = vadd.f32 %v7612_v44, %v16266_v57  ;;  %v17155_v31 = vld [vmem:[#allocation13_spill] sm:$0xff]  ;;  %v9352_v27 = vadd.f32 0.5, %v9177_v53 }
 0x749   :  { %v12390_v43 = vpop.eup %12389  ;;  %v9178_v23 = vmul.f32 0.5, %v12388_v10  ;;  %12401 = vtanh.f32 %v8855_v60  ;;  %v8856_v36 = vmul.f32 0.5, %v7768_v12  ;;  %v7614_v61 = vpop.f32.mrf.mxu0  ;;  %v16521_v52 = vrot.slane %v12745_v48, %v17155_v31  ;;  %v17156_v10 = vld [vmem:[#allocation14_spill] sm:$0xff] }
 0x74a   :  { %v7775_v5 = vpop.f32.mrf.mxu1  ;;  %10023 = vst [vmem:[%s16981_s14 + $0x1f8] sm:$0xff] %v10938_v14  ;;  %v9184_v46 = vmul.f32 0.5, %v12390_v43  ;;  %v8862_v22 = vmul.f32 0.5, %v7772_v35  ;;  %v7774_v15 = vadd.f32 %v7773_v2, %v7613_v1  ;;  %v16524_v14 = vrot.slane %v12745_v48, %v17156_v10  ;;  %v17157_v43 = vld [vmem:[#allocation32_spill] sm:$0xff]  ;;  %v17158_v61 = vld [vmem:[#allocation33_spill] sm:$0xff] }
 0x74b   :  { %v12392_v57 = vpop.eup %12391  ;;  %v9353_v58 = vadd.f32 0.5, %v9178_v23  ;;  %12403 = vtanh.f32 %v8856_v36  ;;  %v7615_v42 = vpop.f32.mrf.mxu0  ;;  %v17159_v36 = vld [vmem:[#allocation34_spill] sm:$0xff] }
 0x74c   :  { %v7776_v60 = vpop.f32.mrf.mxu1  ;;  %v9185_v12 = vmul.f32 0.5, %v12392_v57  ;;  %12405 = vtanh.f32 %v8862_v22  ;;  %v8863_v44 = vmul.f32 0.5, %v7774_v15  ;;  %v9359_v31 = vadd.f32 0.5, %v9184_v46  ;;  %v17160_v22 = vld [vmem:[#allocation35_spill] sm:$0xff] }
 0x74d   :  { %v10942_v2 = vpack.c.bf16 %v9353_v58, %v9352_v27  ;;  %v7812_v35 = vpop.f32.mrf.mxu0  ;;  %8243 = vmatmul.mubr.bf16.gmra.mxu0 %v17157_v43  ;;  %8404 = vmatmul.mubr.bf16.gmra.mxu1 %v17158_v61  ;;  %v12394_v5 = vpop.eup %12393 }
 0x74e   :  { %v7973_v1 = vpop.f32.mrf.mxu1  ;;  %v9360_v53 = vadd.f32 0.5, %v9185_v12  ;;  %12407 = vtanh.f32 %v8863_v44  ;;  %v7813_v23 = vadd.f32 %v7812_v35, %v16521_v52  ;;  %8252 = vmatprep.mubr.bf16.mxu0 %v17159_v36  ;;  %8413 = vmatprep.mubr.bf16.mxu1 %v17160_v22  ;;  %v9191_v15 = vmul.f32 0.5, %v12394_v5 }
 0x74f   :  { %10027 = vst [vmem:[%s16981_s14 + $0x214] sm:$0xff] %v10942_v2  ;;  %v7814_v48 = vpop.f32.mrf.mxu0 }
 0x750   :  { %v7975_v57 = vpop.f32.mrf.mxu1  ;;  %v12396_v27 = vpop.eup %12395  ;;  %v10946_v58 = vpack.c.bf16 %v9360_v53, %v9359_v31  ;;  %v7974_v42 = vadd.f32 %v7973_v1, %v7813_v23  ;;  %v7815_v46 = vadd.f32 %v7814_v48, %v16524_v14  ;;  %v9366_v61 = vadd.f32 0.5, %v9191_v15 }
 0x751   :  { %v12398_v60 = vpop.eup %12397  ;;  %v9192_v12 = vmul.f32 0.5, %v12396_v27  ;;  %v7816_v44 = vpop.f32.mrf.mxu0 }
 0x752   :  { %v7977_v10 = vpop.f32.mrf.mxu1  ;;  %10031 = vst [vmem:[%s16981_s14 + $0x230] sm:$0xff] %v10946_v58  ;;  %v9198_v35 = vmul.f32 0.5, %v12398_v60  ;;  %v8696_v22 = vmul.f32 0.5, %v7974_v42  ;;  %v7976_v36 = vadd.f32 %v7975_v57, %v7815_v46  ;;  %v7817_v2 = vadd.f32 %v7816_v44, %v16521_v52 }
 0x753   :  { %v12400_v5 = vpop.eup %12399  ;;  %v9367_v43 = vadd.f32 0.5, %v9192_v12  ;;  %v7818_v31 = vpop.f32.mrf.mxu0 }
 0x754   :  { %v7979_v1 = vpop.f32.mrf.mxu1  ;;  %v9199_v53 = vmul.f32 0.5, %v12400_v5  ;;  %12409 = vtanh.f32 %v8696_v22  ;;  %v8697_v23 = vmul.f32 0.5, %v7976_v36  ;;  %v7978_v27 = vadd.f32 %v7977_v10, %v7817_v2 }
 0x755   :  { %v10950_v48 = vpack.c.bf16 %v9367_v43, %v9366_v61  ;;  %v7819_v41 = vadd.f32 %v7818_v31, %v16524_v14  ;;  %v7822_v37 = vpop.f32.mrf.mxu0  ;;  %8253 = vmatmul.mubr.bf16.gmra.mxu0 %v16015_v34  ;;  %8414 = vmatmul.mubr.bf16.gmra.mxu1 %v16017_v9  ;;  %v9373_v58 = vadd.f32 0.5, %v9198_v35 }
 0x756   :  { %v7983_v40 = vpop.f32.mrf.mxu1  ;;  %v12402_v57 = vpop.eup %12401  ;;  %v9374_v42 = vadd.f32 0.5, %v9199_v53  ;;  %12411 = vtanh.f32 %v8697_v23  ;;  %v7823_v15 = vadd.f32 %v7822_v37, %v16521_v52  ;;  %8454 = vmatprep.mubr.bf16.mxu0 %v15581_v13  ;;  %8590 = vmatprep.mubr.bf16.mxu1 %v15583_v45  ;;  %v8703_v61 = vmul.f32 0.5, %v7978_v27 }
 0x757   :  { %10035 = vst [vmem:[%s16981_s14 + $0x24c] sm:$0xff] %v10950_v48  ;;  %v9205_v43 = vmul.f32 0.5, %v12402_v57  ;;  %v7980_v36 = vadd.f32 %v7979_v1, %v7819_v41  ;;  %v7824_v22 = vpop.f32.mrf.mxu0 }
 0x758   :  { %v7985_v46 = vpop.f32.mrf.mxu1  ;;  %v12404_v60 = vpop.eup %12403  ;;  %v10954_v12 = vpack.c.bf16 %v9374_v42, %v9373_v58  ;;  %v7984_v44 = vadd.f32 %v7983_v40, %v7823_v15  ;;  %v7825_v10 = vadd.f32 %v7824_v22, %v16524_v14  ;;  %12413 = vtanh.f32 %v8703_v61 }
 0x759   :  { %v12406_v35 = vpop.eup %12405  ;;  %v9206_v37 = vmul.f32 0.5, %v12404_v60  ;;  %v8704_v13 = vmul.f32 0.5, %v7980_v36  ;;  %v7826_v2 = vpop.f32.mrf.mxu0  ;;  %v9380_v23 = vadd.f32 0.5, %v9205_v43  ;;  %v17161_v60 = vld [vmem:[#allocation19_spill] sm:$0xff] }
 0x75a   :  { %v7987_v45 = vpop.f32.mrf.mxu1  ;;  %10039 = vst [vmem:[%s16981_s14 + $0x268] sm:$0xff] %v10954_v12  ;;  %v9212_v5 = vmul.f32 0.5, %v12406_v35  ;;  %v8710_v31 = vmul.f32 0.5, %v7984_v44  ;;  %v7986_v41 = vadd.f32 %v7985_v46, %v7825_v10  ;;  %v7827_v1 = vadd.f32 %v7826_v2, %v16521_v52  ;;  %v17162_v46 = vld [vmem:[#allocation20_spill] sm:$0xff]  ;;  %v17163_v10 = vld [vmem:[#allocation21_spill] sm:$0xff]  ;;  %v17164_v35 = vld [vmem:[#allocation22_spill] sm:$0xff] }
 0x75b   :  { %v12408_v53 = vpop.eup %12407  ;;  %v9381_v40 = vadd.f32 0.5, %v9206_v37  ;;  %12415 = vtanh.f32 %v8704_v13  ;;  %v7828_v48 = vpop.f32.mrf.mxu0 }
 0x75c   :  { %v7989_v27 = vpop.f32.mrf.mxu1  ;;  %v9213_v57 = vmul.f32 0.5, %v12408_v53  ;;  %12417 = vtanh.f32 %v8710_v31  ;;  %v8711_v58 = vmul.f32 0.5, %v7986_v41  ;;  %v7988_v15 = vadd.f32 %v7987_v45, %v7827_v1 }
 0x75d   :  { %v10958_v42 = vpack.c.bf16 %v9381_v40, %v9380_v23  ;;  %v7829_v61 = vadd.f32 %v7828_v48, %v16524_v14  ;;  %v7832_v36 = vpop.f32.mrf.mxu0  ;;  %8455 = vmatmul.mubr.bf16.vlgmr.msra.gmra.mxu0 %v17161_v60  ;;  %8591 = vmatmul.mubr.bf16.vlgmr.msra.gmra.mxu1 %v17162_v46  ;;  %v9387_v12 = vadd.f32 0.5, %v9212_v5 }
 0x75e   :  { %v7993_v22 = vpop.f32.mrf.mxu1  ;;  %v9388_v44 = vadd.f32 0.5, %v9213_v57  ;;  %12419 = vtanh.f32 %v8711_v58  ;;  %v7833_v43 = vadd.f32 %v7832_v36, %v16521_v52  ;;  %8462 = vmatprep.mubr.bf16.mxu0 %v17163_v10  ;;  %8598 = vmatprep.mubr.bf16.mxu1 %v17164_v35  ;;  %v8717_v37 = vmul.f32 0.5, %v7988_v15 }
 0x75f   :  { %10043 = vst [vmem:[%s16981_s14 + $0x284] sm:$0xff] %v10958_v42  ;;  %v7990_v13 = vadd.f32 %v7989_v27, %v7829_v61  ;;  %v7834_v2 = vpop.f32.mrf.mxu0 }
 0x760   :  { %v7995_v45 = vpop.f32.mrf.mxu1  ;;  %v10962_v31 = vpack.c.bf16 %v9388_v44, %v9387_v12  ;;  %v7994_v41 = vadd.f32 %v7993_v22, %v7833_v43  ;;  %v7835_v5 = vadd.f32 %v7834_v2, %v16524_v14  ;;  %12421 = vtanh.f32 %v8717_v37  ;;  %v17165_v43 = vld [vmem:[#allocation23_spill] sm:$0xff]  ;;  %v17166_v2 = vld [vmem:[#allocation24_spill] sm:$0xff] }
 0x761   :  { %v12410_v1 = vpop.eup %12409  ;;  %v8718_v53 = vmul.f32 0.5, %v7990_v13  ;;  %v7836_v23 = vpop.f32.mrf.mxu0 }
 0x762   :  { %v7997_v40 = vpop.f32.mrf.mxu1  ;;  %10047 = vst [vmem:[%s16981_s14 + $0x2a0] sm:$0xff] %v10962_v31  ;;  %v9046_v48 = vmul.f32 0.5, %v12410_v1  ;;  %v8724_v57 = vmul.f32 0.5, %v7994_v41  ;;  %v7996_v58 = vadd.f32 %v7995_v45, %v7835_v5  ;;  %v7837_v27 = vadd.f32 %v7836_v23, %v16521_v52  ;;  %v17167_v45 = vld [vmem:[#allocation25_spill] sm:$0xff] }
 0x763   :  { %v12412_v42 = vpop.eup %12411  ;;  %12423 = vtanh.f32 %v8718_v53  ;;  %v7838_v15 = vpop.f32.mrf.mxu0 }
 0x764   :  { %v7999_v61 = vpop.f32.mrf.mxu1  ;;  %v9047_v36 = vmul.f32 0.5, %v12412_v42  ;;  %12425 = vtanh.f32 %v8724_v57  ;;  %v8725_v22 = vmul.f32 0.5, %v7996_v58  ;;  %v7998_v60 = vadd.f32 %v7997_v40, %v7837_v27 }
 0x765   :  { %v7839_v46 = vadd.f32 %v7838_v15, %v16524_v14  ;;  %v7842_v12 = vpop.f32.mrf.mxu0  ;;  %8463 = vmatmul.mubr.bf16.gmra.mxu0 %v15632_v49  ;;  %8599 = vmatmul.mubr.bf16.gmra.mxu1 %v17165_v43  ;;  %v12414_v10 = vpop.eup %12413  ;;  %v9221_v35 = vadd.f32 0.5, %v9046_v48 }
 0x766   :  { %v8003_v44 = vpop.f32.mrf.mxu1  ;;  %v9222_v37 = vadd.f32 0.5, %v9047_v36  ;;  %12427 = vtanh.f32 %v8725_v22  ;;  %v7843_v13 = vadd.f32 %v7842_v12, %v16521_v52  ;;  %8470 = vmatprep.mubr.bf16.mxu0 %v17166_v2  ;;  %8606 = vmatprep.mubr.bf16.mxu1 %v17167_v45  ;;  %v9053_v31 = vmul.f32 0.5, %v12414_v10 }
 0x767   :  { %v8731_v41 = vmul.f32 0.5, %v7998_v60  ;;  %v8000_v5 = vadd.f32 %v7999_v61, %v7839_v46  ;;  %v7844_v1 = vpop.f32.mrf.mxu0 }
 0x768   :  { %v8005_v53 = vpop.f32.mrf.mxu1  ;;  %v12416_v23 = vpop.eup %12415  ;;  %v10867_v40 = vpack.c.bf16 %v9222_v37, %v9221_v35  ;;  %v8004_v49 = vadd.f32 %v8003_v44, %v7843_v13  ;;  %v7845_v57 = vadd.f32 %v7844_v1, %v16524_v14  ;;  %v9228_v12 = vadd.f32 0.5, %v9053_v31 }
 0x769   :  { %v12418_v58 = vpop.eup %12417  ;;  %v9054_v48 = vmul.f32 0.5, %v12416_v23  ;;  %12429 = vtanh.f32 %v8731_v41  ;;  %v8732_v27 = vmul.f32 0.5, %v8000_v5  ;;  %v7846_v42 = vpop.f32.mrf.mxu0 }
 0x76a   :  { %v8007_v15 = vpop.f32.mrf.mxu1  ;;  %9952 = vst [vmem:[%s16981_s14 + $0x8] sm:$0xff] %v10867_v40  ;;  %v9060_v36 = vmul.f32 0.5, %v12418_v58  ;;  %v8738_v22 = vmul.f32 0.5, %v8004_v49  ;;  %v8006_v61 = vadd.f32 %v8005_v53, %v7845_v57  ;;  %v7847_v60 = vadd.f32 %v7846_v42, %v16521_v52 }
 0x76b   :  { %v12420_v46 = vpop.eup %12419  ;;  %v9229_v44 = vadd.f32 0.5, %v9054_v48  ;;  %12431 = vtanh.f32 %v8732_v27  ;;  %v7848_v43 = vpop.f32.mrf.mxu0 }
 0x76c   :  { %v8009_v10 = vpop.f32.mrf.mxu1  ;;  %v9061_v35 = vmul.f32 0.5, %v12420_v46  ;;  %12433 = vtanh.f32 %v8738_v22  ;;  %v8739_v37 = vmul.f32 0.5, %v8006_v61  ;;  %v8008_v2 = vadd.f32 %v8007_v15, %v7847_v60 }
 0x76d   :  { %v10871_v13 = vpack.c.bf16 %v9229_v44, %v9228_v12  ;;  %v7849_v45 = vadd.f32 %v7848_v43, %v16524_v14  ;;  %v7852_v41 = vpop.f32.mrf.mxu0  ;;  %8471 = vmatmul.mubr.bf16.gmra.mxu0 %v15676_v59  ;;  %8607 = vmatmul.mubr.bf16.gmra.mxu1 %v15678_v26  ;;  %v12422_v1 = vpop.eup %12421  ;;  %v9235_v53 = vadd.f32 0.5, %v9060_v36 }
 0x76e   :  { %v8013_v5 = vpop.f32.mrf.mxu1  ;;  %v9236_v31 = vadd.f32 0.5, %v9061_v35  ;;  %12435 = vtanh.f32 %v8739_v37  ;;  %v7853_v23 = vadd.f32 %v7852_v41, %v16521_v52  ;;  %8478 = vmatprep.mubr.bf16.mxu0 %v15710_v3  ;;  %8614 = vmatprep.mubr.bf16.mxu1 %v15712_v11  ;;  %v9067_v40 = vmul.f32 0.5, %v12422_v1 }
 0x76f   :  { %9956 = vst [vmem:[%s16981_s14 + $0x24] sm:$0xff] %v10871_v13  ;;  %v8745_v49 = vmul.f32 0.5, %v8008_v2  ;;  %v8010_v57 = vadd.f32 %v8009_v10, %v7849_v45  ;;  %v7854_v59 = vpop.f32.mrf.mxu0 }
 0x770   :  { %v8015_v58 = vpop.f32.mrf.mxu1  ;;  %v12424_v26 = vpop.eup %12423  ;;  %v10875_v48 = vpack.c.bf16 %v9236_v31, %v9235_v53  ;;  %v8014_v27 = vadd.f32 %v8013_v5, %v7853_v23  ;;  %v7855_v42 = vadd.f32 %v7854_v59, %v16524_v14  ;;  %v9242_v43 = vadd.f32 0.5, %v9067_v40 }
 0x771   :  { %v12426_v15 = vpop.eup %12425  ;;  %v9068_v36 = vmul.f32 0.5, %v12424_v26  ;;  %12437 = vtanh.f32 %v8745_v49  ;;  %v8746_v3 = vmul.f32 0.5, %v8010_v57  ;;  %v7856_v22 = vpop.f32.mrf.mxu0 }
 0x772   :  { %v8017_v11 = vpop.f32.mrf.mxu1  ;;  %9960 = vst [vmem:[%s16981_s14 + $0x40] sm:$0xff] %v10875_v48  ;;  %v9074_v61 = vmul.f32 0.5, %v12426_v15  ;;  %v8752_v60 = vmul.f32 0.5, %v8014_v27  ;;  %v8016_v46 = vadd.f32 %v8015_v58, %v7855_v42  ;;  %v7857_v12 = vadd.f32 %v7856_v22, %v16521_v52 }
 0x773   :  { %v12428_v44 = vpop.eup %12427  ;;  %v9243_v10 = vadd.f32 0.5, %v9068_v36  ;;  %12439 = vtanh.f32 %v8746_v3  ;;  %v7858_v35 = vpop.f32.mrf.mxu0 }
 0x774   :  { %v8019_v37 = vpop.f32.mrf.mxu1  ;;  %v9075_v13 = vmul.f32 0.5, %v12428_v44  ;;  %12441 = vtanh.f32 %v8752_v60  ;;  %v8753_v2 = vmul.f32 0.5, %v8016_v46  ;;  %v8018_v41 = vadd.f32 %v8017_v11, %v7857_v12 }
 0x775   :  { %v10879_v45 = vpack.c.bf16 %v9243_v10, %v9242_v43  ;;  %v7859_v5 = vadd.f32 %v7858_v35, %v16524_v14  ;;  %v7862_v1 = vpop.f32.mrf.mxu0  ;;  %8479 = vmatmul.mubr.bf16.gmra.mxu0 %v15720_v29  ;;  %8615 = vmatmul.mubr.bf16.gmra.mxu1 %v15722_v63  ;;  %v9249_v23 = vadd.f32 0.5, %v9074_v61 }
 0x776   :  { %v8023_v53 = vpop.f32.mrf.mxu1  ;;  %v12430_v31 = vpop.eup %12429  ;;  %v9250_v40 = vadd.f32 0.5, %v9075_v13  ;;  %12443 = vtanh.f32 %v8753_v2  ;;  %v7863_v49 = vadd.f32 %v7862_v1, %v16521_v52  ;;  %8486 = vmatprep.mubr.bf16.mxu0 %v15754_v55  ;;  %8622 = vmatprep.mubr.bf16.mxu1 %v15756_v24  ;;  %v8759_v59 = vmul.f32 0.5, %v8018_v41 }
 0x777   :  { %9964 = vst [vmem:[%s16981_s14 + $0x5c] sm:$0xff] %v10879_v45  ;;  %v9081_v57 = vmul.f32 0.5, %v12430_v31  ;;  %v8020_v58 = vadd.f32 %v8019_v37, %v7859_v5  ;;  %v7864_v29 = vpop.f32.mrf.mxu0 }
 0x778   :  { %v8025_v26 = vpop.f32.mrf.mxu1  ;;  %v12432_v63 = vpop.eup %12431  ;;  %v10883_v48 = vpack.c.bf16 %v9250_v40, %v9249_v23  ;;  %v8024_v27 = vadd.f32 %v8023_v53, %v7863_v49  ;;  %v7865_v42 = vadd.f32 %v7864_v29, %v16524_v14  ;;  %12445 = vtanh.f32 %v8759_v59  ;;  %v17168_v40 = vld [vmem:[#allocation28_spill] sm:$0xff] }
 0x779   :  { %v12434_v15 = vpop.eup %12433  ;;  %v9082_v36 = vmul.f32 0.5, %v12432_v63  ;;  %v8760_v55 = vmul.f32 0.5, %v8020_v58  ;;  %v7866_v3 = vpop.f32.mrf.mxu0  ;;  %v9256_v12 = vadd.f32 0.5, %v9081_v57 }
 0x77a   :  { %v8027_v24 = vpop.f32.mrf.mxu1  ;;  %9968 = vst [vmem:[%s16981_s14 + $0x78] sm:$0xff] %v10883_v48  ;;  %v9088_v22 = vmul.f32 0.5, %v12434_v15  ;;  %v8766_v11 = vmul.f32 0.5, %v8024_v27  ;;  %v8026_v61 = vadd.f32 %v8025_v26, %v7865_v42  ;;  %v7867_v60 = vadd.f32 %v7866_v3, %v16521_v52 }
 0x77b   :  { %v12436_v46 = vpop.eup %12435  ;;  %v9257_v44 = vadd.f32 0.5, %v9082_v36  ;;  %12447 = vtanh.f32 %v8760_v55  ;;  %v7868_v43 = vpop.f32.mrf.mxu0 }
 0x77c   :  { %v8029_v10 = vpop.f32.mrf.mxu1  ;;  %v9089_v35 = vmul.f32 0.5, %v12436_v46  ;;  %12449 = vtanh.f32 %v8766_v11  ;;  %v8767_v37 = vmul.f32 0.5, %v8026_v61  ;;  %v8028_v2 = vadd.f32 %v8027_v24, %v7867_v60 }
 0x77d   :  { %v10887_v13 = vpack.c.bf16 %v9257_v44, %v9256_v12  ;;  %v7869_v45 = vadd.f32 %v7868_v43, %v16524_v14  ;;  %v7872_v41 = vpop.f32.mrf.mxu0  ;;  %8487 = vmatmul.mubr.bf16.gmra.mxu0 %v15764_v39  ;;  %8623 = vmatmul.mubr.bf16.gmra.mxu1 %v15766_v51  ;;  %v9263_v53 = vadd.f32 0.5, %v9088_v22 }
 0x77e   :  { %v8033_v5 = vpop.f32.mrf.mxu1  ;;  %v12438_v1 = vpop.eup %12437  ;;  %v9264_v31 = vadd.f32 0.5, %v9089_v35  ;;  %12451 = vtanh.f32 %v8767_v37  ;;  %v7873_v23 = vadd.f32 %v7872_v41, %v16521_v52  ;;  %8494 = vmatprep.mubr.bf16.mxu0 %v15798_v28  ;;  %8630 = vmatprep.mubr.bf16.mxu1 %v17168_v40  ;;  %v8773_v57 = vmul.f32 0.5, %v8028_v2 }
 0x77f   :  { %9972 = vst [vmem:[%s16981_s14 + $0x94] sm:$0xff] %v10887_v13  ;;  %v9095_v49 = vmul.f32 0.5, %v12438_v1  ;;  %v8030_v59 = vadd.f32 %v8029_v10, %v7869_v45  ;;  %v7874_v39 = vpop.f32.mrf.mxu0 }
 0x780   :  { %v8035_v58 = vpop.f32.mrf.mxu1  ;;  %v12440_v51 = vpop.eup %12439  ;;  %v10891_v29 = vpack.c.bf16 %v9264_v31, %v9263_v53  ;;  %v8034_v26 = vadd.f32 %v8033_v5, %v7873_v23  ;;  %v7875_v63 = vadd.f32 %v7874_v39, %v16524_v14  ;;  %12453 = vtanh.f32 %v8773_v57 }
 0x781   :  { %v12442_v48 = vpop.eup %12441  ;;  %v9096_v27 = vmul.f32 0.5, %v12440_v51  ;;  %v8774_v28 = vmul.f32 0.5, %v8030_v59  ;;  %v7876_v42 = vpop.f32.mrf.mxu0  ;;  %v9270_v11 = vadd.f32 0.5, %v9095_v49 }
 0x782   :  { %v8037_v15 = vpop.f32.mrf.mxu1  ;;  %9976 = vst [vmem:[%s16981_s14 + $0xb0] sm:$0xff] %v10891_v29  ;;  %v9102_v36 = vmul.f32 0.5, %v12442_v48  ;;  %v8780_v55 = vmul.f32 0.5, %v8034_v26  ;;  %v8036_v3 = vadd.f32 %v8035_v58, %v7875_v63  ;;  %v7877_v24 = vadd.f32 %v7876_v42, %v16521_v52 }
 0x783   :  { %v12444_v22 = vpop.eup %12443  ;;  %v9271_v61 = vadd.f32 0.5, %v9096_v27  ;;  %12455 = vtanh.f32 %v8774_v28  ;;  %v7878_v60 = vpop.f32.mrf.mxu0 }
 0x784   :  { %v8039_v46 = vpop.f32.mrf.mxu1  ;;  %v9103_v12 = vmul.f32 0.5, %v12444_v22  ;;  %12457 = vtanh.f32 %v8780_v55  ;;  %v8781_v44 = vmul.f32 0.5, %v8036_v3  ;;  %v8038_v10 = vadd.f32 %v8037_v15, %v7877_v24 }
 0x785   :  { %v10895_v43 = vpack.c.bf16 %v9271_v61, %v9270_v11  ;;  %v7879_v35 = vadd.f32 %v7878_v60, %v16524_v14  ;;  %v7882_v37 = vpop.f32.mrf.mxu0  ;;  %8495 = vmatmul.mubr.bf16.gmra.mxu0 %v15808_v20  ;;  %8631 = vmatmul.mubr.bf16.gmra.mxu1 %v15810_v50  ;;  %v12446_v2 = vpop.eup %12445  ;;  %v9277_v45 = vadd.f32 0.5, %v9102_v36 }
 0x786   :  { %v8043_v13 = vpop.f32.mrf.mxu1  ;;  %v9278_v41 = vadd.f32 0.5, %v9103_v12  ;;  %12459 = vtanh.f32 %v8781_v44  ;;  %v7883_v5 = vadd.f32 %v7882_v37, %v16521_v52  ;;  %8502 = vmatprep.mubr.bf16.mxu0 %v15842_v32  ;;  %8638 = vmatprep.mubr.bf16.mxu1 %v15844_v6  ;;  %v9109_v1 = vmul.f32 0.5, %v12446_v2 }
 0x787   :  { %9980 = vst [vmem:[%s16981_s14 + $0xcc] sm:$0xff] %v10895_v43  ;;  %v8787_v53 = vmul.f32 0.5, %v8038_v10  ;;  %v8040_v31 = vadd.f32 %v8039_v46, %v7879_v35  ;;  %v7884_v20 = vpop.f32.mrf.mxu0 }
 0x788   :  { %v8045_v23 = vpop.f32.mrf.mxu1  ;;  %v12448_v50 = vpop.eup %12447  ;;  %v10899_v40 = vpack.c.bf16 %v9278_v41, %v9277_v45  ;;  %v8044_v49 = vadd.f32 %v8043_v13, %v7883_v5  ;;  %v7885_v57 = vadd.f32 %v7884_v20, %v16524_v14  ;;  %v9284_v27 = vadd.f32 0.5, %v9109_v1 }
 0x789   :  { %v12450_v59 = vpop.eup %12449  ;;  %v9110_v39 = vmul.f32 0.5, %v12448_v50  ;;  %12461 = vtanh.f32 %v8787_v53  ;;  %v8788_v32 = vmul.f32 0.5, %v8040_v31  ;;  %v7886_v58 = vpop.f32.mrf.mxu0 }
 0x78a   :  { %v8047_v6 = vpop.f32.mrf.mxu1  ;;  %9984 = vst [vmem:[%s16981_s14 + $0xe8] sm:$0xff] %v10899_v40  ;;  %v9116_v51 = vmul.f32 0.5, %v12450_v59  ;;  %v8794_v29 = vmul.f32 0.5, %v8044_v49  ;;  %v8046_v26 = vadd.f32 %v8045_v23, %v7885_v57  ;;  %v7887_v63 = vadd.f32 %v7886_v58, %v16521_v52 }
 0x78b   :  { %v12452_v48 = vpop.eup %12451  ;;  %v9285_v28 = vadd.f32 0.5, %v9110_v39  ;;  %12463 = vtanh.f32 %v8788_v32  ;;  %v7888_v42 = vpop.f32.mrf.mxu0 }
 0x78c   :  { %v8049_v15 = vpop.f32.mrf.mxu1  ;;  %v9117_v36 = vmul.f32 0.5, %v12452_v48  ;;  %12465 = vtanh.f32 %v8794_v29  ;;  %v8795_v55 = vmul.f32 0.5, %v8046_v26  ;;  %v8048_v24 = vadd.f32 %v8047_v6, %v7887_v63 }
 0x78d   :  { %v10903_v3 = vpack.c.bf16 %v9285_v28, %v9284_v27  ;;  %v7889_v22 = vadd.f32 %v7888_v42, %v16524_v14  ;;  %v7892_v11 = vpop.f32.mrf.mxu0  ;;  %8503 = vmatmul.mubr.bf16.gmra.mxu0 %v15852_v8  ;;  %8639 = vmatmul.mubr.bf16.gmra.mxu1 %v15854_v38  ;;  %v12454_v60 = vpop.eup %12453  ;;  %v9291_v46 = vadd.f32 0.5, %v9116_v51 }
 0x78e   :  { %v8053_v61 = vpop.f32.mrf.mxu1  ;;  %v9292_v12 = vadd.f32 0.5, %v9117_v36  ;;  %12467 = vtanh.f32 %v8795_v55  ;;  %v7893_v44 = vadd.f32 %v7892_v11, %v16521_v52  ;;  %8510 = vmatprep.mubr.bf16.mxu0 %v15886_v56  ;;  %8646 = vmatprep.mubr.bf16.mxu1 %v15888_v25  ;;  %v9123_v43 = vmul.f32 0.5, %v12454_v60 }
 0x78f   :  { %9988 = vst [vmem:[%s16981_s14 + $0x104] sm:$0xff] %v10903_v3  ;;  %v8801_v10 = vmul.f32 0.5, %v8048_v24  ;;  %v8050_v35 = vadd.f32 %v8049_v15, %v7889_v22  ;;  %v7894_v8 = vpop.f32.mrf.mxu0 }
 0x790   :  { %v8055_v37 = vpop.f32.mrf.mxu1  ;;  %v12456_v38 = vpop.eup %12455  ;;  %v10907_v13 = vpack.c.bf16 %v9292_v12, %v9291_v46  ;;  %v8054_v2 = vadd.f32 %v8053_v61, %v7893_v44  ;;  %v7895_v45 = vadd.f32 %v7894_v8, %v16524_v14  ;;  %v9298_v40 = vadd.f32 0.5, %v9123_v43 }
 0x791   :  { %v12458_v41 = vpop.eup %12457  ;;  %v9124_v5 = vmul.f32 0.5, %v12456_v38  ;;  %12469 = vtanh.f32 %v8801_v10  ;;  %v8802_v56 = vmul.f32 0.5, %v8050_v35  ;;  %v7896_v1 = vpop.f32.mrf.mxu0 }
 0x792   :  { %v8057_v25 = vpop.f32.mrf.mxu1  ;;  %9992 = vst [vmem:[%s16981_s14 + $0x120] sm:$0xff] %v10907_v13  ;;  %v9130_v53 = vmul.f32 0.5, %v12458_v41  ;;  %v8808_v31 = vmul.f32 0.5, %v8054_v2  ;;  %v8056_v20 = vadd.f32 %v8055_v37, %v7895_v45  ;;  %v7897_v23 = vadd.f32 %v7896_v1, %v16521_v52 }
 0x793   :  { %v12460_v50 = vpop.eup %12459  ;;  %v9299_v49 = vadd.f32 0.5, %v9124_v5  ;;  %12471 = vtanh.f32 %v8802_v56  ;;  %v7898_v57 = vpop.f32.mrf.mxu0 }
 0x794   :  { %v8059_v59 = vpop.f32.mrf.mxu1  ;;  %v9131_v39 = vmul.f32 0.5, %v12460_v50  ;;  %12473 = vtanh.f32 %v8808_v31  ;;  %v8809_v32 = vmul.f32 0.5, %v8056_v20  ;;  %v8058_v6 = vadd.f32 %v8057_v25, %v7897_v23 }
 0x795   :  { %v10911_v58 = vpack.c.bf16 %v9299_v49, %v9298_v40  ;;  %v7899_v51 = vadd.f32 %v7898_v57, %v16524_v14  ;;  %v7902_v29 = vpop.f32.mrf.mxu0  ;;  %8511 = vmatmul.mubr.bf16.gmra.mxu0 %v15896_v33  ;;  %8647 = vmatmul.mubr.bf16.gmra.mxu1 %v15898_v30  ;;  %v9305_v48 = vadd.f32 0.5, %v9130_v53 }
 0x796   :  { %v8063_v26 = vpop.f32.mrf.mxu1  ;;  %v12462_v63 = vpop.eup %12461  ;;  %v9306_v27 = vadd.f32 0.5, %v9131_v39  ;;  %12475 = vtanh.f32 %v8809_v32  ;;  %v7903_v28 = vadd.f32 %v7902_v29, %v16521_v52  ;;  %8518 = vmatprep.mubr.bf16.mxu0 %v15930_v0  ;;  %8654 = vmatprep.mubr.bf16.mxu1 %v15932_v21  ;;  %v8815_v15 = vmul.f32 0.5, %v8058_v6 }
 0x797   :  { %9996 = vst [vmem:[%s16981_s14 + $0x13c] sm:$0xff] %v10911_v58  ;;  %v9137_v42 = vmul.f32 0.5, %v12462_v63  ;;  %v8060_v36 = vadd.f32 %v8059_v59, %v7899_v51  ;;  %v7904_v33 = vpop.f32.mrf.mxu0 }
 0x798   :  { %v8065_v55 = vpop.f32.mrf.mxu1  ;;  %v12464_v30 = vpop.eup %12463  ;;  %v10915_v3 = vpack.c.bf16 %v9306_v27, %v9305_v48  ;;  %v8064_v24 = vadd.f32 %v8063_v26, %v7903_v28  ;;  %v7905_v22 = vadd.f32 %v7904_v33, %v16524_v14  ;;  %12477 = vtanh.f32 %v8815_v15 }
 0x799   :  { %v12466_v11 = vpop.eup %12465  ;;  %v9138_v61 = vmul.f32 0.5, %v12464_v30  ;;  %v8816_v0 = vmul.f32 0.5, %v8060_v36  ;;  %v7906_v60 = vpop.f32.mrf.mxu0  ;;  %v9312_v35 = vadd.f32 0.5, %v9137_v42 }
 0x79a   :  { %v8067_v21 = vpop.f32.mrf.mxu1  ;;  %10000 = vst [vmem:[%s16981_s14 + $0x158] sm:$0xff] %v10915_v3  ;;  %v9144_v46 = vmul.f32 0.5, %v12466_v11  ;;  %v8822_v12 = vmul.f32 0.5, %v8064_v24  ;;  %v8066_v44 = vadd.f32 %v8065_v55, %v7905_v22  ;;  %v7907_v43 = vadd.f32 %v7906_v60, %v16521_v52 }
 0x79b   :  { %v12468_v10 = vpop.eup %12467  ;;  %v9313_v8 = vadd.f32 0.5, %v9138_v61  ;;  %12479 = vtanh.f32 %v8816_v0  ;;  %v7908_v37 = vpop.f32.mrf.mxu0 }
 0x79c   :  { %v8069_v38 = vpop.f32.mrf.mxu1  ;;  %v9145_v13 = vmul.f32 0.5, %v12468_v10  ;;  %12481 = vtanh.f32 %v8822_v12  ;;  %v8823_v2 = vmul.f32 0.5, %v8066_v44  ;;  %v8068_v41 = vadd.f32 %v8067_v21, %v7907_v43 }
 0x79d   :  { %v10919_v45 = vpack.c.bf16 %v9313_v8, %v9312_v35  ;;  %v7909_v5 = vadd.f32 %v7908_v37, %v16524_v14  ;;  %v7912_v56 = vpop.f32.mrf.mxu0  ;;  %8519 = vmatmul.mubr.bf16.gmra.mxu0 %v15937_v4  ;;  %8655 = vmatmul.mubr.bf16.gmra.mxu1 %v17141_v18  ;;  %v9319_v53 = vadd.f32 0.5, %v9144_v46 }
 0x79e   :  { %v8073_v1 = vpop.f32.mrf.mxu1  ;;  %v12470_v25 = vpop.eup %12469  ;;  %v9320_v31 = vadd.f32 0.5, %v9145_v13  ;;  %12483 = vtanh.f32 %v8823_v2  ;;  %v7913_v20 = vadd.f32 %v7912_v56, %v16521_v52  ;;  %8526 = vmatprep.mubr.bf16.mxu0 %v17142_v7  ;;  %8662 = vmatprep.mubr.bf16.mxu1 %v17143_v47  ;;  %v8829_v50 = vmul.f32 0.5, %v8068_v41 }
 0x79f   :  { %10004 = vst [vmem:[%s16981_s14 + $0x174] sm:$0xff] %v10919_v45  ;;  %v9151_v23 = vmul.f32 0.5, %v12470_v25  ;;  %v8070_v40 = vadd.f32 %v8069_v38, %v7909_v5  ;;  %v7914_v4 = vpop.f32.mrf.mxu0 }
 0x7a0   :  { %v8075_v49 = vpop.f32.mrf.mxu1  ;;  %v12472_v18 = vpop.eup %12471  ;;  %v10923_v57 = vpack.c.bf16 %v9320_v31, %v9319_v53  ;;  %v8074_v59 = vadd.f32 %v8073_v1, %v7913_v20  ;;  %v7915_v39 = vadd.f32 %v7914_v4, %v16524_v14  ;;  %12485 = vtanh.f32 %v8829_v50 }
 0x7a1   :  { %v12474_v32 = vpop.eup %12473  ;;  %v9152_v58 = vmul.f32 0.5, %v12472_v18  ;;  %v8830_v7 = vmul.f32 0.5, %v8070_v40  ;;  %v7916_v6 = vpop.f32.mrf.mxu0  ;;  %v9326_v27 = vadd.f32 0.5, %v9151_v23  ;;  %v17169_v18 = vld [vmem:[#allocation11_spill] sm:$0xff] }
 0x7a2   :  { %v8077_v47 = vpop.f32.mrf.mxu1  ;;  %10008 = vst [vmem:[%s16981_s14 + $0x190] sm:$0xff] %v10923_v57  ;;  %v9158_v51 = vmul.f32 0.5, %v12474_v32  ;;  %v8836_v29 = vmul.f32 0.5, %v8074_v59  ;;  %v8076_v26 = vadd.f32 %v8075_v49, %v7915_v39  ;;  %v7917_v63 = vadd.f32 %v7916_v6, %v16521_v52  ;;  %v17170_v57 = vld [vmem:[#allocation8_spill] sm:$0xff]  ;;  %v17171_v6 = vld [vmem:[#allocation18_spill] sm:$0xff] }
 0x7a3   :  { %v12476_v48 = vpop.eup %12475  ;;  %v9327_v28 = vadd.f32 0.5, %v9152_v58  ;;  %12487 = vtanh.f32 %v8830_v7  ;;  %v7918_v42 = vpop.f32.mrf.mxu0  ;;  %v6287_v59 = vsub.s32 4, %v17170_v57 }
 0x7a4   :  { %v8079_v15 = vpop.f32.mrf.mxu1  ;;  %v9159_v36 = vmul.f32 0.5, %v12476_v48  ;;  %12489 = vtanh.f32 %v8836_v29  ;;  %v8837_v33 = vmul.f32 0.5, %v8076_v26  ;;  %v8078_v30 = vadd.f32 %v8077_v47, %v7917_v63  ;;  %v17172_v47 = vld [vmem:[#allocation12_spill] sm:$0xff] }
 0x7a5   :  { %v10927_v55 = vpack.c.bf16 %v9327_v28, %v9326_v27  ;;  %v7919_v3 = vadd.f32 %v7918_v42, %v16524_v14  ;;  %v7922_v24 = vpop.f32.mrf.mxu0  ;;  %8527 = vmatmul.mubr.bf16.gmra.mxu0 %v17144_v62  ;;  %8663 = vmatmul.mubr.bf16.gmra.mxu1 %v17145_v19  ;;  %v12478_v11 = vpop.eup %12477  ;;  %v9333_v61 = vadd.f32 0.5, %v9158_v51 }
 0x7a6   :  { %v8083_v22 = vpop.f32.mrf.mxu1  ;;  %v9334_v0 = vadd.f32 0.5, %v9159_v36  ;;  %12491 = vtanh.f32 %v8837_v33  ;;  %v7923_v60 = vadd.f32 %v7922_v24, %v16521_v52  ;;  %8534 = vmatprep.mubr.bf16.mxu0 %v17146_v54  ;;  %8670 = vmatprep.mubr.bf16.mxu1 %v17147_v17  ;;  %v9165_v21 = vmul.f32 0.5, %v12478_v11  ;;  %v12746_v11 = vld [vmem:[%s16980_s13] sm:$0xff] }
 0x7a7   :  { %10012 = vst [vmem:[%s16981_s14 + $0x1ac] sm:$0xff] %v10927_v55  ;;  %v8843_v46 = vmul.f32 0.5, %v8078_v30  ;;  %v8080_v12 = vadd.f32 %v8079_v15, %v7919_v3  ;;  %v7924_v62 = vpop.f32.mrf.mxu0 }
 0x7a8   :  { %v8085_v44 = vpop.f32.mrf.mxu1  ;;  %v12480_v19 = vpop.eup %12479  ;;  %v10931_v43 = vpack.c.bf16 %v9334_v0, %v9333_v61  ;;  %v8084_v10 = vadd.f32 %v8083_v22, %v7923_v60  ;;  %v7925_v35 = vadd.f32 %v7924_v62, %v16524_v14  ;;  %v9340_v56 = vadd.f32 0.5, %v9165_v21 }
 0x7a9   :  { %v12482_v8 = vpop.eup %12481  ;;  %v9166_v37 = vmul.f32 0.5, %v12480_v19  ;;  %12493 = vtanh.f32 %v8843_v46  ;;  %v8844_v54 = vmul.f32 0.5, %v8080_v12  ;;  %v7926_v38 = vpop.f32.mrf.mxu0 }
 0x7aa   :  { %v8087_v17 = vpop.f32.mrf.mxu1  ;;  %10016 = vst [vmem:[%s16981_s14 + $0x1c8] sm:$0xff] %v10931_v43  ;;  %v9172_v13 = vmul.f32 0.5, %v12482_v8  ;;  %v8850_v2 = vmul.f32 0.5, %v8084_v10  ;;  %v8086_v45 = vadd.f32 %v8085_v44, %v7925_v35  ;;  %v7927_v41 = vadd.f32 %v7926_v38, %v16521_v52  ;;  %v17173_v35 = vld [vmem:[#allocation32_spill] sm:$0xff]  ;;  %v17174_v8 = vld [vmem:[#allocation33_spill] sm:$0xff] }
 0x7ab   :  { %v12484_v5 = vpop.eup %12483  ;;  %v9341_v1 = vadd.f32 0.5, %v9166_v37  ;;  %12495 = vtanh.f32 %v8844_v54  ;;  %v7928_v25 = vpop.f32.mrf.mxu0 }
 0x7ac   :  { %v8089_v53 = vpop.f32.mrf.mxu1  ;;  %v9173_v31 = vmul.f32 0.5, %v12484_v5  ;;  %12497 = vtanh.f32 %v8850_v2  ;;  %v8851_v20 = vmul.f32 0.5, %v8086_v45  ;;  %v8088_v50 = vadd.f32 %v8087_v17, %v7927_v41  ;;  %v17176_v2 = vld [vmem:[#allocation35_spill] sm:$0xff] }
 0x7ad   :  { %v10935_v23 = vpack.c.bf16 %v9341_v1, %v9340_v56  ;;  %v7929_v40 = vadd.f32 %v7928_v25, %v16524_v14  ;;  %v7932_v4 = vpop.f32.mrf.mxu0  ;;  %8535 = vmatmul.mubr.bf16.gmra.mxu0 %v17151_v16  ;;  %8671 = vmatmul.mubr.bf16.gmra.mxu1 %v17169_v18  ;;  %v12486_v39 = vpop.eup %12485  ;;  %v9347_v32 = vadd.f32 0.5, %v9172_v13  ;;  %v17175_v13 = vld [vmem:[#allocation34_spill] sm:$0xff] }
 0x7ae   :  { %v8093_v49 = vpop.f32.mrf.mxu1  ;;  %v9348_v58 = vadd.f32 0.5, %v9173_v31  ;;  %12499 = vtanh.f32 %v8851_v20  ;;  %v7933_v7 = vadd.f32 %v7932_v4, %v16521_v52  ;;  %8542 = vmatprep.mubr.bf16.mxu0 %v17171_v6  ;;  %8678 = vmatprep.mubr.bf16.mxu1 %v17172_v47  ;;  %v9179_v51 = vmul.f32 0.5, %v12486_v39 }
 0x7af   :  { %10020 = vst [vmem:[%s16981_s14 + $0x1e4] sm:$0xff] %v10935_v23  ;;  %v8857_v16 = vmul.f32 0.5, %v8088_v50  ;;  %v8090_v29 = vadd.f32 %v8089_v53, %v7929_v40  ;;  %v7934_v26 = vpop.f32.mrf.mxu0  ;;  %v6291_v52 = vsub.s32 5, %v17170_v57 }
 0x7b0   :  { %v8095_v63 = vpop.f32.mrf.mxu1  ;;  %v12488_v48 = vpop.eup %12487  ;;  %v10939_v27 = vpack.c.bf16 %v9348_v58, %v9347_v32  ;;  %v8094_v28 = vadd.f32 %v8093_v49, %v7933_v7  ;;  %v7935_v42 = vadd.f32 %v7934_v26, %v16524_v14  ;;  %v16708_v14 = vrot.slane %v12746_v11, %v6287_v59 }
 0x7b1   :  { %v12490_v15 = vpop.eup %12489  ;;  %v9180_v36 = vmul.f32 0.5, %v12488_v48  ;;  %12501 = vtanh.f32 %v8857_v16  ;;  %v8858_v33 = vmul.f32 0.5, %v8090_v29  ;;  %v7936_v55 = vpop.f32.mrf.mxu0  ;;  %v9354_v0 = vadd.f32 0.5, %v9179_v51 }
 0x7b2   :  { %v8097_v30 = vpop.f32.mrf.mxu1  ;;  %10024 = vst [vmem:[%s16981_s14 + $0x200] sm:$0xff] %v10939_v27  ;;  %v9186_v3 = vmul.f32 0.5, %v12490_v15  ;;  %v8864_v24 = vmul.f32 0.5, %v8094_v28  ;;  %v8096_v22 = vadd.f32 %v8095_v63, %v7935_v42  ;;  %v16710_v44 = vrot.slane %v12746_v11, %v6291_v52 }
 0x7b3   :  { %v12492_v61 = vpop.eup %12491  ;;  %v9355_v60 = vadd.f32 0.5, %v9180_v36  ;;  %12503 = vtanh.f32 %v8858_v33  ;;  %v7937_v21 = vpop.f32.mrf.mxu0 }
 0x7b4   :  { %v8098_v46 = vpop.f32.mrf.mxu1  ;;  %v9187_v12 = vmul.f32 0.5, %v12492_v61  ;;  %12505 = vtanh.f32 %v8864_v24  ;;  %v8865_v62 = vmul.f32 0.5, %v8096_v22  ;;  %v9361_v54 = vadd.f32 0.5, %v9186_v3 }
 0x7b5   :  { %v10943_v19 = vpack.c.bf16 %v9355_v60, %v9354_v0  ;;  %v8134_v43 = vpop.f32.mrf.mxu0  ;;  %8543 = vmatmul.mubr.bf16.gmra.mxu0 %v17173_v35  ;;  %8679 = vmatmul.mubr.bf16.gmra.mxu1 %v17174_v8 }
 0x7b6   :  { %v8295_v10 = vpop.f32.mrf.mxu1  ;;  %v12494_v37 = vpop.eup %12493  ;;  %v9362_v38 = vadd.f32 0.5, %v9187_v12  ;;  %12507 = vtanh.f32 %v8865_v62  ;;  %v8135_v17 = vadd.f32 %v8134_v43, %v16708_v14  ;;  %8550 = vmatprep.mubr.bf16.mxu0 %v17175_v13  ;;  %8686 = vmatprep.mubr.bf16.mxu1 %v17176_v2 }
 0x7b7   :  { %10028 = vst [vmem:[%s16981_s14 + $0x21c] sm:$0xff] %v10943_v19  ;;  %v9193_v45 = vmul.f32 0.5, %v12494_v37  ;;  %v8136_v41 = vpop.f32.mrf.mxu0 }
 0x7b8   :  { %v8297_v5 = vpop.f32.mrf.mxu1  ;;  %v12496_v56 = vpop.eup %12495  ;;  %v10947_v1 = vpack.c.bf16 %v9362_v38, %v9361_v54  ;;  %v8296_v25 = vadd.f32 %v8295_v10, %v8135_v17  ;;  %v8137_v53 = vadd.f32 %v8136_v41, %v16710_v44 }
 0x7b9   :  { %v12498_v31 = vpop.eup %12497  ;;  %v9194_v20 = vmul.f32 0.5, %v12496_v56  ;;  %v8138_v23 = vpop.f32.mrf.mxu0  ;;  %v9368_v39 = vadd.f32 0.5, %v9193_v45 }
 0x7ba   :  { %v8299_v50 = vpop.f32.mrf.mxu1  ;;  %10032 = vst [vmem:[%s16981_s14 + $0x238] sm:$0xff] %v10947_v1  ;;  %v9200_v40 = vmul.f32 0.5, %v12498_v31  ;;  %v8698_v4 = vmul.f32 0.5, %v8296_v25  ;;  %v8298_v49 = vadd.f32 %v8297_v5, %v8137_v53  ;;  %v8139_v18 = vadd.f32 %v8138_v23, %v16708_v14 }
 0x7bb   :  { %v12500_v59 = vpop.eup %12499  ;;  %v9369_v32 = vadd.f32 0.5, %v9194_v20  ;;  %v8140_v58 = vpop.f32.mrf.mxu0 }
 0x7bc   :  { %v8301_v7 = vpop.f32.mrf.mxu1  ;;  %v9201_v6 = vmul.f32 0.5, %v12500_v59  ;;  %12509 = vtanh.f32 %v8698_v4  ;;  %v8699_v47 = vmul.f32 0.5, %v8298_v49  ;;  %v8300_v16 = vadd.f32 %v8299_v50, %v8139_v18 }
 0x7bd   :  { %v10951_v51 = vpack.c.bf16 %v9369_v32, %v9368_v39  ;;  %v8141_v29 = vadd.f32 %v8140_v58, %v16710_v44  ;;  %v8144_v26 = vpop.f32.mrf.mxu0  ;;  %8551 = vmatmul.mubr.bf16.gmra.mxu0 %v16015_v34  ;;  %8687 = vmatmul.mubr.bf16.gmra.mxu1 %v16017_v9  ;;  %v9375_v27 = vadd.f32 0.5, %v9200_v40 }
 0x7be   :  { %v8305_v63 = vpop.f32.mrf.mxu1  ;;  %v12502_v48 = vpop.eup %12501  ;;  %v9376_v28 = vadd.f32 0.5, %v9201_v6  ;;  %12511 = vtanh.f32 %v8699_v47  ;;  %v8145_v42 = vadd.f32 %v8144_v26, %v16708_v14  ;;  %v8705_v15 = vmul.f32 0.5, %v8300_v16 }
 0x7bf   :  { %10036 = vst [vmem:[%s16981_s14 + $0x254] sm:$0xff] %v10951_v51  ;;  %v9207_v52 = vmul.f32 0.5, %v12502_v48  ;;  %v8302_v36 = vadd.f32 %v8301_v7, %v8141_v29  ;;  %v8146_v33 = vpop.f32.mrf.mxu0 }
 0x7c0   :  { %v8307_v55 = vpop.f32.mrf.mxu1  ;;  %v12504_v30 = vpop.eup %12503  ;;  %v10955_v3 = vpack.c.bf16 %v9376_v28, %v9375_v27  ;;  %v8306_v34 = vadd.f32 %v8305_v63, %v8145_v42  ;;  %v8147_v9 = vadd.f32 %v8146_v33, %v16710_v44  ;;  %12513 = vtanh.f32 %v8705_v15 }
 0x7c1   :  { %v12506_v24 = vpop.eup %12505  ;;  %v9208_v22 = vmul.f32 0.5, %v12504_v30  ;;  %v8706_v11 = vmul.f32 0.5, %v8302_v36  ;;  %v8148_v61 = vpop.f32.mrf.mxu0  ;;  %v9382_v19 = vadd.f32 0.5, %v9207_v52 }
 0x7c2   :  { %v8309_v0 = vpop.f32.mrf.mxu1  ;;  %10040 = vst [vmem:[%s16981_s14 + $0x270] sm:$0xff] %v10955_v3  ;;  %v9214_v60 = vmul.f32 0.5, %v12506_v24  ;;  %v8712_v21 = vmul.f32 0.5, %v8306_v34  ;;  %v8308_v46 = vadd.f32 %v8307_v55, %v8147_v9  ;;  %v8149_v12 = vadd.f32 %v8148_v61, %v16708_v14 }
 0x7c3   :  { %v12508_v62 = vpop.eup %12507  ;;  %v9383_v43 = vadd.f32 0.5, %v9208_v22  ;;  %12515 = vtanh.f32 %v8706_v11  ;;  %v8150_v10 = vpop.f32.mrf.mxu0 }
 0x7c4   :  { %v8311_v35 = vpop.f32.mrf.mxu1  ;;  %v9215_v8 = vmul.f32 0.5, %v12508_v62  ;;  %12517 = vtanh.f32 %v8712_v21  ;;  %v8713_v37 = vmul.f32 0.5, %v8308_v46  ;;  %v8310_v38 = vadd.f32 %v8309_v0, %v8149_v12 }
 0x7c5   :  { %v10959_v54 = vpack.c.bf16 %v9383_v43, %v9382_v19  ;;  %v8151_v17 = vadd.f32 %v8150_v10, %v16710_v44  ;;  %v8154_v13 = vpop.f32.mrf.mxu0  ;;  %v9389_v45 = vadd.f32 0.5, %v9214_v60 }
 0x7c6   :  { %v8315_v2 = vpop.f32.mrf.mxu1  ;;  %v9390_v41 = vadd.f32 0.5, %v9215_v8  ;;  %12519 = vtanh.f32 %v8713_v37  ;;  %v8155_v5 = vadd.f32 %v8154_v13, %v16708_v14  ;;  %v8719_v56 = vmul.f32 0.5, %v8310_v38 }
 0x7c7   :  { %10044 = vst [vmem:[%s16981_s14 + $0x28c] sm:$0xff] %v10959_v54  ;;  %v8312_v1 = vadd.f32 %v8311_v35, %v8151_v17  ;;  %v8156_v25 = vpop.f32.mrf.mxu0 }
 0x7c8   :  { %v8317_v53 = vpop.f32.mrf.mxu1  ;;  %v10963_v31 = vpack.c.bf16 %v9390_v41, %v9389_v45  ;;  %v8316_v20 = vadd.f32 %v8315_v2, %v8155_v5  ;;  %v8157_v23 = vadd.f32 %v8156_v25, %v16710_v44  ;;  %12521 = vtanh.f32 %v8719_v56 }
 0x7c9   :  { %v12510_v50 = vpop.eup %12509  ;;  %v8720_v40 = vmul.f32 0.5, %v8312_v1  ;;  %v8158_v4 = vpop.f32.mrf.mxu0 }
 0x7ca   :  { %v8319_v49 = vpop.f32.mrf.mxu1  ;;  %10048 = vst [vmem:[%s16981_s14 + $0x2a8] sm:$0xff] %v10963_v31  ;;  %v9048_v18 = vmul.f32 0.5, %v12510_v50  ;;  %v8726_v59 = vmul.f32 0.5, %v8316_v20  ;;  %v8318_v39 = vadd.f32 %v8317_v53, %v8157_v23  ;;  %v8159_v32 = vadd.f32 %v8158_v4, %v16708_v14 }
 0x7cb   :  { %v12512_v58 = vpop.eup %12511  ;;  %12523 = vtanh.f32 %v8720_v40  ;;  %v8160_v7 = vpop.f32.mrf.mxu0 }
 0x7cc   :  { %v8321_v6 = vpop.f32.mrf.mxu1  ;;  %v9049_v47 = vmul.f32 0.5, %v12512_v58  ;;  %12525 = vtanh.f32 %v8726_v59  ;;  %v8727_v51 = vmul.f32 0.5, %v8318_v39  ;;  %v8320_v16 = vadd.f32 %v8319_v49, %v8159_v32 }
 0x7cd   :  { %v8161_v29 = vadd.f32 %v8160_v7, %v16710_v44  ;;  %v8164_v26 = vpop.f32.mrf.mxu0  ;;  %v12514_v48 = vpop.eup %12513  ;;  %v9223_v27 = vadd.f32 0.5, %v9048_v18 }
 0x7ce   :  { %v8325_v63 = vpop.f32.mrf.mxu1  ;;  %v9224_v28 = vadd.f32 0.5, %v9049_v47  ;;  %12527 = vtanh.f32 %v8727_v51  ;;  %v8165_v42 = vadd.f32 %v8164_v26, %v16708_v14  ;;  %v9055_v52 = vmul.f32 0.5, %v12514_v48 }
 0x7cf   :  { %v8733_v15 = vmul.f32 0.5, %v8320_v16  ;;  %v8322_v36 = vadd.f32 %v8321_v6, %v8161_v29  ;;  %v8166_v33 = vpop.f32.mrf.mxu0 }
 0x7d0   :  { %v8327_v55 = vpop.f32.mrf.mxu1  ;;  %v12516_v30 = vpop.eup %12515  ;;  %v10868_v3 = vpack.c.bf16 %v9224_v28, %v9223_v27  ;;  %v8326_v34 = vadd.f32 %v8325_v63, %v8165_v42  ;;  %v8167_v9 = vadd.f32 %v8166_v33, %v16710_v44  ;;  %v9230_v19 = vadd.f32 0.5, %v9055_v52 }
 0x7d1   :  { %v12518_v24 = vpop.eup %12517  ;;  %v9056_v22 = vmul.f32 0.5, %v12516_v30  ;;  %12529 = vtanh.f32 %v8733_v15  ;;  %v8734_v11 = vmul.f32 0.5, %v8322_v36  ;;  %v8168_v61 = vpop.f32.mrf.mxu0 }
 0x7d2   :  { %v8329_v0 = vpop.f32.mrf.mxu1  ;;  %9953 = vst [vmem:[%s16981_s14 + $0x10] sm:$0xff] %v10868_v3  ;;  %v9062_v60 = vmul.f32 0.5, %v12518_v24  ;;  %v8740_v21 = vmul.f32 0.5, %v8326_v34  ;;  %v8328_v46 = vadd.f32 %v8327_v55, %v8167_v9  ;;  %v8169_v12 = vadd.f32 %v8168_v61, %v16708_v14 }
 0x7d3   :  { %v12520_v62 = vpop.eup %12519  ;;  %v9231_v43 = vadd.f32 0.5, %v9056_v22  ;;  %12531 = vtanh.f32 %v8734_v11  ;;  %v8170_v10 = vpop.f32.mrf.mxu0 }
 0x7d4   :  { %v8331_v35 = vpop.f32.mrf.mxu1  ;;  %v9063_v8 = vmul.f32 0.5, %v12520_v62  ;;  %12533 = vtanh.f32 %v8740_v21  ;;  %v8741_v37 = vmul.f32 0.5, %v8328_v46  ;;  %v8330_v38 = vadd.f32 %v8329_v0, %v8169_v12 }
 0x7d5   :  { %v10872_v54 = vpack.c.bf16 %v9231_v43, %v9230_v19  ;;  %v8171_v17 = vadd.f32 %v8170_v10, %v16710_v44  ;;  %v8174_v13 = vpop.f32.mrf.mxu0  ;;  %v12522_v45 = vpop.eup %12521  ;;  %v9237_v41 = vadd.f32 0.5, %v9062_v60 }
 0x7d6   :  { %v8335_v2 = vpop.f32.mrf.mxu1  ;;  %v9238_v5 = vadd.f32 0.5, %v9063_v8  ;;  %12535 = vtanh.f32 %v8741_v37  ;;  %v8175_v56 = vadd.f32 %v8174_v13, %v16708_v14  ;;  %v9069_v1 = vmul.f32 0.5, %v12522_v45 }
 0x7d7   :  { %9957 = vst [vmem:[%s16981_s14 + $0x2c] sm:$0xff] %v10872_v54  ;;  %v8747_v25 = vmul.f32 0.5, %v8330_v38  ;;  %v8332_v53 = vadd.f32 %v8331_v35, %v8171_v17  ;;  %v8176_v31 = vpop.f32.mrf.mxu0 }
 0x7d8   :  { %v8337_v20 = vpop.f32.mrf.mxu1  ;;  %v12524_v23 = vpop.eup %12523  ;;  %v10876_v50 = vpack.c.bf16 %v9238_v5, %v9237_v41  ;;  %v8336_v40 = vadd.f32 %v8335_v2, %v8175_v56  ;;  %v8177_v4 = vadd.f32 %v8176_v31, %v16710_v44  ;;  %v9244_v16 = vadd.f32 0.5, %v9069_v1 }
 0x7d9   :  { %v12526_v49 = vpop.eup %12525  ;;  %v9070_v18 = vmul.f32 0.5, %v12524_v23  ;;  %12537 = vtanh.f32 %v8747_v25  ;;  %v8748_v59 = vmul.f32 0.5, %v8332_v53  ;;  %v8178_v39 = vpop.f32.mrf.mxu0 }
 0x7da   :  { %v8339_v32 = vpop.f32.mrf.mxu1  ;;  %9961 = vst [vmem:[%s16981_s14 + $0x48] sm:$0xff] %v10876_v50  ;;  %v9076_v58 = vmul.f32 0.5, %v12526_v49  ;;  %v8754_v7 = vmul.f32 0.5, %v8336_v40  ;;  %v8338_v6 = vadd.f32 %v8337_v20, %v8177_v4  ;;  %v8179_v47 = vadd.f32 %v8178_v39, %v16708_v14 }
 0x7db   :  { %v12528_v51 = vpop.eup %12527  ;;  %v9245_v29 = vadd.f32 0.5, %v9070_v18  ;;  %12539 = vtanh.f32 %v8748_v59  ;;  %v8180_v26 = vpop.f32.mrf.mxu0 }
 0x7dc   :  { %v8341_v63 = vpop.f32.mrf.mxu1  ;;  %v9077_v48 = vmul.f32 0.5, %v12528_v51  ;;  %12541 = vtanh.f32 %v8754_v7  ;;  %v8755_v27 = vmul.f32 0.5, %v8338_v6  ;;  %v8340_v42 = vadd.f32 %v8339_v32, %v8179_v47 }
 0x7dd   :  { %v10880_v28 = vpack.c.bf16 %v9245_v29, %v9244_v16  ;;  %v8181_v52 = vadd.f32 %v8180_v26, %v16710_v44  ;;  %v8184_v15 = vpop.f32.mrf.mxu0  ;;  %v9251_v55 = vadd.f32 0.5, %v9076_v58 }
 0x7de   :  { %v8345_v36 = vpop.f32.mrf.mxu1  ;;  %v12530_v33 = vpop.eup %12529  ;;  %v9252_v30 = vadd.f32 0.5, %v9077_v48  ;;  %12543 = vtanh.f32 %v8755_v27  ;;  %v8185_v3 = vadd.f32 %v8184_v15, %v16708_v14  ;;  %v8761_v9 = vmul.f32 0.5, %v8340_v42 }
 0x7df   :  { %9965 = vst [vmem:[%s16981_s14 + $0x64] sm:$0xff] %v10880_v28  ;;  %v9083_v34 = vmul.f32 0.5, %v12530_v33  ;;  %v8342_v24 = vadd.f32 %v8341_v63, %v8181_v52  ;;  %v8186_v22 = vpop.f32.mrf.mxu0 }
 0x7e0   :  { %v8347_v11 = vpop.f32.mrf.mxu1  ;;  %v12532_v61 = vpop.eup %12531  ;;  %v10884_v0 = vpack.c.bf16 %v9252_v30, %v9251_v55  ;;  %v8346_v60 = vadd.f32 %v8345_v36, %v8185_v3  ;;  %v8187_v21 = vadd.f32 %v8186_v22, %v16710_v44  ;;  %12545 = vtanh.f32 %v8761_v9 }
 0x7e1   :  { %v12534_v46 = vpop.eup %12533  ;;  %v9084_v12 = vmul.f32 0.5, %v12532_v61  ;;  %v8762_v62 = vmul.f32 0.5, %v8342_v24  ;;  %v8188_v19 = vpop.f32.mrf.mxu0  ;;  %v9258_v38 = vadd.f32 0.5, %v9083_v34 }
 0x7e2   :  { %v8349_v43 = vpop.f32.mrf.mxu1  ;;  %9969 = vst [vmem:[%s16981_s14 + $0x80] sm:$0xff] %v10884_v0  ;;  %v9090_v10 = vmul.f32 0.5, %v12534_v46  ;;  %v8768_v35 = vmul.f32 0.5, %v8346_v60  ;;  %v8348_v8 = vadd.f32 %v8347_v11, %v8187_v21  ;;  %v8189_v37 = vadd.f32 %v8188_v19, %v16708_v14 }
 0x7e3   :  { %v12536_v54 = vpop.eup %12535  ;;  %v9259_v17 = vadd.f32 0.5, %v9084_v12  ;;  %12547 = vtanh.f32 %v8762_v62  ;;  %v8190_v13 = vpop.f32.mrf.mxu0 }
 0x7e4   :  { %v8351_v2 = vpop.f32.mrf.mxu1  ;;  %v9091_v45 = vmul.f32 0.5, %v12536_v54  ;;  %12549 = vtanh.f32 %v8768_v35  ;;  %v8769_v41 = vmul.f32 0.5, %v8348_v8  ;;  %v8350_v56 = vadd.f32 %v8349_v43, %v8189_v37 }
 0x7e5   :  { %v10888_v5 = vpack.c.bf16 %v9259_v17, %v9258_v38  ;;  %v8191_v1 = vadd.f32 %v8190_v13, %v16710_v44  ;;  %v8194_v25 = vpop.f32.mrf.mxu0  ;;  %v9265_v20 = vadd.f32 0.5, %v9090_v10 }
 0x7e6   :  { %v8355_v53 = vpop.f32.mrf.mxu1  ;;  %v12538_v31 = vpop.eup %12537  ;;  %v9266_v23 = vadd.f32 0.5, %v9091_v45  ;;  %12551 = vtanh.f32 %v8769_v41  ;;  %v8195_v50 = vadd.f32 %v8194_v25, %v16708_v14  ;;  %v8775_v4 = vmul.f32 0.5, %v8350_v56 }
 0x7e7   :  { %9973 = vst [vmem:[%s16981_s14 + $0x9c] sm:$0xff] %v10888_v5  ;;  %v9097_v40 = vmul.f32 0.5, %v12538_v31  ;;  %v8352_v49 = vadd.f32 %v8351_v2, %v8191_v1  ;;  %v8196_v18 = vpop.f32.mrf.mxu0 }
 0x7e8   :  { %v8357_v59 = vpop.f32.mrf.mxu1  ;;  %v12540_v39 = vpop.eup %12539  ;;  %v10892_v32 = vpack.c.bf16 %v9266_v23, %v9265_v20  ;;  %v8356_v58 = vadd.f32 %v8355_v53, %v8195_v50  ;;  %v8197_v7 = vadd.f32 %v8196_v18, %v16710_v44  ;;  %12553 = vtanh.f32 %v8775_v4 }
 0x7e9   :  { %v12542_v6 = vpop.eup %12541  ;;  %v9098_v47 = vmul.f32 0.5, %v12540_v39  ;;  %v8776_v51 = vmul.f32 0.5, %v8352_v49  ;;  %v8198_v16 = vpop.f32.mrf.mxu0  ;;  %v9272_v42 = vadd.f32 0.5, %v9097_v40 }
 0x7ea   :  { %v8359_v29 = vpop.f32.mrf.mxu1  ;;  %9977 = vst [vmem:[%s16981_s14 + $0xb8] sm:$0xff] %v10892_v32  ;;  %v9104_v26 = vmul.f32 0.5, %v12542_v6  ;;  %v8782_v63 = vmul.f32 0.5, %v8356_v58  ;;  %v8358_v48 = vadd.f32 %v8357_v59, %v8197_v7  ;;  %v8199_v27 = vadd.f32 %v8198_v16, %v16708_v14 }
 0x7eb   :  { %v12544_v28 = vpop.eup %12543  ;;  %v9273_v52 = vadd.f32 0.5, %v9098_v47  ;;  %12555 = vtanh.f32 %v8776_v51  ;;  %v8200_v15 = vpop.f32.mrf.mxu0 }
 0x7ec   :  { %v8361_v36 = vpop.f32.mrf.mxu1  ;;  %v9105_v33 = vmul.f32 0.5, %v12544_v28  ;;  %12557 = vtanh.f32 %v8782_v63  ;;  %v8783_v55 = vmul.f32 0.5, %v8358_v48  ;;  %v8360_v3 = vadd.f32 %v8359_v29, %v8199_v27 }
 0x7ed   :  { %v10896_v30 = vpack.c.bf16 %v9273_v52, %v9272_v42  ;;  %v8201_v34 = vadd.f32 %v8200_v15, %v16710_v44  ;;  %v8204_v9 = vpop.f32.mrf.mxu0  ;;  %v12546_v22 = vpop.eup %12545  ;;  %v9279_v11 = vadd.f32 0.5, %v9104_v26 }
 0x7ee   :  { %v8365_v24 = vpop.f32.mrf.mxu1  ;;  %v9280_v61 = vadd.f32 0.5, %v9105_v33  ;;  %12559 = vtanh.f32 %v8783_v55  ;;  %v8205_v0 = vadd.f32 %v8204_v9, %v16708_v14  ;;  %v9111_v60 = vmul.f32 0.5, %v12546_v22 }
 0x7ef   :  { %9981 = vst [vmem:[%s16981_s14 + $0xd4] sm:$0xff] %v10896_v30  ;;  %v8789_v21 = vmul.f32 0.5, %v8360_v3  ;;  %v8362_v46 = vadd.f32 %v8361_v36, %v8201_v34  ;;  %v8206_v12 = vpop.f32.mrf.mxu0 }
 0x7f0   :  { %v8367_v62 = vpop.f32.mrf.mxu1  ;;  %v12548_v19 = vpop.eup %12547  ;;  %v10900_v43 = vpack.c.bf16 %v9280_v61, %v9279_v11  ;;  %v8366_v10 = vadd.f32 %v8365_v24, %v8205_v0  ;;  %v8207_v35 = vadd.f32 %v8206_v12, %v16710_v44  ;;  %v9286_v56 = vadd.f32 0.5, %v9111_v60 }
 0x7f1   :  { %v12550_v8 = vpop.eup %12549  ;;  %v9112_v37 = vmul.f32 0.5, %v12548_v19  ;;  %12561 = vtanh.f32 %v8789_v21  ;;  %v8790_v54 = vmul.f32 0.5, %v8362_v46  ;;  %v8208_v38 = vpop.f32.mrf.mxu0 }
 0x7f2   :  { %v8369_v17 = vpop.f32.mrf.mxu1  ;;  %9985 = vst [vmem:[%s16981_s14 + $0xf0] sm:$0xff] %v10900_v43  ;;  %v9118_v13 = vmul.f32 0.5, %v12550_v8  ;;  %v8796_v2 = vmul.f32 0.5, %v8366_v10  ;;  %v8368_v45 = vadd.f32 %v8367_v62, %v8207_v35  ;;  %v8209_v41 = vadd.f32 %v8208_v38, %v16708_v14 }
 0x7f3   :  { %v12552_v5 = vpop.eup %12551  ;;  %v9287_v1 = vadd.f32 0.5, %v9112_v37  ;;  %12563 = vtanh.f32 %v8790_v54  ;;  %v8210_v25 = vpop.f32.mrf.mxu0 }
 0x7f4   :  { %v8371_v53 = vpop.f32.mrf.mxu1  ;;  %v9119_v31 = vmul.f32 0.5, %v12552_v5  ;;  %12565 = vtanh.f32 %v8796_v2  ;;  %v8797_v20 = vmul.f32 0.5, %v8368_v45  ;;  %v8370_v50 = vadd.f32 %v8369_v17, %v8209_v41 }
 0x7f5   :  { %v10904_v23 = vpack.c.bf16 %v9287_v1, %v9286_v56  ;;  %v8211_v40 = vadd.f32 %v8210_v25, %v16710_v44  ;;  %v8214_v4 = vpop.f32.mrf.mxu0  ;;  %v12554_v18 = vpop.eup %12553  ;;  %v9293_v59 = vadd.f32 0.5, %v9118_v13 }
 0x7f6   :  { %v8375_v49 = vpop.f32.mrf.mxu1  ;;  %v9294_v39 = vadd.f32 0.5, %v9119_v31  ;;  %12567 = vtanh.f32 %v8797_v20  ;;  %v8215_v32 = vadd.f32 %v8214_v4, %v16708_v14  ;;  %v9125_v58 = vmul.f32 0.5, %v12554_v18 }
 0x7f7   :  { %9989 = vst [vmem:[%s16981_s14 + $0x10c] sm:$0xff] %v10904_v23  ;;  %v8803_v7 = vmul.f32 0.5, %v8370_v50  ;;  %v8372_v6 = vadd.f32 %v8371_v53, %v8211_v40  ;;  %v8216_v47 = vpop.f32.mrf.mxu0 }
 0x7f8   :  { %v8377_v51 = vpop.f32.mrf.mxu1  ;;  %v12556_v16 = vpop.eup %12555  ;;  %v10908_v29 = vpack.c.bf16 %v9294_v39, %v9293_v59  ;;  %v8376_v26 = vadd.f32 %v8375_v49, %v8215_v32  ;;  %v8217_v63 = vadd.f32 %v8216_v47, %v16710_v44  ;;  %v9300_v3 = vadd.f32 0.5, %v9125_v58 }
 0x7f9   :  { %v12558_v48 = vpop.eup %12557  ;;  %v9126_v27 = vmul.f32 0.5, %v12556_v16  ;;  %12569 = vtanh.f32 %v8803_v7  ;;  %v8804_v28 = vmul.f32 0.5, %v8372_v6  ;;  %v8218_v42 = vpop.f32.mrf.mxu0 }
 0x7fa   :  { %v8379_v52 = vpop.f32.mrf.mxu1  ;;  %9993 = vst [vmem:[%s16981_s14 + $0x128] sm:$0xff] %v10908_v29  ;;  %v9132_v15 = vmul.f32 0.5, %v12558_v48  ;;  %v8810_v36 = vmul.f32 0.5, %v8376_v26  ;;  %v8378_v33 = vadd.f32 %v8377_v51, %v8217_v63  ;;  %v8219_v55 = vadd.f32 %v8218_v42, %v16708_v14 }
 0x7fb   :  { %v12560_v30 = vpop.eup %12559  ;;  %v9301_v34 = vadd.f32 0.5, %v9126_v27  ;;  %12571 = vtanh.f32 %v8804_v28  ;;  %v8220_v9 = vpop.f32.mrf.mxu0 }
 0x7fc   :  { %v8381_v24 = vpop.f32.mrf.mxu1  ;;  %v9133_v22 = vmul.f32 0.5, %v12560_v30  ;;  %12573 = vtanh.f32 %v8810_v36  ;;  %v8811_v11 = vmul.f32 0.5, %v8378_v33  ;;  %v8380_v0 = vadd.f32 %v8379_v52, %v8219_v55 }
 0x7fd   :  { %v10912_v61 = vpack.c.bf16 %v9301_v34, %v9300_v3  ;;  %v8221_v60 = vadd.f32 %v8220_v9, %v16710_v44  ;;  %v8224_v21 = vpop.f32.mrf.mxu0  ;;  %v9307_v62 = vadd.f32 0.5, %v9132_v15 }
 0x7fe   :  { %v8385_v46 = vpop.f32.mrf.mxu1  ;;  %v12562_v12 = vpop.eup %12561  ;;  %v9308_v19 = vadd.f32 0.5, %v9133_v22  ;;  %12575 = vtanh.f32 %v8811_v11  ;;  %v8225_v43 = vadd.f32 %v8224_v21, %v16708_v14  ;;  %v8817_v35 = vmul.f32 0.5, %v8380_v0 }
 0x7ff   :  { %9997 = vst [vmem:[%s16981_s14 + $0x144] sm:$0xff] %v10912_v61  ;;  %v9139_v10 = vmul.f32 0.5, %v12562_v12  ;;  %v8382_v8 = vadd.f32 %v8381_v24, %v8221_v60  ;;  %v8226_v37 = vpop.f32.mrf.mxu0 }
 0x800   :  { %v8387_v54 = vpop.f32.mrf.mxu1  ;;  %v12564_v38 = vpop.eup %12563  ;;  %v10916_v17 = vpack.c.bf16 %v9308_v19, %v9307_v62  ;;  %v8386_v13 = vadd.f32 %v8385_v46, %v8225_v43  ;;  %v8227_v2 = vadd.f32 %v8226_v37, %v16710_v44  ;;  %12577 = vtanh.f32 %v8817_v35 }
 0x801   :  { %v12566_v45 = vpop.eup %12565  ;;  %v9140_v41 = vmul.f32 0.5, %v12564_v38  ;;  %v8818_v5 = vmul.f32 0.5, %v8382_v8  ;;  %v8228_v56 = vpop.f32.mrf.mxu0  ;;  %v9314_v50 = vadd.f32 0.5, %v9139_v10 }
 0x802   :  { %v8389_v1 = vpop.f32.mrf.mxu1  ;;  %10001 = vst [vmem:[%s16981_s14 + $0x160] sm:$0xff] %v10916_v17  ;;  %v9146_v25 = vmul.f32 0.5, %v12566_v45  ;;  %v8824_v53 = vmul.f32 0.5, %v8386_v13  ;;  %v8388_v31 = vadd.f32 %v8387_v54, %v8227_v2  ;;  %v8229_v20 = vadd.f32 %v8228_v56, %v16708_v14 }
 0x803   :  { %v12568_v23 = vpop.eup %12567  ;;  %v9315_v40 = vadd.f32 0.5, %v9140_v41  ;;  %12579 = vtanh.f32 %v8818_v5  ;;  %v8230_v4 = vpop.f32.mrf.mxu0 }
 0x804   :  { %v8391_v49 = vpop.f32.mrf.mxu1  ;;  %v9147_v18 = vmul.f32 0.5, %v12568_v23  ;;  %12581 = vtanh.f32 %v8824_v53  ;;  %v8825_v59 = vmul.f32 0.5, %v8388_v31  ;;  %v8390_v32 = vadd.f32 %v8389_v1, %v8229_v20 }
 0x805   :  { %v10920_v39 = vpack.c.bf16 %v9315_v40, %v9314_v50  ;;  %v8231_v58 = vadd.f32 %v8230_v4, %v16710_v44  ;;  %v8234_v7 = vpop.f32.mrf.mxu0  ;;  %v9321_v51 = vadd.f32 0.5, %v9146_v25 }
 0x806   :  { %v8395_v6 = vpop.f32.mrf.mxu1  ;;  %v12570_v47 = vpop.eup %12569  ;;  %v9322_v16 = vadd.f32 0.5, %v9147_v18  ;;  %12583 = vtanh.f32 %v8825_v59  ;;  %v8235_v29 = vadd.f32 %v8234_v7, %v16708_v14  ;;  %v8831_v63 = vmul.f32 0.5, %v8390_v32 }
 0x807   :  { %10005 = vst [vmem:[%s16981_s14 + $0x17c] sm:$0xff] %v10920_v39  ;;  %v9153_v26 = vmul.f32 0.5, %v12570_v47  ;;  %v8392_v48 = vadd.f32 %v8391_v49, %v8231_v58  ;;  %v8236_v27 = vpop.f32.mrf.mxu0 }
 0x808   :  { %v8397_v28 = vpop.f32.mrf.mxu1  ;;  %v12572_v42 = vpop.eup %12571  ;;  %v10924_v52 = vpack.c.bf16 %v9322_v16, %v9321_v51  ;;  %v8396_v15 = vadd.f32 %v8395_v6, %v8235_v29  ;;  %v8237_v36 = vadd.f32 %v8236_v27, %v16710_v44  ;;  %12585 = vtanh.f32 %v8831_v63 }
 0x809   :  { %v12574_v33 = vpop.eup %12573  ;;  %v9154_v55 = vmul.f32 0.5, %v12572_v42  ;;  %v8832_v30 = vmul.f32 0.5, %v8392_v48  ;;  %v8238_v3 = vpop.f32.mrf.mxu0  ;;  %v9328_v0 = vadd.f32 0.5, %v9153_v26 }
 0x80a   :  { %v8399_v34 = vpop.f32.mrf.mxu1  ;;  %10009 = vst [vmem:[%s16981_s14 + $0x198] sm:$0xff] %v10924_v52  ;;  %v9160_v9 = vmul.f32 0.5, %v12574_v33  ;;  %v8838_v24 = vmul.f32 0.5, %v8396_v15  ;;  %v8398_v22 = vadd.f32 %v8397_v28, %v8237_v36  ;;  %v8239_v11 = vadd.f32 %v8238_v3, %v16708_v14 }
 0x80b   :  { %v12576_v61 = vpop.eup %12575  ;;  %v9329_v60 = vadd.f32 0.5, %v9154_v55  ;;  %12587 = vtanh.f32 %v8832_v30  ;;  %v8240_v21 = vpop.f32.mrf.mxu0 }
 0x80c   :  { %v8401_v46 = vpop.f32.mrf.mxu1  ;;  %v9161_v12 = vmul.f32 0.5, %v12576_v61  ;;  %12589 = vtanh.f32 %v8838_v24  ;;  %v8839_v62 = vmul.f32 0.5, %v8398_v22  ;;  %v8400_v43 = vadd.f32 %v8399_v34, %v8239_v11 }
 0x80d   :  { %v10928_v19 = vpack.c.bf16 %v9329_v60, %v9328_v0  ;;  %v8241_v10 = vadd.f32 %v8240_v21, %v16710_v44  ;;  %v8244_v35 = vpop.f32.mrf.mxu0  ;;  %v12578_v37 = vpop.eup %12577  ;;  %v9335_v54 = vadd.f32 0.5, %v9160_v9 }
 0x80e   :  { %v8405_v8 = vpop.f32.mrf.mxu1  ;;  %v9336_v38 = vadd.f32 0.5, %v9161_v12  ;;  %12591 = vtanh.f32 %v8839_v62  ;;  %v8245_v17 = vadd.f32 %v8244_v35, %v16708_v14  ;;  %v9167_v13 = vmul.f32 0.5, %v12578_v37 }
 0x80f   :  { %10013 = vst [vmem:[%s16981_s14 + $0x1b4] sm:$0xff] %v10928_v19  ;;  %v8845_v2 = vmul.f32 0.5, %v8400_v43  ;;  %v8402_v45 = vadd.f32 %v8401_v46, %v8241_v10  ;;  %v8246_v41 = vpop.f32.mrf.mxu0  ;;  %v6295_v12 = vsub.s32 6, %v17170_v57  ;;  %v12747_v57 = vld [vmem:[%s16980_s13] sm:$0xff] }
 0x810   :  { %v8407_v5 = vpop.f32.mrf.mxu1  ;;  %v12580_v56 = vpop.eup %12579  ;;  %v10932_v1 = vpack.c.bf16 %v9336_v38, %v9335_v54  ;;  %v8406_v25 = vadd.f32 %v8405_v8, %v8245_v17  ;;  %v8247_v53 = vadd.f32 %v8246_v41, %v16710_v44  ;;  %v9342_v32 = vadd.f32 0.5, %v9167_v13 }
 0x811   :  { %v12582_v31 = vpop.eup %12581  ;;  %v9168_v20 = vmul.f32 0.5, %v12580_v56  ;;  %12593 = vtanh.f32 %v8845_v2  ;;  %v8846_v23 = vmul.f32 0.5, %v8402_v45  ;;  %v8248_v50 = vpop.f32.mrf.mxu0  ;;  %v16847_v45 = vrot.slane %v12747_v57, %v6295_v12 }
 0x812   :  { %v8409_v40 = vpop.f32.mrf.mxu1  ;;  %10017 = vst [vmem:[%s16981_s14 + $0x1d0] sm:$0xff] %v10932_v1  ;;  %v9174_v4 = vmul.f32 0.5, %v12582_v31  ;;  %v8852_v49 = vmul.f32 0.5, %v8406_v25  ;;  %v8408_v18 = vadd.f32 %v8407_v5, %v8247_v53  ;;  %v8249_v59 = vadd.f32 %v8248_v50, %v16708_v14 }
 0x813   :  { %v12584_v39 = vpop.eup %12583  ;;  %v9343_v58 = vadd.f32 0.5, %v9168_v20  ;;  %12595 = vtanh.f32 %v8846_v23  ;;  %v8250_v7 = vpop.f32.mrf.mxu0 }
 0x814   :  { %v8411_v6 = vpop.f32.mrf.mxu1  ;;  %v9175_v47 = vmul.f32 0.5, %v12584_v39  ;;  %12597 = vtanh.f32 %v8852_v49  ;;  %v8853_v51 = vmul.f32 0.5, %v8408_v18  ;;  %v8410_v29 = vadd.f32 %v8409_v40, %v8249_v59 }
 0x815   :  { %v10936_v16 = vpack.c.bf16 %v9343_v58, %v9342_v32  ;;  %v8251_v26 = vadd.f32 %v8250_v7, %v16710_v44  ;;  %v8254_v63 = vpop.f32.mrf.mxu0  ;;  %v12586_v27 = vpop.eup %12585  ;;  %v9349_v28 = vadd.f32 0.5, %v9174_v4 }
 0x816   :  { %v8415_v48 = vpop.f32.mrf.mxu1  ;;  %v9350_v42 = vadd.f32 0.5, %v9175_v47  ;;  %12599 = vtanh.f32 %v8853_v51  ;;  %v8255_v52 = vadd.f32 %v8254_v63, %v16708_v14  ;;  %v9181_v15 = vmul.f32 0.5, %v12586_v27 }
 0x817   :  { %10021 = vst [vmem:[%s16981_s14 + $0x1ec] sm:$0xff] %v10936_v16  ;;  %v8859_v36 = vmul.f32 0.5, %v8410_v29  ;;  %v8412_v33 = vadd.f32 %v8411_v6, %v8251_v26  ;;  %v8256_v55 = vpop.f32.mrf.mxu0 }
 0x818   :  { %v8417_v30 = vpop.f32.mrf.mxu1  ;;  %v12588_v3 = vpop.eup %12587  ;;  %v10940_v34 = vpack.c.bf16 %v9350_v42, %v9349_v28  ;;  %v8416_v9 = vadd.f32 %v8415_v48, %v8255_v52  ;;  %v8257_v24 = vadd.f32 %v8256_v55, %v16710_v44  ;;  %v9356_v19 = vadd.f32 0.5, %v9181_v15 }
 0x819   :  { %v12590_v22 = vpop.eup %12589  ;;  %v9182_v11 = vmul.f32 0.5, %v12588_v3  ;;  %12601 = vtanh.f32 %v8859_v36  ;;  %v8860_v61 = vmul.f32 0.5, %v8412_v33  ;;  %v8258_v0 = vpop.f32.mrf.mxu0 }
 0x81a   :  { %v8419_v14 = vpop.f32.mrf.mxu1  ;;  %10025 = vst [vmem:[%s16981_s14 + $0x208] sm:$0xff] %v10940_v34  ;;  %v9188_v60 = vmul.f32 0.5, %v12590_v22  ;;  %v8866_v21 = vmul.f32 0.5, %v8416_v9  ;;  %v8418_v46 = vadd.f32 %v8417_v30, %v8257_v24 }
 0x81b   :  { %v12592_v62 = vpop.eup %12591  ;;  %v9357_v43 = vadd.f32 0.5, %v9182_v11  ;;  %12603 = vtanh.f32 %v8860_v61  ;;  %v8259_v44 = vpop.f32.mrf.mxu0 }
 0x81c   :  { %v8420_v10 = vpop.f32.mrf.mxu1  ;;  %v9189_v35 = vmul.f32 0.5, %v12592_v62  ;;  %12605 = vtanh.f32 %v8866_v21  ;;  %v8867_v8 = vmul.f32 0.5, %v8418_v46  ;;  %v9363_v13 = vadd.f32 0.5, %v9188_v60 }
 0x81d   :  { %v10944_v37 = vpack.c.bf16 %v9357_v43, %v9356_v19  ;;  %v11076_v54 = vpop.f32.mrf.mxu0 }
 0x81e   :  { %v11170_v38 = vpop.f32.mrf.mxu1  ;;  %v12594_v17 = vpop.eup %12593  ;;  %v9364_v2 = vadd.f32 0.5, %v9189_v35  ;;  %12607 = vtanh.f32 %v8867_v8 }
 0x81f   :  { %10029 = vst [vmem:[%s16981_s14 + $0x224] sm:$0xff] %v10944_v37  ;;  %v9195_v41 = vmul.f32 0.5, %v12594_v17  ;;  %v11077_v5 = vpop.f32.mrf.mxu0 }
 0x820   :  { %v11171_v56 = vpop.f32.mrf.mxu1  ;;  %v12596_v1 = vpop.eup %12595  ;;  %v10948_v25 = vpack.c.bf16 %v9364_v2, %v9363_v13  ;;  %v11078_v53 = vadd.f32 %v11077_v5, %v11076_v54 }
 0x821   :  { %v12598_v31 = vpop.eup %12597  ;;  %v9196_v20 = vmul.f32 0.5, %v12596_v1  ;;  %v11079_v23 = vpop.f32.mrf.mxu0  ;;  %v11172_v49 = vadd.f32 %v11171_v56, %v11170_v38  ;;  %v9370_v59 = vadd.f32 0.5, %v9195_v41 }
 0x822   :  { %v11173_v50 = vpop.f32.mrf.mxu1  ;;  %10033 = vst [vmem:[%s16981_s14 + $0x240] sm:$0xff] %v10948_v25  ;;  %v9202_v40 = vmul.f32 0.5, %v12598_v31  ;;  %v8457_v4 = vadd.f32 %v11078_v53, %v16847_v45 }
 0x823   :  { %v12600_v18 = vpop.eup %12599  ;;  %v9371_v39 = vadd.f32 0.5, %v9196_v20  ;;  %v11080_v32 = vpop.f32.mrf.mxu0 }
 0x824   :  { %v11174_v58 = vpop.f32.mrf.mxu1  ;;  %v9203_v7 = vmul.f32 0.5, %v12600_v18  ;;  %v8593_v6 = vadd.f32 %v11172_v49, %v8457_v4  ;;  %v11081_v47 = vadd.f32 %v11080_v32, %v11079_v23  ;;  %v9377_v16 = vadd.f32 0.5, %v9202_v40 }
 0x825   :  { %v10952_v51 = vpack.c.bf16 %v9371_v39, %v9370_v59  ;;  %v11082_v29 = vpop.f32.mrf.mxu0  ;;  %v11175_v42 = vadd.f32 %v11174_v58, %v11173_v50 }
 0x826   :  { %v11176_v26 = vpop.f32.mrf.mxu1  ;;  %v12602_v63 = vpop.eup %12601  ;;  %v9378_v48 = vadd.f32 0.5, %v9203_v7  ;;  %v8700_v27 = vmul.f32 0.5, %v8593_v6  ;;  %v8460_v28 = vadd.f32 %v11081_v47, %v16847_v45 }
 0x827   :  { %10037 = vst [vmem:[%s16981_s14 + $0x25c] sm:$0xff] %v10952_v51  ;;  %v9209_v52 = vmul.f32 0.5, %v12602_v63  ;;  %v11083_v15 = vpop.f32.mrf.mxu0 }
 0x828   :  { %v11177_v36 = vpop.f32.mrf.mxu1  ;;  %v12604_v33 = vpop.eup %12603  ;;  %v10956_v55 = vpack.c.bf16 %v9378_v48, %v9377_v16  ;;  %12609 = vtanh.f32 %v8700_v27  ;;  %v8596_v30 = vadd.f32 %v11175_v42, %v8460_v28  ;;  %v11084_v3 = vadd.f32 %v11083_v15, %v11082_v29 }
 0x829   :  { %v12606_v34 = vpop.eup %12605  ;;  %v9210_v9 = vmul.f32 0.5, %v12604_v33  ;;  %v11085_v24 = vpop.f32.mrf.mxu0  ;;  %v11178_v14 = vadd.f32 %v11177_v36, %v11176_v26  ;;  %v9384_v21 = vadd.f32 0.5, %v9209_v52 }
 0x82a   :  { %v11179_v22 = vpop.f32.mrf.mxu1  ;;  %10041 = vst [vmem:[%s16981_s14 + $0x278] sm:$0xff] %v10956_v55  ;;  %v9216_v11 = vmul.f32 0.5, %v12606_v34  ;;  %v8707_v61 = vmul.f32 0.5, %v8596_v30  ;;  %v8465_v0 = vadd.f32 %v11084_v3, %v16847_v45 }
 0x82b   :  { %v12608_v60 = vpop.eup %12607  ;;  %v9385_v46 = vadd.f32 0.5, %v9210_v9  ;;  %v11086_v12 = vpop.f32.mrf.mxu0 }
 0x82c   :  { %v11180_v62 = vpop.f32.mrf.mxu1  ;;  %v9217_v19 = vmul.f32 0.5, %v12608_v60  ;;  %12611 = vtanh.f32 %v8707_v61  ;;  %v8601_v43 = vadd.f32 %v11178_v14, %v8465_v0  ;;  %v11087_v10 = vadd.f32 %v11086_v12, %v11085_v24 }
 0x82d   :  { %v10960_v44 = vpack.c.bf16 %v9385_v46, %v9384_v21  ;;  %v11088_v35 = vpop.f32.mrf.mxu0  ;;  %v9391_v37 = vadd.f32 0.5, %v9216_v11  ;;  %v11181_v13 = vadd.f32 %v11180_v62, %v11179_v22 }
 0x82e   :  { %v11182_v8 = vpop.f32.mrf.mxu1  ;;  %v9392_v54 = vadd.f32 0.5, %v9217_v19  ;;  %v8714_v38 = vmul.f32 0.5, %v8601_v43  ;;  %v8468_v17 = vadd.f32 %v11087_v10, %v16847_v45 }
 0x82f   :  { %10045 = vst [vmem:[%s16981_s14 + $0x294] sm:$0xff] %v10960_v44  ;;  %v11089_v2 = vpop.f32.mrf.mxu0 }
 0x830   :  { %v11183_v57 = vpop.f32.mrf.mxu1  ;;  %v10964_v41 = vpack.c.bf16 %v9392_v54, %v9391_v37  ;;  %12613 = vtanh.f32 %v8714_v38  ;;  %v11090_v5 = vadd.f32 %v11089_v2, %v11088_v35  ;;  %v8604_v56 = vadd.f32 %v11181_v13, %v8468_v17 }
 0x831   :  { %v11091_v1 = vpop.f32.mrf.mxu0  ;;  %v11184_v31 = vadd.f32 %v11183_v57, %v11182_v8 }
 0x832   :  { %v11185_v25 = vpop.f32.mrf.mxu1  ;;  %10049 = vst [vmem:[%s16981_s14 + $0x2b0] sm:$0xff] %v10964_v41  ;;  %v8473_v53 = vadd.f32 %v11090_v5, %v16847_v45  ;;  %v8721_v20 = vmul.f32 0.5, %v8604_v56 }
 0x833   :  { %v11092_v23 = vpop.f32.mrf.mxu0 }
 0x834   :  { %v11186_v50 = vpop.f32.mrf.mxu1  ;;  %v8609_v40 = vadd.f32 %v11184_v31, %v8473_v53  ;;  %v11093_v4 = vadd.f32 %v11092_v23, %v11091_v1  ;;  %12615 = vtanh.f32 %v8721_v20 }
 0x835   :  { %v12610_v49 = vpop.eup %12609  ;;  %v11094_v18 = vpop.f32.mrf.mxu0  ;;  %v11187_v7 = vadd.f32 %v11186_v50, %v11185_v25 }
 0x836   :  { %v11188_v59 = vpop.f32.mrf.mxu1  ;;  %v9050_v39 = vmul.f32 0.5, %v12610_v49  ;;  %v8728_v32 = vmul.f32 0.5, %v8609_v40  ;;  %v8476_v58 = vadd.f32 %v11093_v4, %v16847_v45 }
 0x837   :  { %v11095_v6 = vpop.f32.mrf.mxu0 }
 0x838   :  { %v11189_v47 = vpop.f32.mrf.mxu1  ;;  %v9225_v51 = vadd.f32 0.5, %v9050_v39  ;;  %12617 = vtanh.f32 %v8728_v32  ;;  %v8612_v16 = vadd.f32 %v11187_v7, %v8476_v58  ;;  %v11096_v29 = vadd.f32 %v11095_v6, %v11094_v18 }
 0x839   :  { %v12612_v26 = vpop.eup %12611  ;;  %v11190_v63 = vadd.f32 %v11189_v47, %v11188_v59  ;;  %v11097_v48 = vpop.f32.mrf.mxu0 }
 0x83a   :  { %v11191_v27 = vpop.f32.mrf.mxu1  ;;  %v10869_v28 = vpack.c.bf16 %v9225_v51, %v9225_v51  ;;  %v9057_v42 = vmul.f32 0.5, %v12612_v26  ;;  %v8735_v52 = vmul.f32 0.5, %v8612_v16  ;;  %v8481_v15 = vadd.f32 %v11096_v29, %v16847_v45 }
 0x83b   :  { %v11098_v36 = vpop.f32.mrf.mxu0 }
 0x83c   :  { %v11192_v33 = vpop.f32.mrf.mxu1  ;;  %9954 = vst [vmem:[%s16981_s14 + $0x18] sm:$0xf] %v10869_v28  ;;  %v9232_v55 = vadd.f32 0.5, %v9057_v42  ;;  %12619 = vtanh.f32 %v8735_v52  ;;  %v8617_v30 = vadd.f32 %v11190_v63, %v8481_v15  ;;  %v11099_v3 = vadd.f32 %v11098_v36, %v11097_v48 }
 0x83d   :  { %v12614_v34 = vpop.eup %12613  ;;  %v11193_v9 = vadd.f32 %v11192_v33, %v11191_v27  ;;  %v11100_v24 = vpop.f32.mrf.mxu0 }
 0x83e   :  { %v11194_v22 = vpop.f32.mrf.mxu1  ;;  %v10873_v11 = vpack.c.bf16 %v9232_v55, %v9232_v55  ;;  %v9064_v61 = vmul.f32 0.5, %v12614_v34  ;;  %v8742_v0 = vmul.f32 0.5, %v8617_v30  ;;  %v8484_v14 = vadd.f32 %v11099_v3, %v16847_v45 }
 0x83f   :  { %v11101_v60 = vpop.f32.mrf.mxu0 }
 0x840   :  { %v11195_v21 = vpop.f32.mrf.mxu1  ;;  %9958 = vst [vmem:[%s16981_s14 + $0x34] sm:$0xf] %v10873_v11  ;;  %v9239_v46 = vadd.f32 0.5, %v9064_v61  ;;  %12621 = vtanh.f32 %v8742_v0  ;;  %v8620_v12 = vadd.f32 %v11193_v9, %v8484_v14  ;;  %v11102_v62 = vadd.f32 %v11101_v60, %v11100_v24 }
 0x841   :  { %v11103_v19 = vpop.f32.mrf.mxu0  ;;  %v12616_v44 = vpop.eup %12615  ;;  %v11196_v37 = vadd.f32 %v11195_v21, %v11194_v22 }
 0x842   :  { %v11197_v43 = vpop.f32.mrf.mxu1  ;;  %v10877_v10 = vpack.c.bf16 %v9239_v46, %v9239_v46  ;;  %v8749_v35 = vmul.f32 0.5, %v8620_v12  ;;  %v8489_v8 = vadd.f32 %v11102_v62, %v16847_v45  ;;  %v9071_v54 = vmul.f32 0.5, %v12616_v44 }
 0x843   :  { %v11104_v38 = vpop.f32.mrf.mxu0 }
 0x844   :  { %v11198_v17 = vpop.f32.mrf.mxu1  ;;  %9962 = vst [vmem:[%s16981_s14 + $0x50] sm:$0xf] %v10877_v10  ;;  %12623 = vtanh.f32 %v8749_v35  ;;  %v8625_v13 = vadd.f32 %v11196_v37, %v8489_v8  ;;  %v11105_v2 = vadd.f32 %v11104_v38, %v11103_v19  ;;  %v9246_v41 = vadd.f32 0.5, %v9071_v54 }
 0x845   :  { %v12618_v57 = vpop.eup %12617  ;;  %v11106_v5 = vpop.f32.mrf.mxu0  ;;  %v11199_v31 = vadd.f32 %v11198_v17, %v11197_v43 }
 0x846   :  { %v11200_v56 = vpop.f32.mrf.mxu1  ;;  %v9078_v1 = vmul.f32 0.5, %v12618_v57  ;;  %v8756_v25 = vmul.f32 0.5, %v8625_v13  ;;  %v8492_v53 = vadd.f32 %v11105_v2, %v16847_v45  ;;  %v10881_v20 = vpack.c.bf16 %v9246_v41, %v9246_v41 }
 0x847   :  { %v11107_v23 = vpop.f32.mrf.mxu0 }
 0x848   :  { %v11201_v50 = vpop.f32.mrf.mxu1  ;;  %v9253_v40 = vadd.f32 0.5, %v9078_v1  ;;  %12625 = vtanh.f32 %v8756_v25  ;;  %v8628_v4 = vadd.f32 %v11199_v31, %v8492_v53  ;;  %v11108_v49 = vadd.f32 %v11107_v23, %v11106_v5  ;;  %9966 = vst [vmem:[%s16981_s14 + $0x6c] sm:$0xf] %v10881_v20 }
 0x849   :  { %v12620_v18 = vpop.eup %12619  ;;  %v11202_v59 = vadd.f32 %v11201_v50, %v11200_v56  ;;  %v11109_v39 = vpop.f32.mrf.mxu0 }
 0x84a   :  { %v11203_v32 = vpop.f32.mrf.mxu1  ;;  %v10885_v58 = vpack.c.bf16 %v9253_v40, %v9253_v40  ;;  %v9085_v7 = vmul.f32 0.5, %v12620_v18  ;;  %v8763_v6 = vmul.f32 0.5, %v8628_v4  ;;  %v8497_v47 = vadd.f32 %v11108_v49, %v16847_v45 }
 0x84b   :  { %v11110_v51 = vpop.f32.mrf.mxu0 }
 0x84c   :  { %v11204_v16 = vpop.f32.mrf.mxu1  ;;  %9970 = vst [vmem:[%s16981_s14 + $0x88] sm:$0xf] %v10885_v58  ;;  %v9260_v29 = vadd.f32 0.5, %v9085_v7  ;;  %12627 = vtanh.f32 %v8763_v6  ;;  %v8633_v26 = vadd.f32 %v11202_v59, %v8497_v47  ;;  %v11111_v63 = vadd.f32 %v11110_v51, %v11109_v39 }
 0x84d   :  { %v12622_v48 = vpop.eup %12621  ;;  %v11205_v27 = vadd.f32 %v11204_v16, %v11203_v32  ;;  %v11112_v28 = vpop.f32.mrf.mxu0 }
 0x84e   :  { %v11206_v42 = vpop.f32.mrf.mxu1  ;;  %v10889_v52 = vpack.c.bf16 %v9260_v29, %v9260_v29  ;;  %v9092_v15 = vmul.f32 0.5, %v12622_v48  ;;  %v8770_v36 = vmul.f32 0.5, %v8633_v26  ;;  %v8500_v33 = vadd.f32 %v11111_v63, %v16847_v45 }
 0x84f   :  { %v11113_v55 = vpop.f32.mrf.mxu0 }
 0x850   :  { %v11207_v30 = vpop.f32.mrf.mxu1  ;;  %9974 = vst [vmem:[%s16981_s14 + $0xa4] sm:$0xf] %v10889_v52  ;;  %v9267_v3 = vadd.f32 0.5, %v9092_v15  ;;  %12629 = vtanh.f32 %v8770_v36  ;;  %v8636_v34 = vadd.f32 %v11205_v27, %v8500_v33  ;;  %v11114_v9 = vadd.f32 %v11113_v55, %v11112_v28 }
 0x851   :  { %v12624_v24 = vpop.eup %12623  ;;  %v11208_v22 = vadd.f32 %v11207_v30, %v11206_v42  ;;  %v11115_v11 = vpop.f32.mrf.mxu0 }
 0x852   :  { %v11209_v61 = vpop.f32.mrf.mxu1  ;;  %v10893_v0 = vpack.c.bf16 %v9267_v3, %v9267_v3  ;;  %v9099_v14 = vmul.f32 0.5, %v12624_v24  ;;  %v8777_v60 = vmul.f32 0.5, %v8636_v34  ;;  %v8505_v21 = vadd.f32 %v11114_v9, %v16847_v45 }
 0x853   :  { %v11116_v46 = vpop.f32.mrf.mxu0 }
 0x854   :  { %v11210_v12 = vpop.f32.mrf.mxu1  ;;  %9978 = vst [vmem:[%s16981_s14 + $0xc0] sm:$0xf] %v10893_v0  ;;  %v9274_v62 = vadd.f32 0.5, %v9099_v14  ;;  %12631 = vtanh.f32 %v8777_v60  ;;  %v8641_v19 = vadd.f32 %v11208_v22, %v8505_v21  ;;  %v11117_v43 = vadd.f32 %v11116_v46, %v11115_v11 }
 0x855   :  { %v12626_v44 = vpop.eup %12625  ;;  %v11211_v10 = vadd.f32 %v11210_v12, %v11209_v61  ;;  %v11118_v35 = vpop.f32.mrf.mxu0 }
 0x856   :  { %v11212_v8 = vpop.f32.mrf.mxu1  ;;  %v10897_v37 = vpack.c.bf16 %v9274_v62, %v9274_v62  ;;  %v9106_v54 = vmul.f32 0.5, %v12626_v44  ;;  %v8784_v38 = vmul.f32 0.5, %v8641_v19  ;;  %v8508_v17 = vadd.f32 %v11117_v43, %v16847_v45 }
 0x857   :  { %v11119_v13 = vpop.f32.mrf.mxu0 }
 0x858   :  { %v11213_v2 = vpop.f32.mrf.mxu1  ;;  %9982 = vst [vmem:[%s16981_s14 + $0xdc] sm:$0xf] %v10897_v37  ;;  %v9281_v57 = vadd.f32 0.5, %v9106_v54  ;;  %12633 = vtanh.f32 %v8784_v38  ;;  %v8644_v41 = vadd.f32 %v11211_v10, %v8508_v17  ;;  %v11120_v5 = vadd.f32 %v11119_v13, %v11118_v35 }
 0x859   :  { %v12628_v56 = vpop.eup %12627  ;;  %v11214_v1 = vadd.f32 %v11213_v2, %v11212_v8  ;;  %v11121_v25 = vpop.f32.mrf.mxu0 }
 0x85a   :  { %v11215_v53 = vpop.f32.mrf.mxu1  ;;  %v10901_v31 = vpack.c.bf16 %v9281_v57, %v9281_v57  ;;  %v9113_v20 = vmul.f32 0.5, %v12628_v56  ;;  %v8791_v23 = vmul.f32 0.5, %v8644_v41  ;;  %v8513_v50 = vadd.f32 %v11120_v5, %v16847_v45 }
 0x85b   :  { %v11122_v40 = vpop.f32.mrf.mxu0 }
 0x85c   :  { %v11216_v4 = vpop.f32.mrf.mxu1  ;;  %9986 = vst [vmem:[%s16981_s14 + $0xf8] sm:$0xf] %v10901_v31  ;;  %v9288_v49 = vadd.f32 0.5, %v9113_v20  ;;  %12635 = vtanh.f32 %v8791_v23  ;;  %v8649_v18 = vadd.f32 %v11214_v1, %v8513_v50  ;;  %v11123_v59 = vadd.f32 %v11122_v40, %v11121_v25 }
 0x85d   :  { %v12630_v39 = vpop.eup %12629  ;;  %v11217_v32 = vadd.f32 %v11216_v4, %v11215_v53  ;;  %v11124_v58 = vpop.f32.mrf.mxu0 }
 0x85e   :  { %v11218_v7 = vpop.f32.mrf.mxu1  ;;  %v10905_v6 = vpack.c.bf16 %v9288_v49, %v9288_v49  ;;  %v9120_v47 = vmul.f32 0.5, %v12630_v39  ;;  %v8798_v51 = vmul.f32 0.5, %v8649_v18  ;;  %v8516_v16 = vadd.f32 %v11123_v59, %v16847_v45 }
 0x85f   :  { %v11125_v29 = vpop.f32.mrf.mxu0 }
 0x860   :  { %v11219_v26 = vpop.f32.mrf.mxu1  ;;  %9990 = vst [vmem:[%s16981_s14 + $0x114] sm:$0xf] %v10905_v6  ;;  %v9295_v63 = vadd.f32 0.5, %v9120_v47  ;;  %12637 = vtanh.f32 %v8798_v51  ;;  %v8652_v48 = vadd.f32 %v11217_v32, %v8516_v16  ;;  %v11126_v27 = vadd.f32 %v11125_v29, %v11124_v58 }
 0x861   :  { %v12632_v28 = vpop.eup %12631  ;;  %v11220_v42 = vadd.f32 %v11219_v26, %v11218_v7  ;;  %v11127_v52 = vpop.f32.mrf.mxu0 }
 0x862   :  { %v11221_v15 = vpop.f32.mrf.mxu1  ;;  %v10909_v36 = vpack.c.bf16 %v9295_v63, %v9295_v63  ;;  %v9127_v33 = vmul.f32 0.5, %v12632_v28  ;;  %v8805_v55 = vmul.f32 0.5, %v8652_v48  ;;  %v8521_v30 = vadd.f32 %v11126_v27, %v16847_v45 }
 0x863   :  { %v11128_v3 = vpop.f32.mrf.mxu0 }
 0x864   :  { %v11222_v34 = vpop.f32.mrf.mxu1  ;;  %9994 = vst [vmem:[%s16981_s14 + $0x130] sm:$0xf] %v10909_v36  ;;  %v9302_v9 = vadd.f32 0.5, %v9127_v33  ;;  %12639 = vtanh.f32 %v8805_v55  ;;  %v8657_v24 = vadd.f32 %v11220_v42, %v8521_v30  ;;  %v11129_v22 = vadd.f32 %v11128_v3, %v11127_v52 }
 0x865   :  { %v12634_v11 = vpop.eup %12633  ;;  %v11223_v61 = vadd.f32 %v11222_v34, %v11221_v15  ;;  %v11130_v0 = vpop.f32.mrf.mxu0 }
 0x866   :  { %v11224_v14 = vpop.f32.mrf.mxu1  ;;  %v10913_v60 = vpack.c.bf16 %v9302_v9, %v9302_v9  ;;  %v9134_v21 = vmul.f32 0.5, %v12634_v11  ;;  %v8812_v46 = vmul.f32 0.5, %v8657_v24  ;;  %v8524_v12 = vadd.f32 %v11129_v22, %v16847_v45 }
 0x867   :  { %v11131_v62 = vpop.f32.mrf.mxu0 }
 0x868   :  { %v11225_v19 = vpop.f32.mrf.mxu1  ;;  %9998 = vst [vmem:[%s16981_s14 + $0x14c] sm:$0xf] %v10913_v60  ;;  %v9309_v43 = vadd.f32 0.5, %v9134_v21  ;;  %12641 = vtanh.f32 %v8812_v46  ;;  %v8660_v44 = vadd.f32 %v11223_v61, %v8524_v12  ;;  %v11132_v10 = vadd.f32 %v11131_v62, %v11130_v0 }
 0x869   :  { %v12636_v35 = vpop.eup %12635  ;;  %v11226_v8 = vadd.f32 %v11225_v19, %v11224_v14  ;;  %v11133_v37 = vpop.f32.mrf.mxu0 }
 0x86a   :  { %v11227_v54 = vpop.f32.mrf.mxu1  ;;  %v10917_v38 = vpack.c.bf16 %v9309_v43, %v9309_v43  ;;  %v9141_v17 = vmul.f32 0.5, %v12636_v35  ;;  %v8819_v13 = vmul.f32 0.5, %v8660_v44  ;;  %v8529_v2 = vadd.f32 %v11132_v10, %v16847_v45 }
 0x86b   :  { %v11134_v57 = vpop.f32.mrf.mxu0 }
 0x86c   :  { %v11228_v41 = vpop.f32.mrf.mxu1  ;;  %10002 = vst [vmem:[%s16981_s14 + $0x168] sm:$0xf] %v10917_v38  ;;  %v9316_v5 = vadd.f32 0.5, %v9141_v17  ;;  %12643 = vtanh.f32 %v8819_v13  ;;  %v8665_v56 = vadd.f32 %v11226_v8, %v8529_v2  ;;  %v11135_v1 = vadd.f32 %v11134_v57, %v11133_v37 }
 0x86d   :  { %v12638_v25 = vpop.eup %12637  ;;  %v11229_v53 = vadd.f32 %v11228_v41, %v11227_v54  ;;  %v11136_v31 = vpop.f32.mrf.mxu0 }
 0x86e   :  { %v11230_v20 = vpop.f32.mrf.mxu1  ;;  %v10921_v23 = vpack.c.bf16 %v9316_v5, %v9316_v5  ;;  %v9148_v50 = vmul.f32 0.5, %v12638_v25  ;;  %v8826_v40 = vmul.f32 0.5, %v8665_v56  ;;  %v8532_v4 = vadd.f32 %v11135_v1, %v16847_v45 }
 0x86f   :  { %v11137_v49 = vpop.f32.mrf.mxu0 }
 0x870   :  { %v11231_v18 = vpop.f32.mrf.mxu1  ;;  %10006 = vst [vmem:[%s16981_s14 + $0x184] sm:$0xf] %v10921_v23  ;;  %v9323_v59 = vadd.f32 0.5, %v9148_v50  ;;  %12645 = vtanh.f32 %v8826_v40  ;;  %v8668_v39 = vadd.f32 %v11229_v53, %v8532_v4  ;;  %v11138_v32 = vadd.f32 %v11137_v49, %v11136_v31 }
 0x871   :  { %v12640_v58 = vpop.eup %12639  ;;  %v11232_v7 = vadd.f32 %v11231_v18, %v11230_v20  ;;  %v11139_v6 = vpop.f32.mrf.mxu0 }
 0x872   :  { %v11233_v47 = vpop.f32.mrf.mxu1  ;;  %v10925_v51 = vpack.c.bf16 %v9323_v59, %v9323_v59  ;;  %v9155_v16 = vmul.f32 0.5, %v12640_v58  ;;  %v8833_v29 = vmul.f32 0.5, %v8668_v39  ;;  %v8537_v26 = vadd.f32 %v11138_v32, %v16847_v45 }
 0x873   :  { %v11140_v63 = vpop.f32.mrf.mxu0 }
 0x874   :  { %v11234_v48 = vpop.f32.mrf.mxu1  ;;  %10010 = vst [vmem:[%s16981_s14 + $0x1a0] sm:$0xf] %v10925_v51  ;;  %v9330_v27 = vadd.f32 0.5, %v9155_v16  ;;  %12647 = vtanh.f32 %v8833_v29  ;;  %v8673_v28 = vadd.f32 %v11232_v7, %v8537_v26  ;;  %v11141_v42 = vadd.f32 %v11140_v63, %v11139_v6 }
 0x875   :  { %v12642_v52 = vpop.eup %12641  ;;  %v11235_v15 = vadd.f32 %v11234_v48, %v11233_v47  ;;  %v11142_v36 = vpop.f32.mrf.mxu0 }
 0x876   :  { %v11236_v33 = vpop.f32.mrf.mxu1  ;;  %v10929_v55 = vpack.c.bf16 %v9330_v27, %v9330_v27  ;;  %v9162_v30 = vmul.f32 0.5, %v12642_v52  ;;  %v8840_v3 = vmul.f32 0.5, %v8673_v28  ;;  %v8540_v34 = vadd.f32 %v11141_v42, %v16847_v45 }
 0x877   :  { %v11143_v9 = vpop.f32.mrf.mxu0 }
 0x878   :  { %v11237_v24 = vpop.f32.mrf.mxu1  ;;  %10014 = vst [vmem:[%s16981_s14 + $0x1bc] sm:$0xf] %v10929_v55  ;;  %v9337_v22 = vadd.f32 0.5, %v9162_v30  ;;  %12649 = vtanh.f32 %v8840_v3  ;;  %v8676_v11 = vadd.f32 %v11235_v15, %v8540_v34  ;;  %v11144_v61 = vadd.f32 %v11143_v9, %v11142_v36 }
 0x879   :  { %v12644_v0 = vpop.eup %12643  ;;  %v11238_v14 = vadd.f32 %v11237_v24, %v11236_v33  ;;  %v11145_v60 = vpop.f32.mrf.mxu0 }
 0x87a   :  { %v11239_v21 = vpop.f32.mrf.mxu1  ;;  %v10933_v46 = vpack.c.bf16 %v9337_v22, %v9337_v22  ;;  %v9169_v12 = vmul.f32 0.5, %v12644_v0  ;;  %v8847_v62 = vmul.f32 0.5, %v8676_v11  ;;  %v8545_v19 = vadd.f32 %v11144_v61, %v16847_v45 }
 0x87b   :  { %v11146_v43 = vpop.f32.mrf.mxu0 }
 0x87c   :  { %v11240_v44 = vpop.f32.mrf.mxu1  ;;  %10018 = vst [vmem:[%s16981_s14 + $0x1d8] sm:$0xf] %v10933_v46  ;;  %v9344_v10 = vadd.f32 0.5, %v9169_v12  ;;  %12651 = vtanh.f32 %v8847_v62  ;;  %v8681_v35 = vadd.f32 %v11238_v14, %v8545_v19  ;;  %v11147_v8 = vadd.f32 %v11146_v43, %v11145_v60 }
 0x87d   :  { %v12646_v37 = vpop.eup %12645  ;;  %v11241_v54 = vadd.f32 %v11240_v44, %v11239_v21  ;;  %v11148_v38 = vpop.f32.mrf.mxu0 }
 0x87e   :  { %v11242_v17 = vpop.f32.mrf.mxu1  ;;  %v10937_v13 = vpack.c.bf16 %v9344_v10, %v9344_v10  ;;  %v9176_v2 = vmul.f32 0.5, %v12646_v37  ;;  %v8854_v57 = vmul.f32 0.5, %v8681_v35  ;;  %v8548_v41 = vadd.f32 %v11147_v8, %v16847_v45 }
 0x87f   :  { %v11149_v5 = vpop.f32.mrf.mxu0 }
 0x880   :  { %v11243_v56 = vpop.f32.mrf.mxu1  ;;  %10022 = vst [vmem:[%s16981_s14 + $0x1f4] sm:$0xf] %v10937_v13  ;;  %v9351_v1 = vadd.f32 0.5, %v9176_v2  ;;  %12653 = vtanh.f32 %v8854_v57  ;;  %v8684_v25 = vadd.f32 %v11241_v54, %v8548_v41  ;;  %v11150_v53 = vadd.f32 %v11149_v5, %v11148_v38 }
 0x881   :  { %v12648_v31 = vpop.eup %12647  ;;  %v11244_v20 = vadd.f32 %v11243_v56, %v11242_v17  ;;  %v11151_v23 = vpop.f32.mrf.mxu0 }
 0x882   :  { %v11245_v50 = vpop.f32.mrf.mxu1  ;;  %v10941_v40 = vpack.c.bf16 %v9351_v1, %v9351_v1  ;;  %v9183_v4 = vmul.f32 0.5, %v12648_v31  ;;  %v8861_v49 = vmul.f32 0.5, %v8684_v25  ;;  %v8553_v18 = vadd.f32 %v11150_v53, %v16847_v45 }
 0x883   :  { %v11152_v59 = vpop.f32.mrf.mxu0 }
 0x884   :  { %v11246_v39 = vpop.f32.mrf.mxu1  ;;  %10026 = vst [vmem:[%s16981_s14 + $0x210] sm:$0xf] %v10941_v40  ;;  %v9358_v32 = vadd.f32 0.5, %v9183_v4  ;;  %12655 = vtanh.f32 %v8861_v49  ;;  %v8689_v58 = vadd.f32 %v11244_v20, %v8553_v18 }
 0x885   :  { %v12650_v7 = vpop.eup %12649 }
 0x886   :  { %v10945_v6 = vpack.c.bf16 %v9358_v32, %v9358_v32  ;;  %v9190_v47 = vmul.f32 0.5, %v12650_v7  ;;  %v8868_v51 = vmul.f32 0.5, %v8689_v58 }
 0x888   :  { %10030 = vst [vmem:[%s16981_s14 + $0x22c] sm:$0xf] %v10945_v6  ;;  %v9365_v16 = vadd.f32 0.5, %v9190_v47  ;;  %12657 = vtanh.f32 %v8868_v51 }
 0x889   :  { %v12652_v45 = vpop.eup %12651 }
 0x88a   :  { %v10949_v29 = vpack.c.bf16 %v9365_v16, %v9365_v16  ;;  %v9197_v26 = vmul.f32 0.5, %v12652_v45 }
 0x88c   :  { %10034 = vst [vmem:[%s16981_s14 + $0x248] sm:$0xf] %v10949_v29  ;;  %v9372_v63 = vadd.f32 0.5, %v9197_v26 }
 0x88d   :  { %v12654_v48 = vpop.eup %12653 }
 0x88e   :  { %v10953_v27 = vpack.c.bf16 %v9372_v63, %v9372_v63  ;;  %v9204_v28 = vmul.f32 0.5, %v12654_v48 }
 0x890   :  { %10038 = vst [vmem:[%s16981_s14 + $0x264] sm:$0xf] %v10953_v27  ;;  %v9379_v42 = vadd.f32 0.5, %v9204_v28 }
 0x891   :  { %v12656_v52 = vpop.eup %12655 }
 0x892   :  { %v10957_v15 = vpack.c.bf16 %v9379_v42, %v9379_v42  ;;  %v9211_v36 = vmul.f32 0.5, %v12656_v52 }
 0x894   :  { %10042 = vst [vmem:[%s16981_s14 + $0x280] sm:$0xf] %v10957_v15  ;;  %v9386_v33 = vadd.f32 0.5, %v9211_v36 }
 0x895   :  { %v12658_v55 = vpop.eup %12657 }
 0x896   :  { %v10961_v30 = vpack.c.bf16 %v9386_v33, %v9386_v33  ;;  %v9218_v3 = vmul.f32 0.5, %v12658_v55 }
 0x898   :  { %10046 = vst [vmem:[%s16981_s14 + $0x29c] sm:$0xf] %v10961_v30  ;;  %v9393_v34 = vadd.f32 0.5, %v9218_v3 }
 0x89a   :  { %v10965_v9 = vpack.c.bf16 %v9393_v34, %v9393_v34 }
 0x89c   :  { %10050 = vst [vmem:[%s16981_s14 + $0x2b8] sm:$0xf] %v10965_v9 }
 0x89d   :  { %10059 = vsyncpa [#allocation3], 1 }
 0x89e   :  { %10060 = vsyncpa [#allocation5], 1 }

</bundles_post_ra>
